<compile_context>
chip_gen: v7x
topology: tpu7x:2x2x1
jax: 0.10.0
libtpu: 0.0.40
codegen_flags: <defaults>
</compile_context>

<pallas_src>
import jax
import jax.numpy as jnp
from jax.experimental import pallas as pl
from jax.experimental.pallas import tpu as pltpu


def _round_up(x, m):
    return ((x + m - 1) // m) * m


def _tpu_generation():
    """Best-effort TPU generation (7/6/5/4); 0 if unknown."""
    try:
        kind = jax.devices()[0].device_kind.lower()
    except Exception:
        return 0
    for g in (7, 6, 5, 4):
        if f"v{g}" in kind or f"tpu{g}" in kind:
            return g
    return 0


def _vmem_limit_bytes(gen):
    if gen >= 7:
        return 44 * 1024 * 1024   # 64 MiB/TC physical on v7x -> leave headroom
    if gen in (5, 6):
        return 96 * 1024 * 1024   # 128 MiB physical on v5e/v6e
    return 64 * 1024 * 1024       # conservative fallback (v4 / unknown)


def _make_ffn_kernel(gelu_dtype, use_scratch):
    """Build the fused FFN kernel body.

    Grid = (row_tiles, hidden_tiles); hidden axis is the reduction ("arbitrary").
    """

    def _partial_sum(x_ref, w1_ref, b1_ref, w2_ref):
        # First linear over this hidden tile: (tm,E)bf16 @ (E,th)bf16 -> f32.
        h = jnp.dot(x_ref[...], w1_ref[...], preferred_element_type=jnp.float32)
        h = (h + b1_ref[...]).astype(gelu_dtype)
        # tanh-GELU, exactly the PyTorch formula.
        c = jnp.asarray(0.7978845608028654, dtype=gelu_dtype)  # sqrt(2/pi)
        g = 0.5 * h * (1.0 + jnp.tanh(c * (h + 0.044715 * (h * h * h))))
        # Second linear partial sum: (tm,th)bf16 @ (th,E)bf16 -> f32.
        return jnp.dot(g.astype(w2_ref.dtype), w2_ref[...],
                       preferred_element_type=jnp.float32)

    if use_scratch:
        # Output dtype narrower than f32 -> accumulate in a f32 VMEM scratch.
        def kernel(x_ref, w1_ref, b1_ref, w2_ref, b2_ref, o_ref, acc_ref):
            h_idx = pl.program_id(1)
            part = _partial_sum(x_ref, w1_ref, b1_ref, w2_ref)

            @pl.when(h_idx == 0)
            def _():
                acc_ref[...] = part

            @pl.when(h_idx != 0)
            def _():
                acc_ref[...] += part

            @pl.when(h_idx == pl.num_programs(1) - 1)
            def _():
                o_ref[...] = (acc_ref[...] + b2_ref[...]).astype(o_ref.dtype)
    else:
        # f32 output: accumulate directly into the (resident) output block.
        def kernel(x_ref, w1_ref, b1_ref, w2_ref, b2_ref, o_ref):
            h_idx = pl.program_id(1)
            part = _partial_sum(x_ref, w1_ref, b1_ref, w2_ref)

            @pl.when(h_idx == 0)
            def _():
                o_ref[...] = part

            @pl.when(h_idx != 0)
            def _():
                o_ref[...] += part

            @pl.when(h_idx == pl.num_programs(1) - 1)
            def _():
                o_ref[...] += b2_ref[...]

    return kernel


def feed_forward(x, w1, b1, w2, b2, *, tm=None, th=None):
    """x: (B, S, E); w1: (E, H); b1: (H,); w2: (H, E); b2: (E,).

    Weights are stored (in_dim, out_dim), i.e. transposed vs. nn.Linear.weight.
    Pass w1/w2 pre-cast to bfloat16 to avoid a per-call cast.
    """
    B, S, E = x.shape
    H = w1.shape[1]
    M = B * S
    out_dtype = x.dtype
    out_itemsize = jnp.dtype(out_dtype).itemsize

    gen = _tpu_generation()
    vmem_limit = _vmem_limit_bytes(gen)
    budget = int(0.70 * vmem_limit)
    gelu_dtype = jnp.bfloat16 if gen >= 6 else jnp.float32
    use_scratch = out_dtype != jnp.float32

    def _vmem_bytes(tm_, th_):
        w = 2 * (E * th_ + th_ * E) * 2            # double-buffered bf16 weight tiles
        x_t = 2 * tm_ * E * 2                      # double-buffered bf16 x tile
        o_t = 2 * tm_ * E * out_itemsize           # double-buffered output tile
        mid = tm_ * th_ * 4                        # f32 hidden intermediate
        acc = tm_ * E * 4 if use_scratch else 0    # f32 accumulator scratch
        bias = 2 * (th_ + E) * 4
        return w + x_t + o_t + mid + acc + bias

    # --- weight residency decision -------------------------------------------
    tm_est = min(256, _round_up(M, 16))
    resident = _vmem_bytes(tm_est, H) <= budget

    # --- row tile --------------------------------------------------------------
    if tm is None:
        # Resident weights: arithmetic intensity is not weight-limited -> 256 is
        # plenty.  Streaming: 512 clears the v6e/v7x rooflines; keep 256 on v5e.
        tm = 256 if (resident or gen <= 5) else 512
    tm = _round_up(max(int(tm), 16), 16)           # bf16 sublane packing
    tm = min(tm, _round_up(M, 16))
    if M >= 32 and (resident or gen >= 7):
        # Guarantee >=2 row programs so v7x's second TensorCore gets work.
        tm = max(16, min(tm, _round_up((M + 1) // 2, 16)))
    M_pad = _round_up(M, tm)

    # --- hidden tile -----------------------------------------------------------
    if resident:
        th = H                                     # constant weight block index
    else:
        candidates = ([int(th)] if th else []) + [1536, 1024, 768, 512, 384, 256, 128]
        chosen = None
        for cand in candidates:
            if cand <= 0 or H % cand:
                continue
            if cand != H and cand % 128:
                continue
            if _vmem_bytes(tm, cand) <= budget:
                chosen = cand
                break
        th = chosen if chosen is not None else H

    grid = (M_pad // tm, H // th)

    # --- operands (matmuls in bf16, biases/accumulation in f32) ----------------
    x_bf = x if x.dtype == jnp.bfloat16 else x.astype(jnp.bfloat16)
    x2d = x_bf.reshape(M, E)
    if M_pad != M:
        x2d = jnp.pad(x2d, ((0, M_pad - M), (0, 0)))
    w1_bf = w1 if w1.dtype == jnp.bfloat16 else w1.astype(jnp.bfloat16)
    w2_bf = w2 if w2.dtype == jnp.bfloat16 else w2.astype(jnp.bfloat16)
    b1_2d = b1.astype(jnp.float32).reshape(1, H)
    b2_2d = b2.astype(jnp.float32).reshape(1, E)

    # --- advisory cost: reflects the actual weight (re-)streaming ---------------
    n_row_tiles = M_pad // tm
    weight_passes = 1 if resident else n_row_tiles
    cost = pl.CostEstimate(
        flops=4 * M_pad * E * H,                   # two matmuls: 2*M*E*H each
        transcendentals=M_pad * H,                 # tanh per hidden activation
        bytes_accessed=int(
            M_pad * E * 2                          # x (bf16)
            + M_pad * E * out_itemsize             # output
            + weight_passes * 2 * E * H * 2        # W1 + W2 (bf16) per pass
            + H * 4 + E * 4),                      # biases
    )

    kernel = _make_ffn_kernel(gelu_dtype, use_scratch)
    scratch_shapes = [pltpu.VMEM((tm, E), jnp.float32)] if use_scratch else []

    out2d = pl.pallas_call(
        kernel,
        out_shape=jax.ShapeDtypeStruct((M_pad, E), out_dtype),
        grid_spec=pltpu.PrefetchScalarGridSpec(
            num_scalar_prefetch=0,
            grid=grid,
            in_specs=[
                pl.BlockSpec((tm, E), lambda i, h: (i, 0)),   # x row tile (reused over h)
                pl.BlockSpec((E, th), lambda i, h: (0, h)),   # W1 (resident when th == H)
                pl.BlockSpec((1, th), lambda i, h: (0, h)),   # b1
                pl.BlockSpec((th, E), lambda i, h: (h, 0)),   # W2 (resident when th == H)
                pl.BlockSpec((1, E), lambda i, h: (0, 0)),    # b2 (grid-invariant)
            ],
            out_specs=pl.BlockSpec((tm, E), lambda i, h: (i, 0)),
            scratch_shapes=scratch_shapes,
        ),
        compiler_params=pltpu.CompilerParams(
            dimension_semantics=("parallel", "arbitrary"),
            vmem_limit_bytes=vmem_limit,
        ),
        cost_estimate=cost,
    )(x2d, w1_bf, b1_2d, w2_bf, b2_2d)

    return out2d[:M].reshape(B, S, E)


def feed_forward_ref(x, w1, b1, w2, b2):
    h = jnp.einsum("bse,eh->bsh", x, w1) + b1
    g = 0.5 * h * (1.0 + jnp.tanh(jnp.sqrt(2.0 / jnp.pi)
                                  * (h + 0.044715 * h ** 3)))
    return jnp.einsum("bsh,he->bse", g, w2) + b2


if __name__ == "__main__":
    # Shapes implied by the spec: x = torch.rand(2, 4, 768), emb_dim=768, hidden=4*768.
    B, S, EMB = 2, 4, 768
    HID = 4 * EMB  # 3072

    key = jax.random.PRNGKey(0)
    kx, kw1, kb1, kw2, kb2 = jax.random.split(key, 5)

    x = jax.random.uniform(kx, (B, S, EMB), dtype=jnp.float32)
    # Deterministic synthetic params (nn.Linear(emb, 4*emb) / nn.Linear(4*emb, emb)).
    w1 = jax.random.normal(kw1, (EMB, HID), dtype=jnp.float32) * 0.02
    b1 = jax.random.normal(kb1, (HID,), dtype=jnp.float32) * 0.02
    w2 = jax.random.normal(kw2, (HID, EMB), dtype=jnp.float32) * 0.02
    b2 = jax.random.normal(kb2, (EMB,), dtype=jnp.float32) * 0.02

    # Cache weights in bf16 once -> the per-call f32->bf16 casts are hoisted out
    # of the hot path (the kernel consumes them directly).
    w1_bf = w1.astype(jnp.bfloat16)
    w2_bf = w2.astype(jnp.bfloat16)

    ffn = jax.jit(feed_forward)
    out = jax.block_until_ready(ffn(x, w1_bf, b1, w2_bf, b2))
    ref = feed_forward_ref(x, w1, b1, w2, b2)

    assert out.shape == (B, S, EMB)
    assert out.dtype == x.dtype
    # bf16 matmul operands (+ bf16 GELU on v6e/v7x) with f32 accumulation vs. f32 ref.
    assert jnp.allclose(out, ref, atol=3e-2, rtol=3e-2), \
        float(jnp.max(jnp.abs(out - ref)))

    print("KERNEL_OK")
</pallas_src>

<mosaic_0001>
module attributes {stable_mosaic.version = 11 : i64} {
  func.func @kernel(%arg0: i32, %arg1: i32, %arg2: memref<16x768xbf16, #tpu.memory_space<vmem>>, %arg3: memref<768x3072xbf16, #tpu.memory_space<vmem>>, %arg4: memref<1x3072xf32, #tpu.memory_space<vmem>>, %arg5: memref<3072x768xbf16, #tpu.memory_space<vmem>>, %arg6: memref<1x768xf32, #tpu.memory_space<vmem>>, %arg7: memref<16x768xf32, #tpu.memory_space<vmem>>) attributes {dimension_semantics = [#tpu.dimension_semantics<parallel>, #tpu.dimension_semantics<arbitrary>], iteration_bounds = array<i64: 1, 1>, scalar_prefetch = 0 : i64, scratch_operands = 0 : i64, tpu.core_type = #tpu.core_type<tc>, window_params = [{transform_indices = @transform_0, window_bounds = array<i64: 16, 768>}, {transform_indices = @transform_1, window_bounds = array<i64: 768, 3072>}, {transform_indices = @transform_2, window_bounds = array<i64: 1, 3072>}, {transform_indices = @transform_3, window_bounds = array<i64: 3072, 768>}, {pipeline_mode = #tpu.pipeline_mode<synchronous>, transform_indices = @transform_4, window_bounds = array<i64: 1, 768>}, {transform_indices = @transform_5, window_bounds = array<i64: 16, 768>}]} {
    %c0 = arith.constant 0 : index
    %c0_0 = arith.constant 0 : index
    %0 = vector.load %arg2[%c0, %c0_0] : memref<16x768xbf16, #tpu.memory_space<vmem>>, vector<16x768xbf16>
    %c0_1 = arith.constant 0 : index
    %c0_2 = arith.constant 0 : index
    %1 = vector.load %arg3[%c0_1, %c0_2] : memref<768x3072xbf16, #tpu.memory_space<vmem>>, vector<768x3072xbf16>
    %cst = arith.constant dense<0.000000e+00> : vector<16x3072xf32>
    %2 = tpu.matmul %0, %1, %cst {dimension_numbers = #tpu.dot_dimension_numbers<[1], [0], [0], [1], [0, 0, 1, 1], [], []>} : vector<16x768xbf16>, vector<768x3072xbf16>, vector<16x3072xf32> -> vector<16x3072xf32>
    %c0_3 = arith.constant 0 : index
    %c0_4 = arith.constant 0 : index
    %3 = vector.load %arg4[%c0_3, %c0_4] : memref<1x3072xf32, #tpu.memory_space<vmem>>, vector<1x3072xf32>
    %4 = vector.broadcast %3 : vector<1x3072xf32> to vector<16x3072xf32>
    %5 = arith.addf %2, %4 : vector<16x3072xf32>
    %cst_5 = arith.constant 5.000000e-01 : f32
    %6 = vector.broadcast %cst_5 : f32 to vector<16x3072xf32>
    %7 = arith.mulf %6, %5 : vector<16x3072xf32>
    %8 = arith.mulf %5, %5 : vector<16x3072xf32>
    %9 = arith.mulf %8, %5 : vector<16x3072xf32>
    %cst_6 = arith.constant 4.471500e-02 : f32
    %10 = vector.broadcast %cst_6 : f32 to vector<16x3072xf32>
    %11 = arith.mulf %10, %9 : vector<16x3072xf32>
    %12 = arith.addf %5, %11 : vector<16x3072xf32>
    %cst_7 = arith.constant 0.797884583 : f32
    %13 = vector.broadcast %cst_7 : f32 to vector<16x3072xf32>
    %14 = arith.mulf %13, %12 : vector<16x3072xf32>
    %15 = math.tanh %14 : vector<16x3072xf32>
    %cst_8 = arith.constant 1.000000e+00 : f32
    %16 = vector.broadcast %cst_8 : f32 to vector<16x3072xf32>
    %17 = arith.addf %16, %15 : vector<16x3072xf32>
    %18 = arith.mulf %7, %17 : vector<16x3072xf32>
    %19 = arith.truncf %18 : vector<16x3072xf32> to vector<16x3072xbf16>
    %c0_9 = arith.constant 0 : index
    %c0_10 = arith.constant 0 : index
    %20 = vector.load %arg5[%c0_9, %c0_10] : memref<3072x768xbf16, #tpu.memory_space<vmem>>, vector<3072x768xbf16>
    %cst_11 = arith.constant dense<0.000000e+00> : vector<16x768xf32>
    %21 = tpu.matmul %19, %20, %cst_11 {dimension_numbers = #tpu.dot_dimension_numbers<[1], [0], [0], [1], [0, 0, 1, 1], [], []>} : vector<16x3072xbf16>, vector<3072x768xbf16>, vector<16x768xf32> -> vector<16x768xf32>
    %c0_i32 = arith.constant 0 : i32
    %22 = arith.cmpi eq, %arg1, %c0_i32 : i32
    %23 = arith.extui %22 : i1 to i32
    %c0_i32_12 = arith.constant 0 : i32
    %24 = arith.cmpi ne, %23, %c0_i32_12 : i32
    scf.if %24 {
      %c0_17 = arith.constant 0 : index
      %c0_18 = arith.constant 0 : index
      %31 = vector.load %arg7[%c0_17, %c0_18] : memref<16x768xf32, #tpu.memory_space<vmem>>, vector<16x768xf32>
      tpu.vector_store %arg7[%c0_17, %c0_18], %21 {strides = array<i32>} : memref<16x768xf32, #tpu.memory_space<vmem>>, vector<16x768xf32>,
    } else {
    }
    %c0_i32_13 = arith.constant 0 : i32
    %25 = arith.cmpi ne, %arg1, %c0_i32_13 : i32
    %26 = arith.extui %25 : i1 to i32
    %c0_i32_14 = arith.constant 0 : i32
    %27 = arith.cmpi ne, %26, %c0_i32_14 : i32
    scf.if %27 {
      %c0_17 = arith.constant 0 : index
      %c0_18 = arith.constant 0 : index
      %31 = vector.load %arg7[%c0_17, %c0_18] : memref<16x768xf32, #tpu.memory_space<vmem>>, vector<16x768xf32>
      %32 = arith.addf %31, %21 : vector<16x768xf32>
      %c0_19 = arith.constant 0 : index
      %c0_20 = arith.constant 0 : index
      %33 = vector.load %arg7[%c0_19, %c0_20] : memref<16x768xf32, #tpu.memory_space<vmem>>, vector<16x768xf32>
      tpu.vector_store %arg7[%c0_19, %c0_20], %32 {strides = array<i32>} : memref<16x768xf32, #tpu.memory_space<vmem>>, vector<16x768xf32>,
    } else {
    }
    %c0_i32_15 = arith.constant 0 : i32
    %28 = arith.cmpi eq, %arg1, %c0_i32_15 : i32
    %29 = arith.extui %28 : i1 to i32
    %c0_i32_16 = arith.constant 0 : i32
    %30 = arith.cmpi ne, %29, %c0_i32_16 : i32
    scf.if %30 {
      %c0_17 = arith.constant 0 : index
      %c0_18 = arith.constant 0 : index
      %31 = vector.load %arg7[%c0_17, %c0_18] : memref<16x768xf32, #tpu.memory_space<vmem>>, vector<16x768xf32>
      %c0_19 = arith.constant 0 : index
      %c0_20 = arith.constant 0 : index
      %32 = vector.load %arg6[%c0_19, %c0_20] : memref<1x768xf32, #tpu.memory_space<vmem>>, vector<1x768xf32>
      %33 = vector.broadcast %32 : vector<1x768xf32> to vector<16x768xf32>
      %34 = arith.addf %31, %33 : vector<16x768xf32>
      %c0_21 = arith.constant 0 : index
      %c0_22 = arith.constant 0 : index
      %35 = vector.load %arg7[%c0_21, %c0_22] : memref<16x768xf32, #tpu.memory_space<vmem>>, vector<16x768xf32>
      tpu.vector_store %arg7[%c0_21, %c0_22], %34 {strides = array<i32>} : memref<16x768xf32, #tpu.memory_space<vmem>>, vector<16x768xf32>,
    } else {
    }
    return
  }
  func.func @transform_0(%arg0: i32, %arg1: i32) -> (i32, i32) {
    %c0_i32 = arith.constant 0 : i32
    %c0_i32_0 = arith.constant 0 : i32
    return %arg0, %c0_i32 : i32, i32
  }
  func.func @transform_1(%arg0: i32, %arg1: i32) -> (i32, i32) {
    %c0_i32 = arith.constant 0 : i32
    %c0_i32_0 = arith.constant 0 : i32
    return %c0_i32, %arg1 : i32, i32
  }
  func.func @transform_2(%arg0: i32, %arg1: i32) -> (i32, i32) {
    %c0_i32 = arith.constant 0 : i32
    %c0_i32_0 = arith.constant 0 : i32
    return %c0_i32, %arg1 : i32, i32
  }
  func.func @transform_3(%arg0: i32, %arg1: i32) -> (i32, i32) {
    %c0_i32 = arith.constant 0 : i32
    %c0_i32_0 = arith.constant 0 : i32
    return %arg1, %c0_i32 : i32, i32
  }
  func.func @transform_4(%arg0: i32, %arg1: i32) -> (i32, i32) {
    %c0_i32 = arith.constant 0 : i32
    %c0_i32_0 = arith.constant 0 : i32
    %c0_i32_1 = arith.constant 0 : i32
    return %c0_i32, %c0_i32_0 : i32, i32
  }
  func.func @transform_5(%arg0: i32, %arg1: i32) -> (i32, i32) {
    %c0_i32 = arith.constant 0 : i32
    %c0_i32_0 = arith.constant 0 : i32
    return %arg0, %c0_i32 : i32, i32
  }
}

</mosaic_0001>

<bundles_post_ra>
// kernel: feed_forward.1
= control target key start
LH: loop header
LB: loop body
LE: loop exit
PB: predicated region body
PF: predicated region fallthrough
CT: control target
= control target key end

     0   :  { %10 = vsyncpa [#allocation3], 0  ;;  %s23232_s0 = inlined_call_operand.hbm [shape: bf16[16,768], index: 0, kind: input, shape index: {}]   ;;  %s23233_s1 = inlined_call_operand.hbm [shape: bf16[768,3072], index: 1, kind: input, shape index: {}]   ;;  %s23234_s2 = inlined_call_operand.hbm [shape: f32[1,3072], index: 2, kind: input, shape index: {}]   ;;  %s23235_s3 = inlined_call_operand.hbm [shape: bf16[3072,768], index: 3, kind: input, shape index: {}]   ;;  %s23236_s4 = inlined_call_operand.hbm [shape: f32[1,768], index: 4, kind: input, shape index: {}]   ;;  %s23237_s5 = inlined_call_operand.hbm [shape: f32[16,768], index: 5, kind: output, shape index: {}]  }
   0x1   :  { %11 = vsyncpa [#allocation6], 0 }
   0x2   :  { %12 = vsyncpa [#allocation9], 0 }
   0x3   :  { %13 = vsyncpa [#allocation4], 0  ;;  %s22384_s18 = smov [#allocation5]   ;;  %s22244_s22 = scalar_lea.hbm %s23233_s1, 147456 }
   0x4   :  { %s31_s19 = sshll.u32 %s22384_s18, 4  ;;  %p22245_p0 = scmp.ne.s32.totalorder %s23233_s1, %s22244_s22  ;;  %s32_s19 = int_to_ptr.vmem [resolvable:$true] %s31_s19 }
   0x5   :  { %p22248_p1 = scmp.lt.u32.totalorder %s22244_s22, %s23233_s1 }
   0x7   :  { %p22250_p2 = pnand %p22248_p1, %p22245_p0 }
   0x9   :  { %22253 = shalt.err (!%p22250_p2)
}
   0xa   :  { %s22254_s27 = scalar_lea.vmem %s32_s19, 147456  ;;  %p22259_p4 = scmp.lt.s32.totalorder %s32_s19, %s32_s19 }
   0xb   :  { %p22255_p3 = scmp.ne.s32.totalorder %s32_s19, %s22254_s27  ;;  %p22260_p5 = scmp.lt.s32.totalorder %s22254_s27, %s22254_s27 }
   0xd   :  { %p22261_p6 = por %p22260_p5, %p22259_p4 }
   0xf   :  { %p22262_p7 = pnand %p22261_p6, %p22255_p3 }
  0x11   :  { %22265 = shalt.err (!%p22262_p7)
}
  0x12   :  { %s22385_s28 = smov 1536   ;;  %s22386_s29 = smov 96  }
  0x13   :  { %37 = dma.hbm_to_vmem [thread:$0]  %s23233_s1, 147456, %s32_s19, [#allocation6], %s22385_s28, %s22385_s28, %s22386_s29  }
  0x14   :  { %s22387_s7 = smov [#allocation8]   ;;  %s22388_s9 = smov [#allocation2]  }
  0x15   :  { %s53_s8 = sshll.u32 %s22387_s7, 4  ;;  %s19_s10 = sshll.u32 %s22388_s9, 4  ;;  %s54_s8 = int_to_ptr.vmem [resolvable:$true] %s53_s8  ;;  %s20_s10 = int_to_ptr.vmem [resolvable:$true] %s19_s10 }
  0x16   :  { %s22266_s13 = scalar_lea.hbm %s23235_s3, 147456 }
  0x17   :  { %p22267_p8 = scmp.ne.s32.totalorder %s23235_s3, %s22266_s13  ;;  %p22270_p9 = scmp.lt.u32.totalorder %s22266_s13, %s23235_s3 }
  0x19   :  { %p22272_p10 = pnand %p22270_p9, %p22267_p8 }
  0x1b   :  { %22275 = shalt.err (!%p22272_p10)
}
  0x1c   :  { %s22276_s1 = scalar_lea.vmem %s54_s8, 147456  ;;  %p22281_p12 = scmp.lt.s32.totalorder %s54_s8, %s54_s8 }
  0x1d   :  { %p22277_p11 = scmp.ne.s32.totalorder %s54_s8, %s22276_s1  ;;  %p22282_p13 = scmp.lt.s32.totalorder %s22276_s1, %s22276_s1 }
  0x1f   :  { %p22283_p0 = por %p22282_p13, %p22281_p12 }
  0x21   :  { %p22284_p1 = pnand %p22283_p0, %p22277_p11 }
  0x23   :  { %22287 = shalt.err (!%p22284_p1)
}
  0x24   :  { %s22389_s18 = smov 384   ;;  %s22390_s19 = smov 24  }
  0x25   :  { %59 = dma.hbm_to_vmem [thread:$0]  %s23235_s3, 147456, %s54_s8, [#allocation9], %s22389_s18, %s22389_s18, %s22390_s19  }
  0x26   :  { %s22288_s24 = scalar_lea.hbm %s23232_s0, 768 }
  0x27   :  { %p22289_p2 = scmp.ne.s32.totalorder %s23232_s0, %s22288_s24  ;;  %p22292_p3 = scmp.lt.u32.totalorder %s22288_s24, %s23232_s0 }
  0x29   :  { %p22294_p4 = pnand %p22292_p3, %p22289_p2 }
  0x2b   :  { %22297 = shalt.err (!%p22294_p4)
}
  0x2c   :  { %s22298_s29 = scalar_lea.vmem %s20_s10, 768  ;;  %p22303_p6 = scmp.lt.s32.totalorder %s20_s10, %s20_s10 }
  0x2d   :  { %p22299_p5 = scmp.ne.s32.totalorder %s20_s10, %s22298_s29  ;;  %p22304_p7 = scmp.lt.s32.totalorder %s22298_s29, %s22298_s29 }
  0x2f   :  { %p22305_p8 = por %p22304_p7, %p22303_p6 }
  0x31   :  { %p22306_p9 = pnand %p22305_p8, %p22299_p5 }
  0x33   :  { %22309 = shalt.err (!%p22306_p9)
}
  0x34   :  { %25 = dma.hbm_to_vmem [thread:$0]  %s23232_s0, 768, %s20_s10, [#allocation3], %s22389_s18, %s22389_s18, %s22390_s19  }
  0x35   :  { %s22391_s6 = smov [#allocation7]   ;;  %s22392_s8 = smov [#allocation10]  }
  0x36   :  { %s44_s7 = sshll.u32 %s22391_s6, 4  ;;  %s66_s9 = sshll.u32 %s22392_s8, 4  ;;  %s45_s7 = int_to_ptr.vmem [resolvable:$true] %s44_s7  ;;  %s67_s9 = int_to_ptr.vmem [resolvable:$true] %s66_s9 }
  0x37   :  { %s22310_s13 = scalar_lea.hbm %s23234_s2, 384 }
  0x38   :  { %p22311_p10 = scmp.ne.s32.totalorder %s23234_s2, %s22310_s13  ;;  %p22314_p11 = scmp.lt.u32.totalorder %s22310_s13, %s23234_s2 }
  0x3a   :  { %p22316_p12 = pnand %p22314_p11, %p22311_p10 }
  0x3c   :  { %22319 = shalt.err (!%p22316_p12)
}
  0x3d   :  { %s22320_s0 = scalar_lea.vmem %s45_s7, 384  ;;  %p22325_p0 = scmp.lt.s32.totalorder %s45_s7, %s45_s7 }
  0x3e   :  { %p22321_p13 = scmp.ne.s32.totalorder %s45_s7, %s22320_s0  ;;  %p22326_p1 = scmp.lt.s32.totalorder %s22320_s0, %s22320_s0 }
  0x40   :  { %p22327_p2 = por %p22326_p1, %p22325_p0 }
  0x42   :  { %p22328_p3 = pnand %p22327_p2, %p22321_p13 }
  0x44   :  { %22331 = shalt.err (!%p22328_p3)
}
  0x45   :  { %47 = dma.hbm_to_vmem [thread:$0]  %s23234_s2, 384, %s45_s7, [#allocation6]  }
  0x46   :  { %s22332_s20 = scalar_lea.hbm %s23236_s4, 96 }
  0x47   :  { %p22333_p4 = scmp.ne.s32.totalorder %s23236_s4, %s22332_s20  ;;  %p22336_p5 = scmp.lt.u32.totalorder %s22332_s20, %s23236_s4 }
  0x49   :  { %p22338_p6 = pnand %p22336_p5, %p22333_p4 }
  0x4b   :  { %22341 = shalt.err (!%p22338_p6)
}
  0x4c   :  { %s22342_s25 = scalar_lea.vmem %s67_s9, 96  ;;  %p22347_p8 = scmp.lt.s32.totalorder %s67_s9, %s67_s9 }
  0x4d   :  { %p22343_p7 = scmp.ne.s32.totalorder %s67_s9, %s22342_s25  ;;  %p22348_p9 = scmp.lt.s32.totalorder %s22342_s25, %s22342_s25 }
  0x4f   :  { %p22349_p10 = por %p22348_p9, %p22347_p8 }
  0x51   :  { %p22350_p11 = pnand %p22349_p10, %p22343_p7 }
  0x53   :  { %22353 = shalt.err (!%p22350_p11)
}
  0x54   :  { %69 = dma.hbm_to_vmem [thread:$0]  %s23236_s4, 96, %s67_s9, [#allocation9]  }
  0x55   :  { %22376 = dma.done.wait [#allocation3], 768  }
  0x56   :  { %22377 = vsyncadd [#allocation3], 4294966528 }
  0x57   :  { %22378 = dma.done.wait [#allocation6], 147840  }
  0x58   :  { %22379 = vsyncadd [#allocation6], 4294819456 }
  0x59   :  { %22380 = dma.done.wait [#allocation9], 147552  }
  0x5a   :  { %22381 = vsyncadd [#allocation9], 4294819744  ;;  %v91_v0 = vld [vmem:[#allocation5] sm:$0xff]  ;;  %v20367_v56 = vld [vmem:[#allocation2 + $0x4] ss:$24 sps:$4 sm:$0xff]   ;;  %s22393_s4 = smov [#allocation11]  }
  0x5b   :  { %v103_v1 = vld [vmem:[#allocation5 + $0x60] sm:$0xff]  ;;  %7191 = vmatprep.mubr.bf16.mxu1 %v20367_v56  ;;  %7707 = vmatprep.mubr.bf16.mxu0 %v20367_v56  ;;  %s17755_s27 = sshll.u32 %s22393_s4, 4  ;;  %s17756_s27 = int_to_ptr.vmem [resolvable:$true] %s17755_s27 }
  0x5c   :  { %v95_v2 = vld [vmem:[#allocation5 + $0x20] sm:$0xff]  ;;  %v17776_v3 = vcombine.high %v91_v0, %v103_v1  ;;  %v17775_v5 = vcombine.low %v91_v0, %v103_v1  ;;  %s22354_s28 = scalar_lea.vmem %s17756_s27, 1536  ;;  %p22359_p13 = scmp.lt.s32.totalorder %s17756_s27, %s17756_s27 }
  0x5d   :  { %v107_v4 = vld [vmem:[#allocation5 + $0x80] sm:$0xff]  ;;  %p22355_p12 = scmp.ne.s32.totalorder %s17756_s27, %s22354_s28  ;;  %p22360_p0 = scmp.lt.s32.totalorder %s22354_s28, %s22354_s28 }
  0x5e   :  { %v115_v6 = vld [vmem:[#allocation5 + $0xc0] sm:$0xff]  ;;  %v17784_v8 = vcombine.high %v95_v2, %v107_v4  ;;  %v17783_v9 = vcombine.low %v95_v2, %v107_v4  ;;  %7159 = vmatprep.subr.bf16.mxu1 %v17776_v3 }
  0x5f   :  { %v127_v7 = vld [vmem:[#allocation5 + $0x120] sm:$0xff]  ;;  %7160 = vmatpush1.bf16.msra.mxu1 %v17775_v5  ;;  %p22361_p1 = por %p22360_p0, %p22359_p13 }
  0x60   :  { %v17800_v10 = vcombine.high %v115_v6, %v127_v7  ;;  %v119_v11 = vld [vmem:[#allocation5 + $0xe0] sm:$0xff]  ;;  %7675 = vmatprep.subr.bf16.mxu0 %v17784_v8  ;;  %v17799_v18 = vcombine.low %v115_v6, %v127_v7 }
  0x61   :  { %v131_v12 = vld [vmem:[#allocation5 + $0x140] sm:$0xff]  ;;  %7676 = vmatpush1.bf16.msra.mxu0 %v17783_v9  ;;  %p22362_p2 = pnand %p22361_p1, %p22355_p12 }
  0x62   :  { %v139_v13 = vld [vmem:[#allocation5 + $0x180] sm:$0xff]  ;;  %v17808_v14 = vcombine.high %v119_v11, %v131_v12  ;;  %7161 = vmatprep.subr.bf16.mxu1 %v17800_v10  ;;  %v17807_v19 = vcombine.low %v119_v11, %v131_v12 }
  0x63   :  { %v151_v15 = vld [vmem:[#allocation5 + $0x1e0] sm:$0xff]  ;;  %7162 = vmatpush1.bf16.msra.mxu1 %v17799_v18 }
  0x64   :  { %v143_v16 = vld [vmem:[#allocation5 + $0x1a0] sm:$0xff]  ;;  %v17824_v20 = vcombine.high %v139_v13, %v151_v15  ;;  %7677 = vmatprep.subr.bf16.mxu0 %v17808_v14  ;;  %v17823_v26 = vcombine.low %v139_v13, %v151_v15 }
  0x65   :  { %v155_v17 = vld [vmem:[#allocation5 + $0x200] sm:$0xff]  ;;  %7678 = vmatpush1.bf16.msra.mxu0 %v17807_v19 }
  0x66   :  { %v17832_v21 = vcombine.high %v143_v16, %v155_v17  ;;  %v163_v22 = vld [vmem:[#allocation5 + $0x240] sm:$0xff]  ;;  %7163 = vmatprep.subr.bf16.mxu1 %v17824_v20  ;;  %v17831_v27 = vcombine.low %v143_v16, %v155_v17 }
  0x67   :  { %v175_v23 = vld [vmem:[#allocation5 + $0x2a0] sm:$0xff]  ;;  %7164 = vmatpush1.bf16.msra.mxu1 %v17823_v26 }
  0x68   :  { %v167_v24 = vld [vmem:[#allocation5 + $0x260] sm:$0xff]  ;;  %v17848_v28 = vcombine.high %v163_v22, %v175_v23  ;;  %7679 = vmatprep.subr.bf16.mxu0 %v17832_v21  ;;  %v17847_v34 = vcombine.low %v163_v22, %v175_v23 }
  0x69   :  { %v179_v25 = vld [vmem:[#allocation5 + $0x2c0] sm:$0xff]  ;;  %7680 = vmatpush1.bf16.msra.mxu0 %v17831_v27 }
  0x6a   :  { %v17856_v29 = vcombine.high %v167_v24, %v179_v25  ;;  %v187_v30 = vld [vmem:[#allocation5 + $0x300] sm:$0xff]  ;;  %7165 = vmatprep.subr.bf16.mxu1 %v17848_v28  ;;  %v17855_v35 = vcombine.low %v167_v24, %v179_v25 }
  0x6b   :  { %v199_v31 = vld [vmem:[#allocation5 + $0x360] sm:$0xff]  ;;  %7166 = vmatpush1.bf16.msra.mxu1 %v17847_v34 }
  0x6c   :  { %v191_v32 = vld [vmem:[#allocation5 + $0x320] sm:$0xff]  ;;  %v17872_v36 = vcombine.high %v187_v30, %v199_v31  ;;  %7681 = vmatprep.subr.bf16.mxu0 %v17856_v29  ;;  %v17871_v42 = vcombine.low %v187_v30, %v199_v31 }
  0x6d   :  { %v203_v33 = vld [vmem:[#allocation5 + $0x380] sm:$0xff]  ;;  %7682 = vmatpush1.bf16.msra.mxu0 %v17855_v35 }
  0x6e   :  { %v17880_v37 = vcombine.high %v191_v32, %v203_v33  ;;  %v211_v38 = vld [vmem:[#allocation5 + $0x3c0] sm:$0xff]  ;;  %7167 = vmatprep.subr.bf16.mxu1 %v17872_v36  ;;  %v17879_v43 = vcombine.low %v191_v32, %v203_v33 }
  0x6f   :  { %v223_v39 = vld [vmem:[#allocation5 + $0x420] sm:$0xff]  ;;  %7168 = vmatpush1.bf16.msra.mxu1 %v17871_v42 }
  0x70   :  { %v215_v40 = vld [vmem:[#allocation5 + $0x3e0] sm:$0xff]  ;;  %v17896_v44 = vcombine.high %v211_v38, %v223_v39  ;;  %7683 = vmatprep.subr.bf16.mxu0 %v17880_v37  ;;  %v17895_v50 = vcombine.low %v211_v38, %v223_v39 }
  0x71   :  { %v227_v41 = vld [vmem:[#allocation5 + $0x440] sm:$0xff]  ;;  %7684 = vmatpush1.bf16.msra.mxu0 %v17879_v43 }
  0x72   :  { %v17904_v45 = vcombine.high %v215_v40, %v227_v41  ;;  %v235_v46 = vld [vmem:[#allocation5 + $0x480] sm:$0xff]  ;;  %7169 = vmatprep.subr.bf16.mxu1 %v17896_v44  ;;  %v17903_v51 = vcombine.low %v215_v40, %v227_v41 }
  0x73   :  { %v247_v47 = vld [vmem:[#allocation5 + $0x4e0] sm:$0xff]  ;;  %7170 = vmatpush1.bf16.msra.mxu1 %v17895_v50 }
  0x74   :  { %v239_v48 = vld [vmem:[#allocation5 + $0x4a0] sm:$0xff]  ;;  %v17920_v52 = vcombine.high %v235_v46, %v247_v47  ;;  %7685 = vmatprep.subr.bf16.mxu0 %v17904_v45  ;;  %v17919_v59 = vcombine.low %v235_v46, %v247_v47 }
  0x75   :  { %v251_v49 = vld [vmem:[#allocation5 + $0x500] sm:$0xff]  ;;  %7686 = vmatpush1.bf16.msra.mxu0 %v17903_v51 }
  0x76   :  { %v17928_v53 = vcombine.high %v239_v48, %v251_v49  ;;  %v259_v54 = vld [vmem:[#allocation5 + $0x540] sm:$0xff]  ;;  %7171 = vmatprep.subr.bf16.mxu1 %v17920_v52  ;;  %v17927_v60 = vcombine.low %v239_v48, %v251_v49 }
  0x77   :  { %v271_v55 = vld [vmem:[#allocation5 + $0x5a0] sm:$0xff]  ;;  %7172 = vmatpush1.bf16.msra.mxu1 %v17919_v59 }
  0x78   :  { %v263_v57 = vld [vmem:[#allocation5 + $0x560] sm:$0xff]  ;;  %v17944_v61 = vcombine.high %v259_v54, %v271_v55  ;;  %7687 = vmatprep.subr.bf16.mxu0 %v17928_v53  ;;  %v17943_v3 = vcombine.low %v259_v54, %v271_v55 }
  0x79   :  { %v275_v58 = vld [vmem:[#allocation5 + $0x5c0] sm:$0xff]  ;;  %7688 = vmatpush1.bf16.msra.mxu0 %v17927_v60 }
  0x7a   :  { %v17952_v62 = vcombine.high %v263_v57, %v275_v58  ;;  %v283_v63 = vld [vmem:[#allocation5 + $0x600] sm:$0xff]  ;;  %7173 = vmatprep.subr.bf16.mxu1 %v17944_v61  ;;  %v17951_v4 = vcombine.low %v263_v57, %v275_v58 }
  0x7b   :  { %v295_v0 = vld [vmem:[#allocation5 + $0x660] sm:$0xff]  ;;  %7174 = vmatpush1.bf16.msra.mxu1 %v17943_v3 }
  0x7c   :  { %v287_v1 = vld [vmem:[#allocation5 + $0x620] sm:$0xff]  ;;  %v17968_v5 = vcombine.high %v283_v63, %v295_v0  ;;  %7689 = vmatprep.subr.bf16.mxu0 %v17952_v62  ;;  %v17967_v11 = vcombine.low %v283_v63, %v295_v0 }
  0x7d   :  { %v299_v2 = vld [vmem:[#allocation5 + $0x680] sm:$0xff]  ;;  %7690 = vmatpush1.bf16.msra.mxu0 %v17951_v4 }
  0x7e   :  { %v17976_v6 = vcombine.high %v287_v1, %v299_v2  ;;  %v307_v7 = vld [vmem:[#allocation5 + $0x6c0] sm:$0xff]  ;;  %7175 = vmatprep.subr.bf16.mxu1 %v17968_v5  ;;  %v17975_v12 = vcombine.low %v287_v1, %v299_v2 }
  0x7f   :  { %v319_v8 = vld [vmem:[#allocation5 + $0x720] sm:$0xff]  ;;  %7176 = vmatpush1.bf16.msra.mxu1 %v17967_v11 }
  0x80   :  { %v311_v9 = vld [vmem:[#allocation5 + $0x6e0] sm:$0xff]  ;;  %v17992_v13 = vcombine.high %v307_v7, %v319_v8  ;;  %7691 = vmatprep.subr.bf16.mxu0 %v17976_v6  ;;  %v17991_v19 = vcombine.low %v307_v7, %v319_v8 }
  0x81   :  { %v323_v10 = vld [vmem:[#allocation5 + $0x740] sm:$0xff]  ;;  %7692 = vmatpush1.bf16.msra.mxu0 %v17975_v12 }
  0x82   :  { %v18000_v14 = vcombine.high %v311_v9, %v323_v10  ;;  %v331_v15 = vld [vmem:[#allocation5 + $0x780] sm:$0xff]  ;;  %7177 = vmatprep.subr.bf16.mxu1 %v17992_v13  ;;  %v17999_v20 = vcombine.low %v311_v9, %v323_v10  ;;  %v20369_v9 = vld [vmem:[#allocation2] ss:$24 sps:$4 sm:$0xff]  }
  0x83   :  { %v343_v16 = vld [vmem:[#allocation5 + $0x7e0] sm:$0xff]  ;;  %7178 = vmatpush1.bf16.msra.mxu1 %v17991_v19 }
  0x84   :  { %v335_v17 = vld [vmem:[#allocation5 + $0x7a0] sm:$0xff]  ;;  %v18016_v21 = vcombine.high %v331_v15, %v343_v16  ;;  %7693 = vmatprep.subr.bf16.mxu0 %v18000_v14  ;;  %v18015_v27 = vcombine.low %v331_v15, %v343_v16 }
  0x85   :  { %v347_v18 = vld [vmem:[#allocation5 + $0x800] sm:$0xff]  ;;  %7694 = vmatpush1.bf16.msra.mxu0 %v17999_v20 }
  0x86   :  { %v18024_v22 = vcombine.high %v335_v17, %v347_v18  ;;  %v355_v23 = vld [vmem:[#allocation5 + $0x840] sm:$0xff]  ;;  %7179 = vmatprep.subr.bf16.mxu1 %v18016_v21  ;;  %v18023_v28 = vcombine.low %v335_v17, %v347_v18  ;;  %v20370_v18 = vld [vmem:[#allocation2 + $0xc] ss:$24 sps:$4 sm:$0xff]  }
  0x87   :  { %v367_v24 = vld [vmem:[#allocation5 + $0x8a0] sm:$0xff]  ;;  %7180 = vmatpush1.bf16.msra.mxu1 %v18015_v27 }
  0x88   :  { %v359_v25 = vld [vmem:[#allocation5 + $0x860] sm:$0xff]  ;;  %v18040_v29 = vcombine.high %v355_v23, %v367_v24  ;;  %7695 = vmatprep.subr.bf16.mxu0 %v18024_v22  ;;  %v18039_v35 = vcombine.low %v355_v23, %v367_v24 }
  0x89   :  { %v371_v26 = vld [vmem:[#allocation5 + $0x8c0] sm:$0xff]  ;;  %7696 = vmatpush1.bf16.msra.mxu0 %v18023_v28 }
  0x8a   :  { %v18048_v30 = vcombine.high %v359_v25, %v371_v26  ;;  %v379_v31 = vld [vmem:[#allocation5 + $0x900] sm:$0xff]  ;;  %7181 = vmatprep.subr.bf16.mxu1 %v18040_v29  ;;  %v18047_v36 = vcombine.low %v359_v25, %v371_v26 }
  0x8b   :  { %v391_v32 = vld [vmem:[#allocation5 + $0x960] sm:$0xff]  ;;  %7182 = vmatpush1.bf16.msra.mxu1 %v18039_v35 }
  0x8c   :  { %v383_v33 = vld [vmem:[#allocation5 + $0x920] sm:$0xff]  ;;  %v18064_v37 = vcombine.high %v379_v31, %v391_v32  ;;  %7697 = vmatprep.subr.bf16.mxu0 %v18048_v30  ;;  %v18063_v43 = vcombine.low %v379_v31, %v391_v32 }
  0x8d   :  { %v395_v34 = vld [vmem:[#allocation5 + $0x980] sm:$0xff]  ;;  %7698 = vmatpush1.bf16.msra.mxu0 %v18047_v36 }
  0x8e   :  { %v18072_v38 = vcombine.high %v383_v33, %v395_v34  ;;  %v403_v39 = vld [vmem:[#allocation5 + $0x9c0] sm:$0xff]  ;;  %7183 = vmatprep.subr.bf16.mxu1 %v18064_v37  ;;  %v18071_v44 = vcombine.low %v383_v33, %v395_v34 }
  0x8f   :  { %v415_v40 = vld [vmem:[#allocation5 + $0xa20] sm:$0xff]  ;;  %7184 = vmatpush1.bf16.msra.mxu1 %v18063_v43 }
  0x90   :  { %v407_v41 = vld [vmem:[#allocation5 + $0x9e0] sm:$0xff]  ;;  %v18088_v45 = vcombine.high %v403_v39, %v415_v40  ;;  %7699 = vmatprep.subr.bf16.mxu0 %v18072_v38  ;;  %v18087_v51 = vcombine.low %v403_v39, %v415_v40 }
  0x91   :  { %v419_v42 = vld [vmem:[#allocation5 + $0xa40] sm:$0xff]  ;;  %7700 = vmatpush1.bf16.msra.mxu0 %v18071_v44 }
  0x92   :  { %v18096_v46 = vcombine.high %v407_v41, %v419_v42  ;;  %v427_v47 = vld [vmem:[#allocation5 + $0xa80] sm:$0xff]  ;;  %7185 = vmatprep.subr.bf16.mxu1 %v18088_v45  ;;  %v18095_v52 = vcombine.low %v407_v41, %v419_v42 }
  0x93   :  { %v439_v48 = vld [vmem:[#allocation5 + $0xae0] sm:$0xff]  ;;  %7186 = vmatpush1.bf16.msra.mxu1 %v18087_v51 }
  0x94   :  { %v431_v49 = vld [vmem:[#allocation5 + $0xaa0] sm:$0xff]  ;;  %v18112_v53 = vcombine.high %v427_v47, %v439_v48  ;;  %7701 = vmatprep.subr.bf16.mxu0 %v18096_v46  ;;  %v18111_v59 = vcombine.low %v427_v47, %v439_v48 }
  0x95   :  { %v443_v50 = vld [vmem:[#allocation5 + $0xb00] sm:$0xff]  ;;  %7702 = vmatpush1.bf16.msra.mxu0 %v18095_v52 }
  0x96   :  { %v18120_v54 = vcombine.high %v431_v49, %v443_v50  ;;  %v451_v55 = vld [vmem:[#allocation5 + $0xb40] sm:$0xff]  ;;  %7187 = vmatprep.subr.bf16.mxu1 %v18112_v53  ;;  %v18119_v60 = vcombine.low %v431_v49, %v443_v50 }
  0x97   :  { %v463_v56 = vld [vmem:[#allocation5 + $0xba0] sm:$0xff]  ;;  %7188 = vmatpush1.bf16.msra.mxu1 %v18111_v59 }
  0x98   :  { %v455_v57 = vld [vmem:[#allocation5 + $0xb60] sm:$0xff]  ;;  %v18136_v61 = vcombine.high %v451_v55, %v463_v56  ;;  %7703 = vmatprep.subr.bf16.mxu0 %v18120_v54  ;;  %v18135_v3 = vcombine.low %v451_v55, %v463_v56 }
  0x99   :  { %v467_v58 = vld [vmem:[#allocation5 + $0xbc0] sm:$0xff]  ;;  %7704 = vmatpush1.bf16.msra.mxu0 %v18119_v60 }
  0x9a   :  { %v18144_v62 = vcombine.high %v455_v57, %v467_v58  ;;  %v475_v63 = vld [vmem:[#allocation5 + $0xc00] sm:$0xff]  ;;  %7189 = vmatprep.subr.bf16.mxu1 %v18136_v61  ;;  %v18143_v4 = vcombine.low %v455_v57, %v467_v58 }
  0x9b   :  { %v487_v0 = vld [vmem:[#allocation5 + $0xc60] sm:$0xff]  ;;  %7190 = vmatpush1.bf16.msra.mxu1 %v18135_v3 }
  0x9c   :  { %v479_v1 = vld [vmem:[#allocation5 + $0xc20] sm:$0xff]  ;;  %v18160_v5 = vcombine.high %v475_v63, %v487_v0  ;;  %7705 = vmatprep.subr.bf16.mxu0 %v18144_v62  ;;  %v18159_v12 = vcombine.low %v475_v63, %v487_v0 }
  0x9d   :  { %v491_v2 = vld [vmem:[#allocation5 + $0xc80] sm:$0xff]  ;;  %7706 = vmatpush1.bf16.msra.mxu0 %v18143_v4 }
  0x9e   :  { %v18168_v6 = vcombine.high %v479_v1, %v491_v2  ;;  %v499_v7 = vld [vmem:[#allocation5 + $0xcc0] sm:$0xff]  ;;  %7202 = vmatprep.subr.bf16.mxu1 %v18160_v5  ;;  %v18167_v13 = vcombine.low %v479_v1, %v491_v2  ;;  %7192 = vmatmul.mubr.bf16.vlgmr.msra.gmra.mrb[0].mxu1 %v20369_v9 }
  0x9f   :  { %v511_v8 = vld [vmem:[#allocation5 + $0xd20] sm:$0xff]  ;;  %7203 = vmatpush1.bf16.msra.mxu1 %v18159_v12  ;;  %7234 = vmatprep.mubr.bf16.mxu1 %v20370_v18 }
  0xa0   :  { %v503_v10 = vld [vmem:[#allocation5 + $0xce0] sm:$0xff]  ;;  %v18184_v14 = vcombine.high %v499_v7, %v511_v8  ;;  %7718 = vmatprep.subr.bf16.mxu0 %v18168_v6  ;;  %7708 = vmatmul.mubr.bf16.vlgmr.msra.gmra.mrb[0].mxu0 %v20369_v9  ;;  %v18183_v21 = vcombine.low %v499_v7, %v511_v8 }
  0xa1   :  { %v515_v11 = vld [vmem:[#allocation5 + $0xd40] sm:$0xff]  ;;  %7719 = vmatpush1.bf16.msra.mxu0 %v18167_v13  ;;  %7750 = vmatprep.mubr.bf16.mxu0 %v20370_v18 }
  0xa2   :  { %v523_v15 = vld [vmem:[#allocation5 + $0xd80] sm:$0xff]  ;;  %v18192_v16 = vcombine.high %v503_v10, %v515_v11  ;;  %7204 = vmatprep.subr.bf16.mxu1 %v18184_v14  ;;  %v18191_v22 = vcombine.low %v503_v10, %v515_v11 }
  0xa3   :  { %v535_v17 = vld [vmem:[#allocation5 + $0xde0] sm:$0xff]  ;;  %7205 = vmatpush1.bf16.msra.mxu1 %v18183_v21 }
  0xa4   :  { %v527_v19 = vld [vmem:[#allocation5 + $0xda0] sm:$0xff]  ;;  %v18208_v23 = vcombine.high %v523_v15, %v535_v17  ;;  %7720 = vmatprep.subr.bf16.mxu0 %v18192_v16  ;;  %v18207_v29 = vcombine.low %v523_v15, %v535_v17 }
  0xa5   :  { %v539_v20 = vld [vmem:[#allocation5 + $0xe00] sm:$0xff]  ;;  %7721 = vmatpush1.bf16.msra.mxu0 %v18191_v22 }
  0xa6   :  { %v547_v24 = vld [vmem:[#allocation5 + $0xe40] sm:$0xff]  ;;  %v18216_v26 = vcombine.high %v527_v19, %v539_v20  ;;  %7206 = vmatprep.subr.bf16.mxu1 %v18208_v23  ;;  %v18215_v30 = vcombine.low %v527_v19, %v539_v20 }
  0xa7   :  { %v559_v25 = vld [vmem:[#allocation5 + $0xea0] sm:$0xff]  ;;  %7207 = vmatpush1.bf16.msra.mxu1 %v18207_v29 }
  0xa8   :  { %v551_v27 = vld [vmem:[#allocation5 + $0xe60] sm:$0xff]  ;;  %v18232_v31 = vcombine.high %v547_v24, %v559_v25  ;;  %7722 = vmatprep.subr.bf16.mxu0 %v18216_v26  ;;  %v18231_v37 = vcombine.low %v547_v24, %v559_v25 }
  0xa9   :  { %v563_v28 = vld [vmem:[#allocation5 + $0xec0] sm:$0xff]  ;;  %7723 = vmatpush1.bf16.msra.mxu0 %v18215_v30 }
  0xaa   :  { %v571_v32 = vld [vmem:[#allocation5 + $0xf00] sm:$0xff]  ;;  %v18240_v35 = vcombine.high %v551_v27, %v563_v28  ;;  %7208 = vmatprep.subr.bf16.mxu1 %v18232_v31  ;;  %v18239_v38 = vcombine.low %v551_v27, %v563_v28 }
  0xab   :  { %v583_v33 = vld [vmem:[#allocation5 + $0xf60] sm:$0xff]  ;;  %7209 = vmatpush1.bf16.msra.mxu1 %v18231_v37 }
  0xac   :  { %v575_v34 = vld [vmem:[#allocation5 + $0xf20] sm:$0xff]  ;;  %v18256_v39 = vcombine.high %v571_v32, %v583_v33  ;;  %7724 = vmatprep.subr.bf16.mxu0 %v18240_v35  ;;  %v18255_v45 = vcombine.low %v571_v32, %v583_v33 }
  0xad   :  { %v587_v36 = vld [vmem:[#allocation5 + $0xf80] sm:$0xff]  ;;  %7725 = vmatpush1.bf16.msra.mxu0 %v18239_v38 }
  0xae   :  { %v595_v40 = vld [vmem:[#allocation5 + $0xfc0] sm:$0xff]  ;;  %v18264_v43 = vcombine.high %v575_v34, %v587_v36  ;;  %7210 = vmatprep.subr.bf16.mxu1 %v18256_v39  ;;  %v18263_v46 = vcombine.low %v575_v34, %v587_v36 }
  0xaf   :  { %v607_v41 = vld [vmem:[#allocation5 + $0x1020] sm:$0xff]  ;;  %7211 = vmatpush1.bf16.msra.mxu1 %v18255_v45 }
  0xb0   :  { %v599_v42 = vld [vmem:[#allocation5 + $0xfe0] sm:$0xff]  ;;  %v18280_v47 = vcombine.high %v595_v40, %v607_v41  ;;  %7726 = vmatprep.subr.bf16.mxu0 %v18264_v43  ;;  %v18279_v53 = vcombine.low %v595_v40, %v607_v41 }
  0xb1   :  { %v611_v44 = vld [vmem:[#allocation5 + $0x1040] sm:$0xff]  ;;  %7727 = vmatpush1.bf16.msra.mxu0 %v18263_v46 }
  0xb2   :  { %v619_v48 = vld [vmem:[#allocation5 + $0x1080] sm:$0xff]  ;;  %v18288_v51 = vcombine.high %v599_v42, %v611_v44  ;;  %7212 = vmatprep.subr.bf16.mxu1 %v18280_v47  ;;  %v18287_v54 = vcombine.low %v599_v42, %v611_v44 }
  0xb3   :  { %v631_v49 = vld [vmem:[#allocation5 + $0x10e0] sm:$0xff]  ;;  %7213 = vmatpush1.bf16.msra.mxu1 %v18279_v53 }
  0xb4   :  { %v623_v50 = vld [vmem:[#allocation5 + $0x10a0] sm:$0xff]  ;;  %v18304_v55 = vcombine.high %v619_v48, %v631_v49  ;;  %7728 = vmatprep.subr.bf16.mxu0 %v18288_v51  ;;  %v18303_v61 = vcombine.low %v619_v48, %v631_v49 }
  0xb5   :  { %v635_v52 = vld [vmem:[#allocation5 + $0x1100] sm:$0xff]  ;;  %7729 = vmatpush1.bf16.msra.mxu0 %v18287_v54 }
  0xb6   :  { %v643_v56 = vld [vmem:[#allocation5 + $0x1140] sm:$0xff]  ;;  %v18312_v59 = vcombine.high %v623_v50, %v635_v52  ;;  %7214 = vmatprep.subr.bf16.mxu1 %v18304_v55  ;;  %v18311_v62 = vcombine.low %v623_v50, %v635_v52 }
  0xb7   :  { %v655_v57 = vld [vmem:[#allocation5 + $0x11a0] sm:$0xff]  ;;  %7215 = vmatpush1.bf16.msra.mxu1 %v18303_v61 }
  0xb8   :  { %v647_v58 = vld [vmem:[#allocation5 + $0x1160] sm:$0xff]  ;;  %v18328_v63 = vcombine.high %v643_v56, %v655_v57  ;;  %7730 = vmatprep.subr.bf16.mxu0 %v18312_v59  ;;  %v18327_v5 = vcombine.low %v643_v56, %v655_v57 }
  0xb9   :  { %v659_v60 = vld [vmem:[#allocation5 + $0x11c0] sm:$0xff]  ;;  %7731 = vmatpush1.bf16.msra.mxu0 %v18311_v62 }
  0xba   :  { %v667_v0 = vld [vmem:[#allocation5 + $0x1200] sm:$0xff]  ;;  %v18336_v3 = vcombine.high %v647_v58, %v659_v60  ;;  %7216 = vmatprep.subr.bf16.mxu1 %v18328_v63  ;;  %v18335_v6 = vcombine.low %v647_v58, %v659_v60 }
  0xbb   :  { %v679_v1 = vld [vmem:[#allocation5 + $0x1260] sm:$0xff]  ;;  %7217 = vmatpush1.bf16.msra.mxu1 %v18327_v5 }
  0xbc   :  { %v671_v2 = vld [vmem:[#allocation5 + $0x1220] sm:$0xff]  ;;  %v18352_v7 = vcombine.high %v667_v0, %v679_v1  ;;  %7732 = vmatprep.subr.bf16.mxu0 %v18336_v3  ;;  %v18351_v13 = vcombine.low %v667_v0, %v679_v1 }
  0xbd   :  { %v683_v4 = vld [vmem:[#allocation5 + $0x1280] sm:$0xff]  ;;  %7733 = vmatpush1.bf16.msra.mxu0 %v18335_v6 }
  0xbe   :  { %v691_v8 = vld [vmem:[#allocation5 + $0x12c0] sm:$0xff]  ;;  %v18360_v11 = vcombine.high %v671_v2, %v683_v4  ;;  %7218 = vmatprep.subr.bf16.mxu1 %v18352_v7  ;;  %v18359_v14 = vcombine.low %v671_v2, %v683_v4 }
  0xbf   :  { %v703_v9 = vld [vmem:[#allocation5 + $0x1320] sm:$0xff]  ;;  %7219 = vmatpush1.bf16.msra.mxu1 %v18351_v13 }
  0xc0   :  { %v695_v10 = vld [vmem:[#allocation5 + $0x12e0] sm:$0xff]  ;;  %v18376_v15 = vcombine.high %v691_v8, %v703_v9  ;;  %7734 = vmatprep.subr.bf16.mxu0 %v18360_v11  ;;  %v18375_v21 = vcombine.low %v691_v8, %v703_v9  ;;  %v20372_v8 = vld [vmem:[#allocation2 + $0x8] ss:$24 sps:$4 sm:$0xff]  }
  0xc1   :  { %v707_v12 = vld [vmem:[#allocation5 + $0x1340] sm:$0xff]  ;;  %7735 = vmatpush1.bf16.msra.mxu0 %v18359_v14 }
  0xc2   :  { %v715_v16 = vld [vmem:[#allocation5 + $0x1380] sm:$0xff]  ;;  %v18384_v19 = vcombine.high %v695_v10, %v707_v12  ;;  %7220 = vmatprep.subr.bf16.mxu1 %v18376_v15  ;;  %v18383_v22 = vcombine.low %v695_v10, %v707_v12 }
  0xc3   :  { %v727_v17 = vld [vmem:[#allocation5 + $0x13e0] sm:$0xff]  ;;  %7221 = vmatpush1.bf16.msra.mxu1 %v18375_v21 }
  0xc4   :  { %v719_v18 = vld [vmem:[#allocation5 + $0x13a0] sm:$0xff]  ;;  %v18400_v23 = vcombine.high %v715_v16, %v727_v17  ;;  %7736 = vmatprep.subr.bf16.mxu0 %v18384_v19  ;;  %v18399_v29 = vcombine.low %v715_v16, %v727_v17 }
  0xc5   :  { %v731_v20 = vld [vmem:[#allocation5 + $0x1400] sm:$0xff]  ;;  %7737 = vmatpush1.bf16.msra.mxu0 %v18383_v22 }
  0xc6   :  { %v739_v24 = vld [vmem:[#allocation5 + $0x1440] sm:$0xff]  ;;  %v18408_v27 = vcombine.high %v719_v18, %v731_v20  ;;  %7222 = vmatprep.subr.bf16.mxu1 %v18400_v23  ;;  %v18407_v30 = vcombine.low %v719_v18, %v731_v20 }
  0xc7   :  { %v751_v25 = vld [vmem:[#allocation5 + $0x14a0] sm:$0xff]  ;;  %7223 = vmatpush1.bf16.msra.mxu1 %v18399_v29 }
  0xc8   :  { %v743_v26 = vld [vmem:[#allocation5 + $0x1460] sm:$0xff]  ;;  %v18424_v31 = vcombine.high %v739_v24, %v751_v25  ;;  %7738 = vmatprep.subr.bf16.mxu0 %v18408_v27  ;;  %v18423_v37 = vcombine.low %v739_v24, %v751_v25 }
  0xc9   :  { %v755_v28 = vld [vmem:[#allocation5 + $0x14c0] sm:$0xff]  ;;  %7739 = vmatpush1.bf16.msra.mxu0 %v18407_v30 }
  0xca   :  { %v763_v32 = vld [vmem:[#allocation5 + $0x1500] sm:$0xff]  ;;  %v18432_v35 = vcombine.high %v743_v26, %v755_v28  ;;  %7224 = vmatprep.subr.bf16.mxu1 %v18424_v31  ;;  %v18431_v38 = vcombine.low %v743_v26, %v755_v28 }
  0xcb   :  { %v775_v33 = vld [vmem:[#allocation5 + $0x1560] sm:$0xff]  ;;  %7225 = vmatpush1.bf16.msra.mxu1 %v18423_v37 }
  0xcc   :  { %v767_v34 = vld [vmem:[#allocation5 + $0x1520] sm:$0xff]  ;;  %v18448_v39 = vcombine.high %v763_v32, %v775_v33  ;;  %7740 = vmatprep.subr.bf16.mxu0 %v18432_v35  ;;  %v18447_v45 = vcombine.low %v763_v32, %v775_v33 }
  0xcd   :  { %v779_v36 = vld [vmem:[#allocation5 + $0x1580] sm:$0xff]  ;;  %7741 = vmatpush1.bf16.msra.mxu0 %v18431_v38 }
  0xce   :  { %v787_v40 = vld [vmem:[#allocation5 + $0x15c0] sm:$0xff]  ;;  %v18456_v43 = vcombine.high %v767_v34, %v779_v36  ;;  %7226 = vmatprep.subr.bf16.mxu1 %v18448_v39  ;;  %v18455_v46 = vcombine.low %v767_v34, %v779_v36 }
  0xcf   :  { %v799_v41 = vld [vmem:[#allocation5 + $0x1620] sm:$0xff]  ;;  %7227 = vmatpush1.bf16.msra.mxu1 %v18447_v45 }
  0xd0   :  { %v791_v42 = vld [vmem:[#allocation5 + $0x15e0] sm:$0xff]  ;;  %v18472_v47 = vcombine.high %v787_v40, %v799_v41  ;;  %7742 = vmatprep.subr.bf16.mxu0 %v18456_v43  ;;  %v18471_v53 = vcombine.low %v787_v40, %v799_v41 }
  0xd1   :  { %v803_v44 = vld [vmem:[#allocation5 + $0x1640] sm:$0xff]  ;;  %7743 = vmatpush1.bf16.msra.mxu0 %v18455_v46 }
  0xd2   :  { %v811_v48 = vld [vmem:[#allocation5 + $0x1680] sm:$0xff]  ;;  %v18480_v51 = vcombine.high %v791_v42, %v803_v44  ;;  %7228 = vmatprep.subr.bf16.mxu1 %v18472_v47  ;;  %v18479_v54 = vcombine.low %v791_v42, %v803_v44 }
  0xd3   :  { %v823_v49 = vld [vmem:[#allocation5 + $0x16e0] sm:$0xff]  ;;  %7229 = vmatpush1.bf16.msra.mxu1 %v18471_v53 }
  0xd4   :  { %v815_v50 = vld [vmem:[#allocation5 + $0x16a0] sm:$0xff]  ;;  %v18496_v55 = vcombine.high %v811_v48, %v823_v49  ;;  %7744 = vmatprep.subr.bf16.mxu0 %v18480_v51  ;;  %v18495_v61 = vcombine.low %v811_v48, %v823_v49 }
  0xd5   :  { %v827_v52 = vld [vmem:[#allocation5 + $0x1700] sm:$0xff]  ;;  %7745 = vmatpush1.bf16.msra.mxu0 %v18479_v54 }
  0xd6   :  { %v835_v56 = vld [vmem:[#allocation5 + $0x1740] sm:$0xff]  ;;  %v18504_v59 = vcombine.high %v815_v50, %v827_v52  ;;  %7230 = vmatprep.subr.bf16.mxu1 %v18496_v55  ;;  %v18503_v62 = vcombine.low %v815_v50, %v827_v52 }
  0xd7   :  { %v847_v57 = vld [vmem:[#allocation5 + $0x17a0] sm:$0xff]  ;;  %7231 = vmatpush1.bf16.msra.mxu1 %v18495_v61 }
  0xd8   :  { %v839_v58 = vld [vmem:[#allocation5 + $0x1760] sm:$0xff]  ;;  %v18520_v63 = vcombine.high %v835_v56, %v847_v57  ;;  %7746 = vmatprep.subr.bf16.mxu0 %v18504_v59  ;;  %v18519_v5 = vcombine.low %v835_v56, %v847_v57 }
  0xd9   :  { %v851_v60 = vld [vmem:[#allocation5 + $0x17c0] sm:$0xff]  ;;  %7747 = vmatpush1.bf16.msra.mxu0 %v18503_v62 }
  0xda   :  { %v859_v0 = vld [vmem:[#allocation5 + $0x1800] sm:$0xff]  ;;  %v18528_v3 = vcombine.high %v839_v58, %v851_v60  ;;  %7232 = vmatprep.subr.bf16.mxu1 %v18520_v63  ;;  %v18527_v6 = vcombine.low %v839_v58, %v851_v60 }
  0xdb   :  { %v871_v1 = vld [vmem:[#allocation5 + $0x1860] sm:$0xff]  ;;  %7233 = vmatpush1.bf16.msra.mxu1 %v18519_v5 }
  0xdc   :  { %v863_v2 = vld [vmem:[#allocation5 + $0x1820] sm:$0xff]  ;;  %v18544_v7 = vcombine.high %v859_v0, %v871_v1  ;;  %7748 = vmatprep.subr.bf16.mxu0 %v18528_v3  ;;  %v18543_v14 = vcombine.low %v859_v0, %v871_v1 }
  0xdd   :  { %v875_v4 = vld [vmem:[#allocation5 + $0x1880] sm:$0xff]  ;;  %7749 = vmatpush1.bf16.msra.mxu0 %v18527_v6 }
  0xde   :  { %v883_v9 = vld [vmem:[#allocation5 + $0x18c0] sm:$0xff]  ;;  %v18552_v12 = vcombine.high %v863_v2, %v875_v4  ;;  %7245 = vmatprep.subr.bf16.mxu1 %v18544_v7  ;;  %v18551_v16 = vcombine.low %v863_v2, %v875_v4  ;;  %7235 = vmatmul.mubr.bf16.vlgmr.msra.gmra.mrb[0].mxu1 %v20372_v8 }
  0xdf   :  { %v895_v10 = vld [vmem:[#allocation5 + $0x1920] sm:$0xff]  ;;  %7246 = vmatpush1.bf16.msra.mxu1 %v18543_v14 }
  0xe0   :  { %v887_v11 = vld [vmem:[#allocation5 + $0x18e0] sm:$0xff]  ;;  %v18568_v17 = vcombine.high %v883_v9, %v895_v10  ;;  %7761 = vmatprep.subr.bf16.mxu0 %v18552_v12  ;;  %7751 = vmatmul.mubr.bf16.vlgmr.msra.gmra.mrb[0].mxu0 %v20372_v8  ;;  %v18567_v23 = vcombine.low %v883_v9, %v895_v10 }
  0xe1   :  { %v899_v13 = vld [vmem:[#allocation5 + $0x1940] sm:$0xff]  ;;  %7762 = vmatpush1.bf16.msra.mxu0 %v18551_v16 }
  0xe2   :  { %v907_v15 = vld [vmem:[#allocation5 + $0x1980] sm:$0xff]  ;;  %v18576_v21 = vcombine.high %v887_v11, %v899_v13  ;;  %7247 = vmatprep.subr.bf16.mxu1 %v18568_v17  ;;  %v18575_v24 = vcombine.low %v887_v11, %v899_v13 }
  0xe3   :  { %v919_v18 = vld [vmem:[#allocation5 + $0x19e0] sm:$0xff]  ;;  %7248 = vmatpush1.bf16.msra.mxu1 %v18567_v23 }
  0xe4   :  { %v911_v19 = vld [vmem:[#allocation5 + $0x19a0] sm:$0xff]  ;;  %v18592_v25 = vcombine.high %v907_v15, %v919_v18  ;;  %7763 = vmatprep.subr.bf16.mxu0 %v18576_v21  ;;  %v18591_v31 = vcombine.low %v907_v15, %v919_v18 }
  0xe5   :  { %v923_v20 = vld [vmem:[#allocation5 + $0x1a00] sm:$0xff]  ;;  %7764 = vmatpush1.bf16.msra.mxu0 %v18575_v24 }
  0xe6   :  { %v20373_v22 = vld [vmem:[#allocation2 + $0x14] ss:$24 sps:$4 sm:$0xff]   ;;  %v18600_v29 = vcombine.high %v911_v19, %v923_v20  ;;  %7249 = vmatprep.subr.bf16.mxu1 %v18592_v25  ;;  %v18599_v32 = vcombine.low %v911_v19, %v923_v20 }
  0xe7   :  { %v931_v26 = vld [vmem:[#allocation5 + $0x1a40] sm:$0xff]  ;;  %7277 = vmatprep.mubr.bf16.mxu1 %v20373_v22  ;;  %7793 = vmatprep.mubr.bf16.mxu0 %v20373_v22 }
  0xe8   :  { %v943_v27 = vld [vmem:[#allocation5 + $0x1aa0] sm:$0xff]  ;;  %7765 = vmatprep.subr.bf16.mxu0 %v18600_v29  ;;  %7250 = vmatpush1.bf16.msra.mxu1 %v18591_v31 }
  0xe9   :  { %v935_v28 = vld [vmem:[#allocation5 + $0x1a60] sm:$0xff]  ;;  %v18616_v33 = vcombine.high %v931_v26, %v943_v27  ;;  %v18615_v39 = vcombine.low %v931_v26, %v943_v27  ;;  %7766 = vmatpush1.bf16.msra.mxu0 %v18599_v32 }
  0xea   :  { %v947_v30 = vld [vmem:[#allocation5 + $0x1ac0] sm:$0xff] }
  0xeb   :  { %v955_v34 = vld [vmem:[#allocation5 + $0x1b00] sm:$0xff]  ;;  %v18624_v37 = vcombine.high %v935_v28, %v947_v30  ;;  %7251 = vmatprep.subr.bf16.mxu1 %v18616_v33  ;;  %v18623_v40 = vcombine.low %v935_v28, %v947_v30 }
  0xec   :  { %v967_v35 = vld [vmem:[#allocation5 + $0x1b60] sm:$0xff]  ;;  %7252 = vmatpush1.bf16.msra.mxu1 %v18615_v39 }
  0xed   :  { %v959_v36 = vld [vmem:[#allocation5 + $0x1b20] sm:$0xff]  ;;  %v18640_v41 = vcombine.high %v955_v34, %v967_v35  ;;  %7767 = vmatprep.subr.bf16.mxu0 %v18624_v37  ;;  %v18639_v47 = vcombine.low %v955_v34, %v967_v35 }
  0xee   :  { %v971_v38 = vld [vmem:[#allocation5 + $0x1b80] sm:$0xff]  ;;  %7768 = vmatpush1.bf16.msra.mxu0 %v18623_v40 }
  0xef   :  { %v979_v42 = vld [vmem:[#allocation5 + $0x1bc0] sm:$0xff]  ;;  %v18648_v45 = vcombine.high %v959_v36, %v971_v38  ;;  %7253 = vmatprep.subr.bf16.mxu1 %v18640_v41  ;;  %v18647_v48 = vcombine.low %v959_v36, %v971_v38 }
  0xf0   :  { %v991_v43 = vld [vmem:[#allocation5 + $0x1c20] sm:$0xff]  ;;  %7254 = vmatpush1.bf16.msra.mxu1 %v18639_v47 }
  0xf1   :  { %v983_v44 = vld [vmem:[#allocation5 + $0x1be0] sm:$0xff]  ;;  %v18664_v49 = vcombine.high %v979_v42, %v991_v43  ;;  %7769 = vmatprep.subr.bf16.mxu0 %v18648_v45  ;;  %v18663_v55 = vcombine.low %v979_v42, %v991_v43 }
  0xf2   :  { %v995_v46 = vld [vmem:[#allocation5 + $0x1c40] sm:$0xff]  ;;  %7770 = vmatpush1.bf16.msra.mxu0 %v18647_v48 }
  0xf3   :  { %v1003_v50 = vld [vmem:[#allocation5 + $0x1c80] sm:$0xff]  ;;  %v18672_v53 = vcombine.high %v983_v44, %v995_v46  ;;  %7255 = vmatprep.subr.bf16.mxu1 %v18664_v49  ;;  %v18671_v56 = vcombine.low %v983_v44, %v995_v46 }
  0xf4   :  { %v1015_v51 = vld [vmem:[#allocation5 + $0x1ce0] sm:$0xff]  ;;  %7256 = vmatpush1.bf16.msra.mxu1 %v18663_v55 }
  0xf5   :  { %v1007_v52 = vld [vmem:[#allocation5 + $0x1ca0] sm:$0xff]  ;;  %v18688_v57 = vcombine.high %v1003_v50, %v1015_v51  ;;  %7771 = vmatprep.subr.bf16.mxu0 %v18672_v53  ;;  %v18687_v63 = vcombine.low %v1003_v50, %v1015_v51 }
  0xf6   :  { %v1019_v54 = vld [vmem:[#allocation5 + $0x1d00] sm:$0xff]  ;;  %7772 = vmatpush1.bf16.msra.mxu0 %v18671_v56 }
  0xf7   :  { %v1027_v58 = vld [vmem:[#allocation5 + $0x1d40] sm:$0xff]  ;;  %v18696_v61 = vcombine.high %v1007_v52, %v1019_v54  ;;  %7257 = vmatprep.subr.bf16.mxu1 %v18688_v57  ;;  %v18695_v0 = vcombine.low %v1007_v52, %v1019_v54 }
  0xf8   :  { %v1039_v59 = vld [vmem:[#allocation5 + $0x1da0] sm:$0xff]  ;;  %7258 = vmatpush1.bf16.msra.mxu1 %v18687_v63 }
  0xf9   :  { %v1031_v60 = vld [vmem:[#allocation5 + $0x1d60] sm:$0xff]  ;;  %v18712_v1 = vcombine.high %v1027_v58, %v1039_v59  ;;  %7773 = vmatprep.subr.bf16.mxu0 %v18696_v61  ;;  %v18711_v7 = vcombine.low %v1027_v58, %v1039_v59 }
  0xfa   :  { %v1043_v62 = vld [vmem:[#allocation5 + $0x1dc0] sm:$0xff]  ;;  %7774 = vmatpush1.bf16.msra.mxu0 %v18695_v0 }
  0xfb   :  { %v1051_v2 = vld [vmem:[#allocation5 + $0x1e00] sm:$0xff]  ;;  %v18720_v5 = vcombine.high %v1031_v60, %v1043_v62  ;;  %7259 = vmatprep.subr.bf16.mxu1 %v18712_v1  ;;  %v18719_v8 = vcombine.low %v1031_v60, %v1043_v62 }
  0xfc   :  { %v1063_v3 = vld [vmem:[#allocation5 + $0x1e60] sm:$0xff]  ;;  %7260 = vmatpush1.bf16.msra.mxu1 %v18711_v7 }
  0xfd   :  { %v1055_v4 = vld [vmem:[#allocation5 + $0x1e20] sm:$0xff]  ;;  %v18736_v9 = vcombine.high %v1051_v2, %v1063_v3  ;;  %7775 = vmatprep.subr.bf16.mxu0 %v18720_v5  ;;  %v18735_v15 = vcombine.low %v1051_v2, %v1063_v3  ;;  %v92_v2 = vld [vmem:[#allocation5 + $0x8] sm:$0xff] }
  0xfe   :  { %v1067_v6 = vld [vmem:[#allocation5 + $0x1e80] sm:$0xff]  ;;  %7776 = vmatpush1.bf16.msra.mxu0 %v18719_v8  ;;  %v104_v3 = vld [vmem:[#allocation5 + $0x68] sm:$0xff] }
  0xff   :  { %v1075_v10 = vld [vmem:[#allocation5 + $0x1ec0] sm:$0xff]  ;;  %v18744_v13 = vcombine.high %v1055_v4, %v1067_v6  ;;  %7261 = vmatprep.subr.bf16.mxu1 %v18736_v9  ;;  %v18743_v16 = vcombine.low %v1055_v4, %v1067_v6  ;;  %v97_v4 = vld [vmem:[#allocation5 + $0x30] sm:$0xff] }
 0x100   :  { %v1087_v11 = vld [vmem:[#allocation5 + $0x1f20] sm:$0xff]  ;;  %7262 = vmatpush1.bf16.msra.mxu1 %v18735_v15  ;;  %v109_v6 = vld [vmem:[#allocation5 + $0x90] sm:$0xff] }
 0x101   :  { %v1079_v12 = vld [vmem:[#allocation5 + $0x1ee0] sm:$0xff]  ;;  %v18760_v17 = vcombine.high %v1075_v10, %v1087_v11  ;;  %7777 = vmatprep.subr.bf16.mxu0 %v18744_v13  ;;  %v18759_v23 = vcombine.low %v1075_v10, %v1087_v11  ;;  %v17778_v10 = vcombine.high %v92_v2, %v104_v3  ;;  %v116_v11 = vld [vmem:[#allocation5 + $0xc8] sm:$0xff]  ;;  %v121_v13 = vld [vmem:[#allocation5 + $0xf0] sm:$0xff] }
 0x102   :  { %v1091_v14 = vld [vmem:[#allocation5 + $0x1f40] sm:$0xff]  ;;  %7778 = vmatpush1.bf16.msra.mxu0 %v18743_v16  ;;  %v133_v15 = vld [vmem:[#allocation5 + $0x150] sm:$0xff]  ;;  %v17777_v16 = vcombine.low %v92_v2, %v104_v3 }
 0x103   :  { %v1099_v18 = vld [vmem:[#allocation5 + $0x1f80] sm:$0xff]  ;;  %v18768_v21 = vcombine.high %v1079_v12, %v1091_v14  ;;  %7263 = vmatprep.subr.bf16.mxu1 %v18760_v17  ;;  %v18767_v24 = vcombine.low %v1079_v12, %v1091_v14  ;;  %v128_v12 = vld [vmem:[#allocation5 + $0x128] sm:$0xff]  ;;  %v17788_v14 = vcombine.high %v97_v4, %v109_v6  ;;  %v17787_v17 = vcombine.low %v97_v4, %v109_v6  ;;  %v289_v6 = vld [vmem:[#allocation5 + $0x630] sm:$0xff] }
 0x104   :  { %v1111_v19 = vld [vmem:[#allocation5 + $0x1fe0] sm:$0xff]  ;;  %7264 = vmatpush1.bf16.msra.mxu1 %v18759_v23  ;;  %v157_v23 = vld [vmem:[#allocation5 + $0x210] sm:$0xff]  ;;  %v284_v4 = vld [vmem:[#allocation5 + $0x608] sm:$0xff] }
 0x105   :  { %v1103_v20 = vld [vmem:[#allocation5 + $0x1fa0] sm:$0xff]  ;;  %v18784_v25 = vcombine.high %v1099_v18, %v1111_v19  ;;  %7779 = vmatprep.subr.bf16.mxu0 %v18768_v21  ;;  %v18783_v31 = vcombine.low %v1099_v18, %v1111_v19  ;;  %v17802_v18 = vcombine.high %v116_v11, %v128_v12  ;;  %v140_v19 = vld [vmem:[#allocation5 + $0x188] sm:$0xff]  ;;  %v145_v21 = vld [vmem:[#allocation5 + $0x1b0] sm:$0xff] }
 0x106   :  { %v1115_v22 = vld [vmem:[#allocation5 + $0x2000] sm:$0xff]  ;;  %7780 = vmatpush1.bf16.msra.mxu0 %v18767_v24  ;;  %v17801_v24 = vcombine.low %v116_v11, %v128_v12  ;;  %v308_v12 = vld [vmem:[#allocation5 + $0x6c8] sm:$0xff] }
 0x107   :  { %v1123_v26 = vld [vmem:[#allocation5 + $0x2040] sm:$0xff]  ;;  %v18792_v29 = vcombine.high %v1103_v20, %v1115_v22  ;;  %7265 = vmatprep.subr.bf16.mxu1 %v18784_v25  ;;  %v18791_v32 = vcombine.low %v1103_v20, %v1115_v22  ;;  %v152_v20 = vld [vmem:[#allocation5 + $0x1e8] sm:$0xff]  ;;  %v17812_v22 = vcombine.high %v121_v13, %v133_v15  ;;  %v17811_v25 = vcombine.low %v121_v13, %v133_v15 }
 0x108   :  { %v1135_v27 = vld [vmem:[#allocation5 + $0x20a0] sm:$0xff]  ;;  %7266 = vmatpush1.bf16.msra.mxu1 %v18783_v31  ;;  %v181_v31 = vld [vmem:[#allocation5 + $0x2d0] sm:$0xff]  ;;  %v320_v13 = vld [vmem:[#allocation5 + $0x728] sm:$0xff] }
 0x109   :  { %v1127_v28 = vld [vmem:[#allocation5 + $0x2060] sm:$0xff]  ;;  %v18808_v33 = vcombine.high %v1123_v26, %v1135_v27  ;;  %7781 = vmatprep.subr.bf16.mxu0 %v18792_v29  ;;  %v18807_v39 = vcombine.low %v1123_v26, %v1135_v27  ;;  %v17826_v26 = vcombine.high %v140_v19, %v152_v20  ;;  %v164_v27 = vld [vmem:[#allocation5 + $0x248] sm:$0xff]  ;;  %v169_v29 = vld [vmem:[#allocation5 + $0x270] sm:$0xff] }
 0x10a   :  { %v1139_v30 = vld [vmem:[#allocation5 + $0x20c0] sm:$0xff]  ;;  %7782 = vmatpush1.bf16.msra.mxu0 %v18791_v32  ;;  %v22200_v32 = vld [vmem:[#allocation2 + $0x4] ss:$24 sps:$4 sm:$0xff]  }
 0x10b   :  { %v1147_v34 = vld [vmem:[#allocation5 + $0x2100] sm:$0xff]  ;;  %v18816_v37 = vcombine.high %v1127_v28, %v1139_v30  ;;  %7267 = vmatprep.subr.bf16.mxu1 %v18808_v33  ;;  %v18815_v40 = vcombine.low %v1127_v28, %v1139_v30  ;;  %v176_v28 = vld [vmem:[#allocation5 + $0x2a8] sm:$0xff]  ;;  %v17836_v30 = vcombine.high %v145_v21, %v157_v23  ;;  %v17825_v33 = vcombine.low %v140_v19, %v152_v20 }
 0x10c   :  { %v1159_v35 = vld [vmem:[#allocation5 + $0x2160] sm:$0xff]  ;;  %7268 = vmatpush1.bf16.msra.mxu1 %v18807_v39  ;;  %v17860_v39 = vcombine.high %v169_v29, %v181_v31  ;;  %v17994_v19 = vcombine.high %v308_v12, %v320_v13  ;;  %v332_v20 = vld [vmem:[#allocation5 + $0x788] sm:$0xff] }
 0x10d   :  { %v1151_v36 = vld [vmem:[#allocation5 + $0x2120] sm:$0xff]  ;;  %v18832_v41 = vcombine.high %v1147_v34, %v1159_v35  ;;  %7783 = vmatprep.subr.bf16.mxu0 %v18816_v37  ;;  %v18831_v47 = vcombine.low %v1147_v34, %v1159_v35  ;;  %v17835_v34 = vcombine.low %v145_v21, %v157_v23  ;;  %v17850_v35 = vcombine.high %v164_v27, %v176_v28  ;;  %v200_v37 = vld [vmem:[#allocation5 + $0x368] sm:$0xff] }
 0x10e   :  { %v1163_v38 = vld [vmem:[#allocation5 + $0x2180] sm:$0xff]  ;;  %7784 = vmatpush1.bf16.msra.mxu0 %v18815_v40  ;;  %v205_v40 = vld [vmem:[#allocation5 + $0x390] sm:$0xff]  ;;  %v344_v21 = vld [vmem:[#allocation5 + $0x7e8] sm:$0xff] }
 0x10f   :  { %v1171_v42 = vld [vmem:[#allocation5 + $0x21c0] sm:$0xff]  ;;  %v18840_v45 = vcombine.high %v1151_v36, %v1163_v38  ;;  %7269 = vmatprep.subr.bf16.mxu1 %v18832_v41  ;;  %v18839_v48 = vcombine.low %v1151_v36, %v1163_v38  ;;  %v188_v36 = vld [vmem:[#allocation5 + $0x308] sm:$0xff]  ;;  %v193_v38 = vld [vmem:[#allocation5 + $0x330] sm:$0xff]  ;;  %v17849_v41 = vcombine.low %v164_v27, %v176_v28  ;;  %v18018_v27 = vcombine.high %v332_v20, %v344_v21 }
 0x110   :  { %v1183_v43 = vld [vmem:[#allocation5 + $0x2220] sm:$0xff]  ;;  %7270 = vmatpush1.bf16.msra.mxu1 %v18831_v47  ;;  %v17884_v47 = vcombine.high %v193_v38, %v205_v40  ;;  %v356_v28 = vld [vmem:[#allocation5 + $0x848] sm:$0xff] }
 0x111   :  { %v1175_v44 = vld [vmem:[#allocation5 + $0x21e0] sm:$0xff]  ;;  %v18856_v49 = vcombine.high %v1171_v42, %v1183_v43  ;;  %7785 = vmatprep.subr.bf16.mxu0 %v18840_v45  ;;  %v18855_v55 = vcombine.low %v1171_v42, %v1183_v43  ;;  %v17859_v42 = vcombine.low %v169_v29, %v181_v31  ;;  %v17874_v43 = vcombine.high %v188_v36, %v200_v37  ;;  %v224_v45 = vld [vmem:[#allocation5 + $0x428] sm:$0xff] }
 0x112   :  { %v1187_v46 = vld [vmem:[#allocation5 + $0x2240] sm:$0xff]  ;;  %7786 = vmatpush1.bf16.msra.mxu0 %v18839_v48  ;;  %v229_v48 = vld [vmem:[#allocation5 + $0x450] sm:$0xff]  ;;  %v368_v29 = vld [vmem:[#allocation5 + $0x8a8] sm:$0xff] }
 0x113   :  { %v1195_v50 = vld [vmem:[#allocation5 + $0x2280] sm:$0xff]  ;;  %v18864_v53 = vcombine.high %v1175_v44, %v1187_v46  ;;  %7271 = vmatprep.subr.bf16.mxu1 %v18856_v49  ;;  %v18863_v56 = vcombine.low %v1175_v44, %v1187_v46  ;;  %v212_v44 = vld [vmem:[#allocation5 + $0x3c8] sm:$0xff]  ;;  %v217_v46 = vld [vmem:[#allocation5 + $0x3f0] sm:$0xff]  ;;  %v17873_v49 = vcombine.low %v188_v36, %v200_v37 }
 0x114   :  { %v1207_v51 = vld [vmem:[#allocation5 + $0x22e0] sm:$0xff]  ;;  %7272 = vmatpush1.bf16.msra.mxu1 %v18855_v55  ;;  %v17908_v55 = vcombine.high %v217_v46, %v229_v48  ;;  %v380_v36 = vld [vmem:[#allocation5 + $0x908] sm:$0xff] }
 0x115   :  { %v1199_v52 = vld [vmem:[#allocation5 + $0x22a0] sm:$0xff]  ;;  %v18880_v57 = vcombine.high %v1195_v50, %v1207_v51  ;;  %7787 = vmatprep.subr.bf16.mxu0 %v18864_v53  ;;  %v18879_v63 = vcombine.low %v1195_v50, %v1207_v51  ;;  %v17883_v50 = vcombine.low %v193_v38, %v205_v40  ;;  %v17898_v51 = vcombine.high %v212_v44, %v224_v45  ;;  %v248_v53 = vld [vmem:[#allocation5 + $0x4e8] sm:$0xff]  ;;  %v385_v38 = vld [vmem:[#allocation5 + $0x930] sm:$0xff] }
 0x116   :  { %v1211_v54 = vld [vmem:[#allocation5 + $0x2300] sm:$0xff]  ;;  %7788 = vmatpush1.bf16.msra.mxu0 %v18863_v56  ;;  %v253_v56 = vld [vmem:[#allocation5 + $0x510] sm:$0xff]  ;;  %v392_v37 = vld [vmem:[#allocation5 + $0x968] sm:$0xff] }
 0x117   :  { %v1219_v58 = vld [vmem:[#allocation5 + $0x2340] sm:$0xff]  ;;  %v18888_v61 = vcombine.high %v1199_v52, %v1211_v54  ;;  %7273 = vmatprep.subr.bf16.mxu1 %v18880_v57  ;;  %v18887_v0 = vcombine.low %v1199_v52, %v1211_v54  ;;  %v236_v52 = vld [vmem:[#allocation5 + $0x488] sm:$0xff]  ;;  %v241_v54 = vld [vmem:[#allocation5 + $0x4b0] sm:$0xff]  ;;  %v17897_v57 = vcombine.low %v212_v44, %v224_v45 }
 0x118   :  { %v1231_v59 = vld [vmem:[#allocation5 + $0x23a0] sm:$0xff]  ;;  %7274 = vmatpush1.bf16.msra.mxu1 %v18879_v63  ;;  %v17932_v63 = vcombine.high %v241_v54, %v253_v56  ;;  %v17931_v2 = vcombine.low %v241_v54, %v253_v56  ;;  %v397_v40 = vld [vmem:[#allocation5 + $0x990] sm:$0xff]  ;;  %v404_v44 = vld [vmem:[#allocation5 + $0x9c8] sm:$0xff] }
 0x119   :  { %v1223_v60 = vld [vmem:[#allocation5 + $0x2360] sm:$0xff]  ;;  %v18904_v1 = vcombine.high %v1219_v58, %v1231_v59  ;;  %7789 = vmatprep.subr.bf16.mxu0 %v18888_v61  ;;  %v18903_v7 = vcombine.low %v1219_v58, %v1231_v59  ;;  %v17907_v58 = vcombine.low %v217_v46, %v229_v48  ;;  %v17922_v59 = vcombine.high %v236_v52, %v248_v53  ;;  %v272_v61 = vld [vmem:[#allocation5 + $0x5a8] sm:$0xff]  ;;  %v409_v46 = vld [vmem:[#allocation5 + $0x9f0] sm:$0xff] }
 0x11a   :  { %v1235_v62 = vld [vmem:[#allocation5 + $0x23c0] sm:$0xff]  ;;  %7790 = vmatpush1.bf16.msra.mxu0 %v18887_v0  ;;  %v277_v0 = vld [vmem:[#allocation5 + $0x5d0] sm:$0xff]  ;;  %v416_v45 = vld [vmem:[#allocation5 + $0xa28] sm:$0xff] }
 0x11b   :  { %v18912_v5 = vcombine.high %v1223_v60, %v1235_v62  ;;  %7275 = vmatprep.subr.bf16.mxu1 %v18904_v1  ;;  %v18911_v8 = vcombine.low %v1223_v60, %v1235_v62  ;;  %v20375_v9 = vld [vmem:[#allocation2 + $0x10] ss:$24 sps:$4 sm:$0xff]   ;;  %v260_v60 = vld [vmem:[#allocation5 + $0x548] sm:$0xff]  ;;  %v265_v62 = vld [vmem:[#allocation5 + $0x570] sm:$0xff]  ;;  %v17921_v1 = vcombine.low %v236_v52, %v248_v53 }
 0x11c   :  { %7276 = vmatpush1.bf16.msra.mxu1 %v18903_v7  ;;  %v17946_v3 = vcombine.high %v260_v60, %v272_v61  ;;  %v17956_v7 = vcombine.high %v265_v62, %v277_v0  ;;  %v421_v48 = vld [vmem:[#allocation5 + $0xa50] sm:$0xff]  ;;  %v428_v52 = vld [vmem:[#allocation5 + $0xa88] sm:$0xff] }
 0x11d   :  { %7791 = vmatprep.subr.bf16.mxu0 %v18912_v5  ;;  %7288 = vmatprep.subr.bf16.mxu1 %v17778_v10  ;;  %v296_v5 = vld [vmem:[#allocation5 + $0x668] sm:$0xff]  ;;  %v17955_v10 = vcombine.low %v265_v62, %v277_v0  ;;  %v433_v54 = vld [vmem:[#allocation5 + $0xab0] sm:$0xff] }
 0x11e   :  { %7792 = vmatpush1.bf16.msra.mxu0 %v18911_v8  ;;  %v301_v8 = vld [vmem:[#allocation5 + $0x690] sm:$0xff]  ;;  %v17970_v11 = vcombine.high %v284_v4, %v296_v5  ;;  %v440_v53 = vld [vmem:[#allocation5 + $0xae8] sm:$0xff] }
 0x11f   :  { %7933 = vmatprep.subr.bf16.mxu0 %v17788_v14  ;;  %7278 = vmatmul.mubr.bf16.vlgmr.msra.gmra.mrb[0].mxu1 %v20375_v9  ;;  %v313_v14 = vld [vmem:[#allocation5 + $0x6f0] sm:$0xff]  ;;  %v17980_v15 = vcombine.high %v289_v6, %v301_v8 }
 0x120   :  { %7289 = vmatpush1.bf16.msra.mxu1 %v17777_v16  ;;  %7320 = vmatprep.mubr.bf16.mxu1 %v22200_v32  ;;  %v325_v16 = vld [vmem:[#allocation5 + $0x750] sm:$0xff] }
 0x121   :  { %7794 = vmatmul.mubr.bf16.vlgmr.msra.gmra.mrb[0].mxu0 %v20375_v9  ;;  %7290 = vmatprep.subr.bf16.mxu1 %v17802_v18  ;;  %v17945_v9 = vcombine.low %v260_v60, %v272_v61  ;;  %v17979_v18 = vcombine.low %v289_v6, %v301_v8  ;;  %v18004_v23 = vcombine.high %v313_v14, %v325_v16  ;;  %v445_v56 = vld [vmem:[#allocation5 + $0xb10] sm:$0xff]  ;;  %v452_v60 = vld [vmem:[#allocation5 + $0xb48] sm:$0xff] }
 0x122   :  { %7934 = vmatpush1.bf16.msra.mxu0 %v17787_v17  ;;  %7965 = vmatprep.mubr.bf16.mxu0 %v22200_v32  ;;  %v17969_v17 = vcombine.low %v284_v4, %v296_v5  ;;  %v373_v32 = vld [vmem:[#allocation5 + $0x8d0] sm:$0xff]  ;;  %v464_v61 = vld [vmem:[#allocation5 + $0xba8] sm:$0xff] }
 0x123   :  { %7935 = vmatprep.subr.bf16.mxu0 %v17812_v22  ;;  %v337_v22 = vld [vmem:[#allocation5 + $0x7b0] sm:$0xff]  ;;  %v476_v4 = vld [vmem:[#allocation5 + $0xc08] sm:$0xff] }
 0x124   :  { %7291 = vmatpush1.bf16.msra.mxu1 %v17801_v24  ;;  %v349_v24 = vld [vmem:[#allocation5 + $0x810] sm:$0xff]  ;;  %v488_v5 = vld [vmem:[#allocation5 + $0xc68] sm:$0xff] }
 0x125   :  { %7292 = vmatprep.subr.bf16.mxu1 %v17826_v26  ;;  %v18003_v26 = vcombine.low %v313_v14, %v325_v16  ;;  %v18028_v31 = vcombine.high %v337_v22, %v349_v24  ;;  %v457_v62 = vld [vmem:[#allocation5 + $0xb70] sm:$0xff] }
 0x126   :  { %7936 = vmatpush1.bf16.msra.mxu0 %v17811_v25  ;;  %v17993_v25 = vcombine.low %v308_v12, %v320_v13  ;;  %v469_v0 = vld [vmem:[#allocation5 + $0xbd0] sm:$0xff]  ;;  %v500_v12 = vld [vmem:[#allocation5 + $0xcc8] sm:$0xff] }
 0x127   :  { %7937 = vmatprep.subr.bf16.mxu0 %v17836_v30  ;;  %v361_v30 = vld [vmem:[#allocation5 + $0x870] sm:$0xff]  ;;  %v512_v13 = vld [vmem:[#allocation5 + $0xd28] sm:$0xff] }
 0x128   :  { %7293 = vmatpush1.bf16.msra.mxu1 %v17825_v33  ;;  %v18017_v33 = vcombine.low %v332_v20, %v344_v21  ;;  %v481_v6 = vld [vmem:[#allocation5 + $0xc30] sm:$0xff]  ;;  %v524_v20 = vld [vmem:[#allocation5 + $0xd88] sm:$0xff] }
 0x129   :  { %7294 = vmatprep.subr.bf16.mxu1 %v17850_v35  ;;  %v18042_v35 = vcombine.high %v356_v28, %v368_v29  ;;  %v493_v8 = vld [vmem:[#allocation5 + $0xc90] sm:$0xff]  ;;  %v536_v21 = vld [vmem:[#allocation5 + $0xde8] sm:$0xff] }
 0x12a   :  { %7938 = vmatpush1.bf16.msra.mxu0 %v17835_v34  ;;  %v18027_v34 = vcombine.low %v337_v22, %v349_v24  ;;  %v505_v14 = vld [vmem:[#allocation5 + $0xcf0] sm:$0xff] }
 0x12b   :  { %7939 = vmatprep.subr.bf16.mxu0 %v17860_v39  ;;  %v18052_v39 = vcombine.high %v361_v30, %v373_v32  ;;  %v517_v16 = vld [vmem:[#allocation5 + $0xd50] sm:$0xff] }
 0x12c   :  { %7295 = vmatpush1.bf16.msra.mxu1 %v17849_v41  ;;  %v18041_v41 = vcombine.low %v356_v28, %v368_v29  ;;  %v529_v22 = vld [vmem:[#allocation5 + $0xdb0] sm:$0xff]  ;;  %v18210_v28 = vcombine.high %v524_v20, %v536_v21  ;;  %v548_v29 = vld [vmem:[#allocation5 + $0xe48] sm:$0xff] }
 0x12d   :  { %7296 = vmatprep.subr.bf16.mxu1 %v17874_v43  ;;  %v18066_v43 = vcombine.high %v380_v36, %v392_v37  ;;  %v541_v24 = vld [vmem:[#allocation5 + $0xe10] sm:$0xff] }
 0x12e   :  { %7940 = vmatpush1.bf16.msra.mxu0 %v17859_v42  ;;  %v18051_v42 = vcombine.low %v361_v30, %v373_v32  ;;  %v560_v30 = vld [vmem:[#allocation5 + $0xea8] sm:$0xff]  ;;  %v18220_v32 = vcombine.high %v529_v22, %v541_v24 }
 0x12f   :  { %7941 = vmatprep.subr.bf16.mxu0 %v17884_v47  ;;  %v18076_v47 = vcombine.high %v385_v38, %v397_v40 }
 0x130   :  { %7297 = vmatpush1.bf16.msra.mxu1 %v17873_v49  ;;  %v18065_v49 = vcombine.low %v380_v36, %v392_v37  ;;  %v18219_v36 = vcombine.low %v529_v22, %v541_v24  ;;  %v18234_v37 = vcombine.high %v548_v29, %v560_v30  ;;  %v716_v22 = vld [vmem:[#allocation5 + $0x1388] sm:$0xff]  ;;  %v721_v24 = vld [vmem:[#allocation5 + $0x13b0] sm:$0xff] }
 0x131   :  { %7298 = vmatprep.subr.bf16.mxu1 %v17898_v51  ;;  %v18090_v51 = vcombine.high %v404_v44, %v416_v45 }
 0x132   :  { %7942 = vmatpush1.bf16.msra.mxu0 %v17883_v50  ;;  %v18075_v50 = vcombine.low %v385_v38, %v397_v40  ;;  %v572_v38 = vld [vmem:[#allocation5 + $0xf08] sm:$0xff]  ;;  %v577_v40 = vld [vmem:[#allocation5 + $0xf30] sm:$0xff] }
 0x133   :  { %7943 = vmatprep.subr.bf16.mxu0 %v17908_v55  ;;  %v18100_v55 = vcombine.high %v409_v46, %v421_v48 }
 0x134   :  { %7299 = vmatpush1.bf16.msra.mxu1 %v17897_v57  ;;  %v18089_v57 = vcombine.low %v404_v44, %v416_v45 }
 0x135   :  { %7300 = vmatprep.subr.bf16.mxu1 %v17922_v59  ;;  %v18114_v59 = vcombine.high %v428_v52, %v440_v53 }
 0x136   :  { %7944 = vmatpush1.bf16.msra.mxu0 %v17907_v58  ;;  %v18099_v58 = vcombine.low %v409_v46, %v421_v48  ;;  %v596_v46 = vld [vmem:[#allocation5 + $0xfc8] sm:$0xff]  ;;  %v601_v48 = vld [vmem:[#allocation5 + $0xff0] sm:$0xff] }
 0x137   :  { %7945 = vmatprep.subr.bf16.mxu0 %v17932_v63  ;;  %v18124_v63 = vcombine.high %v433_v54, %v445_v56 }
 0x138   :  { %7301 = vmatpush1.bf16.msra.mxu1 %v17921_v1  ;;  %v18113_v1 = vcombine.low %v428_v52, %v440_v53 }
 0x139   :  { %7302 = vmatprep.subr.bf16.mxu1 %v17946_v3  ;;  %v18138_v3 = vcombine.high %v452_v60, %v464_v61 }
 0x13a   :  { %7946 = vmatpush1.bf16.msra.mxu0 %v17931_v2  ;;  %v18123_v2 = vcombine.low %v433_v54, %v445_v56  ;;  %v620_v54 = vld [vmem:[#allocation5 + $0x1088] sm:$0xff]  ;;  %v625_v56 = vld [vmem:[#allocation5 + $0x10b0] sm:$0xff] }
 0x13b   :  { %7947 = vmatprep.subr.bf16.mxu0 %v17956_v7  ;;  %v18148_v7 = vcombine.high %v457_v62, %v469_v0 }
 0x13c   :  { %7303 = vmatpush1.bf16.msra.mxu1 %v17945_v9  ;;  %v18137_v9 = vcombine.low %v452_v60, %v464_v61 }
 0x13d   :  { %7304 = vmatprep.subr.bf16.mxu1 %v17970_v11  ;;  %v18162_v11 = vcombine.high %v476_v4, %v488_v5 }
 0x13e   :  { %7948 = vmatpush1.bf16.msra.mxu0 %v17955_v10  ;;  %v18147_v10 = vcombine.low %v457_v62, %v469_v0  ;;  %v644_v62 = vld [vmem:[#allocation5 + $0x1148] sm:$0xff] }
 0x13f   :  { %7949 = vmatprep.subr.bf16.mxu0 %v17980_v15  ;;  %v18172_v15 = vcombine.high %v481_v6, %v493_v8 }
 0x140   :  { %7305 = vmatpush1.bf16.msra.mxu1 %v17969_v17  ;;  %v18161_v17 = vcombine.low %v476_v4, %v488_v5 }
 0x141   :  { %7306 = vmatprep.subr.bf16.mxu1 %v17994_v19  ;;  %v18186_v19 = vcombine.high %v500_v12, %v512_v13 }
 0x142   :  { %7950 = vmatpush1.bf16.msra.mxu0 %v17979_v18  ;;  %v18171_v18 = vcombine.low %v481_v6, %v493_v8  ;;  %v668_v6 = vld [vmem:[#allocation5 + $0x1208] sm:$0xff]  ;;  %v673_v8 = vld [vmem:[#allocation5 + $0x1230] sm:$0xff] }
 0x143   :  { %7951 = vmatprep.subr.bf16.mxu0 %v18004_v23  ;;  %v18196_v23 = vcombine.high %v505_v14, %v517_v16 }
 0x144   :  { %7307 = vmatpush1.bf16.msra.mxu1 %v17993_v25  ;;  %v22201_v25 = vld [vmem:[#allocation2] ss:$24 sps:$4 sm:$0xff]  }
 0x145   :  { %7308 = vmatprep.subr.bf16.mxu1 %v18018_v27  ;;  %v18195_v27 = vcombine.low %v505_v14, %v517_v16  ;;  %v692_v14 = vld [vmem:[#allocation5 + $0x12c8] sm:$0xff]  ;;  %v697_v16 = vld [vmem:[#allocation5 + $0x12f0] sm:$0xff] }
 0x146   :  { %7952 = vmatpush1.bf16.msra.mxu0 %v18003_v26  ;;  %v18185_v26 = vcombine.low %v500_v12, %v512_v13 }
 0x147   :  { %7953 = vmatprep.subr.bf16.mxu0 %v18028_v31  ;;  %v553_v31 = vld [vmem:[#allocation5 + $0xe70] sm:$0xff] }
 0x148   :  { %7309 = vmatpush1.bf16.msra.mxu1 %v18017_v33  ;;  %v565_v33 = vld [vmem:[#allocation5 + $0xed0] sm:$0xff] }
 0x149   :  { %7310 = vmatprep.subr.bf16.mxu1 %v18042_v35  ;;  %v18209_v35 = vcombine.low %v524_v20, %v536_v21  ;;  %v18243_v44 = vcombine.low %v553_v31, %v565_v33 }
 0x14a   :  { %7954 = vmatpush1.bf16.msra.mxu0 %v18027_v34  ;;  %v22202_v34 = vld [vmem:[#allocation2 + $0xc] ss:$24 sps:$4 sm:$0xff]  }
 0x14b   :  { %7955 = vmatprep.subr.bf16.mxu0 %v18052_v39  ;;  %v584_v39 = vld [vmem:[#allocation5 + $0xf68] sm:$0xff] }
 0x14c   :  { %7311 = vmatpush1.bf16.msra.mxu1 %v18041_v41  ;;  %v18244_v41 = vcombine.high %v553_v31, %v565_v33  ;;  %v18258_v45 = vcombine.high %v572_v38, %v584_v39  ;;  %v752_v31 = vld [vmem:[#allocation5 + $0x14a8] sm:$0xff] }
 0x14d   :  { %7312 = vmatprep.subr.bf16.mxu1 %v18066_v43  ;;  %v18233_v43 = vcombine.low %v548_v29, %v560_v30  ;;  %v740_v30 = vld [vmem:[#allocation5 + $0x1448] sm:$0xff] }
 0x14e   :  { %7956 = vmatpush1.bf16.msra.mxu0 %v18051_v42  ;;  %v589_v42 = vld [vmem:[#allocation5 + $0xf90] sm:$0xff] }
 0x14f   :  { %7957 = vmatprep.subr.bf16.mxu0 %v18076_v47  ;;  %v608_v47 = vld [vmem:[#allocation5 + $0x1028] sm:$0xff]  ;;  %v18267_v52 = vcombine.low %v577_v40, %v589_v42 }
 0x150   :  { %7313 = vmatpush1.bf16.msra.mxu1 %v18065_v49  ;;  %v18268_v49 = vcombine.high %v577_v40, %v589_v42  ;;  %v18282_v53 = vcombine.high %v596_v46, %v608_v47  ;;  %v769_v40 = vld [vmem:[#allocation5 + $0x1530] sm:$0xff] }
 0x151   :  { %7314 = vmatprep.subr.bf16.mxu1 %v18090_v51  ;;  %v18257_v51 = vcombine.low %v572_v38, %v584_v39  ;;  %v764_v38 = vld [vmem:[#allocation5 + $0x1508] sm:$0xff]  ;;  %v781_v42 = vld [vmem:[#allocation5 + $0x1590] sm:$0xff] }
 0x152   :  { %7958 = vmatpush1.bf16.msra.mxu0 %v18075_v50  ;;  %v613_v50 = vld [vmem:[#allocation5 + $0x1050] sm:$0xff]  ;;  %v776_v39 = vld [vmem:[#allocation5 + $0x1568] sm:$0xff] }
 0x153   :  { %7959 = vmatprep.subr.bf16.mxu0 %v18100_v55  ;;  %v632_v55 = vld [vmem:[#allocation5 + $0x10e8] sm:$0xff]  ;;  %v18291_v60 = vcombine.low %v601_v48, %v613_v50 }
 0x154   :  { %7315 = vmatpush1.bf16.msra.mxu1 %v18089_v57  ;;  %v18292_v57 = vcombine.high %v601_v48, %v613_v50  ;;  %v18306_v61 = vcombine.high %v620_v54, %v632_v55  ;;  %v793_v48 = vld [vmem:[#allocation5 + $0x15f0] sm:$0xff] }
 0x155   :  { %7316 = vmatprep.subr.bf16.mxu1 %v18114_v59  ;;  %v18281_v59 = vcombine.low %v596_v46, %v608_v47  ;;  %v788_v46 = vld [vmem:[#allocation5 + $0x15c8] sm:$0xff]  ;;  %v805_v50 = vld [vmem:[#allocation5 + $0x1650] sm:$0xff] }
 0x156   :  { %7960 = vmatpush1.bf16.msra.mxu0 %v18099_v58  ;;  %v637_v58 = vld [vmem:[#allocation5 + $0x1110] sm:$0xff]  ;;  %v800_v47 = vld [vmem:[#allocation5 + $0x1628] sm:$0xff] }
 0x157   :  { %7961 = vmatprep.subr.bf16.mxu0 %v18124_v63  ;;  %v656_v63 = vld [vmem:[#allocation5 + $0x11a8] sm:$0xff]  ;;  %v18316_v0 = vcombine.high %v625_v56, %v637_v58  ;;  %v18315_v4 = vcombine.low %v625_v56, %v637_v58  ;;  %v817_v56 = vld [vmem:[#allocation5 + $0x16b0] sm:$0xff] }
 0x158   :  { %7317 = vmatpush1.bf16.msra.mxu1 %v18113_v1  ;;  %v649_v1 = vld [vmem:[#allocation5 + $0x1170] sm:$0xff]  ;;  %v18330_v5 = vcombine.high %v644_v62, %v656_v63 }
 0x159   :  { %7318 = vmatprep.subr.bf16.mxu1 %v18138_v3  ;;  %v18305_v3 = vcombine.low %v620_v54, %v632_v55  ;;  %v812_v54 = vld [vmem:[#allocation5 + $0x1688] sm:$0xff]  ;;  %v829_v58 = vld [vmem:[#allocation5 + $0x1710] sm:$0xff] }
 0x15a   :  { %7962 = vmatpush1.bf16.msra.mxu0 %v18123_v2  ;;  %v661_v2 = vld [vmem:[#allocation5 + $0x11d0] sm:$0xff]  ;;  %v824_v55 = vld [vmem:[#allocation5 + $0x16e8] sm:$0xff] }
 0x15b   :  { %7963 = vmatprep.subr.bf16.mxu0 %v18148_v7  ;;  %v680_v7 = vld [vmem:[#allocation5 + $0x1268] sm:$0xff]  ;;  %v18339_v12 = vcombine.low %v649_v1, %v661_v2 }
 0x15c   :  { %7319 = vmatpush1.bf16.msra.mxu1 %v18137_v9  ;;  %v18340_v9 = vcombine.high %v649_v1, %v661_v2  ;;  %v18354_v13 = vcombine.high %v668_v6, %v680_v7  ;;  %v18508_v1 = vcombine.high %v817_v56, %v829_v58  ;;  %v853_v2 = vld [vmem:[#allocation5 + $0x17d0] sm:$0xff] }
 0x15d   :  { %7331 = vmatprep.subr.bf16.mxu1 %v18162_v11  ;;  %v18329_v11 = vcombine.low %v644_v62, %v656_v63  ;;  %v836_v62 = vld [vmem:[#allocation5 + $0x1748] sm:$0xff] }
 0x15e   :  { %7964 = vmatpush1.bf16.msra.mxu0 %v18147_v10  ;;  %v685_v10 = vld [vmem:[#allocation5 + $0x1290] sm:$0xff]  ;;  %v848_v63 = vld [vmem:[#allocation5 + $0x17a8] sm:$0xff] }
 0x15f   :  { %7976 = vmatprep.subr.bf16.mxu0 %v18172_v15  ;;  %7321 = vmatmul.mubr.bf16.vlgmr.msra.gmra.mrb[4].mxu1 %v22201_v25  ;;  %v704_v15 = vld [vmem:[#allocation5 + $0x1328] sm:$0xff]  ;;  %v18363_v20 = vcombine.low %v673_v8, %v685_v10 }
 0x160   :  { %7332 = vmatpush1.bf16.msra.mxu1 %v18161_v17  ;;  %7363 = vmatprep.mubr.bf16.mxu1 %v22202_v34  ;;  %v18364_v17 = vcombine.high %v673_v8, %v685_v10  ;;  %v18378_v21 = vcombine.high %v692_v14, %v704_v15  ;;  %v865_v8 = vld [vmem:[#allocation5 + $0x1830] sm:$0xff] }
 0x161   :  { %7966 = vmatmul.mubr.bf16.vlgmr.msra.gmra.mrb[4].mxu0 %v22201_v25  ;;  %7333 = vmatprep.subr.bf16.mxu1 %v18186_v19  ;;  %v18353_v19 = vcombine.low %v668_v6, %v680_v7  ;;  %v860_v6 = vld [vmem:[#allocation5 + $0x1808] sm:$0xff]  ;;  %v877_v10 = vld [vmem:[#allocation5 + $0x1890] sm:$0xff] }
 0x162   :  { %7977 = vmatpush1.bf16.msra.mxu0 %v18171_v18  ;;  %8008 = vmatprep.mubr.bf16.mxu0 %v22202_v34  ;;  %v709_v18 = vld [vmem:[#allocation5 + $0x1350] sm:$0xff]  ;;  %v872_v7 = vld [vmem:[#allocation5 + $0x1868] sm:$0xff] }
 0x163   :  { %7978 = vmatprep.subr.bf16.mxu0 %v18196_v23  ;;  %v728_v23 = vld [vmem:[#allocation5 + $0x13e8] sm:$0xff]  ;;  %v18388_v25 = vcombine.high %v697_v16, %v709_v18  ;;  %v757_v34 = vld [vmem:[#allocation5 + $0x14d0] sm:$0xff] }
 0x164   :  { %7334 = vmatpush1.bf16.msra.mxu1 %v18185_v26  ;;  %v733_v26 = vld [vmem:[#allocation5 + $0x1410] sm:$0xff]  ;;  %v18402_v29 = vcombine.high %v716_v22, %v728_v23 }
 0x165   :  { %7335 = vmatprep.subr.bf16.mxu1 %v18210_v28  ;;  %v18387_v28 = vcombine.low %v697_v16, %v709_v18  ;;  %v18412_v33 = vcombine.high %v721_v24, %v733_v26  ;;  %v889_v16 = vld [vmem:[#allocation5 + $0x18f0] sm:$0xff] }
 0x166   :  { %7979 = vmatpush1.bf16.msra.mxu0 %v18195_v27  ;;  %v18377_v27 = vcombine.low %v692_v14, %v704_v15  ;;  %v884_v14 = vld [vmem:[#allocation5 + $0x18c8] sm:$0xff]  ;;  %v901_v18 = vld [vmem:[#allocation5 + $0x1950] sm:$0xff] }
 0x167   :  { %7980 = vmatprep.subr.bf16.mxu0 %v18220_v32  ;;  %v745_v32 = vld [vmem:[#allocation5 + $0x1470] sm:$0xff]  ;;  %v896_v15 = vld [vmem:[#allocation5 + $0x1928] sm:$0xff] }
 0x168   :  { %7336 = vmatpush1.bf16.msra.mxu1 %v18209_v35  ;;  %v18401_v35 = vcombine.low %v716_v22, %v728_v23  ;;  %v908_v22 = vld [vmem:[#allocation5 + $0x1988] sm:$0xff] }
 0x169   :  { %7337 = vmatprep.subr.bf16.mxu1 %v18234_v37  ;;  %v18426_v37 = vcombine.high %v740_v30, %v752_v31  ;;  %v920_v23 = vld [vmem:[#allocation5 + $0x19e8] sm:$0xff] }
 0x16a   :  { %7981 = vmatpush1.bf16.msra.mxu0 %v18219_v36  ;;  %v18411_v36 = vcombine.low %v721_v24, %v733_v26  ;;  %v913_v24 = vld [vmem:[#allocation5 + $0x19b0] sm:$0xff] }
 0x16b   :  { %7982 = vmatprep.subr.bf16.mxu0 %v18244_v41  ;;  %v18436_v41 = vcombine.high %v745_v32, %v757_v34  ;;  %v925_v26 = vld [vmem:[#allocation5 + $0x1a10] sm:$0xff] }
 0x16c   :  { %7338 = vmatpush1.bf16.msra.mxu1 %v18233_v43  ;;  %v18425_v43 = vcombine.low %v740_v30, %v752_v31  ;;  %v18594_v30 = vcombine.high %v908_v22, %v920_v23  ;;  %v932_v31 = vld [vmem:[#allocation5 + $0x1a48] sm:$0xff] }
 0x16d   :  { %7339 = vmatprep.subr.bf16.mxu1 %v18258_v45  ;;  %v18450_v45 = vcombine.high %v764_v38, %v776_v39 }
 0x16e   :  { %7983 = vmatpush1.bf16.msra.mxu0 %v18243_v44  ;;  %v18435_v44 = vcombine.low %v745_v32, %v757_v34  ;;  %v944_v32 = vld [vmem:[#allocation5 + $0x1aa8] sm:$0xff]  ;;  %v18604_v34 = vcombine.high %v913_v24, %v925_v26 }
 0x16f   :  { %7984 = vmatprep.subr.bf16.mxu0 %v18268_v49  ;;  %v18460_v49 = vcombine.high %v769_v40, %v781_v42 }
 0x170   :  { %7340 = vmatpush1.bf16.msra.mxu1 %v18257_v51  ;;  %v18449_v51 = vcombine.low %v764_v38, %v776_v39  ;;  %v18603_v38 = vcombine.low %v913_v24, %v925_v26  ;;  %v18618_v39 = vcombine.high %v932_v31, %v944_v32  ;;  %v1100_v24 = vld [vmem:[#allocation5 + $0x1f88] sm:$0xff]  ;;  %v1105_v26 = vld [vmem:[#allocation5 + $0x1fb0] sm:$0xff] }
 0x171   :  { %7341 = vmatprep.subr.bf16.mxu1 %v18282_v53  ;;  %v18474_v53 = vcombine.high %v788_v46, %v800_v47 }
 0x172   :  { %7985 = vmatpush1.bf16.msra.mxu0 %v18267_v52  ;;  %v18459_v52 = vcombine.low %v769_v40, %v781_v42  ;;  %v956_v40 = vld [vmem:[#allocation5 + $0x1b08] sm:$0xff]  ;;  %v961_v42 = vld [vmem:[#allocation5 + $0x1b30] sm:$0xff] }
 0x173   :  { %7986 = vmatprep.subr.bf16.mxu0 %v18292_v57  ;;  %v18484_v57 = vcombine.high %v793_v48, %v805_v50 }
 0x174   :  { %7342 = vmatpush1.bf16.msra.mxu1 %v18281_v59  ;;  %v18473_v59 = vcombine.low %v788_v46, %v800_v47 }
 0x175   :  { %7343 = vmatprep.subr.bf16.mxu1 %v18306_v61  ;;  %v18498_v61 = vcombine.high %v812_v54, %v824_v55 }
 0x176   :  { %7987 = vmatpush1.bf16.msra.mxu0 %v18291_v60  ;;  %v18483_v60 = vcombine.low %v793_v48, %v805_v50  ;;  %v980_v48 = vld [vmem:[#allocation5 + $0x1bc8] sm:$0xff]  ;;  %v985_v50 = vld [vmem:[#allocation5 + $0x1bf0] sm:$0xff] }
 0x177   :  { %7988 = vmatprep.subr.bf16.mxu0 %v18316_v0  ;;  %v841_v0 = vld [vmem:[#allocation5 + $0x1770] sm:$0xff] }
 0x178   :  { %7344 = vmatpush1.bf16.msra.mxu1 %v18305_v3  ;;  %v18497_v3 = vcombine.low %v812_v54, %v824_v55 }
 0x179   :  { %7345 = vmatprep.subr.bf16.mxu1 %v18330_v5  ;;  %v18522_v5 = vcombine.high %v836_v62, %v848_v63 }
 0x17a   :  { %7989 = vmatpush1.bf16.msra.mxu0 %v18315_v4  ;;  %v18507_v4 = vcombine.low %v817_v56, %v829_v58  ;;  %v1004_v56 = vld [vmem:[#allocation5 + $0x1c88] sm:$0xff]  ;;  %v1009_v58 = vld [vmem:[#allocation5 + $0x1cb0] sm:$0xff] }
 0x17b   :  { %7990 = vmatprep.subr.bf16.mxu0 %v18340_v9  ;;  %v18532_v9 = vcombine.high %v841_v0, %v853_v2 }
 0x17c   :  { %7346 = vmatpush1.bf16.msra.mxu1 %v18329_v11  ;;  %v18521_v11 = vcombine.low %v836_v62, %v848_v63 }
 0x17d   :  { %7347 = vmatprep.subr.bf16.mxu1 %v18354_v13  ;;  %v18546_v13 = vcombine.high %v860_v6, %v872_v7 }
 0x17e   :  { %7991 = vmatpush1.bf16.msra.mxu0 %v18339_v12  ;;  %v18531_v12 = vcombine.low %v841_v0, %v853_v2  ;;  %v1028_v0 = vld [vmem:[#allocation5 + $0x1d48] sm:$0xff]  ;;  %v1033_v2 = vld [vmem:[#allocation5 + $0x1d70] sm:$0xff] }
 0x17f   :  { %7992 = vmatprep.subr.bf16.mxu0 %v18364_v17  ;;  %v18556_v17 = vcombine.high %v865_v8, %v877_v10 }
 0x180   :  { %7348 = vmatpush1.bf16.msra.mxu1 %v18353_v19  ;;  %v18545_v19 = vcombine.low %v860_v6, %v872_v7 }
 0x181   :  { %7349 = vmatprep.subr.bf16.mxu1 %v18378_v21  ;;  %v18570_v21 = vcombine.high %v884_v14, %v896_v15 }
 0x182   :  { %7993 = vmatpush1.bf16.msra.mxu0 %v18363_v20  ;;  %v18555_v20 = vcombine.low %v865_v8, %v877_v10  ;;  %v1052_v8 = vld [vmem:[#allocation5 + $0x1e08] sm:$0xff]  ;;  %v1057_v10 = vld [vmem:[#allocation5 + $0x1e30] sm:$0xff] }
 0x183   :  { %7994 = vmatprep.subr.bf16.mxu0 %v18388_v25  ;;  %v18580_v25 = vcombine.high %v889_v16, %v901_v18 }
 0x184   :  { %7350 = vmatpush1.bf16.msra.mxu1 %v18377_v27  ;;  %v22203_v27 = vld [vmem:[#allocation2 + $0x8] ss:$24 sps:$4 sm:$0xff]  }
 0x185   :  { %7351 = vmatprep.subr.bf16.mxu1 %v18402_v29  ;;  %v18579_v29 = vcombine.low %v889_v16, %v901_v18  ;;  %v1076_v16 = vld [vmem:[#allocation5 + $0x1ec8] sm:$0xff]  ;;  %v1081_v18 = vld [vmem:[#allocation5 + $0x1ef0] sm:$0xff] }
 0x186   :  { %7995 = vmatpush1.bf16.msra.mxu0 %v18387_v28  ;;  %v18569_v28 = vcombine.low %v884_v14, %v896_v15 }
 0x187   :  { %7996 = vmatprep.subr.bf16.mxu0 %v18412_v33  ;;  %v937_v33 = vld [vmem:[#allocation5 + $0x1a70] sm:$0xff] }
 0x188   :  { %7352 = vmatpush1.bf16.msra.mxu1 %v18401_v35  ;;  %v949_v35 = vld [vmem:[#allocation5 + $0x1ad0] sm:$0xff] }
 0x189   :  { %7353 = vmatprep.subr.bf16.mxu1 %v18426_v37  ;;  %v18593_v37 = vcombine.low %v908_v22, %v920_v23  ;;  %v18627_v46 = vcombine.low %v937_v33, %v949_v35 }
 0x18a   :  { %7997 = vmatpush1.bf16.msra.mxu0 %v18411_v36  ;;  %v22204_v36 = vld [vmem:[#allocation2 + $0x14] ss:$24 sps:$4 sm:$0xff]  }
 0x18b   :  { %7998 = vmatprep.subr.bf16.mxu0 %v18436_v41  ;;  %v968_v41 = vld [vmem:[#allocation5 + $0x1b68] sm:$0xff] }
 0x18c   :  { %7354 = vmatpush1.bf16.msra.mxu1 %v18425_v43  ;;  %v18628_v43 = vcombine.high %v937_v33, %v949_v35  ;;  %v18642_v47 = vcombine.high %v956_v40, %v968_v41  ;;  %v1136_v33 = vld [vmem:[#allocation5 + $0x20a8] sm:$0xff] }
 0x18d   :  { %7355 = vmatprep.subr.bf16.mxu1 %v18450_v45  ;;  %v18617_v45 = vcombine.low %v932_v31, %v944_v32  ;;  %v1124_v32 = vld [vmem:[#allocation5 + $0x2048] sm:$0xff] }
 0x18e   :  { %7999 = vmatpush1.bf16.msra.mxu0 %v18435_v44  ;;  %v973_v44 = vld [vmem:[#allocation5 + $0x1b90] sm:$0xff] }
 0x18f   :  { %8000 = vmatprep.subr.bf16.mxu0 %v18460_v49  ;;  %v992_v49 = vld [vmem:[#allocation5 + $0x1c28] sm:$0xff]  ;;  %v18651_v54 = vcombine.low %v961_v42, %v973_v44 }
 0x190   :  { %7356 = vmatpush1.bf16.msra.mxu1 %v18449_v51  ;;  %v18652_v51 = vcombine.high %v961_v42, %v973_v44  ;;  %v18666_v55 = vcombine.high %v980_v48, %v992_v49  ;;  %v1153_v42 = vld [vmem:[#allocation5 + $0x2130] sm:$0xff] }
 0x191   :  { %7357 = vmatprep.subr.bf16.mxu1 %v18474_v53  ;;  %v18641_v53 = vcombine.low %v956_v40, %v968_v41  ;;  %v1148_v40 = vld [vmem:[#allocation5 + $0x2108] sm:$0xff]  ;;  %v1165_v44 = vld [vmem:[#allocation5 + $0x2190] sm:$0xff] }
 0x192   :  { %8001 = vmatpush1.bf16.msra.mxu0 %v18459_v52  ;;  %v997_v52 = vld [vmem:[#allocation5 + $0x1c50] sm:$0xff]  ;;  %v1160_v41 = vld [vmem:[#allocation5 + $0x2168] sm:$0xff] }
 0x193   :  { %8002 = vmatprep.subr.bf16.mxu0 %v18484_v57  ;;  %v1016_v57 = vld [vmem:[#allocation5 + $0x1ce8] sm:$0xff]  ;;  %v18675_v62 = vcombine.low %v985_v50, %v997_v52 }
 0x194   :  { %7358 = vmatpush1.bf16.msra.mxu1 %v18473_v59  ;;  %v18676_v59 = vcombine.high %v985_v50, %v997_v52  ;;  %v18690_v63 = vcombine.high %v1004_v56, %v1016_v57  ;;  %v1177_v50 = vld [vmem:[#allocation5 + $0x21f0] sm:$0xff] }
 0x195   :  { %7359 = vmatprep.subr.bf16.mxu1 %v18498_v61  ;;  %v18665_v61 = vcombine.low %v980_v48, %v992_v49  ;;  %v1172_v48 = vld [vmem:[#allocation5 + $0x21c8] sm:$0xff]  ;;  %v1189_v52 = vld [vmem:[#allocation5 + $0x2250] sm:$0xff] }
 0x196   :  { %8003 = vmatpush1.bf16.msra.mxu0 %v18483_v60  ;;  %v1021_v60 = vld [vmem:[#allocation5 + $0x1d10] sm:$0xff]  ;;  %v1184_v49 = vld [vmem:[#allocation5 + $0x2228] sm:$0xff] }
 0x197   :  { %8004 = vmatprep.subr.bf16.mxu0 %v18508_v1  ;;  %v1040_v1 = vld [vmem:[#allocation5 + $0x1da8] sm:$0xff]  ;;  %v18699_v6 = vcombine.low %v1009_v58, %v1021_v60 }
 0x198   :  { %7360 = vmatpush1.bf16.msra.mxu1 %v18497_v3  ;;  %v18700_v3 = vcombine.high %v1009_v58, %v1021_v60  ;;  %v18714_v7 = vcombine.high %v1028_v0, %v1040_v1  ;;  %v18868_v58 = vcombine.high %v1177_v50, %v1189_v52  ;;  %v1213_v60 = vld [vmem:[#allocation5 + $0x2310] sm:$0xff] }
 0x199   :  { %7361 = vmatprep.subr.bf16.mxu1 %v18522_v5  ;;  %v18689_v5 = vcombine.low %v1004_v56, %v1016_v57  ;;  %v1196_v56 = vld [vmem:[#allocation5 + $0x2288] sm:$0xff] }
 0x19a   :  { %8005 = vmatpush1.bf16.msra.mxu0 %v18507_v4  ;;  %v1045_v4 = vld [vmem:[#allocation5 + $0x1dd0] sm:$0xff]  ;;  %v1208_v57 = vld [vmem:[#allocation5 + $0x22e8] sm:$0xff] }
 0x19b   :  { %8006 = vmatprep.subr.bf16.mxu0 %v18532_v9  ;;  %v1064_v9 = vld [vmem:[#allocation5 + $0x1e68] sm:$0xff]  ;;  %v18723_v14 = vcombine.low %v1033_v2, %v1045_v4 }
 0x19c   :  { %7362 = vmatpush1.bf16.msra.mxu1 %v18521_v11  ;;  %v18724_v11 = vcombine.high %v1033_v2, %v1045_v4  ;;  %v18738_v15 = vcombine.high %v1052_v8, %v1064_v9  ;;  %v1225_v2 = vld [vmem:[#allocation5 + $0x2370] sm:$0xff] }
 0x19d   :  { %7374 = vmatprep.subr.bf16.mxu1 %v18546_v13  ;;  %v18713_v13 = vcombine.low %v1028_v0, %v1040_v1  ;;  %v1220_v0 = vld [vmem:[#allocation5 + $0x2348] sm:$0xff]  ;;  %v1237_v4 = vld [vmem:[#allocation5 + $0x23d0] sm:$0xff] }
 0x19e   :  { %8007 = vmatpush1.bf16.msra.mxu0 %v18531_v12  ;;  %v1069_v12 = vld [vmem:[#allocation5 + $0x1e90] sm:$0xff]  ;;  %v1232_v1 = vld [vmem:[#allocation5 + $0x23a8] sm:$0xff] }
 0x19f   :  { %8019 = vmatprep.subr.bf16.mxu0 %v18556_v17  ;;  %7364 = vmatmul.mubr.bf16.vlgmr.msra.gmra.mrb[4].mxu1 %v22203_v27  ;;  %v1088_v17 = vld [vmem:[#allocation5 + $0x1f28] sm:$0xff]  ;;  %v18747_v22 = vcombine.low %v1057_v10, %v1069_v12 }
 0x1a0   :  { %7375 = vmatpush1.bf16.msra.mxu1 %v18545_v19  ;;  %7406 = vmatprep.mubr.bf16.mxu1 %v22204_v36  ;;  %v18748_v19 = vcombine.high %v1057_v10, %v1069_v12  ;;  %v18762_v23 = vcombine.high %v1076_v16, %v1088_v17  ;;  %v99_v10 = vld [vmem:[#allocation5 + $0x40] sm:$0xff] }
 0x1a1   :  { %8009 = vmatmul.mubr.bf16.vlgmr.msra.gmra.mrb[4].mxu0 %v22203_v27  ;;  %7376 = vmatprep.subr.bf16.mxu1 %v18570_v21  ;;  %v18737_v21 = vcombine.low %v1052_v8, %v1064_v9  ;;  %v93_v8 = vld [vmem:[#allocation5 + $0x10] sm:$0xff]  ;;  %v111_v12 = vld [vmem:[#allocation5 + $0xa0] sm:$0xff] }
 0x1a2   :  { %8020 = vmatpush1.bf16.msra.mxu0 %v18555_v20  ;;  %8051 = vmatprep.mubr.bf16.mxu0 %v22204_v36  ;;  %v1093_v20 = vld [vmem:[#allocation5 + $0x1f50] sm:$0xff] }
 0x1a3   :  { %8021 = vmatprep.subr.bf16.mxu0 %v18580_v25  ;;  %v1112_v25 = vld [vmem:[#allocation5 + $0x1fe8] sm:$0xff]  ;;  %v18772_v27 = vcombine.high %v1081_v18, %v1093_v20  ;;  %v1141_v36 = vld [vmem:[#allocation5 + $0x20d0] sm:$0xff] }
 0x1a4   :  { %7377 = vmatpush1.bf16.msra.mxu1 %v18569_v28  ;;  %v1117_v28 = vld [vmem:[#allocation5 + $0x2010] sm:$0xff]  ;;  %v18786_v31 = vcombine.high %v1100_v24, %v1112_v25 }
 0x1a5   :  { %7378 = vmatprep.subr.bf16.mxu1 %v18594_v30  ;;  %v18771_v30 = vcombine.low %v1081_v18, %v1093_v20  ;;  %v18796_v35 = vcombine.high %v1105_v26, %v1117_v28  ;;  %v105_v9 = vld [vmem:[#allocation5 + $0x70] sm:$0xff]  ;;  %v123_v18 = vld [vmem:[#allocation5 + $0x100] sm:$0xff] }
 0x1a6   :  { %8022 = vmatpush1.bf16.msra.mxu0 %v18579_v29  ;;  %v18761_v29 = vcombine.low %v1076_v16, %v1088_v17  ;;  %v117_v16 = vld [vmem:[#allocation5 + $0xd0] sm:$0xff]  ;;  %v135_v20 = vld [vmem:[#allocation5 + $0x160] sm:$0xff] }
 0x1a7   :  { %8023 = vmatprep.subr.bf16.mxu0 %v18604_v34  ;;  %v1129_v34 = vld [vmem:[#allocation5 + $0x2070] sm:$0xff] }
 0x1a8   :  { %7379 = vmatpush1.bf16.msra.mxu1 %v18593_v37  ;;  %v18785_v37 = vcombine.low %v1100_v24, %v1112_v25  ;;  %v129_v17 = vld [vmem:[#allocation5 + $0x130] sm:$0xff] }
 0x1a9   :  { %7380 = vmatprep.subr.bf16.mxu1 %v18618_v39  ;;  %v18810_v39 = vcombine.high %v1124_v32, %v1136_v33  ;;  %v141_v24 = vld [vmem:[#allocation5 + $0x190] sm:$0xff] }
 0x1aa   :  { %8024 = vmatpush1.bf16.msra.mxu0 %v18603_v38  ;;  %v18795_v38 = vcombine.low %v1105_v26, %v1117_v28  ;;  %v153_v25 = vld [vmem:[#allocation5 + $0x1f0] sm:$0xff]  ;;  %v147_v26 = vld [vmem:[#allocation5 + $0x1c0] sm:$0xff] }
 0x1ab   :  { %8025 = vmatprep.subr.bf16.mxu0 %v18628_v43  ;;  %v18820_v43 = vcombine.high %v1129_v34, %v1141_v36  ;;  %v159_v28 = vld [vmem:[#allocation5 + $0x220] sm:$0xff] }
 0x1ac   :  { %7381 = vmatpush1.bf16.msra.mxu1 %v18617_v45  ;;  %v18809_v45 = vcombine.low %v1124_v32, %v1136_v33  ;;  %v17828_v32 = vcombine.high %v141_v24, %v153_v25  ;;  %v165_v33 = vld [vmem:[#allocation5 + $0x250] sm:$0xff] }
 0x1ad   :  { %7382 = vmatprep.subr.bf16.mxu1 %v18642_v47  ;;  %v18834_v47 = vcombine.high %v1148_v40, %v1160_v41 }
 0x1ae   :  { %8026 = vmatpush1.bf16.msra.mxu0 %v18627_v46  ;;  %v18819_v46 = vcombine.low %v1129_v34, %v1141_v36  ;;  %v177_v34 = vld [vmem:[#allocation5 + $0x2b0] sm:$0xff]  ;;  %v17840_v36 = vcombine.high %v147_v26, %v159_v28 }
 0x1af   :  { %8027 = vmatprep.subr.bf16.mxu0 %v18652_v51  ;;  %v18844_v51 = vcombine.high %v1153_v42, %v1165_v44 }
 0x1b0   :  { %7383 = vmatpush1.bf16.msra.mxu1 %v18641_v53  ;;  %v18833_v53 = vcombine.low %v1148_v40, %v1160_v41  ;;  %v17827_v40 = vcombine.low %v141_v24, %v153_v25  ;;  %v17839_v41 = vcombine.low %v147_v26, %v159_v28  ;;  %v22534_v26 = vld [vmem:[#allocation5 + $0x6d0] sm:$0xff] }
 0x1b1   :  { %7384 = vmatprep.subr.bf16.mxu1 %v18666_v55  ;;  %v18858_v55 = vcombine.high %v1172_v48, %v1184_v49 }
 0x1b2   :  { %8028 = vmatpush1.bf16.msra.mxu0 %v18651_v54  ;;  %v18843_v54 = vcombine.low %v1153_v42, %v1165_v44  ;;  %v17852_v42 = vcombine.high %v165_v33, %v177_v34  ;;  %v201_v44 = vld [vmem:[#allocation5 + $0x370] sm:$0xff] }
 0x1b3   :  { %8029 = vmatprep.subr.bf16.mxu0 %v18676_v59  ;;  %v1201_v59 = vld [vmem:[#allocation5 + $0x22b0] sm:$0xff] }
 0x1b4   :  { %7385 = vmatpush1.bf16.msra.mxu1 %v18665_v61  ;;  %v18857_v61 = vcombine.low %v1172_v48, %v1184_v49  ;;  %v17851_v49 = vcombine.low %v165_v33, %v177_v34 }
 0x1b5   :  { %7386 = vmatprep.subr.bf16.mxu1 %v18690_v63  ;;  %v18882_v63 = vcombine.high %v1196_v56, %v1208_v57 }
 0x1b6   :  { %8030 = vmatpush1.bf16.msra.mxu0 %v18675_v62  ;;  %v18867_v62 = vcombine.low %v1177_v50, %v1189_v52  ;;  %v213_v52 = vld [vmem:[#allocation5 + $0x3d0] sm:$0xff] }
 0x1b7   :  { %8031 = vmatprep.subr.bf16.mxu0 %v18700_v3  ;;  %v18892_v3 = vcombine.high %v1201_v59, %v1213_v60 }
 0x1b8   :  { %7387 = vmatpush1.bf16.msra.mxu1 %v18689_v5  ;;  %v18881_v5 = vcombine.low %v1196_v56, %v1208_v57  ;;  %v1243_v56 = vld [vmem:[#allocation7] sm:$0xff] }
 0x1b9   :  { %7388 = vmatprep.subr.bf16.mxu1 %v18714_v7  ;;  %v18906_v7 = vcombine.high %v1220_v0, %v1232_v1  ;;  %v231_v57 = vld [vmem:[#allocation5 + $0x460] sm:$0xff] }
 0x1ba   :  { %8032 = vmatpush1.bf16.msra.mxu0 %v18699_v6  ;;  %v18891_v6 = vcombine.low %v1201_v59, %v1213_v60 }
 0x1bb   :  { %8033 = vmatprep.subr.bf16.mxu0 %v18724_v11  ;;  %v18916_v11 = vcombine.high %v1225_v2, %v1237_v4 }
 0x1bc   :  { %7389 = vmatpush1.bf16.msra.mxu1 %v18713_v13  ;;  %v18905_v13 = vcombine.low %v1220_v0, %v1232_v1  ;;  %v22498_v1 = vld [vmem:[#allocation5 + $0x4c0] sm:$0xff] }
 0x1bd   :  { %7390 = vmatprep.subr.bf16.mxu1 %v18738_v15  ;;  %v17780_v15 = vcombine.high %v93_v8, %v105_v9 }
 0x1be   :  { %8034 = vmatpush1.bf16.msra.mxu0 %v18723_v14  ;;  %v18915_v14 = vcombine.low %v1225_v2, %v1237_v4  ;;  %v22500_v2 = vld [vmem:[#allocation5 + $0x520] sm:$0xff]  ;;  %v22504_v4 = vld [vmem:[#allocation5 + $0x5b0] sm:$0xff] }
 0x1bf   :  { %8035 = vmatprep.subr.bf16.mxu0 %v18748_v19  ;;  %v17792_v19 = vcombine.high %v99_v10, %v111_v12 }
 0x1c0   :  { %7391 = vmatpush1.bf16.msra.mxu1 %v18737_v21  ;;  %v17779_v21 = vcombine.low %v93_v8, %v105_v9  ;;  %v22508_v8 = vld [vmem:[#allocation5 + $0x5e0] sm:$0xff]  ;;  %v22510_v9 = vld [vmem:[#allocation5 + $0x610] sm:$0xff] }
 0x1c1   :  { %7392 = vmatprep.subr.bf16.mxu1 %v18762_v23  ;;  %v17804_v23 = vcombine.high %v117_v16, %v129_v17 }
 0x1c2   :  { %8036 = vmatpush1.bf16.msra.mxu0 %v18747_v22  ;;  %v17791_v22 = vcombine.low %v99_v10, %v111_v12  ;;  %v22512_v10 = vld [vmem:[#allocation5 + $0x670] sm:$0xff] }
 0x1c3   :  { %8037 = vmatprep.subr.bf16.mxu0 %v18772_v27  ;;  %v17816_v27 = vcombine.high %v123_v18, %v135_v20 }
 0x1c4   :  { %7393 = vmatpush1.bf16.msra.mxu1 %v18761_v29  ;;  %v22205_v29 = vld [vmem:[#allocation2 + $0x10] ss:$24 sps:$4 sm:$0xff]  }
 0x1c5   :  { %7394 = vmatprep.subr.bf16.mxu1 %v18786_v31  ;;  %v17815_v31 = vcombine.low %v123_v18, %v135_v20  ;;  %v22521_v18 = vld [vmem:[#allocation5 + $0x640] sm:$0xff] }
 0x1c6   :  { %8038 = vmatpush1.bf16.msra.mxu0 %v18771_v30  ;;  %v17803_v30 = vcombine.low %v117_v16, %v129_v17 }
 0x1c7   :  { %8039 = vmatprep.subr.bf16.mxu0 %v18796_v35  ;;  %v171_v35 = vld [vmem:[#allocation5 + $0x280] sm:$0xff] }
 0x1c8   :  { %7395 = vmatpush1.bf16.msra.mxu1 %v18785_v37  ;;  %v183_v37 = vld [vmem:[#allocation5 + $0x2e0] sm:$0xff] }
 0x1c9   :  { %7396 = vmatprep.subr.bf16.mxu1 %v18810_v39  ;;  %v1249_v39 = vlaneseq  ;;  %v17863_v50 = vcombine.low %v171_v35, %v183_v37 }
 0x1ca   :  { %8040 = vmatpush1.bf16.msra.mxu0 %v18795_v38  ;;  %v22206_v38 = vld [vmem:[#allocation2 + $0x4] ss:$24 sps:$4 sm:$0xff]  }
 0x1cb   :  { %8041 = vmatprep.subr.bf16.mxu0 %v18820_v43  ;;  %v189_v43 = vld [vmem:[#allocation5 + $0x310] sm:$0xff]  ;;  %v22486_v48 = vshrl.u32 %v1249_v39, 7 }
 0x1cc   :  { %7397 = vmatpush1.bf16.msra.mxu1 %v18809_v45  ;;  %v195_v45 = vld [vmem:[#allocation5 + $0x340] sm:$0xff]  ;;  %v17875_v59 = vcombine.low %v189_v43, %v201_v44 }
 0x1cd   :  { %7398 = vmatprep.subr.bf16.mxu1 %v18834_v47  ;;  %v207_v47 = vld [vmem:[#allocation5 + $0x3a0] sm:$0xff]  ;;  %v22492_v60 = vsub.s32 1, %v22486_v48 }
 0x1ce   :  { %8042 = vmatpush1.bf16.msra.mxu0 %v18819_v46  ;;  %v17864_v46 = vcombine.high %v171_v35, %v183_v37 }
 0x1cf   :  { %8043 = vmatprep.subr.bf16.mxu0 %v18844_v51  ;;  %v17876_v51 = vcombine.high %v189_v43, %v201_v44  ;;  %v1256_v12 = vrot.slane %v1243_v56, %v22492_v60  ;;  %v22558_v43 = vld [vmem:[#allocation5 + $0x700] sm:$0xff] }
 0x1d0   :  { %7399 = vmatpush1.bf16.msra.mxu1 %v18833_v53  ;;  %v225_v53 = vld [vmem:[#allocation5 + $0x430] sm:$0xff] }
 0x1d1   :  { %7400 = vmatprep.subr.bf16.mxu1 %v18858_v55  ;;  %v17888_v55 = vcombine.high %v195_v45, %v207_v47  ;;  %v17900_v0 = vcombine.high %v213_v52, %v225_v53 }
 0x1d2   :  { %8044 = vmatpush1.bf16.msra.mxu0 %v18843_v54  ;;  %v219_v54 = vld [vmem:[#allocation5 + $0x400] sm:$0xff] }
 0x1d3   :  { %8045 = vmatprep.subr.bf16.mxu0 %v18868_v58  ;;  %v22489_v58 = vsub.s32 0, %v22486_v48 }
 0x1d4   :  { %7401 = vmatpush1.bf16.msra.mxu1 %v18857_v61  ;;  %v22494_v61 = vld [vmem:[#allocation5 + $0x490] sm:$0xff] }
 0x1d5   :  { %7402 = vmatprep.subr.bf16.mxu1 %v18882_v63  ;;  %v17887_v63 = vcombine.low %v195_v45, %v207_v47 }
 0x1d6   :  { %8046 = vmatpush1.bf16.msra.mxu0 %v18867_v62  ;;  %v22496_v62 = vld [vmem:[#allocation5 + $0x4f0] sm:$0xff] }
 0x1d7   :  { %8047 = vmatprep.subr.bf16.mxu0 %v18892_v3  ;;  %v22502_v3 = vld [vmem:[#allocation5 + $0x550] sm:$0xff]  ;;  %v17923_v16 = vcombine.low %v22494_v61, %v22496_v62  ;;  %v17924_v17 = vcombine.high %v22494_v61, %v22496_v62 }
 0x1d8   :  { %7403 = vmatpush1.bf16.msra.mxu1 %v18881_v5  ;;  %v1244_v5 = vld [vmem:[#allocation7 + $0x8] sm:$0xff]  ;;  %v17947_v24 = vcombine.low %v22502_v3, %v22504_v4  ;;  %v17948_v25 = vcombine.high %v22502_v3, %v22504_v4 }
 0x1d9   :  { %7404 = vmatprep.subr.bf16.mxu1 %v18906_v7  ;;  %v22506_v7 = vld [vmem:[#allocation5 + $0x580] sm:$0xff]  ;;  %v1288_v20 = vrot.slane %v1244_v5, %v22492_v60 }
 0x1da   :  { %8048 = vmatpush1.bf16.msra.mxu0 %v18891_v6  ;;  %v17912_v6 = vcombine.high %v219_v54, %v231_v57 }
 0x1db   :  { %8049 = vmatprep.subr.bf16.mxu0 %v18916_v11  ;;  %v1252_v11 = vrot.slane %v1243_v56, %v22489_v58 }
 0x1dc   :  { %7405 = vmatpush1.bf16.msra.mxu1 %v18905_v13  ;;  %v17899_v13 = vcombine.low %v213_v52, %v225_v53 }
 0x1dd   :  { %7417 = vmatprep.subr.bf16.mxu1 %v17780_v15  ;;  %v1284_v15 = vrot.slane %v1244_v5, %v22489_v58 }
 0x1de   :  { %8050 = vmatpush1.bf16.msra.mxu0 %v18915_v14  ;;  %v17911_v14 = vcombine.low %v219_v54, %v231_v57 }
 0x1df   :  { %8191 = vmatprep.subr.bf16.mxu0 %v17792_v19  ;;  %7407 = vmatmul.mubr.bf16.vlgmr.msra.gmra.mrb[4].mxu1 %v22205_v29  ;;  %v22523_v19 = vld [vmem:[#allocation5 + $0x6a0] sm:$0xff] }
 0x1e0   :  { %7418 = vmatpush1.bf16.msra.mxu1 %v17779_v21  ;;  %7449 = vmatprep.mubr.bf16.mxu1 %v22206_v38  ;;  %v17983_v37 = vcombine.low %v22521_v18, %v22523_v19 }
 0x1e1   :  { %8052 = vmatmul.mubr.bf16.vlgmr.msra.gmra.mrb[4].mxu0 %v22205_v29  ;;  %7419 = vmatprep.subr.bf16.mxu1 %v17804_v23  ;;  %v17936_v23 = vcombine.high %v22498_v1, %v22500_v2 }
 0x1e2   :  { %8192 = vmatpush1.bf16.msra.mxu0 %v17791_v22  ;;  %8223 = vmatprep.mubr.bf16.mxu0 %v22206_v38  ;;  %v17935_v22 = vcombine.low %v22498_v1, %v22500_v2 }
 0x1e3   :  { %8193 = vmatprep.subr.bf16.mxu0 %v17816_v27  ;;  %v22536_v27 = vld [vmem:[#allocation5 + $0x730] sm:$0xff] }
 0x1e4   :  { %7420 = vmatpush1.bf16.msra.mxu1 %v17803_v30  ;;  %v17959_v30 = vcombine.low %v22506_v7, %v22508_v8 }
 0x1e5   :  { %7421 = vmatprep.subr.bf16.mxu1 %v17828_v32  ;;  %v17972_v32 = vcombine.high %v22510_v9, %v22512_v10 }
 0x1e6   :  { %8194 = vmatpush1.bf16.msra.mxu0 %v17815_v31  ;;  %v17960_v31 = vcombine.high %v22506_v7, %v22508_v8 }
 0x1e7   :  { %8195 = vmatprep.subr.bf16.mxu0 %v17840_v36  ;;  %v17971_v36 = vcombine.low %v22510_v9, %v22512_v10 }
 0x1e8   :  { %7422 = vmatpush1.bf16.msra.mxu1 %v17827_v40 }
 0x1e9   :  { %7423 = vmatprep.subr.bf16.mxu1 %v17852_v42 }
 0x1ea   :  { %8196 = vmatpush1.bf16.msra.mxu0 %v17839_v41 }
 0x1eb   :  { %8197 = vmatprep.subr.bf16.mxu0 %v17864_v46 }
 0x1ec   :  { %7424 = vmatpush1.bf16.msra.mxu1 %v17851_v49  ;;  %v17984_v49 = vcombine.high %v22521_v18, %v22523_v19  ;;  %v22616_v19 = vld [vmem:[#allocation5 + $0x910] sm:$0xff] }
 0x1ed   :  { %7425 = vmatprep.subr.bf16.mxu1 %v17876_v51 }
 0x1ee   :  { %8198 = vmatpush1.bf16.msra.mxu0 %v17863_v50  ;;  %v22568_v50 = vld [vmem:[#allocation5 + $0x760] sm:$0xff] }
 0x1ef   :  { %8199 = vmatprep.subr.bf16.mxu0 %v17888_v55  ;;  %v17996_v55 = vcombine.high %v22534_v26, %v22536_v27  ;;  %v18008_v5 = vcombine.high %v22558_v43, %v22568_v50 }
 0x1f0   :  { %7426 = vmatpush1.bf16.msra.mxu1 %v17875_v59 }
 0x1f1   :  { %7427 = vmatprep.subr.bf16.mxu1 %v17900_v0 }
 0x1f2   :  { %8200 = vmatpush1.bf16.msra.mxu0 %v17887_v63  ;;  %v7279_v21 = vpop.f32.mrb[0].mxu1 }
 0x1f3   :  { %8201 = vmatprep.subr.bf16.mxu0 %v17912_v6  ;;  %v22538_v28 = vadd.f32 %v7279_v21, %v1252_v11  ;;  %v7281_v29 = vpop.f32.mrb[1].mxu1  ;;  %v333_v21 = vld [vmem:[#allocation5 + $0x790] sm:$0xff] }
 0x1f4   :  { %v7795_v33 = vpop.f32.mrb[0].mxu0  ;;  %v22546_v34 = vadd.f32 %v7281_v29, %v1256_v12  ;;  %v7283_v35 = vpop.f32.mrb[2].mxu1  ;;  %7428 = vmatpush1.bf16.msra.mxu1 %v17899_v13 }
 0x1f5   :  { %v22552_v38 = vadd.f32 %v7795_v33, %v1284_v15  ;;  %v7797_v39 = vpop.f32.mrb[1].mxu0  ;;  %v8755_v40 = vmul.f32 %v22538_v28, %v22538_v28  ;;  %v22556_v41 = vadd.f32 %v7283_v35, %v1252_v11  ;;  %v7285_v42 = vpop.f32.mrb[3].mxu1  ;;  %7429 = vmatprep.subr.bf16.mxu1 %v17924_v17  ;;  %v351_v33 = vld [vmem:[#allocation5 + $0x820] sm:$0xff] }
 0x1f6   :  { %8202 = vmatpush1.bf16.msra.mxu0 %v17911_v14  ;;  %v22560_v44 = vadd.f32 %v7797_v39, %v1288_v20  ;;  %v7799_v45 = vpop.f32.mrb[2].mxu0  ;;  %v8756_v46 = vmul.f32 %v22546_v34, %v22546_v34  ;;  %v22564_v47 = vadd.f32 %v7285_v42, %v1256_v12 }
 0x1f7   :  { %8203 = vmatprep.subr.bf16.mxu0 %v17936_v23  ;;  %v8763_v51 = vmul.f32 %v22552_v38, %v22552_v38  ;;  %v7801_v52 = vpop.f32.mrb[3].mxu0  ;;  %v8803_v53 = vmul.f32 %v22538_v28, %v8755_v40  ;;  %v8779_v54 = vmul.f32 %v22556_v41, %v22556_v41  ;;  %v22583_v62 = vadd.f32 %v7799_v45, %v1284_v15  ;;  %v339_v23 = vld [vmem:[#allocation5 + $0x7c0] sm:$0xff] }
 0x1f8   :  { %v8764_v56 = vmul.f32 %v22560_v44, %v22560_v44  ;;  %v8804_v57 = vmul.f32 %v22546_v34, %v8756_v46  ;;  %v8780_v59 = vmul.f32 %v22564_v47, %v22564_v47  ;;  %7430 = vmatpush1.bf16.msra.mxu1 %v17923_v16  ;;  %v22587_v2 = vadd.f32 %v7801_v52, %v1288_v20  ;;  %v357_v52 = vld [vmem:[#allocation5 + $0x850] sm:$0xff] }
 0x1f9   :  { %v8811_v61 = vmul.f32 %v22552_v38, %v8763_v51  ;;  %v8851_v63 = vmul.f32 0.044715, %v8803_v53  ;;  %v8827_v0 = vmul.f32 %v22556_v41, %v8779_v54  ;;  %7431 = vmatprep.subr.bf16.mxu1 %v17948_v25  ;;  %v8787_v12 = vmul.f32 %v22583_v62, %v22583_v62  ;;  %v369_v53 = vld [vmem:[#allocation5 + $0x8b0] sm:$0xff]  ;;  %v363_v54 = vld [vmem:[#allocation5 + $0x880] sm:$0xff] }
 0x1fa   :  { %8204 = vmatpush1.bf16.msra.mxu0 %v17935_v22  ;;  %v8812_v1 = vmul.f32 %v22560_v44, %v8764_v56  ;;  %v8852_v3 = vmul.f32 0.044715, %v8804_v57  ;;  %v8828_v4 = vmul.f32 %v22564_v47, %v8780_v59  ;;  %v8788_v16 = vmul.f32 %v22587_v2, %v22587_v2  ;;  %v345_v22 = vld [vmem:[#allocation5 + $0x7f0] sm:$0xff]  ;;  %v387_v56 = vld [vmem:[#allocation5 + $0x940] sm:$0xff] }
 0x1fb   :  { %8205 = vmatprep.subr.bf16.mxu0 %v17960_v31  ;;  %v8859_v6 = vmul.f32 0.044715, %v8811_v61  ;;  %v8899_v7 = vadd.f32 %v22538_v28, %v8851_v63  ;;  %v8875_v8 = vmul.f32 0.044715, %v8827_v0  ;;  %v8835_v29 = vmul.f32 %v22583_v62, %v8787_v12  ;;  %v399_v57 = vld [vmem:[#allocation5 + $0x9a0] sm:$0xff]  ;;  %v22618_v61 = vld [vmem:[#allocation5 + $0x9d0] sm:$0xff] }
 0x1fc   :  { %v8860_v11 = vmul.f32 0.044715, %v8812_v1  ;;  %v8900_v13 = vadd.f32 %v22546_v34, %v8852_v3  ;;  %v8876_v14 = vmul.f32 0.044715, %v8828_v4  ;;  %7432 = vmatpush1.bf16.msra.mxu1 %v17947_v24  ;;  %v8836_v39 = vmul.f32 %v22587_v2, %v8788_v16  ;;  %v22620_v63 = vld [vmem:[#allocation5 + $0xa30] sm:$0xff] }
 0x1fd   :  { %v8907_v15 = vadd.f32 %v22552_v38, %v8859_v6  ;;  %v8947_v17 = vmul.f32 0.7978846, %v8899_v7  ;;  %v8923_v20 = vadd.f32 %v22556_v41, %v8875_v8  ;;  %7433 = vmatprep.subr.bf16.mxu1 %v17972_v32  ;;  %v17995_v45 = vcombine.low %v22534_v26, %v22536_v27  ;;  %v375_v26 = vld [vmem:[#allocation5 + $0x8e0] sm:$0xff] }
 0x1fe   :  { %8206 = vmatpush1.bf16.msra.mxu0 %v17959_v30  ;;  %v8908_v25 = vadd.f32 %v22560_v44, %v8860_v11  ;;  %v8948_v31 = vmul.f32 0.7978846, %v8900_v13  ;;  %v8924_v24 = vadd.f32 %v22564_v47, %v8876_v14  ;;  %v8883_v30 = vmul.f32 0.044715, %v8835_v29  ;;  %v22625_v6 = vld [vmem:[#allocation5 + $0xa60] sm:$0xff] }
 0x1ff   :  { %8207 = vmatprep.subr.bf16.mxu0 %v17984_v49  ;;  %v8955_v35 = vmul.f32 0.7978846, %v8907_v15  ;;  %22104 = vtanh.f32 %v8947_v17  ;;  %v8971_v40 = vmul.f32 0.7978846, %v8923_v20  ;;  %v8884_v46 = vmul.f32 0.044715, %v8836_v39 }
 0x200   :  { %v8956_v42 = vmul.f32 0.7978846, %v8908_v25  ;;  %22106 = vtanh.f32 %v8948_v31  ;;  %v8972_v32 = vmul.f32 0.7978846, %v8924_v24  ;;  %7434 = vmatpush1.bf16.msra.mxu1 %v17971_v36  ;;  %v18007_v49 = vcombine.low %v22558_v43, %v22568_v50  ;;  %v429_v25 = vld [vmem:[#allocation5 + $0xa90] sm:$0xff] }
 0x201   :  { %22108 = vtanh.f32 %v8971_v40  ;;  %7435 = vmatprep.subr.bf16.mxu1 %v17996_v55  ;;  %v18020_v51 = vcombine.high %v333_v21, %v345_v22  ;;  %v8931_v9 = vadd.f32 %v22583_v62, %v8883_v30  ;;  %v18032_v10 = vcombine.high %v339_v23, %v351_v33  ;;  %v393_v55 = vld [vmem:[#allocation5 + $0x970] sm:$0xff]  ;;  %v447_v30 = vld [vmem:[#allocation5 + $0xb20] sm:$0xff] }
 0x202   :  { %8208 = vmatpush1.bf16.msra.mxu0 %v17983_v37  ;;  %22110 = vtanh.f32 %v8972_v32  ;;  %v8932_v27 = vadd.f32 %v22587_v2, %v8884_v46  ;;  %v18019_v18 = vcombine.low %v333_v21, %v345_v22  ;;  %v18031_v43 = vcombine.low %v339_v23, %v351_v33  ;;  %v435_v33 = vld [vmem:[#allocation5 + $0xac0] sm:$0xff] }
 0x203   :  { %8209 = vmatprep.subr.bf16.mxu0 %v18008_v5  ;;  %22112 = vtanh.f32 %v8955_v35  ;;  %v8979_v36 = vmul.f32 0.7978846, %v8931_v9  ;;  %v18044_v50 = vcombine.high %v357_v52, %v369_v53  ;;  %v18056_v59 = vcombine.high %v363_v54, %v375_v26  ;;  %v22623_v5 = vld [vmem:[#allocation5 + $0xa00] sm:$0xff] }
 0x204   :  { %7436 = vmatpush1.bf16.msra.mxu1 %v17995_v45  ;;  %22114 = vtanh.f32 %v8956_v42  ;;  %v8980_v37 = vmul.f32 0.7978846, %v8932_v27  ;;  %v18043_v0 = vcombine.low %v357_v52, %v369_v53  ;;  %v18055_v3 = vcombine.low %v363_v54, %v375_v26  ;;  %v453_v26 = vld [vmem:[#allocation5 + $0xb50] sm:$0xff] }
 0x205   :  { %7437 = vmatprep.subr.bf16.mxu1 %v18020_v51  ;;  %22116 = vtanh.f32 %v8979_v36  ;;  %v18068_v4 = vcombine.high %v22616_v19, %v393_v55  ;;  %v18067_v8 = vcombine.low %v22616_v19, %v393_v55  ;;  %v18079_v11 = vcombine.low %v387_v56, %v399_v57  ;;  %v465_v27 = vld [vmem:[#allocation5 + $0xbb0] sm:$0xff]  ;;  %v459_v36 = vld [vmem:[#allocation5 + $0xb80] sm:$0xff] }
 0x206   :  { %8210 = vmatpush1.bf16.msra.mxu0 %v18007_v49  ;;  %22118 = vtanh.f32 %v8980_v37  ;;  %v18080_v12 = vcombine.high %v387_v56, %v399_v57  ;;  %v8707_v15 = vmul.f32 0.5, %v22538_v28  ;;  %v18091_v16 = vcombine.low %v22618_v61, %v22620_v63  ;;  %v441_v28 = vld [vmem:[#allocation5 + $0xaf0] sm:$0xff] }
 0x207   :  { %8211 = vmatprep.subr.bf16.mxu0 %v18032_v10  ;;  %v18092_v17 = vcombine.high %v22618_v61, %v22620_v63  ;;  %v8731_v22 = vmul.f32 0.5, %v22556_v41  ;;  %v18104_v23 = vcombine.high %v22623_v5, %v22625_v6  ;;  %v8715_v29 = vmul.f32 0.5, %v22552_v38  ;;  %v477_v63 = vld [vmem:[#allocation5 + $0xc10] sm:$0xff] }
 0x208   :  { %7438 = vmatpush1.bf16.msra.mxu1 %v18019_v18  ;;  %v8708_v35 = vmul.f32 0.5, %v22546_v34  ;;  %v8732_v39 = vmul.f32 0.5, %v22564_v47  ;;  %v8716_v41 = vmul.f32 0.5, %v22560_v44  ;;  %v8739_v32 = vmul.f32 0.5, %v22583_v62 }
 0x209   :  { %v22105_v1 = vpop.eup %22104  ;;  %7439 = vmatprep.subr.bf16.mxu1 %v18044_v50  ;;  %v8740_v53 = vmul.f32 0.5, %v22587_v2  ;;  %v18103_v47 = vcombine.low %v22623_v5, %v22625_v6  ;;  %v18116_v62 = vcombine.high %v429_v25, %v441_v28  ;;  %v18128_v37 = vcombine.high %v435_v33, %v447_v30  ;;  %v495_v5 = vld [vmem:[#allocation5 + $0xca0] sm:$0xff] }
 0x20a   :  { %8212 = vmatpush1.bf16.msra.mxu0 %v18031_v43  ;;  %v22107_v7 = vpop.eup %22106  ;;  %v9043_v13 = vadd.f32 1.0, %v22105_v1  ;;  %v471_v43 = vld [vmem:[#allocation5 + $0xbe0] sm:$0xff]  ;;  %v18115_v56 = vcombine.low %v429_v25, %v441_v28  ;;  %v18140_v61 = vcombine.high %v453_v26, %v465_v27  ;;  %v18139_v6 = vcombine.low %v453_v26, %v465_v27 }
 0x20b   :  { %8213 = vmatprep.subr.bf16.mxu0 %v18056_v59  ;;  %v22109_v14 = vpop.eup %22108  ;;  %v9044_v20 = vadd.f32 1.0, %v22107_v7  ;;  %v18127_v59 = vcombine.low %v435_v33, %v447_v30  ;;  %v483_v1 = vld [vmem:[#allocation5 + $0xc40] sm:$0xff]  ;;  %v18151_v7 = vcombine.low %v459_v36, %v471_v43  ;;  %v22208_v30 = vld [vmem:[#allocation2 + $0xc] ss:$24 sps:$4 sm:$0xff]  }
 0x20c   :  { %v22111_v21 = vpop.eup %22110  ;;  %7440 = vmatpush1.bf16.msra.mxu1 %v18043_v0  ;;  %v9067_v31 = vadd.f32 1.0, %v22109_v14  ;;  %v9091_v45 = vmul.f32 %v9043_v13, %v8707_v15  ;;  %v489_v0 = vld [vmem:[#allocation5 + $0xc70] sm:$0xff]  ;;  %v507_v13 = vld [vmem:[#allocation5 + $0xd00] sm:$0xff]  ;;  %v18176_v14 = vcombine.high %v483_v1, %v495_v5 }
 0x20d   :  { %v22113_v24 = vpop.eup %22112  ;;  %7441 = vmatprep.subr.bf16.mxu1 %v18068_v4  ;;  %v9068_v40 = vadd.f32 1.0, %v22111_v21  ;;  %v9092_v51 = vmul.f32 %v9044_v20, %v8708_v35  ;;  %v18152_v4 = vcombine.high %v459_v36, %v471_v43  ;;  %v519_v15 = vld [vmem:[#allocation5 + $0xd60] sm:$0xff]  ;;  %v525_v21 = vld [vmem:[#allocation5 + $0xd90] sm:$0xff] }
 0x20e   :  { %8214 = vmatpush1.bf16.msra.mxu0 %v18055_v3  ;;  %v22115_v42 = vpop.eup %22114  ;;  %v9115_v38 = vmul.f32 %v9067_v31, %v8731_v22  ;;  %v9051_v46 = vadd.f32 1.0, %v22113_v24  ;;  %v537_v22 = vld [vmem:[#allocation5 + $0xdf0] sm:$0xff]  ;;  %v18200_v25 = vcombine.high %v507_v13, %v519_v15  ;;  %v18199_v28 = vcombine.low %v507_v13, %v519_v15  ;;  %v615_v27 = vld [vmem:[#allocation5 + $0x1060] sm:$0xff] }
 0x20f   :  { %8215 = vmatprep.subr.bf16.mxu0 %v18080_v12  ;;  %v22117_v49 = vpop.eup %22116  ;;  %v9116_v52 = vmul.f32 %v9068_v40, %v8732_v39  ;;  %v9052_v54 = vadd.f32 1.0, %v22115_v42  ;;  %v513_v12 = vld [vmem:[#allocation5 + $0xd30] sm:$0xff]  ;;  %v18212_v33 = vcombine.high %v525_v21, %v537_v22  ;;  %v555_v40 = vld [vmem:[#allocation5 + $0xe80] sm:$0xff] }
 0x210   :  { %v22119_v34 = vpop.eup %22118  ;;  %7442 = vmatpush1.bf16.msra.mxu1 %v18067_v8  ;;  %v22644_v44 = vpack.c.bf16 %v9115_v38, %v9091_v45  ;;  %v9075_v9 = vadd.f32 1.0, %v22117_v49  ;;  %v9099_v10 = vmul.f32 %v9051_v46, %v8715_v29  ;;  %v18164_v8 = vcombine.high %v477_v63, %v489_v0  ;;  %v543_v29 = vld [vmem:[#allocation5 + $0xe20] sm:$0xff]  ;;  %v22207_v31 = vld [vmem:[#allocation2] ss:$24 sps:$4 sm:$0xff]  }
 0x211   :  { %7443 = vmatprep.subr.bf16.mxu1 %v18092_v17  ;;  %v22646_v18 = vpack.c.bf16 %v9116_v52, %v9092_v51  ;;  %v9076_v19 = vadd.f32 1.0, %v22119_v34  ;;  %v9100_v2 = vmul.f32 %v9052_v54, %v8716_v41  ;;  %v18175_v17 = vcombine.low %v483_v1, %v495_v5  ;;  %v549_v35 = vld [vmem:[#allocation5 + $0xe50] sm:$0xff]  ;;  %v567_v42 = vld [vmem:[#allocation5 + $0xee0] sm:$0xff] }
 0x212   :  { %8216 = vmatpush1.bf16.msra.mxu0 %v18079_v11  ;;  %v9123_v50 = vmul.f32 %v9075_v9, %v8739_v32  ;;  %v501_v11 = vld [vmem:[#allocation5 + $0xcd0] sm:$0xff]  ;;  %v18211_v32 = vcombine.low %v525_v21, %v537_v22  ;;  %v579_v51 = vld [vmem:[#allocation5 + $0xf40] sm:$0xff]  ;;  %v18248_v52 = vcombine.high %v555_v40, %v567_v42  ;;  %v18247_v34 = vcombine.low %v555_v40, %v567_v42 }
 0x213   :  { %8217 = vmatprep.subr.bf16.mxu0 %v18104_v23  ;;  %v9124_v55 = vmul.f32 %v9076_v19, %v8740_v53  ;;  %v18188_v20 = vcombine.high %v501_v11, %v513_v12  ;;  %v531_v23 = vld [vmem:[#allocation5 + $0xdc0] sm:$0xff]  ;;  %v18187_v24 = vcombine.low %v501_v11, %v513_v12  ;;  %v561_v39 = vld [vmem:[#allocation5 + $0xeb0] sm:$0xff] }
 0x214   :  { %7444 = vmatpush1.bf16.msra.mxu1 %v18091_v16  ;;  %v22648_v57 = vpack.c.bf16 %v9123_v50, %v9099_v10  ;;  %v18163_v16 = vcombine.low %v477_v63, %v489_v0  ;;  %v18224_v41 = vcombine.high %v531_v23, %v543_v29  ;;  %v18223_v45 = vcombine.low %v531_v23, %v543_v29  ;;  %v573_v46 = vld [vmem:[#allocation5 + $0xf10] sm:$0xff]  ;;  %v591_v53 = vld [vmem:[#allocation5 + $0xfa0] sm:$0xff] }
 0x215   :  { %7445 = vmatprep.subr.bf16.mxu1 %v18116_v62  ;;  %v22650_v3 = vpack.c.bf16 %v9124_v55, %v9100_v2  ;;  %v18236_v38 = vcombine.high %v549_v35, %v561_v39  ;;  %v585_v49 = vld [vmem:[#allocation5 + $0xf70] sm:$0xff]  ;;  %v18235_v54 = vcombine.low %v549_v35, %v561_v39  ;;  %v603_v62 = vld [vmem:[#allocation5 + $0x1000] sm:$0xff]  ;;  %v18272_v26 = vcombine.high %v579_v51, %v591_v53 }
 0x216   :  { %8218 = vmatpush1.bf16.msra.mxu0 %v18103_v47  ;;  %v18260_v47 = vcombine.high %v573_v46, %v585_v49  ;;  %v597_v9 = vld [vmem:[#allocation5 + $0xfd0] sm:$0xff]  ;;  %v18259_v36 = vcombine.low %v573_v46, %v585_v49  ;;  %v18271_v19 = vcombine.low %v579_v51, %v591_v53  ;;  %v627_v50 = vld [vmem:[#allocation5 + $0x10c0] sm:$0xff]  ;;  %v18296_v55 = vcombine.high %v603_v62, %v615_v27 }
 0x217   :  { %8219 = vmatprep.subr.bf16.mxu0 %v18128_v37  ;;  %v609_v10 = vld [vmem:[#allocation5 + $0x1030] sm:$0xff]  ;;  %v723_v40 = vld [vmem:[#allocation5 + $0x13c0] sm:$0xff] }
 0x218   :  { %7446 = vmatpush1.bf16.msra.mxu1 %v18115_v56  ;;  %v18284_v2 = vcombine.high %v597_v9, %v609_v10  ;;  %v621_v37 = vld [vmem:[#allocation5 + $0x1090] sm:$0xff]  ;;  %v639_v56 = vld [vmem:[#allocation5 + $0x1120] sm:$0xff] }
 0x219   :  { %7447 = vmatprep.subr.bf16.mxu1 %v18140_v61  ;;  %v633_v43 = vld [vmem:[#allocation5 + $0x10f0] sm:$0xff]  ;;  %v18295_v61 = vcombine.low %v603_v62, %v615_v27  ;;  %v18320_v5 = vcombine.high %v627_v50, %v639_v56  ;;  %v735_v42 = vld [vmem:[#allocation5 + $0x1420] sm:$0xff] }
 0x21a   :  { %8220 = vmatpush1.bf16.msra.mxu0 %v18127_v59  ;;  %v18283_v59 = vcombine.low %v597_v9, %v609_v10  ;;  %v18308_v63 = vcombine.high %v621_v37, %v633_v43  ;;  %v645_v0 = vld [vmem:[#allocation5 + $0x1150] sm:$0xff]  ;;  %v747_v49 = vld [vmem:[#allocation5 + $0x1480] sm:$0xff]  ;;  %v18416_v51 = vcombine.high %v723_v40, %v735_v42 }
 0x21b   :  { %8221 = vmatprep.subr.bf16.mxu0 %v18152_v4  ;;  %v657_v1 = vld [vmem:[#allocation5 + $0x11b0] sm:$0xff]  ;;  %v651_v4 = vld [vmem:[#allocation5 + $0x1180] sm:$0xff] }
 0x21c   :  { %7448 = vmatpush1.bf16.msra.mxu1 %v18139_v6  ;;  %v663_v6 = vld [vmem:[#allocation5 + $0x11e0] sm:$0xff]  ;;  %v18332_v11 = vcombine.high %v645_v0, %v657_v1  ;;  %v669_v12 = vld [vmem:[#allocation5 + $0x1210] sm:$0xff] }
 0x21d   :  { %7460 = vmatprep.subr.bf16.mxu1 %v18164_v8  ;;  %v18319_v8 = vcombine.low %v627_v50, %v639_v56  ;;  %v681_v13 = vld [vmem:[#allocation5 + $0x1270] sm:$0xff]  ;;  %v18344_v15 = vcombine.high %v651_v4, %v663_v6  ;;  %v771_v10 = vld [vmem:[#allocation5 + $0x1540] sm:$0xff] }
 0x21e   :  { %8222 = vmatpush1.bf16.msra.mxu0 %v18151_v7  ;;  %v18307_v7 = vcombine.low %v621_v37, %v633_v43  ;;  %v18356_v21 = vcombine.high %v669_v12, %v681_v13  ;;  %v693_v22 = vld [vmem:[#allocation5 + $0x12d0] sm:$0xff]  ;;  %v795_v43 = vld [vmem:[#allocation5 + $0x1600] sm:$0xff] }
 0x21f   :  { %8234 = vmatprep.subr.bf16.mxu0 %v18176_v14  ;;  %7450 = vmatmul.mubr.bf16.vlgmr.msra.gmra.mrb[8].mxu1 %v22207_v31  ;;  %v675_v14 = vld [vmem:[#allocation5 + $0x1240] sm:$0xff]  ;;  %v705_v23 = vld [vmem:[#allocation5 + $0x1330] sm:$0xff] }
 0x220   :  { %7461 = vmatpush1.bf16.msra.mxu1 %v18163_v16  ;;  %7492 = vmatprep.mubr.bf16.mxu1 %v22208_v30  ;;  %v687_v16 = vld [vmem:[#allocation5 + $0x12a0] sm:$0xff]  ;;  %v717_v35 = vld [vmem:[#allocation5 + $0x1390] sm:$0xff] }
 0x221   :  { %8224 = vmatmul.mubr.bf16.vlgmr.msra.gmra.mrb[8].mxu0 %v22207_v31  ;;  %7462 = vmatprep.subr.bf16.mxu1 %v18188_v20  ;;  %v18343_v20 = vcombine.low %v651_v4, %v663_v6  ;;  %v18368_v29 = vcombine.high %v675_v14, %v687_v16  ;;  %v711_v31 = vld [vmem:[#allocation5 + $0x1360] sm:$0xff]  ;;  %v729_v39 = vld [vmem:[#allocation5 + $0x13f0] sm:$0xff] }
 0x222   :  { %8235 = vmatpush1.bf16.msra.mxu0 %v18175_v17  ;;  %8266 = vmatprep.mubr.bf16.mxu0 %v22208_v30  ;;  %v18331_v17 = vcombine.low %v645_v0, %v657_v1  ;;  %v18379_v30 = vcombine.low %v693_v22, %v705_v23  ;;  %v753_v46 = vld [vmem:[#allocation5 + $0x14b0] sm:$0xff]  ;;  %v18403_v53 = vcombine.low %v717_v35, %v729_v39  ;;  %v819_v1 = vld [vmem:[#allocation5 + $0x16c0] sm:$0xff] }
 0x223   :  { %8236 = vmatprep.subr.bf16.mxu0 %v18200_v25  ;;  %v699_v25 = vld [vmem:[#allocation5 + $0x1300] sm:$0xff]  ;;  %v777_v9 = vld [vmem:[#allocation5 + $0x1570] sm:$0xff] }
 0x224   :  { %7463 = vmatpush1.bf16.msra.mxu1 %v18187_v24  ;;  %v18355_v24 = vcombine.low %v669_v12, %v681_v13  ;;  %v801_v37 = vld [vmem:[#allocation5 + $0x1630] sm:$0xff]  ;;  %v843_v13 = vld [vmem:[#allocation5 + $0x1780] sm:$0xff] }
 0x225   :  { %7464 = vmatprep.subr.bf16.mxu1 %v18212_v33  ;;  %v18380_v33 = vcombine.high %v693_v22, %v705_v23  ;;  %v825_v0 = vld [vmem:[#allocation5 + $0x16f0] sm:$0xff]  ;;  %v867_v23 = vld [vmem:[#allocation5 + $0x1840] sm:$0xff] }
 0x226   :  { %8237 = vmatpush1.bf16.msra.mxu0 %v18199_v28  ;;  %v18367_v28 = vcombine.low %v675_v14, %v687_v16  ;;  %v849_v12 = vld [vmem:[#allocation5 + $0x17b0] sm:$0xff] }
 0x227   :  { %8238 = vmatprep.subr.bf16.mxu0 %v18224_v41  ;;  %v18392_v41 = vcombine.high %v699_v25, %v711_v31  ;;  %v873_v22 = vld [vmem:[#allocation5 + $0x1870] sm:$0xff] }
 0x228   :  { %7465 = vmatpush1.bf16.msra.mxu1 %v18211_v32  ;;  %v18391_v32 = vcombine.low %v699_v25, %v711_v31 }
 0x229   :  { %7466 = vmatprep.subr.bf16.mxu1 %v18236_v38  ;;  %v741_v38 = vld [vmem:[#allocation5 + $0x1450] sm:$0xff] }
 0x22a   :  { %8239 = vmatpush1.bf16.msra.mxu0 %v18223_v45  ;;  %v18404_v45 = vcombine.high %v717_v35, %v729_v39  ;;  %v18427_v27 = vcombine.low %v741_v38, %v753_v46  ;;  %v897_v35 = vld [vmem:[#allocation5 + $0x1930] sm:$0xff]  ;;  %v891_v39 = vld [vmem:[#allocation5 + $0x1900] sm:$0xff] }
 0x22b   :  { %8240 = vmatprep.subr.bf16.mxu0 %v18248_v52  ;;  %v759_v52 = vld [vmem:[#allocation5 + $0x14e0] sm:$0xff] }
 0x22c   :  { %7467 = vmatpush1.bf16.msra.mxu1 %v18235_v54  ;;  %v18415_v54 = vcombine.low %v723_v40, %v735_v42  ;;  %v18440_v62 = vcombine.high %v747_v49, %v759_v52 }
 0x22d   :  { %7468 = vmatprep.subr.bf16.mxu1 %v18260_v47  ;;  %v765_v47 = vld [vmem:[#allocation5 + $0x1510] sm:$0xff] }
 0x22e   :  { %8241 = vmatpush1.bf16.msra.mxu0 %v18247_v34  ;;  %v18428_v34 = vcombine.high %v741_v38, %v753_v46  ;;  %v18451_v56 = vcombine.low %v765_v47, %v777_v9  ;;  %v921_v38 = vld [vmem:[#allocation5 + $0x19f0] sm:$0xff]  ;;  %v915_v46 = vld [vmem:[#allocation5 + $0x19c0] sm:$0xff] }
 0x22f   :  { %8242 = vmatprep.subr.bf16.mxu0 %v18272_v26  ;;  %v783_v26 = vld [vmem:[#allocation5 + $0x15a0] sm:$0xff] }
 0x230   :  { %7469 = vmatpush1.bf16.msra.mxu1 %v18259_v36  ;;  %v18439_v36 = vcombine.low %v747_v49, %v759_v52  ;;  %v18464_v50 = vcombine.high %v771_v10, %v783_v26  ;;  %v22209_v52 = vld [vmem:[#allocation2 + $0x8] ss:$24 sps:$4 sm:$0xff]  }
 0x231   :  { %7470 = vmatprep.subr.bf16.mxu1 %v18284_v2  ;;  %v789_v2 = vld [vmem:[#allocation5 + $0x15d0] sm:$0xff] }
 0x232   :  { %8243 = vmatpush1.bf16.msra.mxu0 %v18271_v19  ;;  %v18452_v19 = vcombine.high %v765_v47, %v777_v9  ;;  %v18475_v6 = vcombine.low %v789_v2, %v801_v37  ;;  %v933_v47 = vld [vmem:[#allocation5 + $0x1a50] sm:$0xff] }
 0x233   :  { %8244 = vmatprep.subr.bf16.mxu0 %v18296_v55  ;;  %v807_v55 = vld [vmem:[#allocation5 + $0x1660] sm:$0xff]  ;;  %v945_v9 = vld [vmem:[#allocation5 + $0x1ab0] sm:$0xff] }
 0x234   :  { %7471 = vmatpush1.bf16.msra.mxu1 %v18283_v59  ;;  %v18463_v59 = vcombine.low %v771_v10, %v783_v26  ;;  %v18488_v4 = vcombine.high %v795_v43, %v807_v55  ;;  %v939_v10 = vld [vmem:[#allocation5 + $0x1a80] sm:$0xff] }
 0x235   :  { %7472 = vmatprep.subr.bf16.mxu1 %v18308_v63  ;;  %v813_v63 = vld [vmem:[#allocation5 + $0x1690] sm:$0xff]  ;;  %v951_v26 = vld [vmem:[#allocation5 + $0x1ae0] sm:$0xff] }
 0x236   :  { %8245 = vmatpush1.bf16.msra.mxu0 %v18295_v61  ;;  %v18476_v61 = vcombine.high %v789_v2, %v801_v37  ;;  %v18499_v16 = vcombine.low %v813_v63, %v825_v0  ;;  %v18620_v2 = vcombine.high %v933_v47, %v945_v9  ;;  %v957_v37 = vld [vmem:[#allocation5 + $0x1b10] sm:$0xff] }
 0x237   :  { %8246 = vmatprep.subr.bf16.mxu0 %v18320_v5  ;;  %v831_v5 = vld [vmem:[#allocation5 + $0x1720] sm:$0xff] }
 0x238   :  { %7473 = vmatpush1.bf16.msra.mxu1 %v18307_v7  ;;  %v18487_v7 = vcombine.low %v795_v43, %v807_v55  ;;  %v18512_v14 = vcombine.high %v819_v1, %v831_v5  ;;  %v969_v43 = vld [vmem:[#allocation5 + $0x1b70] sm:$0xff]  ;;  %v18632_v55 = vcombine.high %v939_v10, %v951_v26 }
 0x239   :  { %7474 = vmatprep.subr.bf16.mxu1 %v18332_v11  ;;  %v837_v11 = vld [vmem:[#allocation5 + $0x1750] sm:$0xff] }
 0x23a   :  { %8247 = vmatpush1.bf16.msra.mxu0 %v18319_v8  ;;  %v18500_v8 = vcombine.high %v813_v63, %v825_v0  ;;  %v18523_v31 = vcombine.low %v837_v11, %v849_v12  ;;  %v18644_v63 = vcombine.high %v957_v37, %v969_v43  ;;  %v981_v0 = vld [vmem:[#allocation5 + $0x1bd0] sm:$0xff] }
 0x23b   :  { %8248 = vmatprep.subr.bf16.mxu0 %v18344_v15  ;;  %v855_v15 = vld [vmem:[#allocation5 + $0x17e0] sm:$0xff] }
 0x23c   :  { %7475 = vmatpush1.bf16.msra.mxu1 %v18331_v17  ;;  %v18511_v17 = vcombine.low %v819_v1, %v831_v5  ;;  %v18536_v25 = vcombine.high %v843_v13, %v855_v15  ;;  %v993_v1 = vld [vmem:[#allocation5 + $0x1c30] sm:$0xff] }
 0x23d   :  { %7476 = vmatprep.subr.bf16.mxu1 %v18356_v21  ;;  %v861_v21 = vld [vmem:[#allocation5 + $0x1810] sm:$0xff] }
 0x23e   :  { %8249 = vmatpush1.bf16.msra.mxu0 %v18343_v20  ;;  %v18524_v20 = vcombine.high %v837_v11, %v849_v12  ;;  %v18547_v42 = vcombine.low %v861_v21, %v873_v22  ;;  %v18668_v11 = vcombine.high %v981_v0, %v993_v1  ;;  %v1005_v12 = vld [vmem:[#allocation5 + $0x1c90] sm:$0xff] }
 0x23f   :  { %8250 = vmatprep.subr.bf16.mxu0 %v18368_v29  ;;  %v879_v29 = vld [vmem:[#allocation5 + $0x18a0] sm:$0xff] }
 0x240   :  { %7477 = vmatpush1.bf16.msra.mxu1 %v18355_v24  ;;  %v18535_v24 = vcombine.low %v843_v13, %v855_v15  ;;  %v18560_v40 = vcombine.high %v867_v23, %v879_v29  ;;  %v1017_v13 = vld [vmem:[#allocation5 + $0x1cf0] sm:$0xff] }
 0x241   :  { %7478 = vmatprep.subr.bf16.mxu1 %v18380_v33  ;;  %v885_v33 = vld [vmem:[#allocation5 + $0x18d0] sm:$0xff] }
 0x242   :  { %8251 = vmatpush1.bf16.msra.mxu0 %v18367_v28  ;;  %v18548_v28 = vcombine.high %v861_v21, %v873_v22  ;;  %v18692_v21 = vcombine.high %v1005_v12, %v1017_v13  ;;  %v1029_v22 = vld [vmem:[#allocation5 + $0x1d50] sm:$0xff] }
 0x243   :  { %8252 = vmatprep.subr.bf16.mxu0 %v18392_v41  ;;  %v903_v41 = vld [vmem:[#allocation5 + $0x1960] sm:$0xff] }
 0x244   :  { %7479 = vmatpush1.bf16.msra.mxu1 %v18379_v30  ;;  %v18559_v30 = vcombine.low %v867_v23, %v879_v29  ;;  %v18584_v49 = vcombine.high %v891_v39, %v903_v41  ;;  %v1041_v23 = vld [vmem:[#allocation5 + $0x1db0] sm:$0xff] }
 0x245   :  { %7480 = vmatprep.subr.bf16.mxu1 %v18404_v45  ;;  %v909_v45 = vld [vmem:[#allocation5 + $0x1990] sm:$0xff] }
 0x246   :  { %8253 = vmatpush1.bf16.msra.mxu0 %v18391_v32  ;;  %v18572_v32 = vcombine.high %v885_v33, %v897_v35 }
 0x247   :  { %8254 = vmatprep.subr.bf16.mxu0 %v18416_v51  ;;  %v927_v51 = vld [vmem:[#allocation5 + $0x1a20] sm:$0xff] }
 0x248   :  { %7481 = vmatpush1.bf16.msra.mxu1 %v18403_v53  ;;  %v18571_v53 = vcombine.low %v885_v33, %v897_v35  ;;  %v18716_v33 = vcombine.high %v1029_v22, %v1041_v23  ;;  %v1053_v35 = vld [vmem:[#allocation5 + $0x1e10] sm:$0xff] }
 0x249   :  { %7482 = vmatprep.subr.bf16.mxu1 %v18428_v34  ;;  %v18596_v34 = vcombine.high %v909_v45, %v921_v38 }
 0x24a   :  { %8255 = vmatpush1.bf16.msra.mxu0 %v18415_v54  ;;  %v18583_v54 = vcombine.low %v891_v39, %v903_v41  ;;  %v1065_v39 = vld [vmem:[#allocation5 + $0x1e70] sm:$0xff] }
 0x24b   :  { %8256 = vmatprep.subr.bf16.mxu0 %v18440_v62  ;;  %v18608_v62 = vcombine.high %v915_v46, %v927_v51 }
 0x24c   :  { %7483 = vmatpush1.bf16.msra.mxu1 %v18427_v27  ;;  %v22210_v27 = vld [vmem:[#allocation2 + $0x14] ss:$24 sps:$4 sm:$0xff]  }
 0x24d   :  { %7484 = vmatprep.subr.bf16.mxu1 %v18452_v19  ;;  %v18607_v19 = vcombine.low %v915_v46, %v927_v51  ;;  %v1089_v46 = vld [vmem:[#allocation5 + $0x1f30] sm:$0xff] }
 0x24e   :  { %8257 = vmatpush1.bf16.msra.mxu0 %v18439_v36  ;;  %v18595_v36 = vcombine.low %v909_v45, %v921_v38  ;;  %v18740_v45 = vcombine.high %v1053_v35, %v1065_v39  ;;  %v1077_v38 = vld [vmem:[#allocation5 + $0x1ed0] sm:$0xff] }
 0x24f   :  { %8258 = vmatprep.subr.bf16.mxu0 %v18464_v50  ;;  %v963_v50 = vld [vmem:[#allocation5 + $0x1b40] sm:$0xff] }
 0x250   :  { %7485 = vmatpush1.bf16.msra.mxu1 %v18451_v56  ;;  %v975_v56 = vld [vmem:[#allocation5 + $0x1ba0] sm:$0xff] }
 0x251   :  { %7486 = vmatprep.subr.bf16.mxu1 %v18476_v61  ;;  %v18631_v61 = vcombine.low %v939_v10, %v951_v26  ;;  %v18656_v5 = vcombine.high %v963_v50, %v975_v56  ;;  %v1107_v10 = vld [vmem:[#allocation5 + $0x1fc0] sm:$0xff] }
 0x252   :  { %8259 = vmatpush1.bf16.msra.mxu0 %v18463_v59  ;;  %v18619_v59 = vcombine.low %v933_v47, %v945_v9  ;;  %v1101_v47 = vld [vmem:[#allocation5 + $0x1f90] sm:$0xff]  ;;  %v1119_v26 = vld [vmem:[#allocation5 + $0x2020] sm:$0xff] }
 0x253   :  { %8260 = vmatprep.subr.bf16.mxu0 %v18488_v4  ;;  %v987_v4 = vld [vmem:[#allocation5 + $0x1c00] sm:$0xff]  ;;  %v1113_v9 = vld [vmem:[#allocation5 + $0x1ff0] sm:$0xff] }
 0x254   :  { %7487 = vmatpush1.bf16.msra.mxu1 %v18475_v6  ;;  %v999_v6 = vld [vmem:[#allocation5 + $0x1c60] sm:$0xff] }
 0x255   :  { %7488 = vmatprep.subr.bf16.mxu1 %v18500_v8  ;;  %v18655_v8 = vcombine.low %v963_v50, %v975_v56  ;;  %v18680_v15 = vcombine.high %v987_v4, %v999_v6  ;;  %v18800_v50 = vcombine.high %v1107_v10, %v1119_v26  ;;  %v18787_v56 = vcombine.low %v1101_v47, %v1113_v9 }
 0x256   :  { %8261 = vmatpush1.bf16.msra.mxu0 %v18487_v7  ;;  %v18643_v7 = vcombine.low %v957_v37, %v969_v43  ;;  %v1137_v37 = vld [vmem:[#allocation5 + $0x20b0] sm:$0xff]  ;;  %v1131_v43 = vld [vmem:[#allocation5 + $0x2080] sm:$0xff] }
 0x257   :  { %8262 = vmatprep.subr.bf16.mxu0 %v18512_v14  ;;  %v1011_v14 = vld [vmem:[#allocation5 + $0x1cc0] sm:$0xff] }
 0x258   :  { %7489 = vmatpush1.bf16.msra.mxu1 %v18499_v16  ;;  %v1023_v16 = vld [vmem:[#allocation5 + $0x1d20] sm:$0xff] }
 0x259   :  { %7490 = vmatprep.subr.bf16.mxu1 %v18524_v20  ;;  %v18679_v20 = vcombine.low %v987_v4, %v999_v6  ;;  %v18704_v29 = vcombine.high %v1011_v14, %v1023_v16 }
 0x25a   :  { %8263 = vmatpush1.bf16.msra.mxu0 %v18511_v17  ;;  %v18667_v17 = vcombine.low %v981_v0, %v993_v1  ;;  %v1161_v0 = vld [vmem:[#allocation5 + $0x2170] sm:$0xff]  ;;  %v1155_v1 = vld [vmem:[#allocation5 + $0x2140] sm:$0xff] }
 0x25b   :  { %8264 = vmatprep.subr.bf16.mxu0 %v18536_v25  ;;  %v1035_v25 = vld [vmem:[#allocation5 + $0x1d80] sm:$0xff] }
 0x25c   :  { %7491 = vmatpush1.bf16.msra.mxu1 %v18523_v31  ;;  %v1047_v31 = vld [vmem:[#allocation5 + $0x1de0] sm:$0xff] }
 0x25d   :  { %7503 = vmatprep.subr.bf16.mxu1 %v18548_v28  ;;  %v18703_v28 = vcombine.low %v1011_v14, %v1023_v16  ;;  %v18728_v41 = vcombine.high %v1035_v25, %v1047_v31 }
 0x25e   :  { %8265 = vmatpush1.bf16.msra.mxu0 %v18535_v24  ;;  %v18691_v24 = vcombine.low %v1005_v12, %v1017_v13  ;;  %v1185_v12 = vld [vmem:[#allocation5 + $0x2230] sm:$0xff]  ;;  %v1179_v13 = vld [vmem:[#allocation5 + $0x2200] sm:$0xff] }
 0x25f   :  { %8277 = vmatprep.subr.bf16.mxu0 %v18560_v40  ;;  %7493 = vmatmul.mubr.bf16.vlgmr.msra.gmra.mrb[8].mxu1 %v22209_v52  ;;  %v1059_v40 = vld [vmem:[#allocation5 + $0x1e40] sm:$0xff] }
 0x260   :  { %7504 = vmatpush1.bf16.msra.mxu1 %v18547_v42  ;;  %7535 = vmatprep.mubr.bf16.mxu1 %v22210_v27  ;;  %v1071_v42 = vld [vmem:[#allocation5 + $0x1ea0] sm:$0xff] }
 0x261   :  { %8267 = vmatmul.mubr.bf16.vlgmr.msra.gmra.mrb[8].mxu0 %v22209_v52  ;;  %7505 = vmatprep.subr.bf16.mxu1 %v18572_v32  ;;  %v18727_v32 = vcombine.low %v1035_v25, %v1047_v31  ;;  %v18752_v51 = vcombine.high %v1059_v40, %v1071_v42  ;;  %v1095_v52 = vld [vmem:[#allocation5 + $0x1f60] sm:$0xff] }
 0x262   :  { %8278 = vmatpush1.bf16.msra.mxu0 %v18559_v30  ;;  %8309 = vmatprep.mubr.bf16.mxu0 %v22210_v27  ;;  %v18715_v30 = vcombine.low %v1029_v22, %v1041_v23  ;;  %v18763_v27 = vcombine.low %v1077_v38, %v1089_v46  ;;  %v1209_v22 = vld [vmem:[#allocation5 + $0x22f0] sm:$0xff]  ;;  %v1203_v23 = vld [vmem:[#allocation5 + $0x22c0] sm:$0xff] }
 0x263   :  { %8279 = vmatprep.subr.bf16.mxu0 %v18584_v49  ;;  %v1083_v49 = vld [vmem:[#allocation5 + $0x1f00] sm:$0xff] }
 0x264   :  { %7506 = vmatpush1.bf16.msra.mxu1 %v18571_v53  ;;  %v18739_v53 = vcombine.low %v1053_v35, %v1065_v39  ;;  %v1233_v35 = vld [vmem:[#allocation5 + $0x23b0] sm:$0xff]  ;;  %v1227_v39 = vld [vmem:[#allocation5 + $0x2380] sm:$0xff] }
 0x265   :  { %7507 = vmatprep.subr.bf16.mxu1 %v18596_v34  ;;  %v18764_v34 = vcombine.high %v1077_v38, %v1089_v46  ;;  %v106_v38 = vld [vmem:[#allocation5 + $0x78] sm:$0xff]  ;;  %v101_v46 = vld [vmem:[#allocation5 + $0x50] sm:$0xff] }
 0x266   :  { %8280 = vmatpush1.bf16.msra.mxu0 %v18583_v54  ;;  %v18751_v54 = vcombine.low %v1059_v40, %v1071_v42 }
 0x267   :  { %8281 = vmatprep.subr.bf16.mxu0 %v18608_v62  ;;  %v18776_v62 = vcombine.high %v1083_v49, %v1095_v52 }
 0x268   :  { %7508 = vmatpush1.bf16.msra.mxu1 %v18595_v36  ;;  %v18775_v36 = vcombine.low %v1083_v49, %v1095_v52 }
 0x269   :  { %7509 = vmatprep.subr.bf16.mxu1 %v18620_v2  ;;  %v1125_v2 = vld [vmem:[#allocation5 + $0x2050] sm:$0xff] }
 0x26a   :  { %8282 = vmatpush1.bf16.msra.mxu0 %v18607_v19  ;;  %v18788_v19 = vcombine.high %v1101_v47, %v1113_v9  ;;  %v18811_v6 = vcombine.low %v1125_v2, %v1137_v37  ;;  %v130_v47 = vld [vmem:[#allocation5 + $0x138] sm:$0xff]  ;;  %v125_v9 = vld [vmem:[#allocation5 + $0x110] sm:$0xff] }
 0x26b   :  { %8283 = vmatprep.subr.bf16.mxu0 %v18632_v55  ;;  %v1143_v55 = vld [vmem:[#allocation5 + $0x20e0] sm:$0xff] }
 0x26c   :  { %7510 = vmatpush1.bf16.msra.mxu1 %v18619_v59  ;;  %v18799_v59 = vcombine.low %v1107_v10, %v1119_v26  ;;  %v18824_v4 = vcombine.high %v1131_v43, %v1143_v55 }
 0x26d   :  { %7511 = vmatprep.subr.bf16.mxu1 %v18644_v63  ;;  %v1149_v63 = vld [vmem:[#allocation5 + $0x2110] sm:$0xff] }
 0x26e   :  { %8284 = vmatpush1.bf16.msra.mxu0 %v18631_v61  ;;  %v18812_v61 = vcombine.high %v1125_v2, %v1137_v37  ;;  %v18835_v16 = vcombine.low %v1149_v63, %v1161_v0  ;;  %v154_v2 = vld [vmem:[#allocation5 + $0x1f8] sm:$0xff]  ;;  %v149_v37 = vld [vmem:[#allocation5 + $0x1d0] sm:$0xff] }
 0x26f   :  { %8285 = vmatprep.subr.bf16.mxu0 %v18656_v5  ;;  %v1167_v5 = vld [vmem:[#allocation5 + $0x21a0] sm:$0xff] }
 0x270   :  { %7512 = vmatpush1.bf16.msra.mxu1 %v18643_v7  ;;  %v18823_v7 = vcombine.low %v1131_v43, %v1143_v55  ;;  %v18848_v14 = vcombine.high %v1155_v1, %v1167_v5  ;;  %v22211_v55 = vld [vmem:[#allocation2 + $0x10] ss:$24 sps:$4 sm:$0xff]  }
 0x271   :  { %7513 = vmatprep.subr.bf16.mxu1 %v18668_v11  ;;  %v1173_v11 = vld [vmem:[#allocation5 + $0x21d0] sm:$0xff] }
 0x272   :  { %8286 = vmatpush1.bf16.msra.mxu0 %v18655_v8  ;;  %v18836_v8 = vcombine.high %v1149_v63, %v1161_v0  ;;  %v18859_v31 = vcombine.low %v1173_v11, %v1185_v12  ;;  %v166_v63 = vld [vmem:[#allocation5 + $0x258] sm:$0xff] }
 0x273   :  { %8287 = vmatprep.subr.bf16.mxu0 %v18680_v15  ;;  %v1191_v15 = vld [vmem:[#allocation5 + $0x2260] sm:$0xff]  ;;  %v178_v0 = vld [vmem:[#allocation5 + $0x2b8] sm:$0xff] }
 0x274   :  { %7514 = vmatpush1.bf16.msra.mxu1 %v18667_v17  ;;  %v18847_v17 = vcombine.low %v1155_v1, %v1167_v5  ;;  %v18872_v25 = vcombine.high %v1179_v13, %v1191_v15  ;;  %v173_v1 = vld [vmem:[#allocation5 + $0x290] sm:$0xff] }
 0x275   :  { %7515 = vmatprep.subr.bf16.mxu1 %v18692_v21  ;;  %v1197_v21 = vld [vmem:[#allocation5 + $0x2290] sm:$0xff] }
 0x276   :  { %8288 = vmatpush1.bf16.msra.mxu0 %v18679_v20  ;;  %v18860_v20 = vcombine.high %v1173_v11, %v1185_v12  ;;  %v18883_v42 = vcombine.low %v1197_v21, %v1209_v22  ;;  %v185_v5 = vld [vmem:[#allocation5 + $0x2f0] sm:$0xff]  ;;  %v17854_v11 = vcombine.high %v166_v63, %v178_v0  ;;  %v190_v12 = vld [vmem:[#allocation5 + $0x318] sm:$0xff] }
 0x277   :  { %8289 = vmatprep.subr.bf16.mxu0 %v18704_v29  ;;  %v1215_v29 = vld [vmem:[#allocation5 + $0x2320] sm:$0xff] }
 0x278   :  { %7516 = vmatpush1.bf16.msra.mxu1 %v18691_v24  ;;  %v18871_v24 = vcombine.low %v1179_v13, %v1191_v15  ;;  %v18896_v40 = vcombine.high %v1203_v23, %v1215_v29  ;;  %v202_v13 = vld [vmem:[#allocation5 + $0x378] sm:$0xff]  ;;  %v17868_v15 = vcombine.high %v173_v1, %v185_v5 }
 0x279   :  { %7517 = vmatprep.subr.bf16.mxu1 %v18716_v33  ;;  %v1221_v33 = vld [vmem:[#allocation5 + $0x2350] sm:$0xff] }
 0x27a   :  { %8290 = vmatpush1.bf16.msra.mxu0 %v18703_v28  ;;  %v18884_v28 = vcombine.high %v1197_v21, %v1209_v22  ;;  %v18907_v52 = vcombine.low %v1221_v33, %v1233_v35  ;;  %v17878_v21 = vcombine.high %v190_v12, %v202_v13  ;;  %v214_v22 = vld [vmem:[#allocation5 + $0x3d8] sm:$0xff] }
 0x27b   :  { %8291 = vmatprep.subr.bf16.mxu0 %v18728_v41  ;;  %v1239_v41 = vld [vmem:[#allocation5 + $0x23e0] sm:$0xff] }
 0x27c   :  { %7518 = vmatpush1.bf16.msra.mxu1 %v18715_v30  ;;  %v18895_v30 = vcombine.low %v1203_v23, %v1215_v29  ;;  %v18920_v49 = vcombine.high %v1227_v39, %v1239_v41  ;;  %v226_v23 = vld [vmem:[#allocation5 + $0x438] sm:$0xff] }
 0x27d   :  { %7519 = vmatprep.subr.bf16.mxu1 %v18740_v45  ;;  %v94_v45 = vld [vmem:[#allocation5 + $0x18] sm:$0xff] }
 0x27e   :  { %8292 = vmatpush1.bf16.msra.mxu0 %v18727_v32  ;;  %v18908_v32 = vcombine.high %v1221_v33, %v1233_v35  ;;  %v17781_v26 = vcombine.low %v94_v45, %v106_v38  ;;  %v22658_v33 = vsub.s32 3, %v22486_v48  ;;  %v22660_v35 = vld [vmem:[#allocation5 + $0x498] sm:$0xff] }
 0x27f   :  { %8293 = vmatprep.subr.bf16.mxu0 %v18752_v51  ;;  %v113_v51 = vld [vmem:[#allocation5 + $0xb0] sm:$0xff] }
 0x280   :  { %7520 = vmatpush1.bf16.msra.mxu1 %v18739_v53  ;;  %v18919_v53 = vcombine.low %v1227_v39, %v1239_v41  ;;  %v17796_v10 = vcombine.high %v101_v46, %v113_v51  ;;  %v22662_v39 = vld [vmem:[#allocation5 + $0x4f8] sm:$0xff] }
 0x281   :  { %7521 = vmatprep.subr.bf16.mxu1 %v18764_v34  ;;  %v118_v34 = vld [vmem:[#allocation5 + $0xd8] sm:$0xff] }
 0x282   :  { %8294 = vmatpush1.bf16.msra.mxu0 %v18751_v54  ;;  %v17782_v54 = vcombine.high %v94_v45, %v106_v38  ;;  %v22671_v45 = vld [vmem:[#allocation5 + $0x558] sm:$0xff] }
 0x283   :  { %8295 = vmatprep.subr.bf16.mxu0 %v18776_v62  ;;  %v137_v62 = vld [vmem:[#allocation5 + $0x170] sm:$0xff]  ;;  %v22673_v38 = vld [vmem:[#allocation5 + $0x5b8] sm:$0xff] }
 0x284   :  { %7522 = vmatpush1.bf16.msra.mxu1 %v18763_v27  ;;  %v17795_v27 = vcombine.low %v101_v46, %v113_v51  ;;  %v17820_v43 = vcombine.high %v125_v9, %v137_v62  ;;  %v22676_v46 = vsub.s32 5, %v22486_v48  ;;  %v22679_v51 = vld [vmem:[#allocation5 + $0x590] sm:$0xff] }
 0x285   :  { %7523 = vmatprep.subr.bf16.mxu1 %v18788_v19  ;;  %v142_v19 = vld [vmem:[#allocation5 + $0x198] sm:$0xff] }
 0x286   :  { %8296 = vmatpush1.bf16.msra.mxu0 %v18775_v36  ;;  %v17806_v36 = vcombine.high %v118_v34, %v130_v47 }
 0x287   :  { %8297 = vmatprep.subr.bf16.mxu0 %v18800_v50  ;;  %v161_v50 = vld [vmem:[#allocation5 + $0x230] sm:$0xff] }
 0x288   :  { %7524 = vmatpush1.bf16.msra.mxu1 %v18787_v56  ;;  %v17805_v56 = vcombine.low %v118_v34, %v130_v47  ;;  %v22213_v34 = vld [vmem:[#allocation7] sm:$0xff] }
 0x289   :  { %7525 = vmatprep.subr.bf16.mxu1 %v18812_v61  ;;  %v17830_v61 = vcombine.high %v142_v19, %v154_v2 }
 0x28a   :  { %8298 = vmatpush1.bf16.msra.mxu0 %v18799_v59  ;;  %v17819_v59 = vcombine.low %v125_v9, %v137_v62  ;;  %v1264_v9 = vrot.slane %v22213_v34, %v22658_v33 }
 0x28b   :  { %8299 = vmatprep.subr.bf16.mxu0 %v18824_v4  ;;  %v17844_v4 = vcombine.high %v149_v37, %v161_v50 }
 0x28c   :  { %7526 = vmatpush1.bf16.msra.mxu1 %v18811_v6  ;;  %v22212_v6 = vld [vmem:[#allocation2 + $0x4] ss:$24 sps:$4 sm:$0xff]  }
 0x28d   :  { %7527 = vmatprep.subr.bf16.mxu1 %v18836_v8  ;;  %v17843_v8 = vcombine.low %v149_v37, %v161_v50  ;;  %v22697_v37 = vld [vmem:[#allocation5 + $0x6b0] sm:$0xff] }
 0x28e   :  { %8300 = vmatpush1.bf16.msra.mxu0 %v18823_v7  ;;  %v17829_v7 = vcombine.low %v142_v19, %v154_v2  ;;  %v17926_v19 = vcombine.high %v22660_v35, %v22662_v39  ;;  %v22695_v2 = vld [vmem:[#allocation5 + $0x650] sm:$0xff] }
 0x28f   :  { %8301 = vmatprep.subr.bf16.mxu0 %v18848_v14  ;;  %v197_v14 = vld [vmem:[#allocation5 + $0x350] sm:$0xff] }
 0x290   :  { %7528 = vmatpush1.bf16.msra.mxu1 %v18835_v16  ;;  %v209_v16 = vld [vmem:[#allocation5 + $0x3b0] sm:$0xff] }
 0x291   :  { %7529 = vmatprep.subr.bf16.mxu1 %v18860_v20  ;;  %v17867_v20 = vcombine.low %v173_v1, %v185_v5  ;;  %v17892_v29 = vcombine.high %v197_v14, %v209_v16  ;;  %v17891_v41 = vcombine.low %v197_v14, %v209_v16  ;;  %v17987_v14 = vcombine.low %v22695_v2, %v22697_v37 }
 0x292   :  { %8302 = vmatpush1.bf16.msra.mxu0 %v18847_v17  ;;  %v17853_v17 = vcombine.low %v166_v63, %v178_v0  ;;  %v22708_v63 = vld [vmem:[#allocation5 + $0x6d8] sm:$0xff] }
 0x293   :  { %8303 = vmatprep.subr.bf16.mxu0 %v18872_v25  ;;  %v22652_v25 = vld [vmem:[#allocation5 + $0x410] sm:$0xff]  ;;  %v22710_v0 = vld [vmem:[#allocation5 + $0x738] sm:$0xff] }
 0x294   :  { %7530 = vmatpush1.bf16.msra.mxu1 %v18859_v31  ;;  %v233_v31 = vld [vmem:[#allocation5 + $0x470] sm:$0xff] }
 0x295   :  { %7531 = vmatprep.subr.bf16.mxu1 %v18884_v28  ;;  %v17877_v28 = vcombine.low %v190_v12, %v202_v13  ;;  %v17915_v62 = vcombine.low %v22652_v25, %v233_v31 }
 0x296   :  { %8304 = vmatpush1.bf16.msra.mxu0 %v18871_v24  ;;  %v22655_v24 = vsub.s32 2, %v22486_v48 }
 0x297   :  { %8305 = vmatprep.subr.bf16.mxu0 %v18896_v40  ;;  %v22665_v40 = vsub.s32 4, %v22486_v48 }
 0x298   :  { %7532 = vmatpush1.bf16.msra.mxu1 %v18883_v42  ;;  %v17902_v42 = vcombine.high %v214_v22, %v226_v23  ;;  %v1260_v47 = vrot.slane %v22213_v34, %v22655_v24 }
 0x299   :  { %7533 = vmatprep.subr.bf16.mxu1 %v18908_v32  ;;  %v22669_v32 = vld [vmem:[#allocation5 + $0x530] sm:$0xff] }
 0x29a   :  { %8306 = vmatpush1.bf16.msra.mxu0 %v18895_v30  ;;  %v22667_v30 = vld [vmem:[#allocation5 + $0x4d0] sm:$0xff] }
 0x29b   :  { %8307 = vmatprep.subr.bf16.mxu0 %v18920_v49  ;;  %v17916_v49 = vcombine.high %v22652_v25, %v233_v31 }
 0x29c   :  { %7534 = vmatpush1.bf16.msra.mxu1 %v18907_v52  ;;  %v22681_v52 = vld [vmem:[#allocation5 + $0x5f0] sm:$0xff] }
 0x29d   :  { %7546 = vmatprep.subr.bf16.mxu1 %v17782_v54  ;;  %v22685_v54 = vld [vmem:[#allocation5 + $0x678] sm:$0xff]  ;;  %v17963_v5 = vcombine.low %v22679_v51, %v22681_v52 }
 0x29e   :  { %8308 = vmatpush1.bf16.msra.mxu0 %v18919_v53  ;;  %v22683_v53 = vld [vmem:[#allocation5 + $0x618] sm:$0xff] }
 0x29f   :  { %8449 = vmatprep.subr.bf16.mxu0 %v17796_v10  ;;  %7536 = vmatmul.mubr.bf16.vlgmr.msra.gmra.mrb[8].mxu1 %v22211_v55  ;;  %v17901_v10 = vcombine.low %v214_v22, %v226_v23  ;;  %v17973_v13 = vcombine.low %v22683_v53, %v22685_v54  ;;  %v22732_v22 = vld [vmem:[#allocation5 + $0x710] sm:$0xff] }
 0x2a0   :  { %7547 = vmatpush1.bf16.msra.mxu1 %v17781_v26  ;;  %7578 = vmatprep.mubr.bf16.mxu1 %v22212_v6  ;;  %v22214_v26 = vld [vmem:[#allocation7 + $0x8] sm:$0xff] }
 0x2a1   :  { %8310 = vmatmul.mubr.bf16.vlgmr.msra.gmra.mrb[8].mxu0 %v22211_v55  ;;  %7548 = vmatprep.subr.bf16.mxu1 %v17806_v36  ;;  %v17925_v36 = vcombine.low %v22660_v35, %v22662_v39  ;;  %v17939_v55 = vcombine.low %v22667_v30, %v22669_v32  ;;  %v22742_v35 = vld [vmem:[#allocation5 + $0x770] sm:$0xff] }
 0x2a2   :  { %8450 = vmatpush1.bf16.msra.mxu0 %v17795_v27  ;;  %8481 = vmatprep.mubr.bf16.mxu0 %v22212_v6  ;;  %v1300_v27 = vrot.slane %v22214_v26, %v22665_v40  ;;  %v17964_v6 = vcombine.high %v22679_v51, %v22681_v52 }
 0x2a3   :  { %8451 = vmatprep.subr.bf16.mxu0 %v17820_v43  ;;  %v1304_v43 = vrot.slane %v22214_v26, %v22676_v46 }
 0x2a4   :  { %7549 = vmatpush1.bf16.msra.mxu1 %v17805_v56  ;;  %v17940_v56 = vcombine.high %v22667_v30, %v22669_v32  ;;  %v17998_v32 = vcombine.high %v22708_v63, %v22710_v0 }
 0x2a5   :  { %7550 = vmatprep.subr.bf16.mxu1 %v17830_v61  ;;  %v17950_v61 = vcombine.high %v22671_v45, %v22673_v38 }
 0x2a6   :  { %8452 = vmatpush1.bf16.msra.mxu0 %v17819_v59  ;;  %v17949_v59 = vcombine.low %v22671_v45, %v22673_v38 }
 0x2a7   :  { %8453 = vmatprep.subr.bf16.mxu0 %v17844_v4 }
 0x2a8   :  { %7551 = vmatpush1.bf16.msra.mxu1 %v17829_v7  ;;  %v17974_v7 = vcombine.high %v22683_v53, %v22685_v54 }
 0x2a9   :  { %7552 = vmatprep.subr.bf16.mxu1 %v17854_v11 }
 0x2aa   :  { %8454 = vmatpush1.bf16.msra.mxu0 %v17843_v8 }
 0x2ab   :  { %8455 = vmatprep.subr.bf16.mxu0 %v17868_v15 }
 0x2ac   :  { %7553 = vmatpush1.bf16.msra.mxu1 %v17853_v17 }
 0x2ad   :  { %7554 = vmatprep.subr.bf16.mxu1 %v17878_v21 }
 0x2ae   :  { %8456 = vmatpush1.bf16.msra.mxu0 %v17867_v20 }
 0x2af   :  { %8457 = vmatprep.subr.bf16.mxu0 %v17892_v29 }
 0x2b0   :  { %7555 = vmatpush1.bf16.msra.mxu1 %v17877_v28  ;;  %v17988_v28 = vcombine.high %v22695_v2, %v22697_v37  ;;  %v22790_v37 = vld [vmem:[#allocation5 + $0x918] sm:$0xff] }
 0x2b1   :  { %7556 = vmatprep.subr.bf16.mxu1 %v17902_v42 }
 0x2b2   :  { %8458 = vmatpush1.bf16.msra.mxu0 %v17891_v41  ;;  %v7408_v50 = vpop.f32.mrb[4].mxu1 }
 0x2b3   :  { %8459 = vmatprep.subr.bf16.mxu0 %v17916_v49  ;;  %v22712_v1 = vadd.f32 %v7408_v50, %v1260_v47  ;;  %v7410_v4 = vpop.f32.mrb[5].mxu1 }
 0x2b4   :  { %v8053_v8 = vpop.f32.mrb[4].mxu0  ;;  %v22720_v11 = vadd.f32 %v7410_v4, %v1264_v9  ;;  %v7412_v12 = vpop.f32.mrb[6].mxu1  ;;  %7557 = vmatpush1.bf16.msra.mxu1 %v17901_v10 }
 0x2b5   :  { %v22726_v15 = vadd.f32 %v8053_v8, %v1300_v27  ;;  %v8055_v16 = vpop.f32.mrb[5].mxu0  ;;  %v8757_v17 = vmul.f32 %v22712_v1, %v22712_v1  ;;  %v22730_v20 = vadd.f32 %v7412_v12, %v1260_v47  ;;  %v7414_v21 = vpop.f32.mrb[7].mxu1  ;;  %7558 = vmatprep.subr.bf16.mxu1 %v17926_v19 }
 0x2b6   :  { %8460 = vmatpush1.bf16.msra.mxu0 %v17915_v62  ;;  %v22734_v23 = vadd.f32 %v8055_v16, %v1304_v43  ;;  %v8057_v25 = vpop.f32.mrb[6].mxu0  ;;  %v8758_v29 = vmul.f32 %v22720_v11, %v22720_v11  ;;  %v22738_v31 = vadd.f32 %v7414_v21, %v1264_v9  ;;  %v334_v16 = vld [vmem:[#allocation5 + $0x798] sm:$0xff]  ;;  %v341_v21 = vld [vmem:[#allocation5 + $0x7d0] sm:$0xff] }
 0x2b7   :  { %8461 = vmatprep.subr.bf16.mxu0 %v17940_v56  ;;  %v8767_v39 = vmul.f32 %v22726_v15, %v22726_v15  ;;  %v8059_v41 = vpop.f32.mrb[7].mxu0  ;;  %v8805_v42 = vmul.f32 %v22712_v1, %v8757_v17  ;;  %v8781_v30 = vmul.f32 %v22730_v20, %v22730_v20  ;;  %v22757_v52 = vadd.f32 %v8057_v25, %v1300_v27  ;;  %v346_v17 = vld [vmem:[#allocation5 + $0x7f8] sm:$0xff] }
 0x2b8   :  { %v8768_v45 = vmul.f32 %v22734_v23, %v22734_v23  ;;  %v8806_v38 = vmul.f32 %v22720_v11, %v8758_v29  ;;  %v8782_v49 = vmul.f32 %v22738_v31, %v22738_v31  ;;  %7559 = vmatpush1.bf16.msra.mxu1 %v17925_v36  ;;  %v22761_v10 = vadd.f32 %v8059_v41, %v1304_v43  ;;  %v353_v41 = vld [vmem:[#allocation5 + $0x830] sm:$0xff] }
 0x2b9   :  { %v8815_v51 = vmul.f32 %v22726_v15, %v8767_v39  ;;  %v8853_v34 = vmul.f32 0.044715, %v8805_v42  ;;  %v8829_v47 = vmul.f32 %v22730_v20, %v8781_v30  ;;  %7560 = vmatprep.subr.bf16.mxu1 %v17950_v61  ;;  %v18012_v36 = vcombine.high %v22732_v22, %v22742_v35 }
 0x2ba   :  { %8462 = vmatpush1.bf16.msra.mxu0 %v17939_v55  ;;  %v8816_v9 = vmul.f32 %v22734_v23, %v8768_v45  ;;  %v8854_v62 = vmul.f32 0.044715, %v8806_v38  ;;  %v8830_v26 = vmul.f32 %v22738_v31, %v8782_v49  ;;  %v8791_v55 = vmul.f32 %v22757_v52, %v22757_v52 }
 0x2bb   :  { %8463 = vmatprep.subr.bf16.mxu0 %v17964_v6  ;;  %v8863_v19 = vmul.f32 0.044715, %v8815_v51  ;;  %v8901_v27 = vadd.f32 %v22712_v1, %v8853_v34  ;;  %v8877_v50 = vmul.f32 0.044715, %v8829_v47  ;;  %v8792_v6 = vmul.f32 %v22761_v10, %v22761_v10  ;;  %v358_v47 = vld [vmem:[#allocation5 + $0x858] sm:$0xff] }
 0x2bc   :  { %v8864_v56 = vmul.f32 0.044715, %v8816_v9  ;;  %v8902_v61 = vadd.f32 %v22720_v11, %v8854_v62  ;;  %v8878_v4 = vmul.f32 0.044715, %v8830_v26  ;;  %7561 = vmatpush1.bf16.msra.mxu1 %v17949_v59  ;;  %v8839_v29 = vmul.f32 %v22757_v52, %v8791_v55  ;;  %v370_v9 = vld [vmem:[#allocation5 + $0x8b8] sm:$0xff]  ;;  %v365_v62 = vld [vmem:[#allocation5 + $0x890] sm:$0xff] }
 0x2bd   :  { %v8911_v43 = vadd.f32 %v22726_v15, %v8863_v19  ;;  %v8949_v8 = vmul.f32 0.7978846, %v8901_v27  ;;  %v8925_v12 = vadd.f32 %v22730_v20, %v8877_v50  ;;  %7562 = vmatprep.subr.bf16.mxu1 %v17974_v7  ;;  %v8840_v30 = vmul.f32 %v22761_v10, %v8792_v6  ;;  %v389_v26 = vld [vmem:[#allocation5 + $0x950] sm:$0xff]  ;;  %v22792_v27 = vld [vmem:[#allocation5 + $0x9d8] sm:$0xff] }
 0x2be   :  { %8464 = vmatpush1.bf16.msra.mxu0 %v17963_v5  ;;  %v8912_v25 = vadd.f32 %v22734_v23, %v8864_v56  ;;  %v8950_v39 = vmul.f32 0.7978846, %v8902_v61  ;;  %v8926_v59 = vadd.f32 %v22738_v31, %v8878_v4  ;;  %v8887_v5 = vmul.f32 0.044715, %v8839_v29  ;;  %v401_v19 = vld [vmem:[#allocation5 + $0x9b0] sm:$0xff]  ;;  %v22794_v50 = vld [vmem:[#allocation5 + $0xa38] sm:$0xff] }
 0x2bf   :  { %8465 = vmatprep.subr.bf16.mxu0 %v17988_v28  ;;  %v8959_v42 = vmul.f32 0.7978846, %v8911_v43  ;;  %22120 = vtanh.f32 %v8949_v8  ;;  %v8973_v45 = vmul.f32 0.7978846, %v8925_v12  ;;  %v17997_v49 = vcombine.low %v22708_v63, %v22710_v0  ;;  %v377_v63 = vld [vmem:[#allocation5 + $0x8f0] sm:$0xff] }
 0x2c0   :  { %v8960_v38 = vmul.f32 0.7978846, %v8912_v25  ;;  %22122 = vtanh.f32 %v8950_v39  ;;  %v8974_v7 = vmul.f32 0.7978846, %v8926_v59  ;;  %7563 = vmatpush1.bf16.msra.mxu1 %v17973_v13  ;;  %v8888_v51 = vmul.f32 0.044715, %v8840_v30 }
 0x2c1   :  { %22124 = vtanh.f32 %v8973_v45  ;;  %7564 = vmatprep.subr.bf16.mxu1 %v17998_v32  ;;  %v18011_v28 = vcombine.low %v22732_v22, %v22742_v35  ;;  %v18022_v34 = vcombine.high %v334_v16, %v346_v17  ;;  %v8935_v53 = vadd.f32 %v22757_v52, %v8887_v5  ;;  %v394_v32 = vld [vmem:[#allocation5 + $0x978] sm:$0xff]  ;;  %v22797_v43 = vld [vmem:[#allocation5 + $0xa10] sm:$0xff] }
 0x2c2   :  { %8466 = vmatpush1.bf16.msra.mxu0 %v17987_v14  ;;  %22126 = vtanh.f32 %v8974_v7  ;;  %v18036_v54 = vcombine.high %v341_v21, %v353_v41  ;;  %v8936_v0 = vadd.f32 %v22761_v10, %v8888_v51  ;;  %v18021_v2 = vcombine.low %v334_v16, %v346_v17  ;;  %v22799_v6 = vld [vmem:[#allocation5 + $0xa70] sm:$0xff] }
 0x2c3   :  { %8467 = vmatprep.subr.bf16.mxu0 %v18012_v36  ;;  %22128 = vtanh.f32 %v8959_v42  ;;  %v8983_v13 = vmul.f32 0.7978846, %v8935_v53  ;;  %v18035_v22 = vcombine.low %v341_v21, %v353_v41  ;;  %v18046_v35 = vcombine.high %v358_v47, %v370_v9  ;;  %v437_v51 = vld [vmem:[#allocation5 + $0xad0] sm:$0xff] }
 0x2c4   :  { %7565 = vmatpush1.bf16.msra.mxu1 %v17997_v49  ;;  %22130 = vtanh.f32 %v8960_v38  ;;  %v8984_v14 = vmul.f32 0.7978846, %v8936_v0  ;;  %v18060_v36 = vcombine.high %v365_v62, %v377_v63  ;;  %v18045_v56 = vcombine.low %v358_v47, %v370_v9  ;;  %v430_v38 = vld [vmem:[#allocation5 + $0xa98] sm:$0xff] }
 0x2c5   :  { %7566 = vmatprep.subr.bf16.mxu1 %v18022_v34  ;;  %22132 = vtanh.f32 %v8983_v13  ;;  %v18059_v61 = vcombine.low %v365_v62, %v377_v63  ;;  %v18070_v4 = vcombine.high %v22790_v37, %v394_v32  ;;  %v18069_v12 = vcombine.low %v22790_v37, %v394_v32  ;;  %v449_v62 = vld [vmem:[#allocation5 + $0xb30] sm:$0xff]  ;;  %v454_v32 = vld [vmem:[#allocation5 + $0xb58] sm:$0xff] }
 0x2c6   :  { %8468 = vmatpush1.bf16.msra.mxu0 %v18011_v28  ;;  %22134 = vtanh.f32 %v8984_v14  ;;  %v18083_v16 = vcombine.low %v389_v26, %v401_v19  ;;  %v18084_v17 = vcombine.high %v389_v26, %v401_v19  ;;  %v8709_v29 = vmul.f32 0.5, %v22712_v1  ;;  %v442_v1 = vld [vmem:[#allocation5 + $0xaf8] sm:$0xff]  ;;  %v461_v19 = vld [vmem:[#allocation5 + $0xb90] sm:$0xff] }
 0x2c7   :  { %8469 = vmatprep.subr.bf16.mxu0 %v18036_v54  ;;  %v18093_v39 = vcombine.low %v22792_v27, %v22794_v50  ;;  %v18094_v59 = vcombine.high %v22792_v27, %v22794_v50  ;;  %v8733_v30 = vmul.f32 0.5, %v22730_v20  ;;  %v18108_v45 = vcombine.high %v22797_v43, %v22799_v6  ;;  %v466_v26 = vld [vmem:[#allocation5 + $0xbb8] sm:$0xff] }
 0x2c8   :  { %7567 = vmatpush1.bf16.msra.mxu1 %v18021_v2  ;;  %v8719_v5 = vmul.f32 0.5, %v22726_v15  ;;  %v8710_v28 = vmul.f32 0.5, %v22720_v11  ;;  %v8734_v34 = vmul.f32 0.5, %v22738_v31  ;;  %v8720_v20 = vmul.f32 0.5, %v22734_v23 }
 0x2c9   :  { %v22121_v55 = vpop.eup %22120  ;;  %7568 = vmatprep.subr.bf16.mxu1 %v18046_v35  ;;  %v8743_v53 = vmul.f32 0.5, %v22757_v52  ;;  %v8744_v37 = vmul.f32 0.5, %v22761_v10  ;;  %v18107_v31 = vcombine.low %v22797_v43, %v22799_v6  ;;  %v18118_v52 = vcombine.high %v430_v38, %v442_v1 }
 0x2ca   :  { %8470 = vmatpush1.bf16.msra.mxu0 %v18035_v22  ;;  %v22123_v8 = vpop.eup %22122  ;;  %v9045_v21 = vadd.f32 1.0, %v22121_v55  ;;  %v18132_v50 = vcombine.high %v437_v51, %v449_v62  ;;  %v18131_v6 = vcombine.low %v437_v51, %v449_v62  ;;  %v526_v51 = vld [vmem:[#allocation5 + $0xd98] sm:$0xff] }
 0x2cb   :  { %8471 = vmatprep.subr.bf16.mxu0 %v18060_v36  ;;  %v22125_v25 = vpop.eup %22124  ;;  %v9046_v41 = vadd.f32 1.0, %v22123_v8  ;;  %v18142_v8 = vcombine.high %v454_v32, %v466_v26 }
 0x2cc   :  { %v22127_v42 = vpop.eup %22126  ;;  %7569 = vmatpush1.bf16.msra.mxu1 %v18045_v56  ;;  %v9069_v7 = vadd.f32 1.0, %v22125_v25  ;;  %v9093_v54 = vmul.f32 %v9045_v21, %v8709_v29  ;;  %v473_v56 = vld [vmem:[#allocation5 + $0xbf0] sm:$0xff] }
 0x2cd   :  { %v22129_v49 = vpop.eup %22128  ;;  %7570 = vmatprep.subr.bf16.mxu1 %v18070_v4  ;;  %v9070_v47 = vadd.f32 1.0, %v22127_v42  ;;  %v9094_v13 = vmul.f32 %v9046_v41, %v8710_v28  ;;  %v18117_v4 = vcombine.low %v430_v38, %v442_v1  ;;  %v18156_v25 = vcombine.high %v461_v19, %v473_v56  ;;  %v497_v29 = vld [vmem:[#allocation5 + $0xcb0] sm:$0xff]  ;;  %v502_v42 = vld [vmem:[#allocation5 + $0xcd8] sm:$0xff] }
 0x2ce   :  { %8472 = vmatpush1.bf16.msra.mxu0 %v18059_v61  ;;  %v22131_v9 = vpop.eup %22130  ;;  %v9117_v15 = vmul.f32 %v9069_v7, %v8733_v30  ;;  %v9055_v63 = vadd.f32 1.0, %v22129_v49  ;;  %v514_v30 = vld [vmem:[#allocation5 + $0xd38] sm:$0xff] }
 0x2cf   :  { %8473 = vmatprep.subr.bf16.mxu0 %v18084_v17  ;;  %v22133_v0 = vpop.eup %22132  ;;  %v9118_v2 = vmul.f32 %v9070_v47, %v8734_v34  ;;  %v9056_v14 = vadd.f32 1.0, %v22131_v9  ;;  %v485_v17 = vld [vmem:[#allocation5 + $0xc50] sm:$0xff]  ;;  %v18190_v1 = vcombine.high %v502_v42, %v514_v30  ;;  %v538_v28 = vld [vmem:[#allocation5 + $0xdf8] sm:$0xff]  ;;  %v18189_v62 = vcombine.low %v502_v42, %v514_v30 }
 0x2d0   :  { %v22135_v11 = vpop.eup %22134  ;;  %7571 = vmatpush1.bf16.msra.mxu1 %v18069_v12  ;;  %v22818_v23 = vpack.c.bf16 %v9117_v15, %v9093_v54  ;;  %v9079_v22 = vadd.f32 1.0, %v22133_v0  ;;  %v9103_v35 = vmul.f32 %v9055_v63, %v8719_v5  ;;  %v478_v12 = vld [vmem:[#allocation5 + $0xc18] sm:$0xff]  ;;  %v18180_v38 = vcombine.high %v485_v17, %v497_v29  ;;  %v521_v5 = vld [vmem:[#allocation5 + $0xd70] sm:$0xff] }
 0x2d1   :  { %7572 = vmatprep.subr.bf16.mxu1 %v18094_v59  ;;  %v22820_v36 = vpack.c.bf16 %v9118_v2, %v9094_v13  ;;  %v9080_v27 = vadd.f32 1.0, %v22135_v11  ;;  %v9104_v10 = vmul.f32 %v9056_v14, %v8720_v20  ;;  %v18141_v59 = vcombine.low %v454_v32, %v466_v26  ;;  %v533_v47 = vld [vmem:[#allocation5 + $0xdd0] sm:$0xff]  ;;  %v550_v15 = vld [vmem:[#allocation5 + $0xe58] sm:$0xff] }
 0x2d2   :  { %8474 = vmatpush1.bf16.msra.mxu0 %v18083_v16  ;;  %v9127_v55 = vmul.f32 %v9079_v22, %v8743_v53  ;;  %v490_v16 = vld [vmem:[#allocation5 + $0xc78] sm:$0xff]  ;;  %v18179_v49 = vcombine.low %v485_v17, %v497_v29  ;;  %v22215_v20 = vld [vmem:[#allocation2] ss:$24 sps:$4 sm:$0xff]   ;;  %v18214_v54 = vcombine.high %v526_v51, %v538_v28  ;;  %v18213_v14 = vcombine.low %v526_v51, %v538_v28 }
 0x2d3   :  { %8475 = vmatprep.subr.bf16.mxu0 %v18108_v45  ;;  %v9128_v61 = vmul.f32 %v9080_v27, %v8744_v37  ;;  %v18166_v41 = vcombine.high %v478_v12, %v490_v16  ;;  %v509_v45 = vld [vmem:[#allocation5 + $0xd10] sm:$0xff]  ;;  %v18165_v7 = vcombine.low %v478_v12, %v490_v16  ;;  %v562_v63 = vld [vmem:[#allocation5 + $0xeb8] sm:$0xff] }
 0x2d4   :  { %7573 = vmatpush1.bf16.msra.mxu1 %v18093_v39  ;;  %v22822_v43 = vpack.c.bf16 %v9127_v55, %v9103_v35  ;;  %v18155_v39 = vcombine.low %v461_v19, %v473_v56  ;;  %v18204_v34 = vcombine.high %v509_v45, %v521_v5  ;;  %v545_v9 = vld [vmem:[#allocation5 + $0xe30] sm:$0xff]  ;;  %v18203_v53 = vcombine.low %v509_v45, %v521_v5  ;;  %v574_v22 = vld [vmem:[#allocation5 + $0xf18] sm:$0xff] }
 0x2d5   :  { %7574 = vmatprep.subr.bf16.mxu1 %v18118_v52  ;;  %v22824_v21 = vpack.c.bf16 %v9128_v61, %v9104_v10  ;;  %v18228_v0 = vcombine.high %v533_v47, %v545_v9  ;;  %v557_v13 = vld [vmem:[#allocation5 + $0xe90] sm:$0xff]  ;;  %v18227_v11 = vcombine.low %v533_v47, %v545_v9  ;;  %v586_v35 = vld [vmem:[#allocation5 + $0xf78] sm:$0xff]  ;;  %v18237_v19 = vcombine.low %v550_v15, %v562_v63 }
 0x2d6   :  { %8476 = vmatpush1.bf16.msra.mxu0 %v18107_v31  ;;  %v569_v2 = vld [vmem:[#allocation5 + $0xef0] sm:$0xff]  ;;  %v18238_v31 = vcombine.high %v550_v15, %v562_v63  ;;  %v18262_v10 = vcombine.high %v574_v22, %v586_v35  ;;  %v610_v55 = vld [vmem:[#allocation5 + $0x1038] sm:$0xff] }
 0x2d7   :  { %8477 = vmatprep.subr.bf16.mxu0 %v18132_v50  ;;  %v22216_v37 = vld [vmem:[#allocation2 + $0xc] ss:$24 sps:$4 sm:$0xff]   ;;  %v18252_v32 = vcombine.high %v557_v13, %v569_v2  ;;  %v18251_v27 = vcombine.low %v557_v13, %v569_v2 }
 0x2d8   :  { %7575 = vmatpush1.bf16.msra.mxu1 %v18117_v4  ;;  %v581_v52 = vld [vmem:[#allocation5 + $0xf50] sm:$0xff]  ;;  %v598_v50 = vld [vmem:[#allocation5 + $0xfd8] sm:$0xff] }
 0x2d9   :  { %7576 = vmatprep.subr.bf16.mxu1 %v18142_v8  ;;  %v593_v26 = vld [vmem:[#allocation5 + $0xfb0] sm:$0xff]  ;;  %v18286_v12 = vcombine.high %v598_v50, %v610_v55  ;;  %v622_v17 = vld [vmem:[#allocation5 + $0x1098] sm:$0xff] }
 0x2da   :  { %8478 = vmatpush1.bf16.msra.mxu0 %v18131_v6  ;;  %v18276_v56 = vcombine.high %v581_v52, %v593_v26  ;;  %v605_v61 = vld [vmem:[#allocation5 + $0x1010] sm:$0xff]  ;;  %v18261_v6 = vcombine.low %v574_v22, %v586_v35  ;;  %v18275_v8 = vcombine.low %v581_v52, %v593_v26  ;;  %v646_v45 = vld [vmem:[#allocation5 + $0x1158] sm:$0xff] }
 0x2db   :  { %8479 = vmatprep.subr.bf16.mxu0 %v18156_v25  ;;  %v617_v4 = vld [vmem:[#allocation5 + $0x1070] sm:$0xff]  ;;  %v634_v25 = vld [vmem:[#allocation5 + $0x10f8] sm:$0xff] }
 0x2dc   :  { %7577 = vmatpush1.bf16.msra.mxu1 %v18141_v59  ;;  %v18300_v16 = vcombine.high %v605_v61, %v617_v4  ;;  %v629_v29 = vld [vmem:[#allocation5 + $0x10d0] sm:$0xff]  ;;  %v18310_v42 = vcombine.high %v622_v17, %v634_v25  ;;  %v682_v47 = vld [vmem:[#allocation5 + $0x1278] sm:$0xff] }
 0x2dd   :  { %7589 = vmatprep.subr.bf16.mxu1 %v18166_v41  ;;  %v641_v59 = vld [vmem:[#allocation5 + $0x1130] sm:$0xff]  ;;  %v18299_v41 = vcombine.low %v605_v61, %v617_v4  ;;  %v694_v63 = vld [vmem:[#allocation5 + $0x12d8] sm:$0xff] }
 0x2de   :  { %8480 = vmatpush1.bf16.msra.mxu0 %v18155_v39  ;;  %v18285_v39 = vcombine.low %v598_v50, %v610_v55  ;;  %v18324_v30 = vcombine.high %v629_v29, %v641_v59  ;;  %v653_v5 = vld [vmem:[#allocation5 + $0x1190] sm:$0xff]  ;;  %v718_v22 = vld [vmem:[#allocation5 + $0x1398] sm:$0xff] }
 0x2df   :  { %8492 = vmatprep.subr.bf16.mxu0 %v18180_v38  ;;  %7579 = vmatmul.mubr.bf16.vlgmr.msra.gmra.mrb[12].mxu1 %v22215_v20  ;;  %v658_v38 = vld [vmem:[#allocation5 + $0x11b8] sm:$0xff]  ;;  %v689_v9 = vld [vmem:[#allocation5 + $0x12b0] sm:$0xff] }
 0x2e0   :  { %7590 = vmatpush1.bf16.msra.mxu1 %v18165_v7  ;;  %7621 = vmatprep.mubr.bf16.mxu1 %v22216_v37  ;;  %v665_v7 = vld [vmem:[#allocation5 + $0x11f0] sm:$0xff]  ;;  %v18334_v51 = vcombine.high %v646_v45, %v658_v38  ;;  %v730_v35 = vld [vmem:[#allocation5 + $0x13f8] sm:$0xff] }
 0x2e1   :  { %8482 = vmatmul.mubr.bf16.vlgmr.msra.gmra.mrb[12].mxu0 %v22215_v20  ;;  %7591 = vmatprep.subr.bf16.mxu1 %v18190_v1  ;;  %v18323_v1 = vcombine.low %v629_v29, %v641_v59  ;;  %v18348_v28 = vcombine.high %v653_v5, %v665_v7  ;;  %v677_v20 = vld [vmem:[#allocation5 + $0x1250] sm:$0xff]  ;;  %v742_v50 = vld [vmem:[#allocation5 + $0x1458] sm:$0xff]  ;;  %v18405_v4 = vcombine.low %v718_v22, %v730_v35 }
 0x2e2   :  { %8493 = vmatpush1.bf16.msra.mxu0 %v18179_v49  ;;  %8524 = vmatprep.mubr.bf16.mxu0 %v22216_v37  ;;  %v18309_v49 = vcombine.low %v622_v17, %v634_v25  ;;  %v18372_v15 = vcombine.high %v677_v20, %v689_v9  ;;  %v701_v13 = vld [vmem:[#allocation5 + $0x1310] sm:$0xff]  ;;  %v778_v17 = vld [vmem:[#allocation5 + $0x1578] sm:$0xff] }
 0x2e3   :  { %8494 = vmatprep.subr.bf16.mxu0 %v18204_v34  ;;  %v670_v34 = vld [vmem:[#allocation5 + $0x1218] sm:$0xff]  ;;  %v713_v2 = vld [vmem:[#allocation5 + $0x1370] sm:$0xff] }
 0x2e4   :  { %7592 = vmatpush1.bf16.msra.mxu1 %v18189_v62  ;;  %v18333_v62 = vcombine.low %v646_v45, %v658_v38  ;;  %v18357_v37 = vcombine.low %v670_v34, %v682_v47  ;;  %v725_v52 = vld [vmem:[#allocation5 + $0x13d0] sm:$0xff]  ;;  %v802_v45 = vld [vmem:[#allocation5 + $0x1638] sm:$0xff] }
 0x2e5   :  { %7593 = vmatprep.subr.bf16.mxu1 %v18214_v54  ;;  %v18358_v54 = vcombine.high %v670_v34, %v682_v47  ;;  %v749_v55 = vld [vmem:[#allocation5 + $0x1490] sm:$0xff]  ;;  %v826_v34 = vld [vmem:[#allocation5 + $0x16f8] sm:$0xff] }
 0x2e6   :  { %8495 = vmatpush1.bf16.msra.mxu0 %v18203_v53  ;;  %v18347_v53 = vcombine.low %v653_v5, %v665_v7  ;;  %v761_v61 = vld [vmem:[#allocation5 + $0x14f0] sm:$0xff] }
 0x2e7   :  { %8496 = vmatprep.subr.bf16.mxu0 %v18228_v0  ;;  %v706_v0 = vld [vmem:[#allocation5 + $0x1338] sm:$0xff]  ;;  %v773_v25 = vld [vmem:[#allocation5 + $0x1550] sm:$0xff] }
 0x2e8   :  { %7594 = vmatpush1.bf16.msra.mxu1 %v18213_v14  ;;  %v18371_v14 = vcombine.low %v677_v20, %v689_v9  ;;  %v18381_v26 = vcombine.low %v694_v63, %v706_v0  ;;  %v785_v29 = vld [vmem:[#allocation5 + $0x15b0] sm:$0xff] }
 0x2e9   :  { %7595 = vmatprep.subr.bf16.mxu1 %v18238_v31  ;;  %v18396_v31 = vcombine.high %v701_v13, %v713_v2  ;;  %v797_v38 = vld [vmem:[#allocation5 + $0x1610] sm:$0xff] }
 0x2ea   :  { %8497 = vmatpush1.bf16.msra.mxu0 %v18227_v11  ;;  %v18382_v11 = vcombine.high %v694_v63, %v706_v0  ;;  %v809_v5 = vld [vmem:[#allocation5 + $0x1670] sm:$0xff]  ;;  %v850_v63 = vld [vmem:[#allocation5 + $0x17b8] sm:$0xff] }
 0x2eb   :  { %8498 = vmatprep.subr.bf16.mxu0 %v18252_v32  ;;  %v737_v32 = vld [vmem:[#allocation5 + $0x1430] sm:$0xff] }
 0x2ec   :  { %7596 = vmatpush1.bf16.msra.mxu1 %v18237_v19  ;;  %v18395_v19 = vcombine.low %v701_v13, %v713_v2  ;;  %v821_v47 = vld [vmem:[#allocation5 + $0x16d0] sm:$0xff] }
 0x2ed   :  { %7597 = vmatprep.subr.bf16.mxu1 %v18262_v10  ;;  %v18420_v10 = vcombine.high %v725_v52, %v737_v32  ;;  %v833_v20 = vld [vmem:[#allocation5 + $0x1730] sm:$0xff] }
 0x2ee   :  { %8499 = vmatpush1.bf16.msra.mxu0 %v18251_v27  ;;  %v18406_v27 = vcombine.high %v718_v22, %v730_v35  ;;  %v845_v0 = vld [vmem:[#allocation5 + $0x1790] sm:$0xff]  ;;  %v874_v22 = vld [vmem:[#allocation5 + $0x1878] sm:$0xff] }
 0x2ef   :  { %8500 = vmatprep.subr.bf16.mxu0 %v18276_v56  ;;  %v754_v56 = vld [vmem:[#allocation5 + $0x14b8] sm:$0xff]  ;;  %v857_v13 = vld [vmem:[#allocation5 + $0x17f0] sm:$0xff] }
 0x2f0   :  { %7598 = vmatpush1.bf16.msra.mxu1 %v18261_v6  ;;  %v18419_v6 = vcombine.low %v725_v52, %v737_v32  ;;  %v18429_v59 = vcombine.low %v742_v50, %v754_v56  ;;  %v869_v35 = vld [vmem:[#allocation5 + $0x1850] sm:$0xff] }
 0x2f1   :  { %7599 = vmatprep.subr.bf16.mxu1 %v18286_v12  ;;  %v18444_v12 = vcombine.high %v749_v55, %v761_v61  ;;  %v881_v52 = vld [vmem:[#allocation5 + $0x18b0] sm:$0xff] }
 0x2f2   :  { %8501 = vmatpush1.bf16.msra.mxu0 %v18275_v8  ;;  %v18430_v8 = vcombine.high %v742_v50, %v754_v56  ;;  %v898_v50 = vld [vmem:[#allocation5 + $0x1938] sm:$0xff]  ;;  %v893_v56 = vld [vmem:[#allocation5 + $0x1910] sm:$0xff] }
 0x2f3   :  { %8502 = vmatprep.subr.bf16.mxu0 %v18300_v16  ;;  %v766_v16 = vld [vmem:[#allocation5 + $0x1518] sm:$0xff] }
 0x2f4   :  { %7600 = vmatpush1.bf16.msra.mxu1 %v18285_v39  ;;  %v18443_v39 = vcombine.low %v749_v55, %v761_v61  ;;  %v18453_v7 = vcombine.low %v766_v16, %v778_v17  ;;  %v905_v55 = vld [vmem:[#allocation5 + $0x1970] sm:$0xff] }
 0x2f5   :  { %7601 = vmatprep.subr.bf16.mxu1 %v18310_v42  ;;  %v18468_v42 = vcombine.high %v773_v25, %v785_v29 }
 0x2f6   :  { %8503 = vmatpush1.bf16.msra.mxu0 %v18299_v41  ;;  %v18454_v41 = vcombine.high %v766_v16, %v778_v17  ;;  %v922_v16 = vld [vmem:[#allocation5 + $0x19f8] sm:$0xff] }
 0x2f7   :  { %8504 = vmatprep.subr.bf16.mxu0 %v18324_v30  ;;  %v790_v30 = vld [vmem:[#allocation5 + $0x15d8] sm:$0xff] }
 0x2f8   :  { %7602 = vmatpush1.bf16.msra.mxu1 %v18309_v49  ;;  %v18467_v49 = vcombine.low %v773_v25, %v785_v29  ;;  %v18477_v9 = vcombine.low %v790_v30, %v802_v45  ;;  %v22217_v17 = vld [vmem:[#allocation2 + $0x8] ss:$24 sps:$4 sm:$0xff]  }
 0x2f9   :  { %7603 = vmatprep.subr.bf16.mxu1 %v18334_v51  ;;  %v18492_v51 = vcombine.high %v797_v38, %v809_v5  ;;  %v917_v25 = vld [vmem:[#allocation5 + $0x19d0] sm:$0xff] }
 0x2fa   :  { %8505 = vmatpush1.bf16.msra.mxu0 %v18323_v1  ;;  %v18478_v1 = vcombine.high %v790_v30, %v802_v45  ;;  %v929_v29 = vld [vmem:[#allocation5 + $0x1a30] sm:$0xff]  ;;  %v934_v30 = vld [vmem:[#allocation5 + $0x1a58] sm:$0xff] }
 0x2fb   :  { %8506 = vmatprep.subr.bf16.mxu0 %v18348_v28  ;;  %v814_v28 = vld [vmem:[#allocation5 + $0x1698] sm:$0xff] }
 0x2fc   :  { %7604 = vmatpush1.bf16.msra.mxu1 %v18333_v62  ;;  %v18491_v62 = vcombine.low %v797_v38, %v809_v5  ;;  %v18501_v2 = vcombine.low %v814_v28, %v826_v34  ;;  %v946_v45 = vld [vmem:[#allocation5 + $0x1ab8] sm:$0xff]  ;;  %v941_v5 = vld [vmem:[#allocation5 + $0x1a90] sm:$0xff] }
 0x2fd   :  { %7605 = vmatprep.subr.bf16.mxu1 %v18358_v54  ;;  %v18516_v54 = vcombine.high %v821_v47, %v833_v20  ;;  %v22218_v38 = vld [vmem:[#allocation2 + $0x14] ss:$24 sps:$4 sm:$0xff]  }
 0x2fe   :  { %8507 = vmatpush1.bf16.msra.mxu0 %v18347_v53  ;;  %v18502_v53 = vcombine.high %v814_v28, %v826_v34  ;;  %v958_v34 = vld [vmem:[#allocation5 + $0x1b18] sm:$0xff] }
 0x2ff   :  { %8508 = vmatprep.subr.bf16.mxu0 %v18372_v15  ;;  %v838_v15 = vld [vmem:[#allocation5 + $0x1758] sm:$0xff] }
 0x300   :  { %7606 = vmatpush1.bf16.msra.mxu1 %v18357_v37  ;;  %v18515_v37 = vcombine.low %v821_v47, %v833_v20  ;;  %v18525_v32 = vcombine.low %v838_v15, %v850_v63  ;;  %v970_v47 = vld [vmem:[#allocation5 + $0x1b78] sm:$0xff]  ;;  %v965_v20 = vld [vmem:[#allocation5 + $0x1b50] sm:$0xff] }
 0x301   :  { %7607 = vmatprep.subr.bf16.mxu1 %v18382_v11  ;;  %v18540_v11 = vcombine.high %v845_v0, %v857_v13 }
 0x302   :  { %8509 = vmatpush1.bf16.msra.mxu0 %v18371_v14  ;;  %v18526_v14 = vcombine.high %v838_v15, %v850_v63  ;;  %v982_v63 = vld [vmem:[#allocation5 + $0x1bd8] sm:$0xff] }
 0x303   :  { %8510 = vmatprep.subr.bf16.mxu0 %v18396_v31  ;;  %v862_v31 = vld [vmem:[#allocation5 + $0x1818] sm:$0xff] }
 0x304   :  { %7608 = vmatpush1.bf16.msra.mxu1 %v18381_v26  ;;  %v18539_v26 = vcombine.low %v845_v0, %v857_v13  ;;  %v18549_v61 = vcombine.low %v862_v31, %v874_v22  ;;  %v994_v0 = vld [vmem:[#allocation5 + $0x1c38] sm:$0xff]  ;;  %v989_v13 = vld [vmem:[#allocation5 + $0x1c10] sm:$0xff] }
 0x305   :  { %7609 = vmatprep.subr.bf16.mxu1 %v18406_v27  ;;  %v18564_v27 = vcombine.high %v869_v35, %v881_v52 }
 0x306   :  { %8511 = vmatpush1.bf16.msra.mxu0 %v18395_v19  ;;  %v18550_v19 = vcombine.high %v862_v31, %v874_v22  ;;  %v1006_v22 = vld [vmem:[#allocation5 + $0x1c98] sm:$0xff] }
 0x307   :  { %8512 = vmatprep.subr.bf16.mxu0 %v18420_v10  ;;  %v886_v10 = vld [vmem:[#allocation5 + $0x18d8] sm:$0xff] }
 0x308   :  { %7610 = vmatpush1.bf16.msra.mxu1 %v18405_v4  ;;  %v18563_v4 = vcombine.low %v869_v35, %v881_v52  ;;  %v1018_v35 = vld [vmem:[#allocation5 + $0x1cf8] sm:$0xff]  ;;  %v1013_v52 = vld [vmem:[#allocation5 + $0x1cd0] sm:$0xff] }
 0x309   :  { %7611 = vmatprep.subr.bf16.mxu1 %v18430_v8  ;;  %v18588_v8 = vcombine.high %v893_v56, %v905_v55 }
 0x30a   :  { %8513 = vmatpush1.bf16.msra.mxu0 %v18419_v6  ;;  %v18574_v6 = vcombine.high %v886_v10, %v898_v50 }
 0x30b   :  { %8514 = vmatprep.subr.bf16.mxu0 %v18444_v12  ;;  %v910_v12 = vld [vmem:[#allocation5 + $0x1998] sm:$0xff] }
 0x30c   :  { %7612 = vmatpush1.bf16.msra.mxu1 %v18429_v59  ;;  %v18573_v59 = vcombine.low %v886_v10, %v898_v50  ;;  %v1030_v50 = vld [vmem:[#allocation5 + $0x1d58] sm:$0xff] }
 0x30d   :  { %7613 = vmatprep.subr.bf16.mxu1 %v18454_v41  ;;  %v18598_v41 = vcombine.high %v910_v12, %v922_v16 }
 0x30e   :  { %8515 = vmatpush1.bf16.msra.mxu0 %v18443_v39  ;;  %v18587_v39 = vcombine.low %v893_v56, %v905_v55  ;;  %v1042_v56 = vld [vmem:[#allocation5 + $0x1db8] sm:$0xff]  ;;  %v1037_v55 = vld [vmem:[#allocation5 + $0x1d90] sm:$0xff] }
 0x30f   :  { %8516 = vmatprep.subr.bf16.mxu0 %v18468_v42  ;;  %v18612_v42 = vcombine.high %v917_v25, %v929_v29 }
 0x310   :  { %7614 = vmatpush1.bf16.msra.mxu1 %v18453_v7  ;;  %v953_v7 = vld [vmem:[#allocation5 + $0x1af0] sm:$0xff] }
 0x311   :  { %7615 = vmatprep.subr.bf16.mxu1 %v18478_v1  ;;  %v18611_v1 = vcombine.low %v917_v25, %v929_v29  ;;  %v18636_v28 = vcombine.high %v941_v5, %v953_v7  ;;  %v1061_v25 = vld [vmem:[#allocation5 + $0x1e50] sm:$0xff] }
 0x312   :  { %8517 = vmatpush1.bf16.msra.mxu0 %v18467_v49  ;;  %v18597_v49 = vcombine.low %v910_v12, %v922_v16  ;;  %v1054_v16 = vld [vmem:[#allocation5 + $0x1e18] sm:$0xff]  ;;  %v1073_v29 = vld [vmem:[#allocation5 + $0x1eb0] sm:$0xff] }
 0x313   :  { %8518 = vmatprep.subr.bf16.mxu0 %v18492_v51  ;;  %v18622_v51 = vcombine.high %v934_v30, %v946_v45 }
 0x314   :  { %7616 = vmatpush1.bf16.msra.mxu1 %v18477_v9  ;;  %v977_v9 = vld [vmem:[#allocation5 + $0x1bb0] sm:$0xff] }
 0x315   :  { %7617 = vmatprep.subr.bf16.mxu1 %v18502_v53  ;;  %v18635_v53 = vcombine.low %v941_v5, %v953_v7  ;;  %v18660_v15 = vcombine.high %v965_v20, %v977_v9  ;;  %v1097_v5 = vld [vmem:[#allocation5 + $0x1f70] sm:$0xff] }
 0x316   :  { %8519 = vmatpush1.bf16.msra.mxu0 %v18491_v62  ;;  %v18621_v62 = vcombine.low %v934_v30, %v946_v45  ;;  %v1078_v30 = vld [vmem:[#allocation5 + $0x1ed8] sm:$0xff] }
 0x317   :  { %8520 = vmatprep.subr.bf16.mxu0 %v18516_v54  ;;  %v18646_v54 = vcombine.high %v958_v34, %v970_v47  ;;  %v1090_v45 = vld [vmem:[#allocation5 + $0x1f38] sm:$0xff] }
 0x318   :  { %7618 = vmatpush1.bf16.msra.mxu1 %v18501_v2  ;;  %v1001_v2 = vld [vmem:[#allocation5 + $0x1c70] sm:$0xff] }
 0x319   :  { %7619 = vmatprep.subr.bf16.mxu1 %v18526_v14  ;;  %v18659_v14 = vcombine.low %v965_v20, %v977_v9  ;;  %v18684_v31 = vcombine.high %v989_v13, %v1001_v2  ;;  %v1121_v20 = vld [vmem:[#allocation5 + $0x2030] sm:$0xff]  ;;  %v18765_v9 = vcombine.low %v1078_v30, %v1090_v45 }
 0x31a   :  { %8521 = vmatpush1.bf16.msra.mxu0 %v18515_v37  ;;  %v18645_v37 = vcombine.low %v958_v34, %v970_v47  ;;  %v1114_v34 = vld [vmem:[#allocation5 + $0x1ff8] sm:$0xff]  ;;  %v1109_v47 = vld [vmem:[#allocation5 + $0x1fd0] sm:$0xff] }
 0x31b   :  { %8522 = vmatprep.subr.bf16.mxu0 %v18540_v11  ;;  %v18670_v11 = vcombine.high %v982_v63, %v994_v0 }
 0x31c   :  { %7620 = vmatpush1.bf16.msra.mxu1 %v18525_v32  ;;  %v1025_v32 = vld [vmem:[#allocation5 + $0x1d30] sm:$0xff] }
 0x31d   :  { %7632 = vmatprep.subr.bf16.mxu1 %v18550_v19  ;;  %v18683_v19 = vcombine.low %v989_v13, %v1001_v2  ;;  %v18708_v10 = vcombine.high %v1013_v52, %v1025_v32  ;;  %v1145_v13 = vld [vmem:[#allocation5 + $0x20f0] sm:$0xff] }
 0x31e   :  { %8523 = vmatpush1.bf16.msra.mxu0 %v18539_v26  ;;  %v18669_v26 = vcombine.low %v982_v63, %v994_v0  ;;  %v1138_v63 = vld [vmem:[#allocation5 + $0x20b8] sm:$0xff]  ;;  %v1133_v0 = vld [vmem:[#allocation5 + $0x2090] sm:$0xff] }
 0x31f   :  { %8535 = vmatprep.subr.bf16.mxu0 %v18564_v27  ;;  %7622 = vmatmul.mubr.bf16.vlgmr.msra.gmra.mrb[12].mxu1 %v22217_v17  ;;  %v18694_v27 = vcombine.high %v1006_v22, %v1018_v35 }
 0x320   :  { %7633 = vmatpush1.bf16.msra.mxu1 %v18549_v61  ;;  %7664 = vmatprep.mubr.bf16.mxu1 %v22218_v38  ;;  %v1049_v61 = vld [vmem:[#allocation5 + $0x1df0] sm:$0xff] }
 0x321   :  { %8525 = vmatmul.mubr.bf16.vlgmr.msra.gmra.mrb[12].mxu0 %v22217_v17  ;;  %7634 = vmatprep.subr.bf16.mxu1 %v18574_v6  ;;  %v18707_v6 = vcombine.low %v1013_v52, %v1025_v32  ;;  %v18732_v12 = vcombine.high %v1037_v55, %v1049_v61  ;;  %v1066_v17 = vld [vmem:[#allocation5 + $0x1e78] sm:$0xff]  ;;  %v1169_v52 = vld [vmem:[#allocation5 + $0x21b0] sm:$0xff] }
 0x322   :  { %8536 = vmatpush1.bf16.msra.mxu0 %v18563_v4  ;;  %8567 = vmatprep.mubr.bf16.mxu0 %v22218_v38  ;;  %v18693_v4 = vcombine.low %v1006_v22, %v1018_v35  ;;  %v1085_v38 = vld [vmem:[#allocation5 + $0x1f10] sm:$0xff]  ;;  %v18741_v7 = vcombine.low %v1054_v16, %v1066_v17  ;;  %v1162_v22 = vld [vmem:[#allocation5 + $0x2178] sm:$0xff] }
 0x323   :  { %8537 = vmatprep.subr.bf16.mxu0 %v18588_v8  ;;  %v18718_v8 = vcombine.high %v1030_v50, %v1042_v56  ;;  %v1157_v35 = vld [vmem:[#allocation5 + $0x2150] sm:$0xff] }
 0x324   :  { %7635 = vmatpush1.bf16.msra.mxu1 %v18573_v59  ;;  %v18717_v59 = vcombine.low %v1030_v50, %v1042_v56  ;;  %v1186_v50 = vld [vmem:[#allocation5 + $0x2238] sm:$0xff]  ;;  %v1181_v56 = vld [vmem:[#allocation5 + $0x2210] sm:$0xff] }
 0x325   :  { %7636 = vmatprep.subr.bf16.mxu1 %v18598_v41  ;;  %v18742_v41 = vcombine.high %v1054_v16, %v1066_v17  ;;  %v1210_v16 = vld [vmem:[#allocation5 + $0x22f8] sm:$0xff]  ;;  %v1205_v17 = vld [vmem:[#allocation5 + $0x22d0] sm:$0xff] }
 0x326   :  { %8538 = vmatpush1.bf16.msra.mxu0 %v18587_v39  ;;  %v18731_v39 = vcombine.low %v1037_v55, %v1049_v61  ;;  %v1193_v55 = vld [vmem:[#allocation5 + $0x2270] sm:$0xff] }
 0x327   :  { %8539 = vmatprep.subr.bf16.mxu0 %v18612_v42  ;;  %v18756_v42 = vcombine.high %v1061_v25, %v1073_v29 }
 0x328   :  { %7637 = vmatpush1.bf16.msra.mxu1 %v18597_v49  ;;  %v18755_v49 = vcombine.low %v1061_v25, %v1073_v29  ;;  %v1217_v25 = vld [vmem:[#allocation5 + $0x2330] sm:$0xff] }
 0x329   :  { %7638 = vmatprep.subr.bf16.mxu1 %v18622_v51  ;;  %v18780_v51 = vcombine.high %v1085_v38, %v1097_v5 }
 0x32a   :  { %8540 = vmatpush1.bf16.msra.mxu0 %v18611_v1  ;;  %v18766_v1 = vcombine.high %v1078_v30, %v1090_v45  ;;  %v1234_v30 = vld [vmem:[#allocation5 + $0x23b8] sm:$0xff]  ;;  %v1229_v45 = vld [vmem:[#allocation5 + $0x2390] sm:$0xff] }
 0x32b   :  { %8541 = vmatprep.subr.bf16.mxu0 %v18636_v28  ;;  %v1102_v28 = vld [vmem:[#allocation5 + $0x1f98] sm:$0xff] }
 0x32c   :  { %7639 = vmatpush1.bf16.msra.mxu1 %v18621_v62  ;;  %v18779_v62 = vcombine.low %v1085_v38, %v1097_v5  ;;  %v18789_v2 = vcombine.low %v1102_v28, %v1114_v34  ;;  %v1241_v38 = vld [vmem:[#allocation5 + $0x23f0] sm:$0xff] }
 0x32d   :  { %7640 = vmatprep.subr.bf16.mxu1 %v18646_v54  ;;  %v18804_v54 = vcombine.high %v1109_v47, %v1121_v20 }
 0x32e   :  { %8542 = vmatpush1.bf16.msra.mxu0 %v18635_v53  ;;  %v18790_v53 = vcombine.high %v1102_v28, %v1114_v34  ;;  %v108_v28 = vld [vmem:[#allocation5 + $0x88] sm:$0xff] }
 0x32f   :  { %8543 = vmatprep.subr.bf16.mxu0 %v18660_v15  ;;  %v1126_v15 = vld [vmem:[#allocation5 + $0x2058] sm:$0xff] }
 0x330   :  { %7641 = vmatpush1.bf16.msra.mxu1 %v18645_v37  ;;  %v18803_v37 = vcombine.low %v1109_v47, %v1121_v20  ;;  %v18813_v32 = vcombine.low %v1126_v15, %v1138_v63  ;;  %v18923_v47 = vcombine.low %v1229_v45, %v1241_v38 }
 0x331   :  { %7642 = vmatprep.subr.bf16.mxu1 %v18670_v11  ;;  %v18828_v11 = vcombine.high %v1133_v0, %v1145_v13 }
 0x332   :  { %8544 = vmatpush1.bf16.msra.mxu0 %v18659_v14  ;;  %v18814_v14 = vcombine.high %v1126_v15, %v1138_v63  ;;  %v20376_v15 = vld [vmem:[#allocation8] ss:$24 sps:$4 sm:$0xff]  }
 0x333   :  { %8545 = vmatprep.subr.bf16.mxu0 %v18684_v31  ;;  %v1150_v31 = vld [vmem:[#allocation5 + $0x2118] sm:$0xff] }
 0x334   :  { %7643 = vmatpush1.bf16.msra.mxu1 %v18669_v26  ;;  %v18827_v26 = vcombine.low %v1133_v0, %v1145_v13  ;;  %v18837_v61 = vcombine.low %v1150_v31, %v1162_v22  ;;  %v20381_v0 = vld [vmem:[#allocation8 + $0x34] ss:$24 sps:$4 sm:$0xff]  }
 0x335   :  { %7644 = vmatprep.subr.bf16.mxu1 %v18694_v27  ;;  %v18852_v27 = vcombine.high %v1157_v35, %v1169_v52  ;;  %v144_v13 = vld [vmem:[#allocation5 + $0x1a8] sm:$0xff] }
 0x336   :  { %8546 = vmatpush1.bf16.msra.mxu0 %v18683_v19  ;;  %v18838_v19 = vcombine.high %v1150_v31, %v1162_v22  ;;  %v20384_v22 = vld [vmem:[#allocation8 + $0x64] ss:$24 sps:$4 sm:$0xff]  }
 0x337   :  { %8547 = vmatprep.subr.bf16.mxu0 %v18708_v10  ;;  %v1174_v10 = vld [vmem:[#allocation5 + $0x21d8] sm:$0xff] }
 0x338   :  { %7645 = vmatpush1.bf16.msra.mxu1 %v18693_v4  ;;  %v18851_v4 = vcombine.low %v1157_v35, %v1169_v52  ;;  %v18861_v29 = vcombine.low %v1174_v10, %v1186_v50  ;;  %v168_v35 = vld [vmem:[#allocation5 + $0x268] sm:$0xff] }
 0x339   :  { %7646 = vmatprep.subr.bf16.mxu1 %v18718_v8  ;;  %v18876_v8 = vcombine.high %v1181_v56, %v1193_v55  ;;  %v180_v52 = vld [vmem:[#allocation5 + $0x2c8] sm:$0xff] }
 0x33a   :  { %8548 = vmatpush1.bf16.msra.mxu0 %v18707_v6  ;;  %v18862_v6 = vcombine.high %v1174_v10, %v1186_v50  ;;  %v20387_v10 = vld [vmem:[#allocation8 + $0x94] ss:$24 sps:$4 sm:$0xff]  }
 0x33b   :  { %8549 = vmatprep.subr.bf16.mxu0 %v18732_v12  ;;  %v1198_v12 = vld [vmem:[#allocation5 + $0x2298] sm:$0xff]  ;;  %v192_v50 = vld [vmem:[#allocation5 + $0x328] sm:$0xff] }
 0x33c   :  { %7647 = vmatpush1.bf16.msra.mxu1 %v18717_v59  ;;  %v18875_v59 = vcombine.low %v1181_v56, %v1193_v55  ;;  %v18885_v5 = vcombine.low %v1198_v12, %v1210_v16  ;;  %v204_v56 = vld [vmem:[#allocation5 + $0x388] sm:$0xff]  ;;  %v17857_v55 = vcombine.low %v168_v35, %v180_v52 }
 0x33d   :  { %7648 = vmatprep.subr.bf16.mxu1 %v18742_v41  ;;  %v18900_v41 = vcombine.high %v1205_v17, %v1217_v25 }
 0x33e   :  { %8550 = vmatpush1.bf16.msra.mxu0 %v18731_v39  ;;  %v18886_v39 = vcombine.high %v1198_v12, %v1210_v16  ;;  %v228_v12 = vld [vmem:[#allocation5 + $0x448] sm:$0xff]  ;;  %v17881_v16 = vcombine.low %v192_v50, %v204_v56 }
 0x33f   :  { %8551 = vmatprep.subr.bf16.mxu0 %v18756_v42  ;;  %v1222_v42 = vld [vmem:[#allocation5 + $0x2358] sm:$0xff] }
 0x340   :  { %7649 = vmatpush1.bf16.msra.mxu1 %v18741_v7  ;;  %v18899_v7 = vcombine.low %v1205_v17, %v1217_v25  ;;  %v18909_v34 = vcombine.low %v1222_v42, %v1234_v30  ;;  %v20388_v17 = vld [vmem:[#allocation8 + $0xc0] ss:$24 sps:$4 sm:$0xff]  }
 0x341   :  { %7650 = vmatprep.subr.bf16.mxu1 %v18766_v1  ;;  %v18924_v1 = vcombine.high %v1229_v45, %v1241_v38 }
 0x342   :  { %8552 = vmatpush1.bf16.msra.mxu0 %v18755_v49  ;;  %v18910_v49 = vcombine.high %v1222_v42, %v1234_v30  ;;  %v22221_v42 = vld [vmem:[#allocation7] sm:$0xff] }
 0x343   :  { %8553 = vmatprep.subr.bf16.mxu0 %v18780_v51  ;;  %v96_v51 = vld [vmem:[#allocation5 + $0x28] sm:$0xff]  ;;  %v1268_v30 = vrot.slane %v22221_v42, %v22665_v40  ;;  %v1272_v45 = vrot.slane %v22221_v42, %v22676_v46 }
 0x344   :  { %7651 = vmatpush1.bf16.msra.mxu1 %v18765_v9  ;;  %v17786_v20 = vcombine.high %v96_v51, %v108_v28  ;;  %v20378_v9 = vld [vmem:[#allocation8 + $0x4] ss:$24 sps:$4 sm:$0xff]  }
 0x345   :  { %7652 = vmatprep.subr.bf16.mxu1 %v18790_v53  ;;  %v132_v53 = vld [vmem:[#allocation5 + $0x148] sm:$0xff] }
 0x346   :  { %8554 = vmatpush1.bf16.msra.mxu0 %v18779_v62  ;;  %v120_v62 = vld [vmem:[#allocation5 + $0xe8] sm:$0xff] }
 0x347   :  { %8555 = vmatprep.subr.bf16.mxu0 %v18804_v54  ;;  %v17785_v54 = vcombine.low %v96_v51, %v108_v28  ;;  %v17810_v63 = vcombine.high %v120_v62, %v132_v53  ;;  %v22832_v51 = vld [vmem:[#allocation5 + $0x5c8] sm:$0xff] }
 0x348   :  { %7653 = vmatpush1.bf16.msra.mxu1 %v18789_v2  ;;  %v156_v2 = vld [vmem:[#allocation5 + $0x208] sm:$0xff] }
 0x349   :  { %7654 = vmatprep.subr.bf16.mxu1 %v18814_v14  ;;  %v17809_v14 = vcombine.low %v120_v62, %v132_v53  ;;  %v17834_v31 = vcombine.high %v144_v13, %v156_v2  ;;  %v22837_v53 = vld [vmem:[#allocation5 + $0x628] sm:$0xff] }
 0x34a   :  { %8556 = vmatpush1.bf16.msra.mxu0 %v18803_v37  ;;  %v22219_v37 = vld [vmem:[#allocation2 + $0x10] ss:$24 sps:$4 sm:$0xff]  }
 0x34b   :  { %8557 = vmatprep.subr.bf16.mxu0 %v18828_v11  ;;  %v20379_v11 = vld [vmem:[#allocation8 + $0x30] ss:$24 sps:$4 sm:$0xff]  }
 0x34c   :  { %7655 = vmatpush1.bf16.msra.mxu1 %v18813_v32  ;;  %v22220_v32 = vld [vmem:[#allocation2 + $0x4] ss:$24 sps:$4 sm:$0xff]  }
 0x34d   :  { %7656 = vmatprep.subr.bf16.mxu1 %v18838_v19  ;;  %v20382_v19 = vld [vmem:[#allocation8 + $0x60] ss:$24 sps:$4 sm:$0xff]  }
 0x34e   :  { %8558 = vmatpush1.bf16.msra.mxu0 %v18827_v26  ;;  %v17833_v26 = vcombine.low %v144_v13, %v156_v2 }
 0x34f   :  { %8559 = vmatprep.subr.bf16.mxu0 %v18852_v27  ;;  %v17858_v27 = vcombine.high %v168_v35, %v180_v52  ;;  %v20394_v35 = vld [vmem:[#allocation8 + $0x120] ss:$24 sps:$4 sm:$0xff]  }
 0x350   :  { %7657 = vmatpush1.bf16.msra.mxu1 %v18837_v61  ;;  %v20385_v61 = vld [vmem:[#allocation8 + $0x90] ss:$24 sps:$4 sm:$0xff]  }
 0x351   :  { %7658 = vmatprep.subr.bf16.mxu1 %v18862_v6  ;;  %v20390_v6 = vld [vmem:[#allocation8 + $0xc4] ss:$24 sps:$4 sm:$0xff]  }
 0x352   :  { %8560 = vmatpush1.bf16.msra.mxu0 %v18851_v4  ;;  %v17882_v4 = vcombine.high %v192_v50, %v204_v56 }
 0x353   :  { %8561 = vmatprep.subr.bf16.mxu0 %v18876_v8  ;;  %v216_v8 = vld [vmem:[#allocation5 + $0x3e8] sm:$0xff] }
 0x354   :  { %7659 = vmatpush1.bf16.msra.mxu1 %v18861_v29  ;;  %v17906_v25 = vcombine.high %v216_v8, %v228_v12  ;;  %v1245_v29 = vld [vmem:[#allocation7 + $0x10] sm:$0xff]  ;;  %v17905_v38 = vcombine.low %v216_v8, %v228_v12  ;;  %v22870_v8 = vld [vmem:[#allocation5 + $0x748] sm:$0xff] }
 0x355   :  { %7660 = vmatprep.subr.bf16.mxu1 %v18886_v39  ;;  %v240_v39 = vld [vmem:[#allocation5 + $0x4a8] sm:$0xff]  ;;  %v1320_v28 = vrot.slane %v1245_v29, %v22492_v60 }
 0x356   :  { %8562 = vmatpush1.bf16.msra.mxu0 %v18875_v59  ;;  %v20393_v59 = vld [vmem:[#allocation8 + $0xf4] ss:$24 sps:$4 sm:$0xff]  }
 0x357   :  { %8563 = vmatprep.subr.bf16.mxu0 %v18900_v41  ;;  %v252_v41 = vld [vmem:[#allocation5 + $0x508] sm:$0xff] }
 0x358   :  { %7661 = vmatpush1.bf16.msra.mxu1 %v18885_v5  ;;  %v1316_v5 = vrot.slane %v1245_v29, %v22489_v58  ;;  %v17929_v62 = vcombine.low %v240_v39, %v252_v41 }
 0x359   :  { %7662 = vmatprep.subr.bf16.mxu1 %v18910_v49  ;;  %v17930_v49 = vcombine.high %v240_v39, %v252_v41  ;;  %v20397_v41 = vld [vmem:[#allocation8 + $0x150] ss:$24 sps:$4 sm:$0xff]  }
 0x35a   :  { %8564 = vmatpush1.bf16.msra.mxu0 %v18899_v7  ;;  %v20391_v7 = vld [vmem:[#allocation8 + $0xf0] ss:$24 sps:$4 sm:$0xff]  }
 0x35b   :  { %8565 = vmatprep.subr.bf16.mxu0 %v18924_v1  ;;  %v22830_v1 = vld [vmem:[#allocation5 + $0x568] sm:$0xff] }
 0x35c   :  { %7663 = vmatpush1.bf16.msra.mxu1 %v18909_v34  ;;  %v17953_v13 = vcombine.low %v22830_v1, %v22832_v51  ;;  %v17954_v2 = vcombine.high %v22830_v1, %v22832_v51 }
 0x35d   :  { %7804 = vmatprep.subr.bf16.mxu1 %v17786_v20 }
 0x35e   :  { %8566 = vmatpush1.bf16.msra.mxu0 %v18923_v47  ;;  %v20396_v47 = vld [vmem:[#allocation8 + $0x124] ss:$24 sps:$4 sm:$0xff]  }
 0x35f   :  { %16075 = vmatprep.subr.bf16.mxu0 %v20378_v9  ;;  %7665 = vmatmul.mubr.bf16.vlgmr.msra.gmra.mrb[12].mxu1 %v22219_v37 }
 0x360   :  { %7805 = vmatpush1.bf16.msra.mxu1 %v17785_v54  ;;  %7836 = vmatprep.mubr.bf16.mxu1 %v22220_v32  ;;  %v22839_v54 = vld [vmem:[#allocation5 + $0x688] sm:$0xff] }
 0x361   :  { %8568 = vmatmul.mubr.bf16.vlgmr.msra.gmra.mrb[12].mxu0 %v22219_v37  ;;  %7806 = vmatprep.subr.bf16.mxu1 %v17810_v63 }
 0x362   :  { %16076 = vmatpush1.bf16.msra.mxu0 %v20376_v15  ;;  %16107 = vmatprep.mubr.bf16.mxu0 %v22646_v18 }
 0x363   :  { %16077 = vmatprep.subr.bf16.mxu0 %v20381_v0 }
 0x364   :  { %7807 = vmatpush1.bf16.msra.mxu1 %v17809_v14 }
 0x365   :  { %7808 = vmatprep.subr.bf16.mxu1 %v17834_v31 }
 0x366   :  { %16078 = vmatpush1.bf16.msra.mxu0 %v20379_v11 }
 0x367   :  { %16079 = vmatprep.subr.bf16.mxu0 %v20384_v22 }
 0x368   :  { %7809 = vmatpush1.bf16.msra.mxu1 %v17833_v26 }
 0x369   :  { %7810 = vmatprep.subr.bf16.mxu1 %v17858_v27  ;;  %v20399_v27 = vld [vmem:[#allocation8 + $0x154] ss:$24 sps:$4 sm:$0xff]  }
 0x36a   :  { %16080 = vmatpush1.bf16.msra.mxu0 %v20382_v19 }
 0x36b   :  { %16081 = vmatprep.subr.bf16.mxu0 %v20387_v10  ;;  %v17977_v10 = vcombine.low %v22837_v53, %v22839_v54 }
 0x36c   :  { %7811 = vmatpush1.bf16.msra.mxu1 %v17857_v55 }
 0x36d   :  { %7812 = vmatprep.subr.bf16.mxu1 %v17882_v4  ;;  %v17978_v4 = vcombine.high %v22837_v53, %v22839_v54 }
 0x36e   :  { %16082 = vmatpush1.bf16.msra.mxu0 %v20385_v61 }
 0x36f   :  { %16083 = vmatprep.subr.bf16.mxu0 %v20390_v6  ;;  %v22868_v6 = vld [vmem:[#allocation5 + $0x6e8] sm:$0xff] }
 0x370   :  { %7813 = vmatpush1.bf16.msra.mxu1 %v17881_v16 }
 0x371   :  { %7814 = vmatprep.subr.bf16.mxu1 %v17906_v25 }
 0x372   :  { %16084 = vmatpush1.bf16.msra.mxu0 %v20388_v17  ;;  %v7537_v34 = vpop.f32.mrb[8].mxu1 }
 0x373   :  { %16085 = vmatprep.subr.bf16.mxu0 %v20393_v59  ;;  %v22835_v20 = vadd.f32 %v7537_v34, %v1268_v30  ;;  %v7539_v9 = vpop.f32.mrb[9].mxu1 }
 0x374   :  { %v8311_v15 = vpop.f32.mrb[8].mxu0  ;;  %v22841_v63 = vadd.f32 %v7539_v9, %v1272_v45  ;;  %v7541_v0 = vpop.f32.mrb[10].mxu1  ;;  %7815 = vmatpush1.bf16.msra.mxu1 %v17905_v38 }
 0x375   :  { %v22847_v37 = vadd.f32 %v8311_v15, %v1316_v5  ;;  %v8313_v14 = vpop.f32.mrb[9].mxu0  ;;  %v8759_v11 = vmul.f32 %v22835_v20, %v22835_v20  ;;  %v22851_v31 = vadd.f32 %v7541_v0, %v1268_v30  ;;  %v7543_v22 = vpop.f32.mrb[11].mxu1  ;;  %7816 = vmatprep.subr.bf16.mxu1 %v17930_v49  ;;  %v18002_v49 = vcombine.high %v22868_v6, %v22870_v8  ;;  %v20400_v0 = vld [vmem:[#allocation8 + $0x180] ss:$24 sps:$4 sm:$0xff]  }
 0x376   :  { %16086 = vmatpush1.bf16.msra.mxu0 %v20391_v7  ;;  %v22853_v52 = vadd.f32 %v8313_v14, %v1320_v28  ;;  %v8315_v32 = vpop.f32.mrb[10].mxu0  ;;  %v8760_v26 = vmul.f32 %v22841_v63, %v22841_v63  ;;  %v22857_v19 = vadd.f32 %v7543_v22, %v1272_v45  ;;  %v20402_v7 = vld [vmem:[#allocation8 + $0x184] ss:$24 sps:$4 sm:$0xff]  }
 0x377   :  { %16087 = vmatprep.subr.bf16.mxu0 %v20396_v47  ;;  %v8771_v50 = vmul.f32 %v22847_v37, %v22847_v37  ;;  %v8317_v56 = vpop.f32.mrb[11].mxu0  ;;  %v8807_v55 = vmul.f32 %v22835_v20, %v8759_v11  ;;  %v8783_v61 = vmul.f32 %v22851_v31, %v22851_v31  ;;  %v22878_v29 = vadd.f32 %v8315_v32, %v1316_v5  ;;  %v336_v32 = vld [vmem:[#allocation5 + $0x7a8] sm:$0xff] }
 0x378   :  { %v8772_v12 = vmul.f32 %v22853_v52, %v22853_v52  ;;  %v8808_v16 = vmul.f32 %v22841_v63, %v8760_v26  ;;  %v8784_v17 = vmul.f32 %v22857_v19, %v22857_v19  ;;  %7817 = vmatpush1.bf16.msra.mxu1 %v17929_v62  ;;  %v22882_v30 = vadd.f32 %v8317_v56, %v1320_v28  ;;  %v348_v26 = vld [vmem:[#allocation5 + $0x808] sm:$0xff] }
 0x379   :  { %v8819_v25 = vmul.f32 %v22847_v37, %v8771_v50  ;;  %v8855_v59 = vmul.f32 0.044715, %v8807_v55  ;;  %v8831_v39 = vmul.f32 %v22851_v31, %v8783_v61  ;;  %7818 = vmatprep.subr.bf16.mxu1 %v17954_v2  ;;  %v8795_v47 = vmul.f32 %v22878_v29, %v22878_v29 }
 0x37a   :  { %16088 = vmatpush1.bf16.msra.mxu0 %v20394_v35  ;;  %v8820_v42 = vmul.f32 %v22853_v52, %v8772_v12  ;;  %v8856_v45 = vmul.f32 0.044715, %v8808_v16  ;;  %v8832_v38 = vmul.f32 %v22857_v19, %v8784_v17  ;;  %v8796_v53 = vmul.f32 %v22882_v30, %v22882_v30  ;;  %v20405_v35 = vld [vmem:[#allocation8 + $0x1b4] ss:$24 sps:$4 sm:$0xff]   ;;  %v20403_v16 = vld [vmem:[#allocation8 + $0x1b0] ss:$24 sps:$4 sm:$0xff]  }
 0x37b   :  { %16089 = vmatprep.subr.bf16.mxu0 %v20399_v27  ;;  %v8867_v5 = vmul.f32 0.044715, %v8819_v25  ;;  %v8903_v1 = vadd.f32 %v22835_v20, %v8855_v59  ;;  %v8879_v51 = vmul.f32 0.044715, %v8831_v39  ;;  %v8843_v14 = vmul.f32 %v22878_v29, %v8795_v47  ;;  %v360_v25 = vld [vmem:[#allocation5 + $0x868] sm:$0xff] }
 0x37c   :  { %v8868_v34 = vmul.f32 0.044715, %v8820_v42  ;;  %v8904_v9 = vadd.f32 %v22841_v63, %v8856_v45  ;;  %v8880_v28 = vmul.f32 0.044715, %v8832_v38  ;;  %7819 = vmatpush1.bf16.msra.mxu1 %v17953_v13  ;;  %v18001_v13 = vcombine.low %v22868_v6, %v22870_v8  ;;  %v20408_v8 = vld [vmem:[#allocation8 + $0x1e4] ss:$24 sps:$4 sm:$0xff]  }
 0x37d   :  { %v8915_v62 = vadd.f32 %v22847_v37, %v8867_v5  ;;  %v8951_v54 = vmul.f32 0.7978846, %v8903_v1  ;;  %v8927_v15 = vadd.f32 %v22851_v31, %v8879_v51  ;;  %7820 = vmatprep.subr.bf16.mxu1 %v17978_v4  ;;  %v8844_v27 = vmul.f32 %v22882_v30, %v8796_v53  ;;  %v372_v59 = vld [vmem:[#allocation5 + $0x8c8] sm:$0xff]  ;;  %v20406_v45 = vld [vmem:[#allocation8 + $0x1e0] ss:$24 sps:$4 sm:$0xff]  }
 0x37e   :  { %16090 = vmatpush1.bf16.msra.mxu0 %v20397_v41  ;;  %v8916_v2 = vadd.f32 %v22853_v52, %v8868_v34  ;;  %v8952_v11 = vmul.f32 0.7978846, %v8904_v9  ;;  %v8928_v22 = vadd.f32 %v22857_v19, %v8880_v28  ;;  %v8891_v55 = vmul.f32 0.044715, %v8843_v14  ;;  %v396_v5 = vld [vmem:[#allocation5 + $0x988] sm:$0xff] }
 0x37f   :  { %16091 = vmatprep.subr.bf16.mxu0 %v20402_v7  ;;  %22136 = vtanh.f32 %v8951_v54  ;;  %v8975_v50 = vmul.f32 0.7978846, %v8927_v15  ;;  %v8963_v56 = vmul.f32 0.7978846, %v8915_v62  ;;  %v8892_v12 = vmul.f32 0.044715, %v8844_v27 }
 0x380   :  { %22138 = vtanh.f32 %v8952_v11  ;;  %v8976_v61 = vmul.f32 0.7978846, %v8928_v22  ;;  %7821 = vmatpush1.bf16.msra.mxu1 %v17977_v10  ;;  %v8964_v4 = vmul.f32 0.7978846, %v8916_v2  ;;  %v18026_v17 = vcombine.high %v336_v32, %v348_v26  ;;  %v20411_v7 = vld [vmem:[#allocation8 + $0x214] ss:$24 sps:$4 sm:$0xff]  }
 0x381   :  { %22140 = vtanh.f32 %v8975_v50  ;;  %7822 = vmatprep.subr.bf16.mxu1 %v18002_v49  ;;  %v8939_v6 = vadd.f32 %v22878_v29, %v8891_v55  ;;  %v8940_v39 = vadd.f32 %v22882_v30, %v8892_v12  ;;  %v18025_v10 = vcombine.low %v336_v32, %v348_v26  ;;  %v384_v49 = vld [vmem:[#allocation5 + $0x928] sm:$0xff]  ;;  %v20414_v53 = vld [vmem:[#allocation8 + $0x244] ss:$24 sps:$4 sm:$0xff]   ;;  %v20412_v27 = vld [vmem:[#allocation8 + $0x240] ss:$24 sps:$4 sm:$0xff]  }
 0x382   :  { %16092 = vmatpush1.bf16.msra.mxu0 %v20400_v0  ;;  %22142 = vtanh.f32 %v8976_v61  ;;  %v18050_v38 = vcombine.high %v360_v25, %v372_v59  ;;  %v18049_v1 = vcombine.low %v360_v25, %v372_v59  ;;  %v408_v51 = vld [vmem:[#allocation5 + $0x9e8] sm:$0xff]  ;;  %v18074_v28 = vcombine.high %v384_v49, %v396_v5 }
 0x383   :  { %16093 = vmatprep.subr.bf16.mxu0 %v20405_v35  ;;  %22144 = vtanh.f32 %v8963_v56  ;;  %v8987_v41 = vmul.f32 0.7978846, %v8939_v6  ;;  %v8988_v42 = vmul.f32 0.7978846, %v8940_v39  ;;  %v420_v34 = vld [vmem:[#allocation5 + $0xa48] sm:$0xff]  ;;  %v18073_v0 = vcombine.low %v384_v49, %v396_v5 }
 0x384   :  { %7823 = vmatpush1.bf16.msra.mxu1 %v18001_v13  ;;  %22146 = vtanh.f32 %v8964_v4  ;;  %v20409_v9 = vld [vmem:[#allocation8 + $0x210] ss:$24 sps:$4 sm:$0xff]   ;;  %v18098_v2 = vcombine.high %v408_v51, %v420_v34  ;;  %v8711_v22 = vmul.f32 0.5, %v22835_v20  ;;  %v8735_v13 = vmul.f32 0.5, %v22851_v31  ;;  %v20417_v20 = vld [vmem:[#allocation8 + $0x274] ss:$24 sps:$4 sm:$0xff]  }
 0x385   :  { %7824 = vmatprep.subr.bf16.mxu1 %v18026_v17  ;;  %22148 = vtanh.f32 %v8987_v41  ;;  %v8723_v35 = vmul.f32 0.5, %v22847_v37  ;;  %v8712_v50 = vmul.f32 0.5, %v22841_v63  ;;  %v8736_v56 = vmul.f32 0.5, %v22857_v19  ;;  %v432_v12 = vld [vmem:[#allocation5 + $0xaa8] sm:$0xff]  ;;  %v20420_v5 = vld [vmem:[#allocation8 + $0x2a4] ss:$24 sps:$4 sm:$0xff]  }
 0x386   :  { %16094 = vmatpush1.bf16.msra.mxu0 %v20403_v16  ;;  %22150 = vtanh.f32 %v8988_v42  ;;  %v8724_v61 = vmul.f32 0.5, %v22853_v52  ;;  %v444_v31 = vld [vmem:[#allocation5 + $0xb08] sm:$0xff]  ;;  %v8747_v16 = vmul.f32 0.5, %v22878_v29  ;;  %v8748_v63 = vmul.f32 0.5, %v22882_v30 }
 0x387   :  { %16095 = vmatprep.subr.bf16.mxu0 %v20408_v8  ;;  %v18097_v41 = vcombine.low %v408_v51, %v420_v34  ;;  %v18122_v29 = vcombine.high %v432_v12, %v444_v31  ;;  %v468_v30 = vld [vmem:[#allocation5 + $0xbc8] sm:$0xff]  ;;  %v18121_v51 = vcombine.low %v432_v12, %v444_v31  ;;  %v20432_v31 = vld [vmem:[#allocation8 + $0x364] ss:$24 sps:$4 sm:$0xff]  }
 0x388   :  { %7825 = vmatpush1.bf16.msra.mxu1 %v18025_v10 }
 0x389   :  { %v22137_v47 = vpop.eup %22136  ;;  %7826 = vmatprep.subr.bf16.mxu1 %v18050_v38 }
 0x38a   :  { %16096 = vmatpush1.bf16.msra.mxu0 %v20406_v45  ;;  %v22139_v62 = vpop.eup %22138  ;;  %v9047_v54 = vadd.f32 1.0, %v22137_v47  ;;  %v20415_v45 = vld [vmem:[#allocation8 + $0x270] ss:$24 sps:$4 sm:$0xff]  }
 0x38b   :  { %16097 = vmatprep.subr.bf16.mxu0 %v20411_v7  ;;  %v22141_v15 = vpop.eup %22140  ;;  %v9048_v14 = vadd.f32 1.0, %v22139_v62 }
 0x38c   :  { %v22143_v11 = vpop.eup %22142  ;;  %7827 = vmatpush1.bf16.msra.mxu1 %v18049_v1  ;;  %v9071_v32 = vadd.f32 1.0, %v22141_v15  ;;  %v9095_v37 = vmul.f32 %v9047_v54, %v8711_v22  ;;  %v456_v1 = vld [vmem:[#allocation5 + $0xb68] sm:$0xff]  ;;  %v20426_v22 = vld [vmem:[#allocation8 + $0x304] ss:$24 sps:$4 sm:$0xff]  }
 0x38d   :  { %v22145_v26 = vpop.eup %22144  ;;  %7828 = vmatprep.subr.bf16.mxu1 %v18074_v28  ;;  %v9072_v55 = vadd.f32 1.0, %v22143_v11  ;;  %v9096_v25 = vmul.f32 %v9048_v14, %v8712_v50  ;;  %v20418_v28 = vld [vmem:[#allocation8 + $0x2a0] ss:$24 sps:$4 sm:$0xff]   ;;  %v18146_v62 = vcombine.high %v456_v1, %v468_v30  ;;  %v20423_v54 = vld [vmem:[#allocation8 + $0x2d4] ss:$24 sps:$4 sm:$0xff]  }
 0x38e   :  { %16098 = vmatpush1.bf16.msra.mxu0 %v20409_v9  ;;  %v22147_v4 = vpop.eup %22146  ;;  %v9119_v17 = vmul.f32 %v9071_v32, %v8735_v13  ;;  %v9059_v6 = vadd.f32 1.0, %v22145_v26  ;;  %v480_v15 = vld [vmem:[#allocation5 + $0xc28] sm:$0xff]  ;;  %v20424_v26 = vld [vmem:[#allocation8 + $0x300] ss:$24 sps:$4 sm:$0xff]  }
 0x38f   :  { %16099 = vmatprep.subr.bf16.mxu0 %v20414_v53  ;;  %v22149_v8 = vpop.eup %22148  ;;  %v9120_v59 = vmul.f32 %v9072_v55, %v8736_v56  ;;  %v9060_v39 = vadd.f32 1.0, %v22147_v4  ;;  %v20421_v14 = vld [vmem:[#allocation8 + $0x2d0] ss:$24 sps:$4 sm:$0xff]   ;;  %v20429_v50 = vld [vmem:[#allocation8 + $0x334] ss:$24 sps:$4 sm:$0xff]  }
 0x390   :  { %v22151_v19 = vpop.eup %22150  ;;  %7829 = vmatpush1.bf16.msra.mxu1 %v18073_v0  ;;  %v22911_v52 = vpack.c.bf16 %v9119_v17, %v9095_v37  ;;  %v9083_v10 = vadd.f32 1.0, %v22149_v8  ;;  %v9107_v42 = vmul.f32 %v9059_v6, %v8723_v35  ;;  %v492_v0 = vld [vmem:[#allocation5 + $0xc88] sm:$0xff]  ;;  %v22223_v17 = vld [vmem:[#allocation2 + $0xc] ss:$24 sps:$4 sm:$0xff]   ;;  %v20430_v8 = vld [vmem:[#allocation8 + $0x360] ss:$24 sps:$4 sm:$0xff]  }
 0x391   :  { %7830 = vmatprep.subr.bf16.mxu1 %v18098_v2  ;;  %v22913_v38 = vpack.c.bf16 %v9120_v59, %v9096_v25  ;;  %v9084_v7 = vadd.f32 1.0, %v22151_v19  ;;  %v9108_v49 = vmul.f32 %v9060_v39, %v8724_v61  ;;  %v18145_v2 = vcombine.low %v456_v1, %v468_v30  ;;  %v504_v13 = vld [vmem:[#allocation5 + $0xce8] sm:$0xff] }
 0x392   :  { %16100 = vmatpush1.bf16.msra.mxu0 %v20412_v27  ;;  %v9131_v47 = vmul.f32 %v9083_v10, %v8747_v16  ;;  %v18170_v11 = vcombine.high %v480_v15, %v492_v0  ;;  %v516_v35 = vld [vmem:[#allocation5 + $0xd48] sm:$0xff]  ;;  %v18169_v32 = vcombine.low %v480_v15, %v492_v0 }
 0x393   :  { %16101 = vmatprep.subr.bf16.mxu0 %v20417_v20  ;;  %v9132_v9 = vmul.f32 %v9084_v7, %v8748_v63  ;;  %v18194_v27 = vcombine.high %v504_v13, %v516_v35  ;;  %v528_v56 = vld [vmem:[#allocation5 + $0xda8] sm:$0xff]  ;;  %v18193_v4 = vcombine.low %v504_v13, %v516_v35 }
 0x394   :  { %7831 = vmatpush1.bf16.msra.mxu1 %v18097_v41  ;;  %v22915_v34 = vpack.c.bf16 %v9131_v47, %v9107_v42  ;;  %v540_v55 = vld [vmem:[#allocation5 + $0xe08] sm:$0xff]  ;;  %v20438_v42 = vld [vmem:[#allocation8 + $0x3c4] ss:$24 sps:$4 sm:$0xff]  }
 0x395   :  { %7832 = vmatprep.subr.bf16.mxu1 %v18122_v29  ;;  %v22917_v53 = vpack.c.bf16 %v9132_v9, %v9108_v49  ;;  %v22222_v61 = vld [vmem:[#allocation2] ss:$24 sps:$4 sm:$0xff]   ;;  %v18218_v12 = vcombine.high %v528_v56, %v540_v55  ;;  %v18217_v6 = vcombine.low %v528_v56, %v540_v55  ;;  %v20435_v59 = vld [vmem:[#allocation8 + $0x394] ss:$24 sps:$4 sm:$0xff]  }
 0x396   :  { %16102 = vmatpush1.bf16.msra.mxu0 %v20415_v45  ;;  %v20427_v20 = vld [vmem:[#allocation8 + $0x330] ss:$24 sps:$4 sm:$0xff]   ;;  %v20436_v49 = vld [vmem:[#allocation8 + $0x3c0] ss:$24 sps:$4 sm:$0xff]   ;;  %v20441_v1 = vld [vmem:[#allocation8 + $0x3f4] ss:$24 sps:$4 sm:$0xff]  }
 0x397   :  { %16103 = vmatprep.subr.bf16.mxu0 %v20420_v5  ;;  %v552_v16 = vld [vmem:[#allocation5 + $0xe68] sm:$0xff] }
 0x398   :  { %7833 = vmatpush1.bf16.msra.mxu1 %v18121_v51  ;;  %v564_v37 = vld [vmem:[#allocation5 + $0xec8] sm:$0xff] }
 0x399   :  { %7834 = vmatprep.subr.bf16.mxu1 %v18146_v62  ;;  %v18242_v25 = vcombine.high %v552_v16, %v564_v37  ;;  %v576_v63 = vld [vmem:[#allocation5 + $0xf28] sm:$0xff]  ;;  %v18241_v19 = vcombine.low %v552_v16, %v564_v37  ;;  %v20444_v62 = vld [vmem:[#allocation8 + $0x424] ss:$24 sps:$4 sm:$0xff]  }
 0x39a   :  { %16104 = vmatpush1.bf16.msra.mxu0 %v20418_v28  ;;  %v588_v39 = vld [vmem:[#allocation5 + $0xf88] sm:$0xff] }
 0x39b   :  { %16105 = vmatprep.subr.bf16.mxu0 %v20423_v54  ;;  %v20433_v41 = vld [vmem:[#allocation8 + $0x390] ss:$24 sps:$4 sm:$0xff]   ;;  %v18266_v10 = vcombine.high %v576_v63, %v588_v39  ;;  %v18265_v7 = vcombine.low %v576_v63, %v588_v39  ;;  %v20454_v63 = vld [vmem:[#allocation8 + $0x4e0] ss:$24 sps:$4 sm:$0xff]  }
 0x39c   :  { %7835 = vmatpush1.bf16.msra.mxu1 %v18145_v2  ;;  %v600_v45 = vld [vmem:[#allocation5 + $0xfe8] sm:$0xff]  ;;  %v20442_v2 = vld [vmem:[#allocation8 + $0x420] ss:$24 sps:$4 sm:$0xff]  }
 0x39d   :  { %7847 = vmatprep.subr.bf16.mxu1 %v18170_v11  ;;  %v612_v29 = vld [vmem:[#allocation5 + $0x1048] sm:$0xff] }
 0x39e   :  { %16106 = vmatpush1.bf16.msra.mxu0 %v20421_v14  ;;  %v18290_v5 = vcombine.high %v600_v45, %v612_v29  ;;  %v624_v30 = vld [vmem:[#allocation5 + $0x10a8] sm:$0xff]  ;;  %v18289_v9 = vcombine.low %v600_v45, %v612_v29 }
 0x39f   :  { %16118 = vmatprep.subr.bf16.mxu0 %v20426_v22  ;;  %7837 = vmatmul.mubr.bf16.vlgmr.msra.gmra.mrb[16].mxu1 %v22222_v61  ;;  %v636_v47 = vld [vmem:[#allocation5 + $0x1108] sm:$0xff]  ;;  %v20448_v61 = vld [vmem:[#allocation8 + $0x480] ss:$24 sps:$4 sm:$0xff]  }
 0x3a0   :  { %7848 = vmatpush1.bf16.msra.mxu1 %v18169_v32  ;;  %7879 = vmatprep.mubr.bf16.mxu1 %v22223_v17  ;;  %v20439_v51 = vld [vmem:[#allocation8 + $0x3f0] ss:$24 sps:$4 sm:$0xff]   ;;  %v18314_v28 = vcombine.high %v624_v30, %v636_v47  ;;  %v18313_v0 = vcombine.low %v624_v30, %v636_v47  ;;  %v20447_v11 = vld [vmem:[#allocation8 + $0x454] ss:$24 sps:$4 sm:$0xff]   ;;  %v20460_v30 = vld [vmem:[#allocation8 + $0x540] ss:$24 sps:$4 sm:$0xff]  }
 0x3a1   :  { %16108 = vmatmul.mubr.bf16.vlgmr.msra.gmra.mrb[16].mxu0 %v22644_v44  ;;  %7849 = vmatprep.subr.bf16.mxu1 %v18194_v27  ;;  %v648_v54 = vld [vmem:[#allocation5 + $0x1168] sm:$0xff]  ;;  %v20450_v27 = vld [vmem:[#allocation8 + $0x484] ss:$24 sps:$4 sm:$0xff]  }
 0x3a2   :  { %16119 = vmatpush1.bf16.msra.mxu0 %v20424_v26  ;;  %16150 = vmatprep.mubr.bf16.mxu0 %v22820_v36  ;;  %v660_v15 = vld [vmem:[#allocation5 + $0x11c8] sm:$0xff] }
 0x3a3   :  { %16120 = vmatprep.subr.bf16.mxu0 %v20429_v50  ;;  %v18338_v14 = vcombine.high %v648_v54, %v660_v15  ;;  %v672_v22 = vld [vmem:[#allocation5 + $0x1228] sm:$0xff]  ;;  %v18337_v35 = vcombine.low %v648_v54, %v660_v15 }
 0x3a4   :  { %7850 = vmatpush1.bf16.msra.mxu1 %v18193_v4  ;;  %v684_v13 = vld [vmem:[#allocation5 + $0x1288] sm:$0xff] }
 0x3a5   :  { %7851 = vmatprep.subr.bf16.mxu1 %v18218_v12  ;;  %v20445_v32 = vld [vmem:[#allocation8 + $0x450] ss:$24 sps:$4 sm:$0xff]   ;;  %v18362_v26 = vcombine.high %v672_v22, %v684_v13  ;;  %v18361_v55 = vcombine.low %v672_v22, %v684_v13  ;;  %v20466_v22 = vld [vmem:[#allocation8 + $0x5a0] ss:$24 sps:$4 sm:$0xff]  }
 0x3a6   :  { %16121 = vmatpush1.bf16.msra.mxu0 %v20427_v20  ;;  %v696_v50 = vld [vmem:[#allocation5 + $0x12e8] sm:$0xff] }
 0x3a7   :  { %16122 = vmatprep.subr.bf16.mxu0 %v20432_v31  ;;  %v708_v56 = vld [vmem:[#allocation5 + $0x1348] sm:$0xff] }
 0x3a8   :  { %7852 = vmatpush1.bf16.msra.mxu1 %v18217_v6  ;;  %v18386_v4 = vcombine.high %v696_v50, %v708_v56  ;;  %v20453_v20 = vld [vmem:[#allocation8 + $0x4b4] ss:$24 sps:$4 sm:$0xff]   ;;  %v18385_v16 = vcombine.low %v696_v50, %v708_v56  ;;  %v20451_v37 = vld [vmem:[#allocation8 + $0x4b0] ss:$24 sps:$4 sm:$0xff]   ;;  %v20456_v6 = vld [vmem:[#allocation8 + $0x4e4] ss:$24 sps:$4 sm:$0xff]  }
 0x3a9   :  { %7853 = vmatprep.subr.bf16.mxu1 %v18242_v25  ;;  %v720_v12 = vld [vmem:[#allocation5 + $0x13a8] sm:$0xff] }
 0x3aa   :  { %16123 = vmatpush1.bf16.msra.mxu0 %v20430_v8  ;;  %v732_v31 = vld [vmem:[#allocation5 + $0x1408] sm:$0xff] }
 0x3ab   :  { %16124 = vmatprep.subr.bf16.mxu0 %v20435_v59  ;;  %v18410_v17 = vcombine.high %v720_v12, %v732_v31  ;;  %v744_v8 = vld [vmem:[#allocation5 + $0x1468] sm:$0xff]  ;;  %v18409_v59 = vcombine.low %v720_v12, %v732_v31  ;;  %v20472_v12 = vld [vmem:[#allocation8 + $0x600] ss:$24 sps:$4 sm:$0xff]  }
 0x3ac   :  { %7854 = vmatpush1.bf16.msra.mxu1 %v18241_v19  ;;  %v756_v25 = vld [vmem:[#allocation5 + $0x14c8] sm:$0xff] }
 0x3ad   :  { %7855 = vmatprep.subr.bf16.mxu1 %v18266_v10  ;;  %v18434_v39 = vcombine.high %v744_v8, %v756_v25  ;;  %v20459_v19 = vld [vmem:[#allocation8 + $0x514] ss:$24 sps:$4 sm:$0xff]   ;;  %v20457_v45 = vld [vmem:[#allocation8 + $0x510] ss:$24 sps:$4 sm:$0xff]  }
 0x3ae   :  { %16125 = vmatpush1.bf16.msra.mxu0 %v20433_v41  ;;  %v768_v41 = vld [vmem:[#allocation5 + $0x1528] sm:$0xff] }
 0x3af   :  { %16126 = vmatprep.subr.bf16.mxu0 %v20438_v42  ;;  %v780_v10 = vld [vmem:[#allocation5 + $0x1588] sm:$0xff]  ;;  %v18433_v42 = vcombine.low %v744_v8, %v756_v25 }
 0x3b0   :  { %7856 = vmatpush1.bf16.msra.mxu1 %v18265_v7  ;;  %v18458_v29 = vcombine.high %v768_v41, %v780_v10  ;;  %v20462_v7 = vld [vmem:[#allocation8 + $0x544] ss:$24 sps:$4 sm:$0xff]   ;;  %v20463_v54 = vld [vmem:[#allocation8 + $0x570] ss:$24 sps:$4 sm:$0xff]  }
 0x3b1   :  { %7857 = vmatprep.subr.bf16.mxu1 %v18290_v5  ;;  %v804_v5 = vld [vmem:[#allocation5 + $0x1648] sm:$0xff] }
 0x3b2   :  { %16127 = vmatpush1.bf16.msra.mxu0 %v20436_v49  ;;  %v792_v49 = vld [vmem:[#allocation5 + $0x15e8] sm:$0xff] }
 0x3b3   :  { %16128 = vmatprep.subr.bf16.mxu0 %v20441_v1  ;;  %v18457_v1 = vcombine.low %v768_v41, %v780_v10  ;;  %v18482_v47 = vcombine.high %v792_v49, %v804_v5  ;;  %v20469_v50 = vld [vmem:[#allocation8 + $0x5d0] ss:$24 sps:$4 sm:$0xff]   ;;  %v22225_v41 = vld [vmem:[#allocation2 + $0x14] ss:$24 sps:$4 sm:$0xff]  }
 0x3b4   :  { %7858 = vmatpush1.bf16.msra.mxu1 %v18289_v9  ;;  %v20465_v9 = vld [vmem:[#allocation8 + $0x574] ss:$24 sps:$4 sm:$0xff]   ;;  %v20475_v25 = vld [vmem:[#allocation8 + $0x630] ss:$24 sps:$4 sm:$0xff]  }
 0x3b5   :  { %7859 = vmatprep.subr.bf16.mxu1 %v18314_v28  ;;  %v828_v28 = vld [vmem:[#allocation5 + $0x1708] sm:$0xff] }
 0x3b6   :  { %16129 = vmatpush1.bf16.msra.mxu0 %v20439_v51  ;;  %v816_v51 = vld [vmem:[#allocation5 + $0x16a8] sm:$0xff] }
 0x3b7   :  { %16130 = vmatprep.subr.bf16.mxu0 %v20444_v62  ;;  %v18481_v62 = vcombine.low %v792_v49, %v804_v5  ;;  %v18506_v15 = vcombine.high %v816_v51, %v828_v28  ;;  %v972_v49 = vld [vmem:[#allocation5 + $0x1b88] sm:$0xff] }
 0x3b8   :  { %7860 = vmatpush1.bf16.msra.mxu1 %v18313_v0  ;;  %v20468_v0 = vld [vmem:[#allocation8 + $0x5a4] ss:$24 sps:$4 sm:$0xff]  }
 0x3b9   :  { %7861 = vmatprep.subr.bf16.mxu1 %v18338_v14  ;;  %v852_v14 = vld [vmem:[#allocation5 + $0x17c8] sm:$0xff] }
 0x3ba   :  { %16131 = vmatpush1.bf16.msra.mxu0 %v20442_v2  ;;  %v840_v2 = vld [vmem:[#allocation5 + $0x1768] sm:$0xff] }
 0x3bb   :  { %16132 = vmatprep.subr.bf16.mxu0 %v20447_v11  ;;  %v18505_v11 = vcombine.low %v816_v51, %v828_v28  ;;  %v18530_v13 = vcombine.high %v840_v2, %v852_v14  ;;  %v996_v51 = vld [vmem:[#allocation5 + $0x1c48] sm:$0xff] }
 0x3bc   :  { %7862 = vmatpush1.bf16.msra.mxu1 %v18337_v35  ;;  %v20471_v35 = vld [vmem:[#allocation8 + $0x5d4] ss:$24 sps:$4 sm:$0xff]  }
 0x3bd   :  { %7863 = vmatprep.subr.bf16.mxu1 %v18362_v26  ;;  %v876_v26 = vld [vmem:[#allocation5 + $0x1888] sm:$0xff] }
 0x3be   :  { %16133 = vmatpush1.bf16.msra.mxu0 %v20445_v32  ;;  %v864_v32 = vld [vmem:[#allocation5 + $0x1828] sm:$0xff] }
 0x3bf   :  { %16134 = vmatprep.subr.bf16.mxu0 %v20450_v27  ;;  %v18529_v27 = vcombine.low %v840_v2, %v852_v14  ;;  %v18554_v56 = vcombine.high %v864_v32, %v876_v26  ;;  %v1020_v2 = vld [vmem:[#allocation5 + $0x1d08] sm:$0xff] }
 0x3c0   :  { %7864 = vmatpush1.bf16.msra.mxu1 %v18361_v55  ;;  %v20474_v55 = vld [vmem:[#allocation8 + $0x604] ss:$24 sps:$4 sm:$0xff]  }
 0x3c1   :  { %7865 = vmatprep.subr.bf16.mxu1 %v18386_v4  ;;  %v900_v4 = vld [vmem:[#allocation5 + $0x1948] sm:$0xff] }
 0x3c2   :  { %16135 = vmatpush1.bf16.msra.mxu0 %v20448_v61  ;;  %v888_v61 = vld [vmem:[#allocation5 + $0x18e8] sm:$0xff] }
 0x3c3   :  { %16136 = vmatprep.subr.bf16.mxu0 %v20453_v20  ;;  %v18553_v20 = vcombine.low %v864_v32, %v876_v26  ;;  %v18578_v31 = vcombine.high %v888_v61, %v900_v4  ;;  %v18577_v8 = vcombine.low %v888_v61, %v900_v4  ;;  %v1044_v32 = vld [vmem:[#allocation5 + $0x1dc8] sm:$0xff] }
 0x3c4   :  { %7866 = vmatpush1.bf16.msra.mxu1 %v18385_v16  ;;  %v20477_v16 = vld [vmem:[#allocation8 + $0x634] ss:$24 sps:$4 sm:$0xff]  }
 0x3c5   :  { %7867 = vmatprep.subr.bf16.mxu1 %v18410_v17  ;;  %v924_v17 = vld [vmem:[#allocation5 + $0x1a08] sm:$0xff] }
 0x3c6   :  { %16137 = vmatpush1.bf16.msra.mxu0 %v20451_v37  ;;  %v912_v37 = vld [vmem:[#allocation5 + $0x19a8] sm:$0xff] }
 0x3c7   :  { %16138 = vmatprep.subr.bf16.mxu0 %v20456_v6  ;;  %v22224_v6 = vld [vmem:[#allocation2 + $0x8] ss:$24 sps:$4 sm:$0xff]   ;;  %v18601_v10 = vcombine.low %v912_v37, %v924_v17  ;;  %v1068_v61 = vld [vmem:[#allocation5 + $0x1e88] sm:$0xff] }
 0x3c8   :  { %7868 = vmatpush1.bf16.msra.mxu1 %v18409_v59  ;;  %v18602_v59 = vcombine.high %v912_v37, %v924_v17  ;;  %v1092_v37 = vld [vmem:[#allocation5 + $0x1f48] sm:$0xff] }
 0x3c9   :  { %7869 = vmatprep.subr.bf16.mxu1 %v18434_v39  ;;  %v936_v39 = vld [vmem:[#allocation5 + $0x1a68] sm:$0xff] }
 0x3ca   :  { %16139 = vmatpush1.bf16.msra.mxu0 %v20454_v63  ;;  %v20480_v63 = vld [vmem:[#allocation8 + $0x664] ss:$24 sps:$4 sm:$0xff]  }
 0x3cb   :  { %16140 = vmatprep.subr.bf16.mxu0 %v20459_v19  ;;  %v948_v19 = vld [vmem:[#allocation5 + $0x1ac8] sm:$0xff] }
 0x3cc   :  { %7870 = vmatpush1.bf16.msra.mxu1 %v18433_v42  ;;  %v20478_v42 = vld [vmem:[#allocation8 + $0x660] ss:$24 sps:$4 sm:$0xff]   ;;  %v18625_v5 = vcombine.low %v936_v39, %v948_v19 }
 0x3cd   :  { %7871 = vmatprep.subr.bf16.mxu1 %v18458_v29  ;;  %v20483_v29 = vld [vmem:[#allocation8 + $0x694] ss:$24 sps:$4 sm:$0xff]  }
 0x3ce   :  { %16141 = vmatpush1.bf16.msra.mxu0 %v20457_v45  ;;  %v18626_v45 = vcombine.high %v936_v39, %v948_v19  ;;  %v20499_v19 = vld [vmem:[#allocation8 + $0x7b0] ss:$24 sps:$4 sm:$0xff]  }
 0x3cf   :  { %16142 = vmatprep.subr.bf16.mxu0 %v20462_v7  ;;  %v960_v7 = vld [vmem:[#allocation5 + $0x1b28] sm:$0xff] }
 0x3d0   :  { %7872 = vmatpush1.bf16.msra.mxu1 %v18457_v1  ;;  %v20481_v1 = vld [vmem:[#allocation8 + $0x690] ss:$24 sps:$4 sm:$0xff]   ;;  %v18649_v28 = vcombine.low %v960_v7, %v972_v49 }
 0x3d1   :  { %7873 = vmatprep.subr.bf16.mxu1 %v18482_v47  ;;  %v20486_v47 = vld [vmem:[#allocation8 + $0x6c4] ss:$24 sps:$4 sm:$0xff]  }
 0x3d2   :  { %16143 = vmatpush1.bf16.msra.mxu0 %v20460_v30  ;;  %v18650_v30 = vcombine.high %v960_v7, %v972_v49  ;;  %v20502_v7 = vld [vmem:[#allocation8 + $0x7e0] ss:$24 sps:$4 sm:$0xff]  }
 0x3d3   :  { %16144 = vmatprep.subr.bf16.mxu0 %v20465_v9  ;;  %v984_v9 = vld [vmem:[#allocation5 + $0x1be8] sm:$0xff] }
 0x3d4   :  { %7874 = vmatpush1.bf16.msra.mxu1 %v18481_v62  ;;  %v20484_v62 = vld [vmem:[#allocation8 + $0x6c0] ss:$24 sps:$4 sm:$0xff]   ;;  %v18673_v14 = vcombine.low %v984_v9, %v996_v51 }
 0x3d5   :  { %7875 = vmatprep.subr.bf16.mxu1 %v18506_v15  ;;  %v20489_v15 = vld [vmem:[#allocation8 + $0x6f4] ss:$24 sps:$4 sm:$0xff]  }
 0x3d6   :  { %16145 = vmatpush1.bf16.msra.mxu0 %v20463_v54  ;;  %v18674_v54 = vcombine.high %v984_v9, %v996_v51  ;;  %v20505_v9 = vld [vmem:[#allocation8 + $0x810] ss:$24 sps:$4 sm:$0xff]  }
 0x3d7   :  { %16146 = vmatprep.subr.bf16.mxu0 %v20468_v0  ;;  %v1008_v0 = vld [vmem:[#allocation5 + $0x1ca8] sm:$0xff] }
 0x3d8   :  { %7876 = vmatpush1.bf16.msra.mxu1 %v18505_v11  ;;  %v20487_v11 = vld [vmem:[#allocation8 + $0x6f0] ss:$24 sps:$4 sm:$0xff]   ;;  %v18697_v26 = vcombine.low %v1008_v0, %v1020_v2 }
 0x3d9   :  { %7877 = vmatprep.subr.bf16.mxu1 %v18530_v13  ;;  %v20492_v13 = vld [vmem:[#allocation8 + $0x724] ss:$24 sps:$4 sm:$0xff]  }
 0x3da   :  { %16147 = vmatpush1.bf16.msra.mxu0 %v20466_v22  ;;  %v18698_v22 = vcombine.high %v1008_v0, %v1020_v2  ;;  %v20508_v0 = vld [vmem:[#allocation8 + $0x840] ss:$24 sps:$4 sm:$0xff]  }
 0x3db   :  { %16148 = vmatprep.subr.bf16.mxu0 %v20471_v35  ;;  %v1032_v35 = vld [vmem:[#allocation5 + $0x1d68] sm:$0xff] }
 0x3dc   :  { %7878 = vmatpush1.bf16.msra.mxu1 %v18529_v27  ;;  %v20490_v27 = vld [vmem:[#allocation8 + $0x720] ss:$24 sps:$4 sm:$0xff]   ;;  %v18721_v4 = vcombine.low %v1032_v35, %v1044_v32 }
 0x3dd   :  { %7890 = vmatprep.subr.bf16.mxu1 %v18554_v56  ;;  %v20495_v56 = vld [vmem:[#allocation8 + $0x754] ss:$24 sps:$4 sm:$0xff]  }
 0x3de   :  { %16149 = vmatpush1.bf16.msra.mxu0 %v20469_v50  ;;  %v18722_v50 = vcombine.high %v1032_v35, %v1044_v32  ;;  %v20511_v35 = vld [vmem:[#allocation8 + $0x870] ss:$24 sps:$4 sm:$0xff]  }
 0x3df   :  { %16161 = vmatprep.subr.bf16.mxu0 %v20474_v55  ;;  %7880 = vmatmul.mubr.bf16.vlgmr.msra.gmra.mrb[16].mxu1 %v22224_v6  ;;  %v1056_v55 = vld [vmem:[#allocation5 + $0x1e28] sm:$0xff]  ;;  %v20496_v6 = vld [vmem:[#allocation8 + $0x780] ss:$24 sps:$4 sm:$0xff]  }
 0x3e0   :  { %7891 = vmatpush1.bf16.msra.mxu1 %v18553_v20  ;;  %7922 = vmatprep.mubr.bf16.mxu1 %v22225_v41  ;;  %v20493_v20 = vld [vmem:[#allocation8 + $0x750] ss:$24 sps:$4 sm:$0xff]   ;;  %v18745_v17 = vcombine.low %v1056_v55, %v1068_v61 }
 0x3e1   :  { %16151 = vmatmul.mubr.bf16.vlgmr.msra.gmra.mrb[16].mxu0 %v22818_v23  ;;  %7892 = vmatprep.subr.bf16.mxu1 %v18578_v31  ;;  %v20498_v31 = vld [vmem:[#allocation8 + $0x784] ss:$24 sps:$4 sm:$0xff]  }
 0x3e2   :  { %16162 = vmatpush1.bf16.msra.mxu0 %v20472_v12  ;;  %16193 = vmatprep.mubr.bf16.mxu0 %v22913_v38  ;;  %v18746_v12 = vcombine.high %v1056_v55, %v1068_v61  ;;  %v20514_v55 = vld [vmem:[#allocation8 + $0x8a0] ss:$24 sps:$4 sm:$0xff]  }
 0x3e3   :  { %16163 = vmatprep.subr.bf16.mxu0 %v20477_v16  ;;  %v1080_v16 = vld [vmem:[#allocation5 + $0x1ee8] sm:$0xff] }
 0x3e4   :  { %7893 = vmatpush1.bf16.msra.mxu1 %v18577_v8  ;;  %v18770_v8 = vcombine.high %v1080_v16, %v1092_v37  ;;  %v18769_v39 = vcombine.low %v1080_v16, %v1092_v37  ;;  %v20517_v16 = vld [vmem:[#allocation8 + $0x8d0] ss:$24 sps:$4 sm:$0xff]  }
 0x3e5   :  { %7894 = vmatprep.subr.bf16.mxu1 %v18602_v59  ;;  %v1104_v59 = vld [vmem:[#allocation5 + $0x1fa8] sm:$0xff] }
 0x3e6   :  { %16164 = vmatpush1.bf16.msra.mxu0 %v20475_v25  ;;  %v20501_v25 = vld [vmem:[#allocation8 + $0x7b4] ss:$24 sps:$4 sm:$0xff]  }
 0x3e7   :  { %16165 = vmatprep.subr.bf16.mxu0 %v20480_v63  ;;  %v1116_v63 = vld [vmem:[#allocation5 + $0x2008] sm:$0xff] }
 0x3e8   :  { %7895 = vmatpush1.bf16.msra.mxu1 %v18601_v10  ;;  %v18794_v41 = vcombine.high %v1104_v59, %v1116_v63  ;;  %v20504_v10 = vld [vmem:[#allocation8 + $0x7e4] ss:$24 sps:$4 sm:$0xff]  }
 0x3e9   :  { %7896 = vmatprep.subr.bf16.mxu1 %v18626_v45  ;;  %v1140_v45 = vld [vmem:[#allocation5 + $0x20c8] sm:$0xff] }
 0x3ea   :  { %16166 = vmatpush1.bf16.msra.mxu0 %v20478_v42  ;;  %v1128_v42 = vld [vmem:[#allocation5 + $0x2068] sm:$0xff] }
 0x3eb   :  { %16167 = vmatprep.subr.bf16.mxu0 %v20483_v29  ;;  %v18793_v29 = vcombine.low %v1104_v59, %v1116_v63  ;;  %v18818_v49 = vcombine.high %v1128_v42, %v1140_v45  ;;  %v20520_v59 = vld [vmem:[#allocation8 + $0x900] ss:$24 sps:$4 sm:$0xff]  }
 0x3ec   :  { %7897 = vmatpush1.bf16.msra.mxu1 %v18625_v5  ;;  %v20507_v5 = vld [vmem:[#allocation8 + $0x814] ss:$24 sps:$4 sm:$0xff]  }
 0x3ed   :  { %7898 = vmatprep.subr.bf16.mxu1 %v18650_v30  ;;  %v1164_v30 = vld [vmem:[#allocation5 + $0x2188] sm:$0xff] }
 0x3ee   :  { %16168 = vmatpush1.bf16.msra.mxu0 %v20481_v1  ;;  %v1152_v1 = vld [vmem:[#allocation5 + $0x2128] sm:$0xff] }
 0x3ef   :  { %16169 = vmatprep.subr.bf16.mxu0 %v20486_v47  ;;  %v18817_v47 = vcombine.low %v1128_v42, %v1140_v45  ;;  %v18842_v51 = vcombine.high %v1152_v1, %v1164_v30  ;;  %v20523_v45 = vld [vmem:[#allocation8 + $0x930] ss:$24 sps:$4 sm:$0xff]  }
 0x3f0   :  { %7899 = vmatpush1.bf16.msra.mxu1 %v18649_v28  ;;  %v20510_v28 = vld [vmem:[#allocation8 + $0x844] ss:$24 sps:$4 sm:$0xff]  }
 0x3f1   :  { %7900 = vmatprep.subr.bf16.mxu1 %v18674_v54  ;;  %v1188_v54 = vld [vmem:[#allocation5 + $0x2248] sm:$0xff] }
 0x3f2   :  { %16170 = vmatpush1.bf16.msra.mxu0 %v20484_v62  ;;  %v1176_v62 = vld [vmem:[#allocation5 + $0x21e8] sm:$0xff] }
 0x3f3   :  { %16171 = vmatprep.subr.bf16.mxu0 %v20489_v15  ;;  %v18841_v15 = vcombine.low %v1152_v1, %v1164_v30  ;;  %v18866_v2 = vcombine.high %v1176_v62, %v1188_v54  ;;  %v22227_v1 = vld [vmem:[#allocation2 + $0x4] ss:$24 sps:$4 sm:$0xff]  }
 0x3f4   :  { %7901 = vmatpush1.bf16.msra.mxu1 %v18673_v14  ;;  %v20513_v14 = vld [vmem:[#allocation8 + $0x874] ss:$24 sps:$4 sm:$0xff]  }
 0x3f5   :  { %7902 = vmatprep.subr.bf16.mxu1 %v18698_v22  ;;  %v1212_v22 = vld [vmem:[#allocation5 + $0x2308] sm:$0xff] }
 0x3f6   :  { %16172 = vmatpush1.bf16.msra.mxu0 %v20487_v11  ;;  %v1200_v11 = vld [vmem:[#allocation5 + $0x22a8] sm:$0xff] }
 0x3f7   :  { %16173 = vmatprep.subr.bf16.mxu0 %v20492_v13  ;;  %v18865_v13 = vcombine.low %v1176_v62, %v1188_v54  ;;  %v18890_v32 = vcombine.high %v1200_v11, %v1212_v22  ;;  %v206_v62 = vld [vmem:[#allocation5 + $0x398] sm:$0xff] }
 0x3f8   :  { %7903 = vmatpush1.bf16.msra.mxu1 %v18697_v26  ;;  %v20516_v26 = vld [vmem:[#allocation8 + $0x8a4] ss:$24 sps:$4 sm:$0xff]  }
 0x3f9   :  { %7904 = vmatprep.subr.bf16.mxu1 %v18722_v50  ;;  %v1236_v50 = vld [vmem:[#allocation5 + $0x23c8] sm:$0xff] }
 0x3fa   :  { %16174 = vmatpush1.bf16.msra.mxu0 %v20490_v27  ;;  %v1224_v27 = vld [vmem:[#allocation5 + $0x2368] sm:$0xff] }
 0x3fb   :  { %16175 = vmatprep.subr.bf16.mxu0 %v20495_v56  ;;  %v18889_v56 = vcombine.low %v1200_v11, %v1212_v22  ;;  %v18914_v61 = vcombine.high %v1224_v27, %v1236_v50  ;;  %v230_v11 = vld [vmem:[#allocation5 + $0x458] sm:$0xff]  ;;  %v22925_v22 = vsub.s32 6, %v22486_v48 }
 0x3fc   :  { %7905 = vmatpush1.bf16.msra.mxu1 %v18721_v4  ;;  %v20519_v4 = vld [vmem:[#allocation8 + $0x8d4] ss:$24 sps:$4 sm:$0xff]  }
 0x3fd   :  { %7906 = vmatprep.subr.bf16.mxu1 %v18746_v12  ;;  %v110_v12 = vld [vmem:[#allocation5 + $0x98] sm:$0xff] }
 0x3fe   :  { %16176 = vmatpush1.bf16.msra.mxu0 %v20493_v20  ;;  %v98_v20 = vld [vmem:[#allocation5 + $0x38] sm:$0xff] }
 0x3ff   :  { %16177 = vmatprep.subr.bf16.mxu0 %v20498_v31  ;;  %v18913_v31 = vcombine.low %v1224_v27, %v1236_v50  ;;  %v17790_v37 = vcombine.high %v98_v20, %v110_v12  ;;  %v20537_v27 = vld [vmem:[#allocation8 + $0x9f4] ss:$24 sps:$4 sm:$0xff]   ;;  %v242_v50 = vld [vmem:[#allocation5 + $0x4b8] sm:$0xff] }
 0x400   :  { %7907 = vmatpush1.bf16.msra.mxu1 %v18745_v17  ;;  %v20522_v17 = vld [vmem:[#allocation8 + $0x904] ss:$24 sps:$4 sm:$0xff]  }
 0x401   :  { %7908 = vmatprep.subr.bf16.mxu1 %v18770_v8  ;;  %v134_v8 = vld [vmem:[#allocation5 + $0x158] sm:$0xff] }
 0x402   :  { %16178 = vmatpush1.bf16.msra.mxu0 %v20496_v6  ;;  %v122_v6 = vld [vmem:[#allocation5 + $0xf8] sm:$0xff] }
 0x403   :  { %16179 = vmatprep.subr.bf16.mxu0 %v20501_v25  ;;  %v17789_v25 = vcombine.low %v98_v20, %v110_v12  ;;  %v17814_v63 = vcombine.high %v122_v6, %v134_v8  ;;  %v17813_v42 = vcombine.low %v122_v6, %v134_v8  ;;  %v22229_v12 = vld [vmem:[#allocation7 + $0x10] sm:$0xff] }
 0x404   :  { %7909 = vmatpush1.bf16.msra.mxu1 %v18769_v39  ;;  %v20525_v39 = vld [vmem:[#allocation8 + $0x934] ss:$24 sps:$4 sm:$0xff]   ;;  %v1336_v6 = vrot.slane %v22229_v12, %v22676_v46 }
 0x405   :  { %7910 = vmatprep.subr.bf16.mxu1 %v18794_v41  ;;  %v158_v41 = vld [vmem:[#allocation5 + $0x218] sm:$0xff] }
 0x406   :  { %16180 = vmatpush1.bf16.msra.mxu0 %v20499_v19  ;;  %v146_v19 = vld [vmem:[#allocation5 + $0x1b8] sm:$0xff] }
 0x407   :  { %16181 = vmatprep.subr.bf16.mxu0 %v20504_v10  ;;  %v22226_v10 = vld [vmem:[#allocation2 + $0x10] ss:$24 sps:$4 sm:$0xff]   ;;  %v17837_v30 = vcombine.low %v146_v19, %v158_v41 }
 0x408   :  { %7911 = vmatpush1.bf16.msra.mxu1 %v18793_v29  ;;  %v17838_v29 = vcombine.high %v146_v19, %v158_v41  ;;  %v22940_v19 = vld [vmem:[#allocation5 + $0x698] sm:$0xff] }
 0x409   :  { %7912 = vmatprep.subr.bf16.mxu1 %v18818_v49  ;;  %v170_v49 = vld [vmem:[#allocation5 + $0x278] sm:$0xff] }
 0x40a   :  { %16182 = vmatpush1.bf16.msra.mxu0 %v20502_v7  ;;  %v20528_v7 = vld [vmem:[#allocation8 + $0x964] ss:$24 sps:$4 sm:$0xff]  }
 0x40b   :  { %16183 = vmatprep.subr.bf16.mxu0 %v20507_v5  ;;  %v182_v5 = vld [vmem:[#allocation5 + $0x2d8] sm:$0xff] }
 0x40c   :  { %7913 = vmatpush1.bf16.msra.mxu1 %v18817_v47  ;;  %v20526_v47 = vld [vmem:[#allocation8 + $0x960] ss:$24 sps:$4 sm:$0xff]   ;;  %v17861_v54 = vcombine.low %v170_v49, %v182_v5 }
 0x40d   :  { %7914 = vmatprep.subr.bf16.mxu1 %v18842_v51  ;;  %v20531_v51 = vld [vmem:[#allocation8 + $0x994] ss:$24 sps:$4 sm:$0xff]  }
 0x40e   :  { %16184 = vmatpush1.bf16.msra.mxu0 %v20505_v9  ;;  %v17862_v9 = vcombine.high %v170_v49, %v182_v5 }
 0x40f   :  { %16185 = vmatprep.subr.bf16.mxu0 %v20510_v28  ;;  %v194_v28 = vld [vmem:[#allocation5 + $0x338] sm:$0xff] }
 0x410   :  { %7915 = vmatpush1.bf16.msra.mxu1 %v18841_v15  ;;  %v20529_v15 = vld [vmem:[#allocation8 + $0x990] ss:$24 sps:$4 sm:$0xff]  }
 0x411   :  { %7916 = vmatprep.subr.bf16.mxu1 %v18866_v2  ;;  %v20534_v2 = vld [vmem:[#allocation8 + $0x9c4] ss:$24 sps:$4 sm:$0xff]  }
 0x412   :  { %16186 = vmatpush1.bf16.msra.mxu0 %v20508_v0  ;;  %v17886_v0 = vcombine.high %v194_v28, %v206_v62 }
 0x413   :  { %16187 = vmatprep.subr.bf16.mxu0 %v20513_v14  ;;  %v218_v14 = vld [vmem:[#allocation5 + $0x3f8] sm:$0xff] }
 0x414   :  { %7917 = vmatpush1.bf16.msra.mxu1 %v18865_v13  ;;  %v17885_v13 = vcombine.low %v194_v28, %v206_v62  ;;  %v17909_v20 = vcombine.low %v218_v14, %v230_v11 }
 0x415   :  { %7918 = vmatprep.subr.bf16.mxu1 %v18890_v32  ;;  %v20532_v32 = vld [vmem:[#allocation8 + $0x9c0] ss:$24 sps:$4 sm:$0xff]  }
 0x416   :  { %16188 = vmatpush1.bf16.msra.mxu0 %v20511_v35  ;;  %v22928_v35 = vsub.s32 7, %v22486_v48  ;;  %v20535_v48 = vld [vmem:[#allocation8 + $0x9f0] ss:$24 sps:$4 sm:$0xff]  }
 0x417   :  { %16189 = vmatprep.subr.bf16.mxu0 %v20516_v26  ;;  %v17910_v26 = vcombine.high %v218_v14, %v230_v11 }
 0x418   :  { %7919 = vmatpush1.bf16.msra.mxu1 %v18889_v56  ;;  %v254_v56 = vld [vmem:[#allocation5 + $0x518] sm:$0xff] }
 0x419   :  { %7920 = vmatprep.subr.bf16.mxu1 %v18914_v61 }
 0x41a   :  { %16190 = vmatpush1.bf16.msra.mxu0 %v20514_v55  ;;  %v22228_v55 = vld [vmem:[#allocation7] sm:$0xff] }
 0x41b   :  { %16191 = vmatprep.subr.bf16.mxu0 %v20519_v4  ;;  %v1276_v61 = vrot.slane %v22228_v55, %v22925_v22  ;;  %v1280_v4 = vrot.slane %v22228_v55, %v22928_v35 }
 0x41c   :  { %7921 = vmatpush1.bf16.msra.mxu1 %v18913_v31  ;;  %v1332_v31 = vrot.slane %v22229_v12, %v22665_v40  ;;  %v20541_v12 = vld [vmem:[#allocation8 + $0xa50] ss:$24 sps:$4 sm:$0xff]  }
 0x41d   :  { %8062 = vmatprep.subr.bf16.mxu1 %v17790_v37  ;;  %v22933_v37 = vld [vmem:[#allocation5 + $0x578] sm:$0xff] }
 0x41e   :  { %16192 = vmatpush1.bf16.msra.mxu0 %v20517_v16  ;;  %v17934_v16 = vcombine.high %v242_v50, %v254_v56 }
 0x41f   :  { %16204 = vmatprep.subr.bf16.mxu0 %v20522_v17  ;;  %7923 = vmatmul.mubr.bf16.vlgmr.msra.gmra.mrb[16].mxu1 %v22226_v10  ;;  %v278_v17 = vld [vmem:[#allocation5 + $0x5d8] sm:$0xff] }
 0x420   :  { %8063 = vmatpush1.bf16.msra.mxu1 %v17789_v25  ;;  %8094 = vmatprep.mubr.bf16.mxu1 %v22227_v1  ;;  %v20540_v25 = vld [vmem:[#allocation8 + $0xa24] ss:$24 sps:$4 sm:$0xff]  }
 0x421   :  { %16194 = vmatmul.mubr.bf16.vlgmr.msra.gmra.mrb[16].mxu0 %v22911_v52  ;;  %8064 = vmatprep.subr.bf16.mxu1 %v17814_v63 }
 0x422   :  { %16205 = vmatpush1.bf16.msra.mxu0 %v20520_v59 }
 0x423   :  { %16206 = vmatprep.subr.bf16.mxu0 %v20525_v39  ;;  %v22938_v39 = vld [vmem:[#allocation5 + $0x638] sm:$0xff] }
 0x424   :  { %8065 = vmatpush1.bf16.msra.mxu1 %v17813_v42  ;;  %v17981_v14 = vcombine.low %v22938_v39, %v22940_v19 }
 0x425   :  { %8066 = vmatprep.subr.bf16.mxu1 %v17838_v29  ;;  %v17958_v29 = vcombine.high %v22933_v37, %v278_v17 }
 0x426   :  { %16207 = vmatpush1.bf16.msra.mxu0 %v20523_v45  ;;  %v17933_v45 = vcombine.low %v242_v50, %v254_v56 }
 0x427   :  { %16208 = vmatprep.subr.bf16.mxu0 %v20528_v7 }
 0x428   :  { %8067 = vmatpush1.bf16.msra.mxu1 %v17837_v30 }
 0x429   :  { %8068 = vmatprep.subr.bf16.mxu1 %v17862_v9  ;;  %v22951_v9 = vld [vmem:[#allocation5 + $0x6f8] sm:$0xff] }
 0x42a   :  { %16209 = vmatpush1.bf16.msra.mxu0 %v20526_v47  ;;  %v20538_v47 = vld [vmem:[#allocation8 + $0xa20] ss:$24 sps:$4 sm:$0xff]  }
 0x42b   :  { %16210 = vmatprep.subr.bf16.mxu0 %v20531_v51  ;;  %v22953_v51 = vld [vmem:[#allocation5 + $0x758] sm:$0xff] }
 0x42c   :  { %8069 = vmatpush1.bf16.msra.mxu1 %v17861_v54  ;;  %v18005_v55 = vcombine.low %v22951_v9, %v22953_v51 }
 0x42d   :  { %8070 = vmatprep.subr.bf16.mxu1 %v17886_v0  ;;  %v17957_v0 = vcombine.low %v22933_v37, %v278_v17 }
 0x42e   :  { %16211 = vmatpush1.bf16.msra.mxu0 %v20529_v15 }
 0x42f   :  { %16212 = vmatprep.subr.bf16.mxu0 %v20534_v2  ;;  %v20543_v2 = vld [vmem:[#allocation8 + $0xa54] ss:$24 sps:$4 sm:$0xff]  }
 0x430   :  { %8071 = vmatpush1.bf16.msra.mxu1 %v17885_v13 }
 0x431   :  { %8072 = vmatprep.subr.bf16.mxu1 %v17910_v26  ;;  %v17982_v26 = vcombine.high %v22938_v39, %v22940_v19 }
 0x432   :  { %16213 = vmatpush1.bf16.msra.mxu0 %v20532_v32  ;;  %v7666_v8 = vpop.f32.mrb[12].mxu1 }
 0x433   :  { %16214 = vmatprep.subr.bf16.mxu0 %v20537_v27  ;;  %v22936_v59 = vadd.f32 %v7666_v8, %v1276_v61  ;;  %v7668_v63 = vpop.f32.mrb[13].mxu1  ;;  %v20546_v8 = vld [vmem:[#allocation8 + $0xa84] ss:$24 sps:$4 sm:$0xff]  }
 0x434   :  { %v8569_v41 = vpop.f32.mrb[12].mxu0  ;;  %v22942_v10 = vadd.f32 %v7668_v63, %v1280_v4  ;;  %v7670_v42 = vpop.f32.mrb[14].mxu1  ;;  %8073 = vmatpush1.bf16.msra.mxu1 %v17909_v20 }
 0x435   :  { %v22945_v7 = vadd.f32 %v8569_v41, %v1332_v31  ;;  %v8571_v49 = vpop.f32.mrb[13].mxu0  ;;  %v8761_v5 = vmul.f32 %v22936_v59, %v22936_v59  ;;  %v22949_v1 = vadd.f32 %v7670_v42, %v1276_v61  ;;  %v7672_v30 = vpop.f32.mrb[15].mxu1  ;;  %8074 = vmatprep.subr.bf16.mxu1 %v17934_v16  ;;  %v18006_v41 = vcombine.high %v22951_v9, %v22953_v51 }
 0x436   :  { %16215 = vmatpush1.bf16.msra.mxu0 %v20535_v48  ;;  %v22955_v28 = vadd.f32 %v8571_v49, %v1336_v6  ;;  %v8573_v62 = vpop.f32.mrb[14].mxu0  ;;  %v8762_v54 = vmul.f32 %v22942_v10, %v22942_v10  ;;  %v22959_v15 = vadd.f32 %v7672_v30, %v1280_v4 }
 0x437   :  { %16216 = vmatprep.subr.bf16.mxu0 %v20540_v25  ;;  %v8575_v11 = vpop.f32.mrb[15].mxu0  ;;  %v8809_v13 = vmul.f32 %v22936_v59, %v8761_v5  ;;  %v8785_v32 = vmul.f32 %v22949_v1, %v22949_v1  ;;  %v8775_v27 = vmul.f32 %v22945_v7, %v22945_v7  ;;  %v22980_v16 = vadd.f32 %v8573_v62, %v1332_v31 }
 0x438   :  { %v8810_v50 = vmul.f32 %v22942_v10, %v8762_v54  ;;  %v8786_v56 = vmul.f32 %v22959_v15, %v22959_v15  ;;  %8075 = vmatpush1.bf16.msra.mxu1 %v17933_v45  ;;  %v8776_v61 = vmul.f32 %v22955_v28, %v22955_v28  ;;  %v22984_v63 = vadd.f32 %v8575_v11, %v1336_v6  ;;  %v20544_v6 = vld [vmem:[#allocation8 + $0xa80] ss:$24 sps:$4 sm:$0xff]   ;;  %v20549_v54 = vld [vmem:[#allocation8 + $0xab4] ss:$24 sps:$4 sm:$0xff]  }
 0x439   :  { %v8857_v4 = vmul.f32 0.044715, %v8809_v13  ;;  %v8833_v20 = vmul.f32 %v22949_v1, %v8785_v32  ;;  %8076 = vmatprep.subr.bf16.mxu1 %v17958_v29  ;;  %v8823_v48 = vmul.f32 %v22945_v7, %v8775_v27  ;;  %v8799_v49 = vmul.f32 %v22980_v16, %v22980_v16 }
 0x43a   :  { %16217 = vmatpush1.bf16.msra.mxu0 %v20538_v47  ;;  %v8858_v37 = vmul.f32 0.044715, %v8810_v50  ;;  %v8834_v17 = vmul.f32 %v22959_v15, %v8786_v56  ;;  %v8824_v25 = vmul.f32 %v22955_v28, %v8776_v61  ;;  %v8800_v9 = vmul.f32 %v22984_v63, %v22984_v63 }
 0x43b   :  { %16218 = vmatprep.subr.bf16.mxu0 %v20543_v2  ;;  %v8905_v39 = vadd.f32 %v22936_v59, %v8857_v4  ;;  %v8881_v19 = vmul.f32 0.044715, %v8833_v20  ;;  %v8871_v42 = vmul.f32 0.044715, %v8823_v48  ;;  %v350_v2 = vld [vmem:[#allocation5 + $0x818] sm:$0xff]  ;;  %v8847_v13 = vmul.f32 %v22980_v16, %v8799_v49 }
 0x43c   :  { %v8906_v45 = vadd.f32 %v22942_v10, %v8858_v37  ;;  %v8882_v31 = vmul.f32 0.044715, %v8834_v17  ;;  %8077 = vmatpush1.bf16.msra.mxu1 %v17957_v0  ;;  %v8872_v29 = vmul.f32 0.044715, %v8824_v25  ;;  %v338_v0 = vld [vmem:[#allocation5 + $0x7b8] sm:$0xff]  ;;  %v8848_v27 = vmul.f32 %v22984_v63, %v8800_v9 }
 0x43d   :  { %v8953_v5 = vmul.f32 0.7978846, %v8905_v39  ;;  %v8929_v30 = vadd.f32 %v22949_v1, %v8881_v19  ;;  %8078 = vmatprep.subr.bf16.mxu1 %v17982_v26  ;;  %v8919_v47 = vadd.f32 %v22945_v7, %v8871_v42  ;;  %v8895_v61 = vmul.f32 0.044715, %v8847_v13  ;;  %v20547_v4 = vld [vmem:[#allocation8 + $0xab0] ss:$24 sps:$4 sm:$0xff]  }
 0x43e   :  { %16219 = vmatpush1.bf16.msra.mxu0 %v20541_v12  ;;  %v8954_v51 = vmul.f32 0.7978846, %v8906_v45  ;;  %v8930_v62 = vadd.f32 %v22959_v15, %v8882_v31  ;;  %v8920_v11 = vadd.f32 %v22955_v28, %v8872_v29  ;;  %v18030_v20 = vcombine.high %v338_v0, %v350_v2  ;;  %v20552_v48 = vld [vmem:[#allocation8 + $0xae4] ss:$24 sps:$4 sm:$0xff]   ;;  %v20550_v19 = vld [vmem:[#allocation8 + $0xae0] ss:$24 sps:$4 sm:$0xff]  }
 0x43f   :  { %16220 = vmatprep.subr.bf16.mxu0 %v20546_v8  ;;  %22152 = vtanh.f32 %v8953_v5  ;;  %v8977_v32 = vmul.f32 0.7978846, %v8929_v30  ;;  %v8967_v26 = vmul.f32 0.7978846, %v8919_v47  ;;  %v8896_v12 = vmul.f32 0.044715, %v8848_v27 }
 0x440   :  { %22154 = vtanh.f32 %v8954_v51  ;;  %v8978_v50 = vmul.f32 0.7978846, %v8930_v62  ;;  %8079 = vmatpush1.bf16.msra.mxu1 %v17981_v14  ;;  %v8968_v56 = vmul.f32 0.7978846, %v8920_v11  ;;  %v362_v37 = vld [vmem:[#allocation5 + $0x878] sm:$0xff]  ;;  %v8943_v8 = vadd.f32 %v22980_v16, %v8895_v61 }
 0x441   :  { %22156 = vtanh.f32 %v8977_v32  ;;  %8080 = vmatprep.subr.bf16.mxu1 %v18006_v41  ;;  %v374_v17 = vld [vmem:[#allocation5 + $0x8d8] sm:$0xff]  ;;  %v8944_v25 = vadd.f32 %v22984_v63, %v8896_v12  ;;  %v18029_v14 = vcombine.low %v338_v0, %v350_v2  ;;  %v20555_v45 = vld [vmem:[#allocation8 + $0xb14] ss:$24 sps:$4 sm:$0xff]   ;;  %v8713_v13 = vmul.f32 0.5, %v22936_v59 }
 0x442   :  { %16221 = vmatpush1.bf16.msra.mxu0 %v20544_v6  ;;  %22158 = vtanh.f32 %v8978_v50  ;;  %v8991_v39 = vmul.f32 0.7978846, %v8943_v8  ;;  %v18054_v41 = vcombine.high %v362_v37, %v374_v17  ;;  %v386_v31 = vld [vmem:[#allocation5 + $0x938] sm:$0xff]  ;;  %v18053_v49 = vcombine.low %v362_v37, %v374_v17  ;;  %v20561_v37 = vld [vmem:[#allocation8 + $0xb74] ss:$24 sps:$4 sm:$0xff]  }
 0x443   :  { %16222 = vmatprep.subr.bf16.mxu0 %v20549_v54  ;;  %22160 = vtanh.f32 %v8967_v26  ;;  %v8992_v42 = vmul.f32 0.7978846, %v8944_v25  ;;  %v398_v29 = vld [vmem:[#allocation5 + $0x998] sm:$0xff]  ;;  %v8737_v32 = vmul.f32 0.5, %v22949_v1  ;;  %v8714_v61 = vmul.f32 0.5, %v22942_v10 }
 0x444   :  { %8081 = vmatpush1.bf16.msra.mxu1 %v18005_v55  ;;  %22162 = vtanh.f32 %v8968_v56  ;;  %v20553_v55 = vld [vmem:[#allocation8 + $0xb10] ss:$24 sps:$4 sm:$0xff]   ;;  %v18078_v30 = vcombine.high %v386_v31, %v398_v29  ;;  %v410_v6 = vld [vmem:[#allocation5 + $0x9f8] sm:$0xff]  ;;  %v18077_v0 = vcombine.low %v386_v31, %v398_v29  ;;  %v8727_v12 = vmul.f32 0.5, %v22945_v7 }
 0x445   :  { %8082 = vmatprep.subr.bf16.mxu1 %v18030_v20  ;;  %22164 = vtanh.f32 %v8991_v39  ;;  %v422_v47 = vld [vmem:[#allocation5 + $0xa58] sm:$0xff]  ;;  %v8728_v25 = vmul.f32 0.5, %v22955_v28  ;;  %v8752_v7 = vmul.f32 0.5, %v22984_v63  ;;  %v20559_v29 = vld [vmem:[#allocation8 + $0xb70] ss:$24 sps:$4 sm:$0xff]  }
 0x446   :  { %16223 = vmatpush1.bf16.msra.mxu0 %v20547_v4  ;;  %22166 = vtanh.f32 %v8992_v42  ;;  %v20558_v51 = vld [vmem:[#allocation8 + $0xb44] ss:$24 sps:$4 sm:$0xff]   ;;  %v18102_v26 = vcombine.high %v410_v6, %v422_v47  ;;  %v20556_v56 = vld [vmem:[#allocation8 + $0xb40] ss:$24 sps:$4 sm:$0xff]   ;;  %v8738_v4 = vmul.f32 0.5, %v22959_v15  ;;  %v18101_v15 = vcombine.low %v410_v6, %v422_v47 }
 0x447   :  { %16224 = vmatprep.subr.bf16.mxu0 %v20552_v48  ;;  %v434_v59 = vld [vmem:[#allocation5 + $0xab8] sm:$0xff] }
 0x448   :  { %8083 = vmatpush1.bf16.msra.mxu1 %v18029_v14  ;;  %v446_v17 = vld [vmem:[#allocation5 + $0xb18] sm:$0xff] }
 0x449   :  { %v22153_v5 = vpop.eup %22152  ;;  %8084 = vmatprep.subr.bf16.mxu1 %v18054_v41  ;;  %v8751_v41 = vmul.f32 0.5, %v22980_v16  ;;  %v18126_v28 = vcombine.high %v434_v59, %v446_v17  ;;  %v458_v16 = vld [vmem:[#allocation5 + $0xb78] sm:$0xff]  ;;  %v18125_v63 = vcombine.low %v434_v59, %v446_v17  ;;  %v20573_v59 = vld [vmem:[#allocation8 + $0xc34] ss:$24 sps:$4 sm:$0xff]  }
 0x44a   :  { %16225 = vmatpush1.bf16.msra.mxu0 %v20550_v19  ;;  %v22155_v9 = vpop.eup %22154  ;;  %v9049_v62 = vadd.f32 1.0, %v22153_v5  ;;  %v530_v17 = vld [vmem:[#allocation5 + $0xdb8] sm:$0xff] }
 0x44b   :  { %16226 = vmatprep.subr.bf16.mxu0 %v20555_v45  ;;  %v22157_v54 = vpop.eup %22156  ;;  %v9050_v2 = vadd.f32 1.0, %v22155_v9  ;;  %v470_v9 = vld [vmem:[#allocation5 + $0xbd8] sm:$0xff] }
 0x44c   :  { %v22159_v11 = vpop.eup %22158  ;;  %8085 = vmatpush1.bf16.msra.mxu1 %v18053_v49  ;;  %v9073_v27 = vadd.f32 1.0, %v22157_v54  ;;  %v9097_v1 = vmul.f32 %v9049_v62, %v8713_v13  ;;  %v20562_v54 = vld [vmem:[#allocation8 + $0xba0] ss:$24 sps:$4 sm:$0xff]  }
 0x44d   :  { %v22161_v50 = vpop.eup %22160  ;;  %8086 = vmatprep.subr.bf16.mxu1 %v18078_v30  ;;  %v9074_v20 = vadd.f32 1.0, %v22159_v11  ;;  %v9098_v39 = vmul.f32 %v9050_v2, %v8714_v61  ;;  %v20564_v30 = vld [vmem:[#allocation8 + $0xba4] ss:$24 sps:$4 sm:$0xff]   ;;  %v20567_v11 = vld [vmem:[#allocation8 + $0xbd4] ss:$24 sps:$4 sm:$0xff]  }
 0x44e   :  { %16227 = vmatpush1.bf16.msra.mxu0 %v20553_v55  ;;  %v22163_v48 = vpop.eup %22162  ;;  %v9121_v8 = vmul.f32 %v9073_v27, %v8737_v32  ;;  %v9063_v14 = vadd.f32 1.0, %v22161_v50  ;;  %v482_v13 = vld [vmem:[#allocation5 + $0xc38] sm:$0xff]  ;;  %v18149_v27 = vcombine.low %v458_v16, %v470_v9  ;;  %v20565_v50 = vld [vmem:[#allocation8 + $0xbd0] ss:$24 sps:$4 sm:$0xff]  }
 0x44f   :  { %16228 = vmatprep.subr.bf16.mxu0 %v20558_v51  ;;  %v9122_v19 = vmul.f32 %v9074_v20, %v8738_v4  ;;  %v9064_v10 = vadd.f32 1.0, %v22163_v48  ;;  %v22165_v42 = vpop.eup %22164  ;;  %v494_v32 = vld [vmem:[#allocation5 + $0xc98] sm:$0xff] }
 0x450   :  { %8087 = vmatpush1.bf16.msra.mxu1 %v18077_v0  ;;  %v23009_v45 = vpack.c.bf16 %v9121_v8, %v9097_v1  ;;  %v22167_v31 = vpop.eup %22166  ;;  %v9087_v5 = vadd.f32 1.0, %v22165_v42  ;;  %v9111_v55 = vmul.f32 %v9063_v14, %v8727_v12  ;;  %v18150_v0 = vcombine.high %v458_v16, %v470_v9  ;;  %v20570_v61 = vld [vmem:[#allocation8 + $0xc04] ss:$24 sps:$4 sm:$0xff]   ;;  %v20568_v48 = vld [vmem:[#allocation8 + $0xc00] ss:$24 sps:$4 sm:$0xff]  }
 0x451   :  { %8088 = vmatprep.subr.bf16.mxu1 %v18102_v26  ;;  %v23012_v49 = vpack.c.bf16 %v9122_v19, %v9098_v39  ;;  %v9088_v51 = vadd.f32 1.0, %v22167_v31  ;;  %v9112_v62 = vmul.f32 %v9064_v10, %v8728_v25  ;;  %v506_v4 = vld [vmem:[#allocation5 + $0xcf8] sm:$0xff]  ;;  %v18173_v12 = vcombine.low %v482_v13, %v494_v32  ;;  %v23019_v8 = vld [vmem:[#allocation2] ss:$24 sps:$4 sm:$0xff]  }
 0x452   :  { %16229 = vmatpush1.bf16.msra.mxu0 %v20556_v56  ;;  %v9135_v6 = vmul.f32 %v9087_v5, %v8751_v41  ;;  %v18174_v56 = vcombine.high %v482_v13, %v494_v32  ;;  %v518_v20 = vld [vmem:[#allocation5 + $0xd58] sm:$0xff]  ;;  %v20571_v14 = vld [vmem:[#allocation8 + $0xc30] ss:$24 sps:$4 sm:$0xff]  }
 0x453   :  { %16230 = vmatprep.subr.bf16.mxu0 %v20561_v37  ;;  %16236 = vmatprep.mubr.bf16.mxu0 %v23012_v49  ;;  %v9136_v47 = vmul.f32 %v9088_v51, %v8752_v7  ;;  %v18198_v37 = vcombine.high %v506_v4, %v518_v20  ;;  %v542_v1 = vld [vmem:[#allocation5 + $0xe18] sm:$0xff]  ;;  %v18197_v25 = vcombine.low %v506_v4, %v518_v20  ;;  %v20583_v32 = vld [vmem:[#allocation8 + $0xcf0] ss:$24 sps:$4 sm:$0xff]  }
 0x454   :  { %8089 = vmatpush1.bf16.msra.mxu1 %v18101_v15  ;;  %v23015_v2 = vpack.c.bf16 %v9135_v6, %v9111_v55  ;;  %v18222_v39 = vcombine.high %v530_v17, %v542_v1  ;;  %v20576_v19 = vld [vmem:[#allocation8 + $0xc64] ss:$24 sps:$4 sm:$0xff]   ;;  %v18221_v15 = vcombine.low %v530_v17, %v542_v1  ;;  %v20574_v7 = vld [vmem:[#allocation8 + $0xc60] ss:$24 sps:$4 sm:$0xff]   ;;  %v20589_v1 = vld [vmem:[#allocation8 + $0xd50] ss:$24 sps:$4 sm:$0xff]  }
 0x455   :  { %8090 = vmatprep.subr.bf16.mxu1 %v18126_v28  ;;  %v23017_v26 = vpack.c.bf16 %v9136_v47, %v9112_v62  ;;  %v554_v41 = vld [vmem:[#allocation5 + $0xe78] sm:$0xff] }
 0x456   :  { %16231 = vmatpush1.bf16.msra.mxu0 %v20559_v29  ;;  %v566_v10 = vld [vmem:[#allocation5 + $0xed8] sm:$0xff]  ;;  %v20579_v29 = vld [vmem:[#allocation8 + $0xc94] ss:$24 sps:$4 sm:$0xff]  }
 0x457   :  { %16232 = vmatprep.subr.bf16.mxu0 %v20564_v30  ;;  %v23024_v42 = vld [vmem:[#allocation2 + $0xc] ss:$24 sps:$4 sm:$0xff]   ;;  %v18246_v31 = vcombine.high %v554_v41, %v566_v10  ;;  %v18245_v55 = vcombine.low %v554_v41, %v566_v10  ;;  %v20577_v30 = vld [vmem:[#allocation8 + $0xc90] ss:$24 sps:$4 sm:$0xff]   ;;  %v20586_v20 = vld [vmem:[#allocation8 + $0xd20] ss:$24 sps:$4 sm:$0xff]  }
 0x458   :  { %8091 = vmatpush1.bf16.msra.mxu1 %v18125_v63  ;;  %v578_v28 = vld [vmem:[#allocation5 + $0xf38] sm:$0xff] }
 0x459   :  { %8092 = vmatprep.subr.bf16.mxu1 %v18150_v0  ;;  %v590_v5 = vld [vmem:[#allocation5 + $0xf98] sm:$0xff] }
 0x45a   :  { %16233 = vmatpush1.bf16.msra.mxu0 %v20562_v54  ;;  %v18270_v16 = vcombine.high %v578_v28, %v590_v5  ;;  %v20582_v9 = vld [vmem:[#allocation8 + $0xcc4] ss:$24 sps:$4 sm:$0xff]   ;;  %v18269_v6 = vcombine.low %v578_v28, %v590_v5  ;;  %v20580_v63 = vld [vmem:[#allocation8 + $0xcc0] ss:$24 sps:$4 sm:$0xff]   ;;  %v20585_v54 = vld [vmem:[#allocation8 + $0xcf4] ss:$24 sps:$4 sm:$0xff]  }
 0x45b   :  { %16234 = vmatprep.subr.bf16.mxu0 %v20567_v11  ;;  %v602_v51 = vld [vmem:[#allocation5 + $0xff8] sm:$0xff]  ;;  %v20595_v5 = vld [vmem:[#allocation8 + $0xdb0] ss:$24 sps:$4 sm:$0xff]  }
 0x45c   :  { %8093 = vmatpush1.bf16.msra.mxu1 %v18149_v27  ;;  %v614_v62 = vld [vmem:[#allocation5 + $0x1058] sm:$0xff] }
 0x45d   :  { %8105 = vmatprep.subr.bf16.mxu1 %v18174_v56  ;;  %v18294_v47 = vcombine.high %v602_v51, %v614_v62  ;;  %v626_v0 = vld [vmem:[#allocation5 + $0x10b8] sm:$0xff]  ;;  %v18293_v13 = vcombine.low %v602_v51, %v614_v62 }
 0x45e   :  { %16235 = vmatpush1.bf16.msra.mxu0 %v20565_v50  ;;  %v638_v11 = vld [vmem:[#allocation5 + $0x1118] sm:$0xff] }
 0x45f   :  { %16247 = vmatprep.subr.bf16.mxu0 %v20570_v61  ;;  %8095 = vmatmul.mubr.bf16.vlgmr.msra.gmra.mrb[20].mxu1 %v23019_v8  ;;  %v18318_v27 = vcombine.high %v626_v0, %v638_v11  ;;  %v20588_v50 = vld [vmem:[#allocation8 + $0xd24] ss:$24 sps:$4 sm:$0xff]   ;;  %v18317_v4 = vcombine.low %v626_v0, %v638_v11  ;;  %v20592_v10 = vld [vmem:[#allocation8 + $0xd80] ss:$24 sps:$4 sm:$0xff]   ;;  %v20601_v11 = vld [vmem:[#allocation8 + $0xe10] ss:$24 sps:$4 sm:$0xff]  }
 0x460   :  { %8106 = vmatpush1.bf16.msra.mxu1 %v18173_v12  ;;  %8137 = vmatprep.mubr.bf16.mxu1 %v23024_v42  ;;  %v650_v56 = vld [vmem:[#allocation5 + $0x1178] sm:$0xff] }
 0x461   :  { %16237 = vmatmul.mubr.bf16.vlgmr.msra.gmra.mrb[16].mxu0 %v23009_v45  ;;  %8107 = vmatprep.subr.bf16.mxu1 %v18198_v37  ;;  %v662_v61 = vld [vmem:[#allocation5 + $0x11d8] sm:$0xff] }
 0x462   :  { %16248 = vmatpush1.bf16.msra.mxu0 %v20568_v48  ;;  %16279 = vmatprep.mubr.bf16.mxu0 %v22650_v3  ;;  %v18342_v12 = vcombine.high %v650_v56, %v662_v61  ;;  %v20591_v48 = vld [vmem:[#allocation8 + $0xd54] ss:$24 sps:$4 sm:$0xff]   ;;  %v674_v37 = vld [vmem:[#allocation5 + $0x1238] sm:$0xff]  ;;  %v18341_v17 = vcombine.low %v650_v56, %v662_v61 }
 0x463   :  { %16249 = vmatprep.subr.bf16.mxu0 %v20573_v59  ;;  %v686_v59 = vld [vmem:[#allocation5 + $0x1298] sm:$0xff] }
 0x464   :  { %8108 = vmatpush1.bf16.msra.mxu1 %v18197_v25  ;;  %v18366_v25 = vcombine.high %v674_v37, %v686_v59  ;;  %v18365_v41 = vcombine.low %v674_v37, %v686_v59  ;;  %v20598_v62 = vld [vmem:[#allocation8 + $0xde0] ss:$24 sps:$4 sm:$0xff]   ;;  %v20607_v59 = vld [vmem:[#allocation8 + $0xe70] ss:$24 sps:$4 sm:$0xff]  }
 0x465   :  { %8109 = vmatprep.subr.bf16.mxu1 %v18222_v39  ;;  %v698_v39 = vld [vmem:[#allocation5 + $0x12f8] sm:$0xff] }
 0x466   :  { %16250 = vmatpush1.bf16.msra.mxu0 %v20571_v14  ;;  %v20594_v14 = vld [vmem:[#allocation8 + $0xd84] ss:$24 sps:$4 sm:$0xff]   ;;  %v20604_v61 = vld [vmem:[#allocation8 + $0xe40] ss:$24 sps:$4 sm:$0xff]  }
 0x467   :  { %16251 = vmatprep.subr.bf16.mxu0 %v20576_v19  ;;  %v710_v19 = vld [vmem:[#allocation5 + $0x1358] sm:$0xff] }
 0x468   :  { %8110 = vmatpush1.bf16.msra.mxu1 %v18221_v15  ;;  %v18390_v15 = vcombine.high %v698_v39, %v710_v19  ;;  %v18389_v28 = vcombine.low %v698_v39, %v710_v19  ;;  %v20610_v19 = vld [vmem:[#allocation8 + $0xea0] ss:$24 sps:$4 sm:$0xff]  }
 0x469   :  { %8111 = vmatprep.subr.bf16.mxu1 %v18246_v31  ;;  %v722_v31 = vld [vmem:[#allocation5 + $0x13b8] sm:$0xff] }
 0x46a   :  { %16252 = vmatpush1.bf16.msra.mxu0 %v20574_v7  ;;  %v20597_v7 = vld [vmem:[#allocation8 + $0xdb4] ss:$24 sps:$4 sm:$0xff]  }
 0x46b   :  { %16253 = vmatprep.subr.bf16.mxu0 %v20579_v29  ;;  %v734_v29 = vld [vmem:[#allocation5 + $0x1418] sm:$0xff] }
 0x46c   :  { %8112 = vmatpush1.bf16.msra.mxu1 %v18245_v55  ;;  %v18414_v55 = vcombine.high %v722_v31, %v734_v29  ;;  %v18413_v51 = vcombine.low %v722_v31, %v734_v29  ;;  %v20613_v29 = vld [vmem:[#allocation8 + $0xed0] ss:$24 sps:$4 sm:$0xff]  }
 0x46d   :  { %8113 = vmatprep.subr.bf16.mxu1 %v18270_v16  ;;  %v746_v16 = vld [vmem:[#allocation5 + $0x1478] sm:$0xff] }
 0x46e   :  { %16254 = vmatpush1.bf16.msra.mxu0 %v20577_v30  ;;  %v20600_v30 = vld [vmem:[#allocation8 + $0xde4] ss:$24 sps:$4 sm:$0xff]  }
 0x46f   :  { %16255 = vmatprep.subr.bf16.mxu0 %v20582_v9  ;;  %v758_v9 = vld [vmem:[#allocation5 + $0x14d8] sm:$0xff] }
 0x470   :  { %8114 = vmatpush1.bf16.msra.mxu1 %v18269_v6  ;;  %v18438_v6 = vcombine.high %v746_v16, %v758_v9  ;;  %v18437_v0 = vcombine.low %v746_v16, %v758_v9 }
 0x471   :  { %8115 = vmatprep.subr.bf16.mxu1 %v18294_v47  ;;  %v770_v47 = vld [vmem:[#allocation5 + $0x1538] sm:$0xff] }
 0x472   :  { %16256 = vmatpush1.bf16.msra.mxu0 %v20580_v63  ;;  %v20603_v63 = vld [vmem:[#allocation8 + $0xe14] ss:$24 sps:$4 sm:$0xff]  }
 0x473   :  { %16257 = vmatprep.subr.bf16.mxu0 %v20585_v54  ;;  %v782_v54 = vld [vmem:[#allocation5 + $0x1598] sm:$0xff] }
 0x474   :  { %8116 = vmatpush1.bf16.msra.mxu1 %v18293_v13  ;;  %v18462_v13 = vcombine.high %v770_v47, %v782_v54  ;;  %v18461_v56 = vcombine.low %v770_v47, %v782_v54  ;;  %v23027_v47 = vld [vmem:[#allocation2 + $0x8] ss:$24 sps:$4 sm:$0xff]  }
 0x475   :  { %8117 = vmatprep.subr.bf16.mxu1 %v18318_v27  ;;  %v794_v27 = vld [vmem:[#allocation5 + $0x15f8] sm:$0xff] }
 0x476   :  { %16258 = vmatpush1.bf16.msra.mxu0 %v20583_v32  ;;  %v20606_v32 = vld [vmem:[#allocation8 + $0xe44] ss:$24 sps:$4 sm:$0xff]  }
 0x477   :  { %16259 = vmatprep.subr.bf16.mxu0 %v20588_v50  ;;  %v806_v50 = vld [vmem:[#allocation5 + $0x1658] sm:$0xff] }
 0x478   :  { %8118 = vmatpush1.bf16.msra.mxu1 %v18317_v4  ;;  %v18486_v4 = vcombine.high %v794_v27, %v806_v50  ;;  %v18485_v37 = vcombine.low %v794_v27, %v806_v50  ;;  %v20624_v27 = vld [vmem:[#allocation8 + $0xf64] ss:$24 sps:$4 sm:$0xff]  }
 0x479   :  { %8119 = vmatprep.subr.bf16.mxu1 %v18342_v12  ;;  %v818_v12 = vld [vmem:[#allocation5 + $0x16b8] sm:$0xff] }
 0x47a   :  { %16260 = vmatpush1.bf16.msra.mxu0 %v20586_v20  ;;  %v20609_v20 = vld [vmem:[#allocation8 + $0xe74] ss:$24 sps:$4 sm:$0xff]  }
 0x47b   :  { %16261 = vmatprep.subr.bf16.mxu0 %v20591_v48  ;;  %v830_v48 = vld [vmem:[#allocation5 + $0x1718] sm:$0xff] }
 0x47c   :  { %8120 = vmatpush1.bf16.msra.mxu1 %v18341_v17  ;;  %v18510_v17 = vcombine.high %v818_v12, %v830_v48  ;;  %v18509_v39 = vcombine.low %v818_v12, %v830_v48  ;;  %v23031_v50 = vld [vmem:[#allocation2 + $0x14] ss:$24 sps:$4 sm:$0xff]  }
 0x47d   :  { %8121 = vmatprep.subr.bf16.mxu1 %v18366_v25  ;;  %v842_v25 = vld [vmem:[#allocation5 + $0x1778] sm:$0xff]  ;;  %v20627_v48 = vld [vmem:[#allocation8 + $0xf94] ss:$24 sps:$4 sm:$0xff]  }
 0x47e   :  { %16262 = vmatpush1.bf16.msra.mxu0 %v20589_v1  ;;  %v20612_v1 = vld [vmem:[#allocation8 + $0xea4] ss:$24 sps:$4 sm:$0xff]  }
 0x47f   :  { %16263 = vmatprep.subr.bf16.mxu0 %v20594_v14  ;;  %v854_v14 = vld [vmem:[#allocation5 + $0x17d8] sm:$0xff] }
 0x480   :  { %8122 = vmatpush1.bf16.msra.mxu1 %v18365_v41  ;;  %v18534_v41 = vcombine.high %v842_v25, %v854_v14  ;;  %v18533_v31 = vcombine.low %v842_v25, %v854_v14  ;;  %v974_v12 = vld [vmem:[#allocation5 + $0x1b98] sm:$0xff] }
 0x481   :  { %8123 = vmatprep.subr.bf16.mxu1 %v18390_v15  ;;  %v866_v15 = vld [vmem:[#allocation5 + $0x1838] sm:$0xff] }
 0x482   :  { %16264 = vmatpush1.bf16.msra.mxu0 %v20592_v10  ;;  %v20615_v10 = vld [vmem:[#allocation8 + $0xed4] ss:$24 sps:$4 sm:$0xff]   ;;  %v998_v25 = vld [vmem:[#allocation5 + $0x1c58] sm:$0xff] }
 0x483   :  { %16265 = vmatprep.subr.bf16.mxu0 %v20597_v7  ;;  %v878_v7 = vld [vmem:[#allocation5 + $0x1898] sm:$0xff] }
 0x484   :  { %8124 = vmatpush1.bf16.msra.mxu1 %v18389_v28  ;;  %v18558_v28 = vcombine.high %v866_v15, %v878_v7  ;;  %v18557_v16 = vcombine.low %v866_v15, %v878_v7  ;;  %v20630_v14 = vld [vmem:[#allocation8 + $0xfc4] ss:$24 sps:$4 sm:$0xff]   ;;  %v20633_v7 = vld [vmem:[#allocation8 + $0xff4] ss:$24 sps:$4 sm:$0xff]  }
 0x485   :  { %8125 = vmatprep.subr.bf16.mxu1 %v18414_v55  ;;  %v902_v55 = vld [vmem:[#allocation5 + $0x1958] sm:$0xff] }
 0x486   :  { %16266 = vmatpush1.bf16.msra.mxu0 %v20595_v5  ;;  %v890_v5 = vld [vmem:[#allocation5 + $0x18f8] sm:$0xff] }
 0x487   :  { %16267 = vmatprep.subr.bf16.mxu0 %v20600_v30  ;;  %v20618_v30 = vld [vmem:[#allocation8 + $0xf04] ss:$24 sps:$4 sm:$0xff]   ;;  %v18582_v9 = vcombine.high %v890_v5, %v902_v55  ;;  %v18581_v54 = vcombine.low %v890_v5, %v902_v55 }
 0x488   :  { %8126 = vmatpush1.bf16.msra.mxu1 %v18413_v51  ;;  %v20616_v51 = vld [vmem:[#allocation8 + $0xf00] ss:$24 sps:$4 sm:$0xff]  }
 0x489   :  { %8127 = vmatprep.subr.bf16.mxu1 %v18438_v6  ;;  %v926_v6 = vld [vmem:[#allocation5 + $0x1a18] sm:$0xff] }
 0x48a   :  { %16268 = vmatpush1.bf16.msra.mxu0 %v20598_v62  ;;  %v914_v62 = vld [vmem:[#allocation5 + $0x19b8] sm:$0xff] }
 0x48b   :  { %16269 = vmatprep.subr.bf16.mxu0 %v20603_v63  ;;  %v20621_v63 = vld [vmem:[#allocation8 + $0xf34] ss:$24 sps:$4 sm:$0xff]   ;;  %v1022_v15 = vld [vmem:[#allocation5 + $0x1d18] sm:$0xff] }
 0x48c   :  { %8128 = vmatpush1.bf16.msra.mxu1 %v18437_v0  ;;  %v18606_v0 = vcombine.high %v914_v62, %v926_v6  ;;  %v1034_v5 = vld [vmem:[#allocation5 + $0x1d78] sm:$0xff] }
 0x48d   :  { %8129 = vmatprep.subr.bf16.mxu1 %v18462_v13  ;;  %v938_v13 = vld [vmem:[#allocation5 + $0x1a78] sm:$0xff] }
 0x48e   :  { %16270 = vmatpush1.bf16.msra.mxu0 %v20601_v11  ;;  %v20619_v11 = vld [vmem:[#allocation8 + $0xf30] ss:$24 sps:$4 sm:$0xff]   ;;  %v1046_v55 = vld [vmem:[#allocation5 + $0x1dd8] sm:$0xff] }
 0x48f   :  { %16271 = vmatprep.subr.bf16.mxu0 %v20606_v32  ;;  %v950_v32 = vld [vmem:[#allocation5 + $0x1ad8] sm:$0xff] }
 0x490   :  { %8130 = vmatpush1.bf16.msra.mxu1 %v18461_v56  ;;  %v18605_v56 = vcombine.low %v914_v62, %v926_v6  ;;  %v1058_v62 = vld [vmem:[#allocation5 + $0x1e38] sm:$0xff] }
 0x491   :  { %8131 = vmatprep.subr.bf16.mxu1 %v18486_v4  ;;  %v20622_v4 = vld [vmem:[#allocation8 + $0xf60] ss:$24 sps:$4 sm:$0xff]  }
 0x492   :  { %16272 = vmatpush1.bf16.msra.mxu0 %v20604_v61  ;;  %v18630_v61 = vcombine.high %v938_v13, %v950_v32  ;;  %v1070_v6 = vld [vmem:[#allocation5 + $0x1e98] sm:$0xff] }
 0x493   :  { %16273 = vmatprep.subr.bf16.mxu0 %v20609_v20  ;;  %v962_v20 = vld [vmem:[#allocation5 + $0x1b38] sm:$0xff] }
 0x494   :  { %8132 = vmatpush1.bf16.msra.mxu1 %v18485_v37  ;;  %v18629_v37 = vcombine.low %v938_v13, %v950_v32  ;;  %v1082_v13 = vld [vmem:[#allocation5 + $0x1ef8] sm:$0xff] }
 0x495   :  { %8133 = vmatprep.subr.bf16.mxu1 %v18510_v17  ;;  %v20625_v17 = vld [vmem:[#allocation8 + $0xf90] ss:$24 sps:$4 sm:$0xff]   ;;  %v1094_v32 = vld [vmem:[#allocation5 + $0x1f58] sm:$0xff] }
 0x496   :  { %16274 = vmatpush1.bf16.msra.mxu0 %v20607_v59  ;;  %v18654_v59 = vcombine.high %v962_v20, %v974_v12 }
 0x497   :  { %16275 = vmatprep.subr.bf16.mxu0 %v20612_v1  ;;  %v986_v1 = vld [vmem:[#allocation5 + $0x1bf8] sm:$0xff] }
 0x498   :  { %8134 = vmatpush1.bf16.msra.mxu1 %v18509_v39  ;;  %v18653_v39 = vcombine.low %v962_v20, %v974_v12  ;;  %v1106_v20 = vld [vmem:[#allocation5 + $0x1fb8] sm:$0xff] }
 0x499   :  { %8135 = vmatprep.subr.bf16.mxu1 %v18534_v41  ;;  %v20628_v41 = vld [vmem:[#allocation8 + $0xfc0] ss:$24 sps:$4 sm:$0xff]  }
 0x49a   :  { %16276 = vmatpush1.bf16.msra.mxu0 %v20610_v19  ;;  %v18678_v19 = vcombine.high %v986_v1, %v998_v25  ;;  %v1118_v12 = vld [vmem:[#allocation5 + $0x2018] sm:$0xff] }
 0x49b   :  { %16277 = vmatprep.subr.bf16.mxu0 %v20615_v10  ;;  %v1010_v10 = vld [vmem:[#allocation5 + $0x1cb8] sm:$0xff] }
 0x49c   :  { %8136 = vmatpush1.bf16.msra.mxu1 %v18533_v31  ;;  %v18677_v31 = vcombine.low %v986_v1, %v998_v25  ;;  %v1130_v1 = vld [vmem:[#allocation5 + $0x2078] sm:$0xff] }
 0x49d   :  { %8148 = vmatprep.subr.bf16.mxu1 %v18558_v28  ;;  %v20631_v28 = vld [vmem:[#allocation8 + $0xff0] ss:$24 sps:$4 sm:$0xff]   ;;  %v1142_v25 = vld [vmem:[#allocation5 + $0x20d8] sm:$0xff] }
 0x49e   :  { %16278 = vmatpush1.bf16.msra.mxu0 %v20613_v29  ;;  %v18702_v29 = vcombine.high %v1010_v10, %v1022_v15 }
 0x49f   :  { %16290 = vmatprep.subr.bf16.mxu0 %v20618_v30  ;;  %8138 = vmatmul.mubr.bf16.vlgmr.msra.gmra.mrb[20].mxu1 %v23027_v47  ;;  %v20636_v30 = vld [vmem:[#allocation8 + $0x1024] ss:$24 sps:$4 sm:$0xff]  }
 0x4a0   :  { %8149 = vmatpush1.bf16.msra.mxu1 %v18557_v16  ;;  %8180 = vmatprep.mubr.bf16.mxu1 %v23031_v50  ;;  %v18701_v16 = vcombine.low %v1010_v10, %v1022_v15  ;;  %v1154_v10 = vld [vmem:[#allocation5 + $0x2138] sm:$0xff] }
 0x4a1   :  { %16280 = vmatmul.mubr.bf16.vlgmr.msra.gmra.mrb[16].mxu0 %v22648_v57  ;;  %8150 = vmatprep.subr.bf16.mxu1 %v18582_v9  ;;  %v18726_v9 = vcombine.high %v1034_v5, %v1046_v55  ;;  %v1166_v15 = vld [vmem:[#allocation5 + $0x2198] sm:$0xff] }
 0x4a2   :  { %16291 = vmatpush1.bf16.msra.mxu0 %v20616_v51  ;;  %v20634_v51 = vld [vmem:[#allocation8 + $0x1020] ss:$24 sps:$4 sm:$0xff]  }
 0x4a3   :  { %16292 = vmatprep.subr.bf16.mxu0 %v20621_v63  ;;  %v20639_v63 = vld [vmem:[#allocation8 + $0x1054] ss:$24 sps:$4 sm:$0xff]  }
 0x4a4   :  { %8151 = vmatpush1.bf16.msra.mxu1 %v18581_v54  ;;  %v18725_v54 = vcombine.low %v1034_v5, %v1046_v55  ;;  %v1178_v5 = vld [vmem:[#allocation5 + $0x21f8] sm:$0xff] }
 0x4a5   :  { %8152 = vmatprep.subr.bf16.mxu1 %v18606_v0  ;;  %v18750_v0 = vcombine.high %v1058_v62, %v1070_v6  ;;  %v1190_v55 = vld [vmem:[#allocation5 + $0x2258] sm:$0xff] }
 0x4a6   :  { %16293 = vmatpush1.bf16.msra.mxu0 %v20619_v11  ;;  %v20637_v11 = vld [vmem:[#allocation8 + $0x1050] ss:$24 sps:$4 sm:$0xff]  }
 0x4a7   :  { %16294 = vmatprep.subr.bf16.mxu0 %v20624_v27  ;;  %v20642_v27 = vld [vmem:[#allocation8 + $0x1084] ss:$24 sps:$4 sm:$0xff]  }
 0x4a8   :  { %8153 = vmatpush1.bf16.msra.mxu1 %v18605_v56  ;;  %v18749_v56 = vcombine.low %v1058_v62, %v1070_v6  ;;  %v1202_v62 = vld [vmem:[#allocation5 + $0x22b8] sm:$0xff] }
 0x4a9   :  { %8154 = vmatprep.subr.bf16.mxu1 %v18630_v61  ;;  %v18774_v61 = vcombine.high %v1082_v13, %v1094_v32  ;;  %v1214_v6 = vld [vmem:[#allocation5 + $0x2318] sm:$0xff] }
 0x4aa   :  { %16295 = vmatpush1.bf16.msra.mxu0 %v20622_v4  ;;  %v20640_v4 = vld [vmem:[#allocation8 + $0x1080] ss:$24 sps:$4 sm:$0xff]  }
 0x4ab   :  { %16296 = vmatprep.subr.bf16.mxu0 %v20627_v48  ;;  %v20645_v48 = vld [vmem:[#allocation8 + $0x10b4] ss:$24 sps:$4 sm:$0xff]  }
 0x4ac   :  { %8155 = vmatpush1.bf16.msra.mxu1 %v18629_v37  ;;  %v18773_v37 = vcombine.low %v1082_v13, %v1094_v32  ;;  %v1226_v13 = vld [vmem:[#allocation5 + $0x2378] sm:$0xff] }
 0x4ad   :  { %8156 = vmatprep.subr.bf16.mxu1 %v18654_v59  ;;  %v18798_v59 = vcombine.high %v1106_v20, %v1118_v12  ;;  %v1238_v32 = vld [vmem:[#allocation5 + $0x23d8] sm:$0xff] }
 0x4ae   :  { %16297 = vmatpush1.bf16.msra.mxu0 %v20625_v17  ;;  %v20643_v17 = vld [vmem:[#allocation8 + $0x10b0] ss:$24 sps:$4 sm:$0xff]  }
 0x4af   :  { %16298 = vmatprep.subr.bf16.mxu0 %v20630_v14  ;;  %v20648_v14 = vld [vmem:[#allocation8 + $0x10e4] ss:$24 sps:$4 sm:$0xff]  }
 0x4b0   :  { %8157 = vmatpush1.bf16.msra.mxu1 %v18653_v39  ;;  %v18797_v39 = vcombine.low %v1106_v20, %v1118_v12  ;;  %v100_v20 = vld [vmem:[#allocation5 + $0x48] sm:$0xff] }
 0x4b1   :  { %8158 = vmatprep.subr.bf16.mxu1 %v18678_v19  ;;  %v18822_v19 = vcombine.high %v1130_v1, %v1142_v25  ;;  %v112_v12 = vld [vmem:[#allocation5 + $0xa8] sm:$0xff] }
 0x4b2   :  { %16299 = vmatpush1.bf16.msra.mxu0 %v20628_v41  ;;  %v20646_v41 = vld [vmem:[#allocation8 + $0x10e0] ss:$24 sps:$4 sm:$0xff]  }
 0x4b3   :  { %16300 = vmatprep.subr.bf16.mxu0 %v20633_v7  ;;  %v20651_v7 = vld [vmem:[#allocation8 + $0x1114] ss:$24 sps:$4 sm:$0xff]  }
 0x4b4   :  { %8159 = vmatpush1.bf16.msra.mxu1 %v18677_v31  ;;  %v18821_v31 = vcombine.low %v1130_v1, %v1142_v25  ;;  %v124_v1 = vld [vmem:[#allocation5 + $0x108] sm:$0xff] }
 0x4b5   :  { %8160 = vmatprep.subr.bf16.mxu1 %v18702_v29  ;;  %v18846_v29 = vcombine.high %v1154_v10, %v1166_v15  ;;  %v136_v25 = vld [vmem:[#allocation5 + $0x168] sm:$0xff] }
 0x4b6   :  { %16301 = vmatpush1.bf16.msra.mxu0 %v20631_v28  ;;  %v20649_v28 = vld [vmem:[#allocation8 + $0x1110] ss:$24 sps:$4 sm:$0xff]  }
 0x4b7   :  { %16302 = vmatprep.subr.bf16.mxu0 %v20636_v30  ;;  %v20654_v30 = vld [vmem:[#allocation8 + $0x1144] ss:$24 sps:$4 sm:$0xff]  }
 0x4b8   :  { %8161 = vmatpush1.bf16.msra.mxu1 %v18701_v16  ;;  %v18845_v16 = vcombine.low %v1154_v10, %v1166_v15  ;;  %v160_v10 = vld [vmem:[#allocation5 + $0x228] sm:$0xff]  ;;  %v23034_v15 = vld [vmem:[#allocation2 + $0x10] ss:$24 sps:$4 sm:$0xff]  }
 0x4b9   :  { %8162 = vmatprep.subr.bf16.mxu1 %v18726_v9  ;;  %v18870_v9 = vcombine.high %v1178_v5, %v1190_v55 }
 0x4ba   :  { %16303 = vmatpush1.bf16.msra.mxu0 %v20634_v51  ;;  %v20652_v51 = vld [vmem:[#allocation8 + $0x1140] ss:$24 sps:$4 sm:$0xff]  }
 0x4bb   :  { %16304 = vmatprep.subr.bf16.mxu0 %v20639_v63  ;;  %v20657_v63 = vld [vmem:[#allocation8 + $0x1174] ss:$24 sps:$4 sm:$0xff]  }
 0x4bc   :  { %8163 = vmatpush1.bf16.msra.mxu1 %v18725_v54  ;;  %v18869_v54 = vcombine.low %v1178_v5, %v1190_v55  ;;  %v184_v5 = vld [vmem:[#allocation5 + $0x2e8] sm:$0xff] }
 0x4bd   :  { %8164 = vmatprep.subr.bf16.mxu1 %v18750_v0  ;;  %v18894_v0 = vcombine.high %v1202_v62, %v1214_v6 }
 0x4be   :  { %16305 = vmatpush1.bf16.msra.mxu0 %v20637_v11  ;;  %v20655_v11 = vld [vmem:[#allocation8 + $0x1170] ss:$24 sps:$4 sm:$0xff]  }
 0x4bf   :  { %16306 = vmatprep.subr.bf16.mxu0 %v20642_v27  ;;  %v20660_v27 = vld [vmem:[#allocation8 + $0x11a4] ss:$24 sps:$4 sm:$0xff]  }
 0x4c0   :  { %8165 = vmatpush1.bf16.msra.mxu1 %v18749_v56  ;;  %v18893_v56 = vcombine.low %v1202_v62, %v1214_v6  ;;  %v220_v6 = vld [vmem:[#allocation5 + $0x408] sm:$0xff] }
 0x4c1   :  { %8166 = vmatprep.subr.bf16.mxu1 %v18774_v61  ;;  %v18918_v61 = vcombine.high %v1226_v13, %v1238_v32 }
 0x4c2   :  { %16307 = vmatpush1.bf16.msra.mxu0 %v20640_v4  ;;  %v20658_v4 = vld [vmem:[#allocation8 + $0x11a0] ss:$24 sps:$4 sm:$0xff]  }
 0x4c3   :  { %16308 = vmatprep.subr.bf16.mxu0 %v20645_v48  ;;  %v20663_v48 = vld [vmem:[#allocation8 + $0x11d4] ss:$24 sps:$4 sm:$0xff]  }
 0x4c4   :  { %8167 = vmatpush1.bf16.msra.mxu1 %v18773_v37  ;;  %v18917_v37 = vcombine.low %v1226_v13, %v1238_v32  ;;  %v256_v13 = vld [vmem:[#allocation5 + $0x528] sm:$0xff] }
 0x4c5   :  { %8168 = vmatprep.subr.bf16.mxu1 %v18798_v59  ;;  %v17794_v59 = vcombine.high %v100_v20, %v112_v12  ;;  %v23040_v32 = vld [vmem:[#allocation7 + $0x8] sm:$0xff] }
 0x4c6   :  { %16309 = vmatpush1.bf16.msra.mxu0 %v20643_v17  ;;  %v20661_v17 = vld [vmem:[#allocation8 + $0x11d0] ss:$24 sps:$4 sm:$0xff]  }
 0x4c7   :  { %16310 = vmatprep.subr.bf16.mxu0 %v20648_v14  ;;  %v20666_v14 = vld [vmem:[#allocation8 + $0x1204] ss:$24 sps:$4 sm:$0xff]  }
 0x4c8   :  { %8169 = vmatpush1.bf16.msra.mxu1 %v18797_v39  ;;  %v17793_v39 = vcombine.low %v100_v20, %v112_v12  ;;  %v268_v12 = vld [vmem:[#allocation5 + $0x588] sm:$0xff] }
 0x4c9   :  { %8170 = vmatprep.subr.bf16.mxu1 %v18822_v19  ;;  %v17818_v19 = vcombine.high %v124_v1, %v136_v25 }
 0x4ca   :  { %16311 = vmatpush1.bf16.msra.mxu0 %v20646_v41  ;;  %v148_v41 = vld [vmem:[#allocation5 + $0x1c8] sm:$0xff] }
 0x4cb   :  { %16312 = vmatprep.subr.bf16.mxu0 %v20651_v7  ;;  %v17817_v7 = vcombine.low %v124_v1, %v136_v25  ;;  %v17841_v55 = vcombine.low %v148_v41, %v160_v10 }
 0x4cc   :  { %8171 = vmatpush1.bf16.msra.mxu1 %v18821_v31  ;;  %v23037_v31 = vld [vmem:[#allocation2 + $0x4] ss:$24 sps:$4 sm:$0xff]  }
 0x4cd   :  { %8172 = vmatprep.subr.bf16.mxu1 %v18846_v29  ;;  %v17842_v29 = vcombine.high %v148_v41, %v160_v10 }
 0x4ce   :  { %16313 = vmatpush1.bf16.msra.mxu0 %v20649_v28  ;;  %v172_v28 = vld [vmem:[#allocation5 + $0x288] sm:$0xff] }
 0x4cf   :  { %16314 = vmatprep.subr.bf16.mxu0 %v20654_v30  ;;  %v17866_v30 = vcombine.high %v172_v28, %v184_v5 }
 0x4d0   :  { %8173 = vmatpush1.bf16.msra.mxu1 %v18845_v16  ;;  %v196_v16 = vld [vmem:[#allocation5 + $0x348] sm:$0xff] }
 0x4d1   :  { %8174 = vmatprep.subr.bf16.mxu1 %v18870_v9  ;;  %v208_v9 = vld [vmem:[#allocation5 + $0x3a8] sm:$0xff] }
 0x4d2   :  { %16315 = vmatpush1.bf16.msra.mxu0 %v20652_v51  ;;  %v17865_v51 = vcombine.low %v172_v28, %v184_v5  ;;  %v17890_v62 = vcombine.high %v196_v16, %v208_v9  ;;  %v304_v28 = vld [vmem:[#allocation5 + $0x6a8] sm:$0xff] }
 0x4d3   :  { %16316 = vmatprep.subr.bf16.mxu0 %v20657_v63  ;;  %v232_v63 = vld [vmem:[#allocation5 + $0x468] sm:$0xff] }
 0x4d4   :  { %8175 = vmatpush1.bf16.msra.mxu1 %v18869_v54  ;;  %v17889_v54 = vcombine.low %v196_v16, %v208_v9 }
 0x4d5   :  { %8176 = vmatprep.subr.bf16.mxu1 %v18894_v0  ;;  %v17914_v0 = vcombine.high %v220_v6, %v232_v63 }
 0x4d6   :  { %16317 = vmatpush1.bf16.msra.mxu0 %v20655_v11  ;;  %v244_v11 = vld [vmem:[#allocation5 + $0x4c8] sm:$0xff] }
 0x4d7   :  { %16318 = vmatprep.subr.bf16.mxu0 %v20660_v27  ;;  %v1292_v27 = vrot.slane %v23040_v32, %v22655_v24  ;;  %v17937_v25 = vcombine.low %v244_v11, %v256_v13 }
 0x4d8   :  { %8177 = vmatpush1.bf16.msra.mxu1 %v18893_v56  ;;  %v1296_v56 = vrot.slane %v23040_v32, %v22658_v33 }
 0x4d9   :  { %8178 = vmatprep.subr.bf16.mxu1 %v18918_v61  ;;  %v17913_v61 = vcombine.low %v220_v6, %v232_v63 }
 0x4da   :  { %16319 = vmatpush1.bf16.msra.mxu0 %v20658_v4  ;;  %v17938_v4 = vcombine.high %v244_v11, %v256_v13  ;;  %v328_v11 = vld [vmem:[#allocation5 + $0x768] sm:$0xff] }
 0x4db   :  { %16320 = vmatprep.subr.bf16.mxu0 %v20663_v48  ;;  %v280_v48 = vld [vmem:[#allocation5 + $0x5e8] sm:$0xff] }
 0x4dc   :  { %8179 = vmatpush1.bf16.msra.mxu1 %v18917_v37  ;;  %v17962_v41 = vcombine.high %v268_v12, %v280_v48  ;;  %v17961_v9 = vcombine.low %v268_v12, %v280_v48 }
 0x4dd   :  { %8320 = vmatprep.subr.bf16.mxu1 %v17794_v59 }
 0x4de   :  { %16321 = vmatpush1.bf16.msra.mxu0 %v20661_v17 }
 0x4df   :  { %16333 = vmatprep.subr.bf16.mxu0 %v20666_v14  ;;  %8181 = vmatmul.mubr.bf16.vlgmr.msra.gmra.mrb[20].mxu1 %v23034_v15 }
 0x4e0   :  { %8321 = vmatpush1.bf16.msra.mxu1 %v17793_v39  ;;  %8352 = vmatprep.mubr.bf16.mxu1 %v23037_v31 }
 0x4e1   :  { %8322 = vmatprep.subr.bf16.mxu1 %v17818_v19 }
 0x4e4   :  { %8323 = vmatpush1.bf16.msra.mxu1 %v17817_v7 }
 0x4e5   :  { %8324 = vmatprep.subr.bf16.mxu1 %v17842_v29  ;;  %v292_v29 = vld [vmem:[#allocation5 + $0x648] sm:$0xff] }
 0x4e6   :  { %v17986_v6 = vcombine.high %v292_v29, %v304_v28 }
 0x4e8   :  { %8325 = vmatpush1.bf16.msra.mxu1 %v17841_v55 }
 0x4e9   :  { %8326 = vmatprep.subr.bf16.mxu1 %v17866_v30 }
 0x4ec   :  { %8327 = vmatpush1.bf16.msra.mxu1 %v17865_v51 }
 0x4ed   :  { %8328 = vmatprep.subr.bf16.mxu1 %v17890_v62 }
 0x4f0   :  { %8329 = vmatpush1.bf16.msra.mxu1 %v17889_v54 }
 0x4f1   :  { %8330 = vmatprep.subr.bf16.mxu1 %v17914_v0  ;;  %v316_v0 = vld [vmem:[#allocation5 + $0x708] sm:$0xff] }
 0x4f2   :  { %v7924_v20 = vpop.f32.mrb[16].mxu1  ;;  %v18010_v48 = vcombine.high %v316_v0, %v328_v11 }
 0x4f3   :  { %v23046_v37 = vadd.f32 %v7924_v20, %v1292_v27  ;;  %v7926_v59 = vpop.f32.mrb[17].mxu1 }
 0x4f4   :  { %v23048_v17 = vadd.f32 %v7926_v59, %v1296_v56  ;;  %v7928_v1 = vpop.f32.mrb[18].mxu1  ;;  %8331 = vmatpush1.bf16.msra.mxu1 %v17913_v61 }
 0x4f5   :  { %v8765_v14 = vmul.f32 %v23046_v37, %v23046_v37  ;;  %v23052_v39 = vadd.f32 %v7928_v1, %v1292_v27  ;;  %v7930_v19 = vpop.f32.mrb[19].mxu1  ;;  %8332 = vmatprep.subr.bf16.mxu1 %v17938_v4  ;;  %v17985_v4 = vcombine.low %v292_v29, %v304_v28  ;;  %v364_v29 = vld [vmem:[#allocation5 + $0x888] sm:$0xff] }
 0x4f6   :  { %v8766_v10 = vmul.f32 %v23048_v17, %v23048_v17  ;;  %v23056_v7 = vadd.f32 %v7930_v19, %v1296_v56  ;;  %v376_v28 = vld [vmem:[#allocation5 + $0x8e8] sm:$0xff] }
 0x4f7   :  { %v8813_v5 = vmul.f32 %v23046_v37, %v8765_v14  ;;  %v8789_v55 = vmul.f32 %v23052_v39, %v23052_v39  ;;  %v352_v14 = vld [vmem:[#allocation5 + $0x828] sm:$0xff] }
 0x4f8   :  { %v8814_v30 = vmul.f32 %v23048_v17, %v8766_v10  ;;  %v8790_v16 = vmul.f32 %v23056_v7, %v23056_v7  ;;  %8333 = vmatpush1.bf16.msra.mxu1 %v17937_v25  ;;  %v340_v25 = vld [vmem:[#allocation5 + $0x7c8] sm:$0xff]  ;;  %v18009_v10 = vcombine.low %v316_v0, %v328_v11 }
 0x4f9   :  { %v8861_v51 = vmul.f32 0.044715, %v8813_v5  ;;  %v8837_v62 = vmul.f32 %v23052_v39, %v8789_v55  ;;  %8334 = vmatprep.subr.bf16.mxu1 %v17962_v41  ;;  %v18034_v5 = vcombine.high %v340_v25, %v352_v14  ;;  %v18033_v55 = vcombine.low %v340_v25, %v352_v14  ;;  %v424_v0 = vld [vmem:[#allocation5 + $0xa68] sm:$0xff] }
 0x4fa   :  { %v8862_v63 = vmul.f32 0.044715, %v8814_v30  ;;  %v8838_v54 = vmul.f32 %v23056_v7, %v8790_v16  ;;  %v18058_v30 = vcombine.high %v364_v29, %v376_v28  ;;  %v388_v16 = vld [vmem:[#allocation5 + $0x948] sm:$0xff] }
 0x4fb   :  { %v8909_v13 = vadd.f32 %v23046_v37, %v8861_v51  ;;  %v8885_v27 = vmul.f32 0.044715, %v8837_v62  ;;  %v18057_v51 = vcombine.low %v364_v29, %v376_v28  ;;  %v448_v29 = vld [vmem:[#allocation5 + $0xb28] sm:$0xff] }
 0x4fc   :  { %v8910_v56 = vadd.f32 %v23048_v17, %v8862_v63  ;;  %v8886_v61 = vmul.f32 0.044715, %v8838_v54  ;;  %8335 = vmatpush1.bf16.msra.mxu1 %v17961_v9  ;;  %v400_v9 = vld [vmem:[#allocation5 + $0x9a8] sm:$0xff] }
 0x4fd   :  { %v8957_v20 = vmul.f32 0.7978846, %v8909_v13  ;;  %v8933_v12 = vadd.f32 %v23052_v39, %v8885_v27  ;;  %8336 = vmatprep.subr.bf16.mxu1 %v17986_v6  ;;  %v18082_v6 = vcombine.high %v388_v16, %v400_v9  ;;  %v412_v54 = vld [vmem:[#allocation5 + $0xa08] sm:$0xff] }
 0x4fe   :  { %v8958_v59 = vmul.f32 0.7978846, %v8910_v56  ;;  %v8934_v1 = vadd.f32 %v23056_v7, %v8886_v61  ;;  %v8717_v61 = vmul.f32 0.5, %v23046_v37  ;;  %v18105_v37 = vcombine.low %v412_v54, %v424_v0 }
 0x4ff   :  { %22168 = vtanh.f32 %v8957_v20  ;;  %v8981_v19 = vmul.f32 0.7978846, %v8933_v12  ;;  %v18081_v20 = vcombine.low %v388_v16, %v400_v9  ;;  %v20669_v16 = vld [vmem:[#allocation8 + $0x1234] ss:$24 sps:$4 sm:$0xff]  }
 0x500   :  { %22170 = vtanh.f32 %v8958_v59  ;;  %v8982_v41 = vmul.f32 0.7978846, %v8934_v1  ;;  %8337 = vmatpush1.bf16.msra.mxu1 %v17985_v4  ;;  %v8741_v4 = vmul.f32 0.5, %v23052_v39  ;;  %v8718_v59 = vmul.f32 0.5, %v23048_v17  ;;  %v460_v17 = vld [vmem:[#allocation5 + $0xb88] sm:$0xff] }
 0x501   :  { %22172 = vtanh.f32 %v8981_v19  ;;  %8338 = vmatprep.subr.bf16.mxu1 %v18010_v48  ;;  %v18106_v48 = vcombine.high %v412_v54, %v424_v0  ;;  %v8742_v1 = vmul.f32 0.5, %v23056_v7  ;;  %v472_v9 = vld [vmem:[#allocation5 + $0xbe8] sm:$0xff] }
 0x502   :  { %22174 = vtanh.f32 %v8982_v41  ;;  %v496_v54 = vld [vmem:[#allocation5 + $0xca8] sm:$0xff]  ;;  %v18153_v0 = vcombine.low %v460_v17, %v472_v9 }
 0x504   :  { %8339 = vmatpush1.bf16.msra.mxu1 %v18009_v10 }
 0x505   :  { %8340 = vmatprep.subr.bf16.mxu1 %v18034_v5  ;;  %v436_v5 = vld [vmem:[#allocation5 + $0xac8] sm:$0xff] }
 0x506   :  { %v18129_v7 = vcombine.low %v436_v5, %v448_v29 }
 0x508   :  { %8341 = vmatpush1.bf16.msra.mxu1 %v18033_v55  ;;  %v20664_v55 = vld [vmem:[#allocation8 + $0x1200] ss:$24 sps:$4 sm:$0xff]  }
 0x509   :  { %v22169_v62 = vpop.eup %22168  ;;  %8342 = vmatprep.subr.bf16.mxu1 %v18058_v30  ;;  %v18130_v30 = vcombine.high %v436_v5, %v448_v29  ;;  %v568_v5 = vld [vmem:[#allocation5 + $0xee8] sm:$0xff] }
 0x50a   :  { %v22171_v63 = vpop.eup %22170  ;;  %v9053_v11 = vadd.f32 1.0, %v22169_v62  ;;  %v18154_v62 = vcombine.high %v460_v17, %v472_v9  ;;  %v20682_v17 = vld [vmem:[#allocation8 + $0x1320] ss:$24 sps:$4 sm:$0xff]  }
 0x50b   :  { %v22173_v13 = vpop.eup %22172  ;;  %v9054_v27 = vadd.f32 1.0, %v22171_v63  ;;  %v484_v63 = vld [vmem:[#allocation5 + $0xc48] sm:$0xff] }
 0x50c   :  { %v22175_v56 = vpop.eup %22174  ;;  %8343 = vmatpush1.bf16.msra.mxu1 %v18057_v51  ;;  %v9077_v12 = vadd.f32 1.0, %v22173_v13  ;;  %v9101_v14 = vmul.f32 %v9053_v11, %v8717_v61  ;;  %v20667_v51 = vld [vmem:[#allocation8 + $0x1230] ss:$24 sps:$4 sm:$0xff]   ;;  %v20670_v11 = vld [vmem:[#allocation8 + $0x1260] ss:$24 sps:$4 sm:$0xff]   ;;  %v18178_v13 = vcombine.high %v484_v63, %v496_v54 }
 0x50d   :  { %8344 = vmatprep.subr.bf16.mxu1 %v18082_v6  ;;  %v9078_v25 = vadd.f32 1.0, %v22175_v56  ;;  %v9102_v41 = vmul.f32 %v9054_v27, %v8718_v59  ;;  %v20672_v6 = vld [vmem:[#allocation8 + $0x1264] ss:$24 sps:$4 sm:$0xff]   ;;  %v20675_v27 = vld [vmem:[#allocation8 + $0x1294] ss:$24 sps:$4 sm:$0xff]  }
 0x50e   :  { %v9125_v19 = vmul.f32 %v9077_v12, %v8741_v4  ;;  %v508_v56 = vld [vmem:[#allocation5 + $0xd08] sm:$0xff]  ;;  %v18177_v4 = vcombine.low %v484_v63, %v496_v54 }
 0x50f   :  { %v9126_v10 = vmul.f32 %v9078_v25, %v8742_v1  ;;  %v520_v61 = vld [vmem:[#allocation5 + $0xd68] sm:$0xff] }
 0x510   :  { %8345 = vmatpush1.bf16.msra.mxu1 %v18081_v20  ;;  %v23074_v28 = vpack.c.bf16 %v9125_v19, %v9101_v14  ;;  %v20673_v20 = vld [vmem:[#allocation8 + $0x1290] ss:$24 sps:$4 sm:$0xff]   ;;  %v18202_v12 = vcombine.high %v508_v56, %v520_v61  ;;  %v18201_v25 = vcombine.low %v508_v56, %v520_v61  ;;  %v20676_v14 = vld [vmem:[#allocation8 + $0x12c0] ss:$24 sps:$4 sm:$0xff]  }
 0x511   :  { %8346 = vmatprep.subr.bf16.mxu1 %v18106_v48  ;;  %v23076_v39 = vpack.c.bf16 %v9126_v10, %v9102_v41  ;;  %v20678_v48 = vld [vmem:[#allocation8 + $0x12c4] ss:$24 sps:$4 sm:$0xff]   ;;  %v532_v59 = vld [vmem:[#allocation5 + $0xdc8] sm:$0xff]  ;;  %v20688_v56 = vld [vmem:[#allocation8 + $0x1380] ss:$24 sps:$4 sm:$0xff]  }
 0x512   :  { %v544_v1 = vld [vmem:[#allocation5 + $0xe28] sm:$0xff] }
 0x513   :  { %16322 = vmatprep.mubr.bf16.mxu0 %v23076_v39  ;;  %v18226_v19 = vcombine.high %v532_v59, %v544_v1  ;;  %v20681_v41 = vld [vmem:[#allocation8 + $0x12f4] ss:$24 sps:$4 sm:$0xff]   ;;  %v18225_v29 = vcombine.low %v532_v59, %v544_v1  ;;  %v20685_v63 = vld [vmem:[#allocation8 + $0x1350] ss:$24 sps:$4 sm:$0xff]  }
 0x514   :  { %8347 = vmatpush1.bf16.msra.mxu1 %v18105_v37  ;;  %16323 = vmatmul.mubr.bf16.vlgmr.msra.gmra.mrb[16].mxu0 %v23074_v28  ;;  %v556_v10 = vld [vmem:[#allocation5 + $0xe88] sm:$0xff] }
 0x515   :  { %16334 = vmatpush1.bf16.msra.mxu0 %v20664_v55  ;;  %16365 = vmatprep.mubr.bf16.mxu0 %v22824_v21  ;;  %v20679_v37 = vld [vmem:[#allocation8 + $0x12f0] ss:$24 sps:$4 sm:$0xff]   ;;  %v18250_v55 = vcombine.high %v556_v10, %v568_v5 }
 0x516   :  { %8348 = vmatprep.subr.bf16.mxu1 %v18130_v30  ;;  %16335 = vmatprep.subr.bf16.mxu0 %v20669_v16  ;;  %v580_v30 = vld [vmem:[#allocation5 + $0xf48] sm:$0xff] }
 0x517   :  { %v592_v16 = vld [vmem:[#allocation5 + $0xfa8] sm:$0xff] }
 0x518   :  { %8349 = vmatpush1.bf16.msra.mxu1 %v18129_v7  ;;  %v18274_v9 = vcombine.high %v580_v30, %v592_v16  ;;  %v20687_v7 = vld [vmem:[#allocation8 + $0x1354] ss:$24 sps:$4 sm:$0xff]   ;;  %v20691_v59 = vld [vmem:[#allocation8 + $0x13b0] ss:$24 sps:$4 sm:$0xff]  }
 0x519   :  { %16336 = vmatpush1.bf16.msra.mxu0 %v20667_v51  ;;  %8350 = vmatprep.subr.bf16.mxu1 %v18154_v62  ;;  %v604_v51 = vld [vmem:[#allocation5 + $0x1008] sm:$0xff] }
 0x51a   :  { %16337 = vmatprep.subr.bf16.mxu0 %v20672_v6  ;;  %v616_v62 = vld [vmem:[#allocation5 + $0x1068] sm:$0xff]  ;;  %v18273_v6 = vcombine.low %v580_v30, %v592_v16 }
 0x51b   :  { %v18298_v54 = vcombine.high %v604_v51, %v616_v62  ;;  %v20697_v30 = vld [vmem:[#allocation8 + $0x1410] ss:$24 sps:$4 sm:$0xff]  }
 0x51c   :  { %8351 = vmatpush1.bf16.msra.mxu1 %v18153_v0  ;;  %v20690_v0 = vld [vmem:[#allocation8 + $0x1384] ss:$24 sps:$4 sm:$0xff]  }
 0x51d   :  { %16338 = vmatpush1.bf16.msra.mxu0 %v20670_v11  ;;  %8363 = vmatprep.subr.bf16.mxu1 %v18178_v13  ;;  %v628_v11 = vld [vmem:[#allocation5 + $0x10c8] sm:$0xff] }
 0x51e   :  { %16339 = vmatprep.subr.bf16.mxu0 %v20675_v27  ;;  %v640_v13 = vld [vmem:[#allocation5 + $0x1128] sm:$0xff]  ;;  %v18297_v27 = vcombine.low %v604_v51, %v616_v62  ;;  %v20700_v51 = vld [vmem:[#allocation8 + $0x1440] ss:$24 sps:$4 sm:$0xff]  }
 0x51f   :  { %8353 = vmatmul.mubr.bf16.vlgmr.msra.gmra.mrb[24].mxu1 %v23019_v8  ;;  %v20684_v8 = vld [vmem:[#allocation8 + $0x1324] ss:$24 sps:$4 sm:$0xff]   ;;  %v18322_v61 = vcombine.high %v628_v11, %v640_v13 }
 0x520   :  { %8364 = vmatpush1.bf16.msra.mxu1 %v18177_v4  ;;  %8395 = vmatprep.mubr.bf16.mxu1 %v23024_v42  ;;  %v18249_v42 = vcombine.low %v556_v10, %v568_v5  ;;  %v20693_v4 = vld [vmem:[#allocation8 + $0x13b4] ss:$24 sps:$4 sm:$0xff]   ;;  %v20694_v10 = vld [vmem:[#allocation8 + $0x13e0] ss:$24 sps:$4 sm:$0xff]  }
 0x521   :  { %16340 = vmatpush1.bf16.msra.mxu0 %v20673_v20  ;;  %8365 = vmatprep.subr.bf16.mxu1 %v18202_v12  ;;  %v652_v20 = vld [vmem:[#allocation5 + $0x1188] sm:$0xff] }
 0x522   :  { %16341 = vmatprep.subr.bf16.mxu0 %v20678_v48  ;;  %v664_v12 = vld [vmem:[#allocation5 + $0x11e8] sm:$0xff]  ;;  %v18321_v48 = vcombine.low %v628_v11, %v640_v13 }
 0x523   :  { %v18346_v1 = vcombine.high %v652_v20, %v664_v12  ;;  %v20703_v11 = vld [vmem:[#allocation8 + $0x1470] ss:$24 sps:$4 sm:$0xff]  }
 0x524   :  { %8366 = vmatpush1.bf16.msra.mxu1 %v18201_v25  ;;  %v20696_v25 = vld [vmem:[#allocation8 + $0x13e4] ss:$24 sps:$4 sm:$0xff]  }
 0x525   :  { %16342 = vmatpush1.bf16.msra.mxu0 %v20676_v14  ;;  %8367 = vmatprep.subr.bf16.mxu1 %v18226_v19  ;;  %v676_v14 = vld [vmem:[#allocation5 + $0x1248] sm:$0xff] }
 0x526   :  { %16343 = vmatprep.subr.bf16.mxu0 %v20681_v41  ;;  %v688_v19 = vld [vmem:[#allocation5 + $0x12a8] sm:$0xff]  ;;  %v18345_v41 = vcombine.low %v652_v20, %v664_v12  ;;  %v20706_v20 = vld [vmem:[#allocation8 + $0x14a0] ss:$24 sps:$4 sm:$0xff]  }
 0x527   :  { %v18370_v5 = vcombine.high %v676_v14, %v688_v19 }
 0x528   :  { %8368 = vmatpush1.bf16.msra.mxu1 %v18225_v29  ;;  %v20699_v29 = vld [vmem:[#allocation8 + $0x1414] ss:$24 sps:$4 sm:$0xff]  }
 0x529   :  { %16344 = vmatpush1.bf16.msra.mxu0 %v20679_v37  ;;  %8369 = vmatprep.subr.bf16.mxu1 %v18250_v55  ;;  %v700_v37 = vld [vmem:[#allocation5 + $0x1308] sm:$0xff] }
 0x52a   :  { %16345 = vmatprep.subr.bf16.mxu0 %v20684_v8  ;;  %v712_v55 = vld [vmem:[#allocation5 + $0x1368] sm:$0xff]  ;;  %v18369_v8 = vcombine.low %v676_v14, %v688_v19 }
 0x52b   :  { %v18394_v16 = vcombine.high %v700_v37, %v712_v55  ;;  %v20709_v14 = vld [vmem:[#allocation8 + $0x14d0] ss:$24 sps:$4 sm:$0xff]  }
 0x52c   :  { %8370 = vmatpush1.bf16.msra.mxu1 %v18249_v42  ;;  %v20702_v42 = vld [vmem:[#allocation8 + $0x1444] ss:$24 sps:$4 sm:$0xff]  }
 0x52d   :  { %16346 = vmatpush1.bf16.msra.mxu0 %v20682_v17  ;;  %8371 = vmatprep.subr.bf16.mxu1 %v18274_v9  ;;  %v724_v17 = vld [vmem:[#allocation5 + $0x13c8] sm:$0xff] }
 0x52e   :  { %16347 = vmatprep.subr.bf16.mxu0 %v20687_v7  ;;  %v736_v9 = vld [vmem:[#allocation5 + $0x1428] sm:$0xff]  ;;  %v18393_v7 = vcombine.low %v700_v37, %v712_v55  ;;  %v20712_v55 = vld [vmem:[#allocation8 + $0x1500] ss:$24 sps:$4 sm:$0xff]  }
 0x52f   :  { %v18418_v62 = vcombine.high %v724_v17, %v736_v9 }
 0x530   :  { %8372 = vmatpush1.bf16.msra.mxu1 %v18273_v6  ;;  %v20705_v6 = vld [vmem:[#allocation8 + $0x1474] ss:$24 sps:$4 sm:$0xff]  }
 0x531   :  { %16348 = vmatpush1.bf16.msra.mxu0 %v20685_v63  ;;  %8373 = vmatprep.subr.bf16.mxu1 %v18298_v54  ;;  %v748_v63 = vld [vmem:[#allocation5 + $0x1488] sm:$0xff] }
 0x532   :  { %16349 = vmatprep.subr.bf16.mxu0 %v20690_v0  ;;  %v760_v54 = vld [vmem:[#allocation5 + $0x14e8] sm:$0xff]  ;;  %v18417_v0 = vcombine.low %v724_v17, %v736_v9 }
 0x533   :  { %v18442_v13 = vcombine.high %v748_v63, %v760_v54  ;;  %v20715_v9 = vld [vmem:[#allocation8 + $0x1530] ss:$24 sps:$4 sm:$0xff]  }
 0x534   :  { %8374 = vmatpush1.bf16.msra.mxu1 %v18297_v27  ;;  %v20708_v27 = vld [vmem:[#allocation8 + $0x14a4] ss:$24 sps:$4 sm:$0xff]  }
 0x535   :  { %16350 = vmatpush1.bf16.msra.mxu0 %v20688_v56  ;;  %8375 = vmatprep.subr.bf16.mxu1 %v18322_v61  ;;  %v772_v56 = vld [vmem:[#allocation5 + $0x1548] sm:$0xff] }
 0x536   :  { %16351 = vmatprep.subr.bf16.mxu0 %v20693_v4  ;;  %v784_v61 = vld [vmem:[#allocation5 + $0x15a8] sm:$0xff]  ;;  %v18441_v4 = vcombine.low %v748_v63, %v760_v54  ;;  %v20718_v54 = vld [vmem:[#allocation8 + $0x1560] ss:$24 sps:$4 sm:$0xff]  }
 0x537   :  { %v18466_v12 = vcombine.high %v772_v56, %v784_v61 }
 0x538   :  { %8376 = vmatpush1.bf16.msra.mxu1 %v18321_v48  ;;  %v20711_v48 = vld [vmem:[#allocation8 + $0x14d4] ss:$24 sps:$4 sm:$0xff]  }
 0x539   :  { %16352 = vmatpush1.bf16.msra.mxu0 %v20691_v59  ;;  %8377 = vmatprep.subr.bf16.mxu1 %v18346_v1  ;;  %v796_v59 = vld [vmem:[#allocation5 + $0x1608] sm:$0xff] }
 0x53a   :  { %16353 = vmatprep.subr.bf16.mxu0 %v20696_v25  ;;  %v808_v1 = vld [vmem:[#allocation5 + $0x1668] sm:$0xff]  ;;  %v18465_v25 = vcombine.low %v772_v56, %v784_v61 }
 0x53b   :  { %v18490_v19 = vcombine.high %v796_v59, %v808_v1  ;;  %v20721_v61 = vld [vmem:[#allocation8 + $0x1590] ss:$24 sps:$4 sm:$0xff]  }
 0x53c   :  { %8378 = vmatpush1.bf16.msra.mxu1 %v18345_v41  ;;  %v820_v41 = vld [vmem:[#allocation5 + $0x16c8] sm:$0xff] }
 0x53d   :  { %16354 = vmatpush1.bf16.msra.mxu0 %v20694_v10  ;;  %8379 = vmatprep.subr.bf16.mxu1 %v18370_v5  ;;  %v832_v10 = vld [vmem:[#allocation5 + $0x1728] sm:$0xff]  ;;  %v20714_v5 = vld [vmem:[#allocation8 + $0x1504] ss:$24 sps:$4 sm:$0xff]  }
 0x53e   :  { %16355 = vmatprep.subr.bf16.mxu0 %v20699_v29  ;;  %v18489_v29 = vcombine.low %v796_v59, %v808_v1  ;;  %v18514_v37 = vcombine.high %v820_v41, %v832_v10  ;;  %v20724_v1 = vld [vmem:[#allocation8 + $0x15c0] ss:$24 sps:$4 sm:$0xff]  }
 0x540   :  { %8380 = vmatpush1.bf16.msra.mxu1 %v18369_v8  ;;  %v844_v8 = vld [vmem:[#allocation5 + $0x1788] sm:$0xff] }
 0x541   :  { %16356 = vmatpush1.bf16.msra.mxu0 %v20697_v30  ;;  %8381 = vmatprep.subr.bf16.mxu1 %v18394_v16  ;;  %v856_v30 = vld [vmem:[#allocation5 + $0x17e8] sm:$0xff] }
 0x542   :  { %16357 = vmatprep.subr.bf16.mxu0 %v20702_v42  ;;  %v20717_v16 = vld [vmem:[#allocation8 + $0x1534] ss:$24 sps:$4 sm:$0xff]   ;;  %v18513_v42 = vcombine.low %v820_v41, %v832_v10  ;;  %v18538_v17 = vcombine.high %v844_v8, %v856_v30 }
 0x544   :  { %8382 = vmatpush1.bf16.msra.mxu1 %v18393_v7  ;;  %v868_v7 = vld [vmem:[#allocation5 + $0x1848] sm:$0xff] }
 0x545   :  { %16358 = vmatpush1.bf16.msra.mxu0 %v20700_v51  ;;  %8383 = vmatprep.subr.bf16.mxu1 %v18418_v62  ;;  %v880_v51 = vld [vmem:[#allocation5 + $0x18a8] sm:$0xff]  ;;  %v20720_v62 = vld [vmem:[#allocation8 + $0x1564] ss:$24 sps:$4 sm:$0xff]  }
 0x546   :  { %16359 = vmatprep.subr.bf16.mxu0 %v20705_v6  ;;  %v18537_v6 = vcombine.low %v844_v8, %v856_v30  ;;  %v18562_v63 = vcombine.high %v868_v7, %v880_v51  ;;  %v20730_v8 = vld [vmem:[#allocation8 + $0x1620] ss:$24 sps:$4 sm:$0xff]   ;;  %v988_v30 = vld [vmem:[#allocation5 + $0x1c08] sm:$0xff] }
 0x548   :  { %8384 = vmatpush1.bf16.msra.mxu1 %v18417_v0  ;;  %v892_v0 = vld [vmem:[#allocation5 + $0x1908] sm:$0xff] }
 0x549   :  { %16360 = vmatpush1.bf16.msra.mxu0 %v20703_v11  ;;  %8385 = vmatprep.subr.bf16.mxu1 %v18442_v13  ;;  %v904_v11 = vld [vmem:[#allocation5 + $0x1968] sm:$0xff] }
 0x54a   :  { %16361 = vmatprep.subr.bf16.mxu0 %v20708_v27  ;;  %v20723_v13 = vld [vmem:[#allocation8 + $0x1594] ss:$24 sps:$4 sm:$0xff]   ;;  %v18561_v27 = vcombine.low %v868_v7, %v880_v51  ;;  %v18586_v56 = vcombine.high %v892_v0, %v904_v11  ;;  %v20733_v7 = vld [vmem:[#allocation8 + $0x1650] ss:$24 sps:$4 sm:$0xff]  }
 0x54b   :  { %v1012_v51 = vld [vmem:[#allocation5 + $0x1cc8] sm:$0xff] }
 0x54c   :  { %8386 = vmatpush1.bf16.msra.mxu1 %v18441_v4  ;;  %v916_v4 = vld [vmem:[#allocation5 + $0x19c8] sm:$0xff] }
 0x54d   :  { %16362 = vmatpush1.bf16.msra.mxu0 %v20706_v20  ;;  %8387 = vmatprep.subr.bf16.mxu1 %v18466_v12  ;;  %v928_v20 = vld [vmem:[#allocation5 + $0x1a28] sm:$0xff]  ;;  %v20726_v12 = vld [vmem:[#allocation8 + $0x15c4] ss:$24 sps:$4 sm:$0xff]  }
 0x54e   :  { %16363 = vmatprep.subr.bf16.mxu0 %v20711_v48  ;;  %v18585_v48 = vcombine.low %v892_v0, %v904_v11  ;;  %v18610_v59 = vcombine.high %v916_v4, %v928_v20  ;;  %v18609_v41 = vcombine.low %v916_v4, %v928_v20  ;;  %v20736_v0 = vld [vmem:[#allocation8 + $0x1680] ss:$24 sps:$4 sm:$0xff]   ;;  %v1036_v11 = vld [vmem:[#allocation5 + $0x1d88] sm:$0xff] }
 0x54f   :  { %v20739_v4 = vld [vmem:[#allocation8 + $0x16b0] ss:$24 sps:$4 sm:$0xff]  }
 0x550   :  { %8388 = vmatpush1.bf16.msra.mxu1 %v18465_v25  ;;  %v940_v25 = vld [vmem:[#allocation5 + $0x1a88] sm:$0xff] }
 0x551   :  { %16364 = vmatpush1.bf16.msra.mxu0 %v20709_v14  ;;  %8389 = vmatprep.subr.bf16.mxu1 %v18490_v19  ;;  %v952_v14 = vld [vmem:[#allocation5 + $0x1ae8] sm:$0xff] }
 0x552   :  { %16376 = vmatprep.subr.bf16.mxu0 %v20714_v5  ;;  %v20729_v19 = vld [vmem:[#allocation8 + $0x15f4] ss:$24 sps:$4 sm:$0xff]   ;;  %v18634_v10 = vcombine.high %v940_v25, %v952_v14  ;;  %v20727_v5 = vld [vmem:[#allocation8 + $0x15f0] ss:$24 sps:$4 sm:$0xff]  }
 0x553   :  { %v1060_v20 = vld [vmem:[#allocation5 + $0x1e48] sm:$0xff] }
 0x554   :  { %16366 = vmatmul.mubr.bf16.vlgmr.msra.gmra.mrb[16].mxu0 %v22822_v43  ;;  %8390 = vmatpush1.bf16.msra.mxu1 %v18489_v29  ;;  %v964_v29 = vld [vmem:[#allocation5 + $0x1b48] sm:$0xff] }
 0x555   :  { %8391 = vmatprep.subr.bf16.mxu1 %v18514_v37  ;;  %16377 = vmatpush1.bf16.msra.mxu0 %v20712_v55  ;;  %v20732_v37 = vld [vmem:[#allocation8 + $0x1624] ss:$24 sps:$4 sm:$0xff]  }
 0x556   :  { %16378 = vmatprep.subr.bf16.mxu0 %v20717_v16  ;;  %v1000_v16 = vld [vmem:[#allocation5 + $0x1c68] sm:$0xff] }
 0x558   :  { %8392 = vmatpush1.bf16.msra.mxu1 %v18513_v42  ;;  %v20735_v42 = vld [vmem:[#allocation8 + $0x1654] ss:$24 sps:$4 sm:$0xff]  }
 0x559   :  { %8393 = vmatprep.subr.bf16.mxu1 %v18538_v17  ;;  %16379 = vmatpush1.bf16.msra.mxu0 %v20715_v9  ;;  %v18682_v9 = vcombine.high %v988_v30, %v1000_v16 }
 0x55a   :  { %16380 = vmatprep.subr.bf16.mxu0 %v20720_v62  ;;  %v1024_v62 = vld [vmem:[#allocation5 + $0x1d28] sm:$0xff] }
 0x55c   :  { %8394 = vmatpush1.bf16.msra.mxu1 %v18537_v6  ;;  %v20738_v6 = vld [vmem:[#allocation8 + $0x1684] ss:$24 sps:$4 sm:$0xff]  }
 0x55d   :  { %8406 = vmatprep.subr.bf16.mxu1 %v18562_v63  ;;  %16381 = vmatpush1.bf16.msra.mxu0 %v20718_v54  ;;  %v18681_v63 = vcombine.low %v988_v30, %v1000_v16  ;;  %v18706_v54 = vcombine.high %v1012_v51, %v1024_v62  ;;  %v20748_v30 = vld [vmem:[#allocation8 + $0x1740] ss:$24 sps:$4 sm:$0xff]   ;;  %v1132_v16 = vld [vmem:[#allocation5 + $0x2088] sm:$0xff] }
 0x55e   :  { %16382 = vmatprep.subr.bf16.mxu0 %v20723_v13  ;;  %v1048_v13 = vld [vmem:[#allocation5 + $0x1de8] sm:$0xff] }
 0x55f   :  { %8396 = vmatmul.mubr.bf16.vlgmr.msra.gmra.mrb[24].mxu1 %v23027_v47  ;;  %v976_v47 = vld [vmem:[#allocation5 + $0x1ba8] sm:$0xff] }
 0x560   :  { %8407 = vmatpush1.bf16.msra.mxu1 %v18561_v27  ;;  %8438 = vmatprep.mubr.bf16.mxu1 %v23031_v50  ;;  %v18633_v50 = vcombine.low %v940_v25, %v952_v14  ;;  %v18658_v55 = vcombine.high %v964_v29, %v976_v47  ;;  %v18657_v17 = vcombine.low %v964_v29, %v976_v47  ;;  %v20741_v27 = vld [vmem:[#allocation8 + $0x16b4] ss:$24 sps:$4 sm:$0xff]   ;;  %v20742_v25 = vld [vmem:[#allocation8 + $0x16e0] ss:$24 sps:$4 sm:$0xff]   ;;  %v20745_v29 = vld [vmem:[#allocation8 + $0x1710] ss:$24 sps:$4 sm:$0xff]  }
 0x561   :  { %8408 = vmatprep.subr.bf16.mxu1 %v18586_v56  ;;  %16383 = vmatpush1.bf16.msra.mxu0 %v20721_v61  ;;  %v18705_v56 = vcombine.low %v1012_v51, %v1024_v62  ;;  %v18730_v61 = vcombine.high %v1036_v11, %v1048_v13  ;;  %v1084_v14 = vld [vmem:[#allocation5 + $0x1f08] sm:$0xff] }
 0x562   :  { %16384 = vmatprep.subr.bf16.mxu0 %v20726_v12  ;;  %v1072_v12 = vld [vmem:[#allocation5 + $0x1ea8] sm:$0xff] }
 0x563   :  { %v1108_v47 = vld [vmem:[#allocation5 + $0x1fc8] sm:$0xff] }
 0x564   :  { %8409 = vmatpush1.bf16.msra.mxu1 %v18585_v48  ;;  %v20744_v48 = vld [vmem:[#allocation8 + $0x16e4] ss:$24 sps:$4 sm:$0xff]   ;;  %v20751_v51 = vld [vmem:[#allocation8 + $0x1770] ss:$24 sps:$4 sm:$0xff]  }
 0x565   :  { %8410 = vmatprep.subr.bf16.mxu1 %v18610_v59  ;;  %16385 = vmatpush1.bf16.msra.mxu0 %v20724_v1  ;;  %v18729_v59 = vcombine.low %v1036_v11, %v1048_v13  ;;  %v18754_v1 = vcombine.high %v1060_v20, %v1072_v12  ;;  %v1156_v62 = vld [vmem:[#allocation5 + $0x2148] sm:$0xff]  ;;  %v20754_v11 = vld [vmem:[#allocation8 + $0x17a0] ss:$24 sps:$4 sm:$0xff]  }
 0x566   :  { %16386 = vmatprep.subr.bf16.mxu0 %v20729_v19  ;;  %v1096_v19 = vld [vmem:[#allocation5 + $0x1f68] sm:$0xff] }
 0x567   :  { %v1180_v13 = vld [vmem:[#allocation5 + $0x2208] sm:$0xff] }
 0x568   :  { %8411 = vmatpush1.bf16.msra.mxu1 %v18609_v41  ;;  %v20747_v41 = vld [vmem:[#allocation8 + $0x1714] ss:$24 sps:$4 sm:$0xff]  }
 0x569   :  { %8412 = vmatprep.subr.bf16.mxu1 %v18634_v10  ;;  %16387 = vmatpush1.bf16.msra.mxu0 %v20727_v5  ;;  %v18753_v10 = vcombine.low %v1060_v20, %v1072_v12  ;;  %v18778_v5 = vcombine.high %v1084_v14, %v1096_v19  ;;  %v20757_v20 = vld [vmem:[#allocation8 + $0x17d0] ss:$24 sps:$4 sm:$0xff]  }
 0x56a   :  { %16388 = vmatprep.subr.bf16.mxu0 %v20732_v37  ;;  %v1120_v37 = vld [vmem:[#allocation5 + $0x2028] sm:$0xff] }
 0x56b   :  { %v1204_v12 = vld [vmem:[#allocation5 + $0x22c8] sm:$0xff] }
 0x56c   :  { %8413 = vmatpush1.bf16.msra.mxu1 %v18633_v50  ;;  %v20750_v50 = vld [vmem:[#allocation8 + $0x1744] ss:$24 sps:$4 sm:$0xff]  }
 0x56d   :  { %8414 = vmatprep.subr.bf16.mxu1 %v18658_v55  ;;  %16389 = vmatpush1.bf16.msra.mxu0 %v20730_v8  ;;  %v18777_v55 = vcombine.low %v1084_v14, %v1096_v19  ;;  %v18802_v8 = vcombine.high %v1108_v47, %v1120_v37  ;;  %v1228_v14 = vld [vmem:[#allocation5 + $0x2388] sm:$0xff] }
 0x56e   :  { %16390 = vmatprep.subr.bf16.mxu0 %v20735_v42  ;;  %v1144_v42 = vld [vmem:[#allocation5 + $0x20e8] sm:$0xff] }
 0x56f   :  { %v1240_v19 = vld [vmem:[#allocation5 + $0x23e8] sm:$0xff] }
 0x570   :  { %8415 = vmatpush1.bf16.msra.mxu1 %v18657_v17  ;;  %v20753_v17 = vld [vmem:[#allocation8 + $0x1774] ss:$24 sps:$4 sm:$0xff]  }
 0x571   :  { %8416 = vmatprep.subr.bf16.mxu1 %v18682_v9  ;;  %16391 = vmatpush1.bf16.msra.mxu0 %v20733_v7  ;;  %v18801_v9 = vcombine.low %v1108_v47, %v1120_v37  ;;  %v18826_v7 = vcombine.high %v1132_v16, %v1144_v42  ;;  %v18921_v47 = vcombine.low %v1228_v14, %v1240_v19 }
 0x572   :  { %16392 = vmatprep.subr.bf16.mxu0 %v20738_v6  ;;  %v1168_v6 = vld [vmem:[#allocation5 + $0x21a8] sm:$0xff] }
 0x574   :  { %8417 = vmatpush1.bf16.msra.mxu1 %v18681_v63  ;;  %v20756_v63 = vld [vmem:[#allocation8 + $0x17a4] ss:$24 sps:$4 sm:$0xff]  }
 0x575   :  { %8418 = vmatprep.subr.bf16.mxu1 %v18706_v54  ;;  %16393 = vmatpush1.bf16.msra.mxu0 %v20736_v0  ;;  %v18825_v54 = vcombine.low %v1132_v16, %v1144_v42  ;;  %v18850_v0 = vcombine.high %v1156_v62, %v1168_v6  ;;  %v150_v16 = vld [vmem:[#allocation5 + $0x1d8] sm:$0xff] }
 0x576   :  { %16394 = vmatprep.subr.bf16.mxu0 %v20741_v27  ;;  %v1192_v27 = vld [vmem:[#allocation5 + $0x2268] sm:$0xff]  ;;  %v162_v42 = vld [vmem:[#allocation5 + $0x238] sm:$0xff] }
 0x578   :  { %8419 = vmatpush1.bf16.msra.mxu1 %v18705_v56  ;;  %v20759_v56 = vld [vmem:[#allocation8 + $0x17d4] ss:$24 sps:$4 sm:$0xff]  }
 0x579   :  { %8420 = vmatprep.subr.bf16.mxu1 %v18730_v61  ;;  %16395 = vmatpush1.bf16.msra.mxu0 %v20739_v4  ;;  %v18849_v61 = vcombine.low %v1156_v62, %v1168_v6  ;;  %v18874_v4 = vcombine.high %v1180_v13, %v1192_v27  ;;  %v17845_v62 = vcombine.low %v150_v16, %v162_v42 }
 0x57a   :  { %16396 = vmatprep.subr.bf16.mxu0 %v20744_v48  ;;  %v1216_v48 = vld [vmem:[#allocation5 + $0x2328] sm:$0xff] }
 0x57c   :  { %8421 = vmatpush1.bf16.msra.mxu1 %v18729_v59  ;;  %v20762_v59 = vld [vmem:[#allocation8 + $0x1804] ss:$24 sps:$4 sm:$0xff]  }
 0x57d   :  { %8422 = vmatprep.subr.bf16.mxu1 %v18754_v1  ;;  %16397 = vmatpush1.bf16.msra.mxu0 %v20742_v25  ;;  %v18873_v1 = vcombine.low %v1180_v13, %v1192_v27  ;;  %v18898_v25 = vcombine.high %v1204_v12, %v1216_v48  ;;  %v222_v13 = vld [vmem:[#allocation5 + $0x418] sm:$0xff] }
 0x57e   :  { %16398 = vmatprep.subr.bf16.mxu0 %v20747_v41  ;;  %v18897_v41 = vcombine.low %v1204_v12, %v1216_v48 }
 0x580   :  { %8423 = vmatpush1.bf16.msra.mxu1 %v18753_v10  ;;  %v18922_v10 = vcombine.high %v1228_v14, %v1240_v19 }
 0x581   :  { %8424 = vmatprep.subr.bf16.mxu1 %v18778_v5  ;;  %16399 = vmatpush1.bf16.msra.mxu0 %v20745_v29  ;;  %v102_v5 = vld [vmem:[#allocation5 + $0x58] sm:$0xff] }
 0x582   :  { %16400 = vmatprep.subr.bf16.mxu0 %v20750_v50  ;;  %v114_v29 = vld [vmem:[#allocation5 + $0xb8] sm:$0xff] }
 0x583   :  { %v17798_v37 = vcombine.high %v102_v5, %v114_v29  ;;  %v126_v50 = vld [vmem:[#allocation5 + $0x118] sm:$0xff] }
 0x584   :  { %8425 = vmatpush1.bf16.msra.mxu1 %v18777_v55  ;;  %v138_v55 = vld [vmem:[#allocation5 + $0x178] sm:$0xff] }
 0x585   :  { %8426 = vmatprep.subr.bf16.mxu1 %v18802_v8  ;;  %16401 = vmatpush1.bf16.msra.mxu0 %v20748_v30  ;;  %v17797_v8 = vcombine.low %v102_v5, %v114_v29  ;;  %v17822_v30 = vcombine.high %v126_v50, %v138_v55 }
 0x586   :  { %16402 = vmatprep.subr.bf16.mxu0 %v20753_v17  ;;  %v17821_v17 = vcombine.low %v126_v50, %v138_v55 }
 0x588   :  { %8427 = vmatpush1.bf16.msra.mxu1 %v18801_v9  ;;  %v17846_v9 = vcombine.high %v150_v16, %v162_v42 }
 0x589   :  { %8428 = vmatprep.subr.bf16.mxu1 %v18826_v7  ;;  %16403 = vmatpush1.bf16.msra.mxu0 %v20751_v51  ;;  %v174_v7 = vld [vmem:[#allocation5 + $0x298] sm:$0xff] }
 0x58a   :  { %16404 = vmatprep.subr.bf16.mxu0 %v20756_v63  ;;  %v186_v51 = vld [vmem:[#allocation5 + $0x2f8] sm:$0xff] }
 0x58b   :  { %v17870_v6 = vcombine.high %v174_v7, %v186_v51  ;;  %v198_v63 = vld [vmem:[#allocation5 + $0x358] sm:$0xff] }
 0x58c   :  { %8429 = vmatpush1.bf16.msra.mxu1 %v18825_v54  ;;  %v210_v54 = vld [vmem:[#allocation5 + $0x3b8] sm:$0xff] }
 0x58d   :  { %8430 = vmatprep.subr.bf16.mxu1 %v18850_v0  ;;  %16405 = vmatpush1.bf16.msra.mxu0 %v20754_v11  ;;  %v17869_v0 = vcombine.low %v174_v7, %v186_v51  ;;  %v17894_v11 = vcombine.high %v198_v63, %v210_v54  ;;  %v17893_v27 = vcombine.low %v198_v63, %v210_v54 }
 0x58e   :  { %16406 = vmatprep.subr.bf16.mxu0 %v20759_v56  ;;  %v246_v56 = vld [vmem:[#allocation5 + $0x4d8] sm:$0xff] }
 0x590   :  { %8431 = vmatpush1.bf16.msra.mxu1 %v18849_v61  ;;  %v258_v61 = vld [vmem:[#allocation5 + $0x538] sm:$0xff] }
 0x591   :  { %8432 = vmatprep.subr.bf16.mxu1 %v18874_v4  ;;  %16407 = vmatpush1.bf16.msra.mxu0 %v20757_v20  ;;  %v1308_v4 = vrot.slane %v23040_v32, %v22925_v22  ;;  %v1312_v20 = vrot.slane %v23040_v32, %v22928_v35  ;;  %v17942_v48 = vcombine.high %v246_v56, %v258_v61 }
 0x592   :  { %16419 = vmatprep.subr.bf16.mxu0 %v20762_v59  ;;  %v17941_v5 = vcombine.low %v246_v56, %v258_v61 }
 0x594   :  { %8433 = vmatpush1.bf16.msra.mxu1 %v18873_v1  ;;  %v270_v1 = vld [vmem:[#allocation5 + $0x598] sm:$0xff] }
 0x595   :  { %8434 = vmatprep.subr.bf16.mxu1 %v18898_v25  ;;  %v282_v25 = vld [vmem:[#allocation5 + $0x5f8] sm:$0xff] }
 0x596   :  { %v17965_v7 = vcombine.low %v270_v1, %v282_v25 }
 0x598   :  { %8435 = vmatpush1.bf16.msra.mxu1 %v18897_v41 }
 0x599   :  { %8436 = vmatprep.subr.bf16.mxu1 %v18922_v10 }
 0x59c   :  { %8437 = vmatpush1.bf16.msra.mxu1 %v18921_v47 }
 0x59d   :  { %8578 = vmatprep.subr.bf16.mxu1 %v17798_v37  ;;  %v17966_v37 = vcombine.high %v270_v1, %v282_v25  ;;  %v354_v1 = vld [vmem:[#allocation5 + $0x838] sm:$0xff] }
 0x59f   :  { %8439 = vmatmul.mubr.bf16.vlgmr.msra.gmra.mrb[24].mxu1 %v23034_v15  ;;  %v234_v15 = vld [vmem:[#allocation5 + $0x478] sm:$0xff] }
 0x5a0   :  { %8579 = vmatpush1.bf16.msra.mxu1 %v17797_v8  ;;  %8610 = vmatprep.mubr.bf16.mxu1 %v23037_v31  ;;  %v17918_v31 = vcombine.high %v222_v13, %v234_v15  ;;  %v17917_v12 = vcombine.low %v222_v13, %v234_v15  ;;  %v294_v8 = vld [vmem:[#allocation5 + $0x658] sm:$0xff] }
 0x5a1   :  { %8580 = vmatprep.subr.bf16.mxu1 %v17822_v30  ;;  %v306_v30 = vld [vmem:[#allocation5 + $0x6b8] sm:$0xff] }
 0x5a2   :  { %v17989_v56 = vcombine.low %v294_v8, %v306_v30 }
 0x5a4   :  { %8581 = vmatpush1.bf16.msra.mxu1 %v17821_v17 }
 0x5a5   :  { %8582 = vmatprep.subr.bf16.mxu1 %v17846_v9 }
 0x5a8   :  { %8583 = vmatpush1.bf16.msra.mxu1 %v17845_v62 }
 0x5a9   :  { %8584 = vmatprep.subr.bf16.mxu1 %v17870_v6  ;;  %v17990_v6 = vcombine.high %v294_v8, %v306_v30  ;;  %v390_v8 = vld [vmem:[#allocation5 + $0x958] sm:$0xff] }
 0x5aa   :  { %v402_v30 = vld [vmem:[#allocation5 + $0x9b8] sm:$0xff] }
 0x5ac   :  { %8585 = vmatpush1.bf16.msra.mxu1 %v17869_v0  ;;  %v318_v0 = vld [vmem:[#allocation5 + $0x718] sm:$0xff] }
 0x5ad   :  { %8586 = vmatprep.subr.bf16.mxu1 %v17894_v11  ;;  %v330_v11 = vld [vmem:[#allocation5 + $0x778] sm:$0xff] }
 0x5b0   :  { %8587 = vmatpush1.bf16.msra.mxu1 %v17893_v27 }
 0x5b1   :  { %8588 = vmatprep.subr.bf16.mxu1 %v17918_v31 }
 0x5b2   :  { %v8182_v59 = vpop.f32.mrb[20].mxu1 }
 0x5b3   :  { %v23092_v14 = vadd.f32 %v8182_v59, %v1308_v4  ;;  %v8184_v19 = vpop.f32.mrb[21].mxu1  ;;  %v342_v59 = vld [vmem:[#allocation5 + $0x7d8] sm:$0xff] }
 0x5b4   :  { %v23094_v41 = vadd.f32 %v8184_v19, %v1312_v20  ;;  %v8186_v10 = vpop.f32.mrb[22].mxu1  ;;  %8589 = vmatpush1.bf16.msra.mxu1 %v17917_v12 }
 0x5b5   :  { %v8769_v29 = vmul.f32 %v23092_v14, %v23092_v14  ;;  %v23098_v47 = vadd.f32 %v8186_v10, %v1308_v4  ;;  %v8188_v32 = vpop.f32.mrb[23].mxu1  ;;  %8590 = vmatprep.subr.bf16.mxu1 %v17942_v48  ;;  %v18013_v10 = vcombine.low %v318_v0, %v330_v11 }
 0x5b6   :  { %v8770_v50 = vmul.f32 %v23094_v41, %v23094_v41  ;;  %v23102_v55 = vadd.f32 %v8188_v32, %v1312_v20  ;;  %v18014_v20 = vcombine.high %v318_v0, %v330_v11  ;;  %v378_v32 = vld [vmem:[#allocation5 + $0x8f8] sm:$0xff]  ;;  %v8721_v0 = vmul.f32 0.5, %v23092_v14 }
 0x5b7   :  { %v8817_v16 = vmul.f32 %v23092_v14, %v8769_v29  ;;  %v8793_v42 = vmul.f32 %v23098_v47, %v23098_v47  ;;  %v366_v29 = vld [vmem:[#allocation5 + $0x898] sm:$0xff]  ;;  %v8745_v11 = vmul.f32 0.5, %v23098_v47 }
 0x5b8   :  { %v8818_v17 = vmul.f32 %v23094_v41, %v8770_v50  ;;  %v8794_v9 = vmul.f32 %v23102_v55, %v23102_v55  ;;  %8591 = vmatpush1.bf16.msra.mxu1 %v17941_v5  ;;  %v18038_v5 = vcombine.high %v342_v59, %v354_v1  ;;  %v18062_v50 = vcombine.high %v366_v29, %v378_v32 }
 0x5b9   :  { %v8865_v51 = vmul.f32 0.044715, %v8817_v16  ;;  %v8841_v62 = vmul.f32 %v23098_v47, %v8793_v42  ;;  %8592 = vmatprep.subr.bf16.mxu1 %v17966_v37  ;;  %v18037_v37 = vcombine.low %v342_v59, %v354_v1  ;;  %v18061_v16 = vcombine.low %v366_v29, %v378_v32  ;;  %v438_v59 = vld [vmem:[#allocation5 + $0xad8] sm:$0xff]  ;;  %v20763_v32 = vld [vmem:[#allocation8 + $0x1830] ss:$24 sps:$4 sm:$0xff]  }
 0x5ba   :  { %v8866_v63 = vmul.f32 0.044715, %v8818_v17  ;;  %v8842_v54 = vmul.f32 %v23102_v55, %v8794_v9  ;;  %v18086_v17 = vcombine.high %v390_v8, %v402_v30  ;;  %v450_v1 = vld [vmem:[#allocation5 + $0xb38] sm:$0xff] }
 0x5bb   :  { %v8913_v13 = vadd.f32 %v23092_v14, %v8865_v51  ;;  %v8889_v15 = vmul.f32 0.044715, %v8841_v62  ;;  %v426_v51 = vld [vmem:[#allocation5 + $0xa78] sm:$0xff] }
 0x5bc   :  { %v8914_v27 = vadd.f32 %v23094_v41, %v8866_v63  ;;  %v8890_v31 = vmul.f32 0.044715, %v8842_v54  ;;  %8593 = vmatpush1.bf16.msra.mxu1 %v17965_v7  ;;  %v414_v7 = vld [vmem:[#allocation5 + $0xa18] sm:$0xff] }
 0x5bd   :  { %v8961_v61 = vmul.f32 0.7978846, %v8913_v13  ;;  %v8937_v4 = vadd.f32 %v23098_v47, %v8889_v15  ;;  %8594 = vmatprep.subr.bf16.mxu1 %v17990_v6  ;;  %v18085_v13 = vcombine.low %v390_v8, %v402_v30  ;;  %v18109_v14 = vcombine.low %v414_v7, %v426_v51  ;;  %v474_v29 = vld [vmem:[#allocation5 + $0xbf8] sm:$0xff] }
 0x5be   :  { %v8962_v12 = vmul.f32 0.7978846, %v8914_v27  ;;  %v8938_v48 = vadd.f32 %v23102_v55, %v8890_v31  ;;  %v18110_v27 = vcombine.high %v414_v7, %v426_v51  ;;  %v8722_v31 = vmul.f32 0.5, %v23094_v41  ;;  %v462_v41 = vld [vmem:[#allocation5 + $0xb98] sm:$0xff] }
 0x5bf   :  { %22176 = vtanh.f32 %v8961_v61  ;;  %v8985_v25 = vmul.f32 0.7978846, %v8937_v4  ;;  %v486_v8 = vld [vmem:[#allocation5 + $0xc58] sm:$0xff] }
 0x5c0   :  { %22178 = vtanh.f32 %v8962_v12  ;;  %v8986_v19 = vmul.f32 0.7978846, %v8938_v48  ;;  %8595 = vmatpush1.bf16.msra.mxu1 %v17989_v56  ;;  %v8746_v56 = vmul.f32 0.5, %v23102_v55  ;;  %v18133_v55 = vcombine.low %v438_v59, %v450_v1  ;;  %v498_v30 = vld [vmem:[#allocation5 + $0xcb8] sm:$0xff] }
 0x5c1   :  { %22180 = vtanh.f32 %v8985_v25  ;;  %8596 = vmatprep.subr.bf16.mxu1 %v18014_v20  ;;  %v510_v7 = vld [vmem:[#allocation5 + $0xd18] sm:$0xff] }
 0x5c2   :  { %22182 = vtanh.f32 %v8986_v19  ;;  %v20760_v19 = vld [vmem:[#allocation8 + $0x1800] ss:$24 sps:$4 sm:$0xff]  }
 0x5c3   :  { %v522_v51 = vld [vmem:[#allocation5 + $0xd78] sm:$0xff] }
 0x5c4   :  { %8597 = vmatpush1.bf16.msra.mxu1 %v18013_v10  ;;  %v18134_v10 = vcombine.high %v438_v59, %v450_v1  ;;  %v20780_v1 = vld [vmem:[#allocation8 + $0x1924] ss:$24 sps:$4 sm:$0xff]  }
 0x5c5   :  { %8598 = vmatprep.subr.bf16.mxu1 %v18038_v5  ;;  %v20765_v5 = vld [vmem:[#allocation8 + $0x1834] ss:$24 sps:$4 sm:$0xff]  }
 0x5c8   :  { %8599 = vmatpush1.bf16.msra.mxu1 %v18037_v37  ;;  %v18158_v37 = vcombine.high %v462_v41, %v474_v29 }
 0x5c9   :  { %v22177_v42 = vpop.eup %22176  ;;  %8600 = vmatprep.subr.bf16.mxu1 %v18062_v50  ;;  %v20768_v50 = vld [vmem:[#allocation8 + $0x1864] ss:$24 sps:$4 sm:$0xff]  }
 0x5ca   :  { %v22179_v9 = vpop.eup %22178  ;;  %v9057_v62 = vadd.f32 1.0, %v22177_v42  ;;  %v20766_v42 = vld [vmem:[#allocation8 + $0x1860] ss:$24 sps:$4 sm:$0xff]  }
 0x5cb   :  { %v22181_v6 = vpop.eup %22180  ;;  %v9058_v63 = vadd.f32 1.0, %v22179_v9  ;;  %v20771_v9 = vld [vmem:[#allocation8 + $0x1894] ss:$24 sps:$4 sm:$0xff]  }
 0x5cc   :  { %v22183_v54 = vpop.eup %22182  ;;  %8601 = vmatpush1.bf16.msra.mxu1 %v18061_v16  ;;  %v9081_v15 = vadd.f32 1.0, %v22181_v6  ;;  %v9105_v4 = vmul.f32 %v9057_v62, %v8721_v0  ;;  %v18157_v16 = vcombine.low %v462_v41, %v474_v29  ;;  %v18181_v62 = vcombine.low %v486_v8, %v498_v30  ;;  %v20769_v6 = vld [vmem:[#allocation8 + $0x1890] ss:$24 sps:$4 sm:$0xff]   ;;  %v534_v0 = vld [vmem:[#allocation5 + $0xdd8] sm:$0xff]  ;;  %v20783_v29 = vld [vmem:[#allocation8 + $0x1954] ss:$24 sps:$4 sm:$0xff]  }
 0x5cd   :  { %8602 = vmatprep.subr.bf16.mxu1 %v18086_v17  ;;  %v9082_v61 = vadd.f32 1.0, %v22183_v54  ;;  %v9106_v12 = vmul.f32 %v9058_v63, %v8722_v31  ;;  %v18182_v17 = vcombine.high %v486_v8, %v498_v30  ;;  %v18206_v63 = vcombine.high %v510_v7, %v522_v51  ;;  %v20774_v54 = vld [vmem:[#allocation8 + $0x18c4] ss:$24 sps:$4 sm:$0xff]   ;;  %v20772_v31 = vld [vmem:[#allocation8 + $0x18c0] ss:$24 sps:$4 sm:$0xff]  }
 0x5ce   :  { %v9129_v20 = vmul.f32 %v9081_v15, %v8745_v11  ;;  %v546_v11 = vld [vmem:[#allocation5 + $0xe38] sm:$0xff]  ;;  %v18205_v15 = vcombine.low %v510_v7, %v522_v51  ;;  %v20789_v51 = vld [vmem:[#allocation8 + $0x19b4] ss:$24 sps:$4 sm:$0xff]  }
 0x5cf   :  { %v9130_v48 = vmul.f32 %v9082_v61, %v8746_v56  ;;  %v18230_v56 = vcombine.high %v534_v0, %v546_v11  ;;  %v20777_v61 = vld [vmem:[#allocation8 + $0x18f4] ss:$24 sps:$4 sm:$0xff]   ;;  %v20786_v30 = vld [vmem:[#allocation8 + $0x1984] ss:$24 sps:$4 sm:$0xff]  }
 0x5d0   :  { %8603 = vmatpush1.bf16.msra.mxu1 %v18085_v13  ;;  %v23120_v25 = vpack.c.bf16 %v9129_v20, %v9105_v4  ;;  %v22237_v13 = vld [vmem:[#allocation2] ss:$24 sps:$4 sm:$0xff]   ;;  %v558_v4 = vld [vmem:[#allocation5 + $0xe98] sm:$0xff] }
 0x5d1   :  { %8604 = vmatprep.subr.bf16.mxu1 %v18110_v27  ;;  %v23122_v47 = vpack.c.bf16 %v9130_v48, %v9106_v12  ;;  %v22238_v27 = vld [vmem:[#allocation2 + $0xc] ss:$24 sps:$4 sm:$0xff]   ;;  %v18229_v12 = vcombine.low %v534_v0, %v546_v11  ;;  %v20775_v48 = vld [vmem:[#allocation8 + $0x18f0] ss:$24 sps:$4 sm:$0xff]  }
 0x5d2   :  { %v570_v20 = vld [vmem:[#allocation5 + $0xef8] sm:$0xff] }
 0x5d3   :  { %16408 = vmatprep.mubr.bf16.mxu0 %v23122_v47  ;;  %v18254_v59 = vcombine.high %v558_v4, %v570_v20  ;;  %v20792_v11 = vld [vmem:[#allocation8 + $0x19e4] ss:$24 sps:$4 sm:$0xff]  }
 0x5d4   :  { %8605 = vmatpush1.bf16.msra.mxu1 %v18109_v14  ;;  %16409 = vmatmul.mubr.bf16.vlgmr.msra.gmra.mrb[16].mxu0 %v23120_v25  ;;  %v582_v14 = vld [vmem:[#allocation5 + $0xf58] sm:$0xff] }
 0x5d5   :  { %16420 = vmatpush1.bf16.msra.mxu0 %v20760_v19  ;;  %16451 = vmatprep.mubr.bf16.mxu0 %v22917_v53  ;;  %v594_v19 = vld [vmem:[#allocation5 + $0xfb8] sm:$0xff] }
 0x5d6   :  { %8606 = vmatprep.subr.bf16.mxu1 %v18134_v10  ;;  %16421 = vmatprep.subr.bf16.mxu0 %v20765_v5  ;;  %v18253_v10 = vcombine.low %v558_v4, %v570_v20  ;;  %v20778_v5 = vld [vmem:[#allocation8 + $0x1920] ss:$24 sps:$4 sm:$0xff]   ;;  %v18278_v41 = vcombine.high %v582_v14, %v594_v19 }
 0x5d7   :  { %v702_v4 = vld [vmem:[#allocation5 + $0x1318] sm:$0xff] }
 0x5d8   :  { %8607 = vmatpush1.bf16.msra.mxu1 %v18133_v55  ;;  %v606_v55 = vld [vmem:[#allocation5 + $0x1018] sm:$0xff] }
 0x5d9   :  { %16422 = vmatpush1.bf16.msra.mxu0 %v20763_v32  ;;  %8608 = vmatprep.subr.bf16.mxu1 %v18158_v37  ;;  %v618_v32 = vld [vmem:[#allocation5 + $0x1078] sm:$0xff]  ;;  %v18277_v37 = vcombine.low %v582_v14, %v594_v19 }
 0x5da   :  { %16423 = vmatprep.subr.bf16.mxu0 %v20768_v50  ;;  %v20781_v50 = vld [vmem:[#allocation8 + $0x1950] ss:$24 sps:$4 sm:$0xff]   ;;  %v18302_v8 = vcombine.high %v606_v55, %v618_v32  ;;  %v714_v20 = vld [vmem:[#allocation5 + $0x1378] sm:$0xff] }
 0x5db   :  { %v726_v14 = vld [vmem:[#allocation5 + $0x13d8] sm:$0xff] }
 0x5dc   :  { %8609 = vmatpush1.bf16.msra.mxu1 %v18157_v16  ;;  %v630_v16 = vld [vmem:[#allocation5 + $0x10d8] sm:$0xff] }
 0x5dd   :  { %16424 = vmatpush1.bf16.msra.mxu0 %v20766_v42  ;;  %8621 = vmatprep.subr.bf16.mxu1 %v18182_v17  ;;  %v642_v42 = vld [vmem:[#allocation5 + $0x1138] sm:$0xff]  ;;  %v18301_v17 = vcombine.low %v606_v55, %v618_v32 }
 0x5de   :  { %16425 = vmatprep.subr.bf16.mxu0 %v20771_v9  ;;  %v20784_v9 = vld [vmem:[#allocation8 + $0x1980] ss:$24 sps:$4 sm:$0xff]   ;;  %v18326_v7 = vcombine.high %v630_v16, %v642_v42 }
 0x5df   :  { %8611 = vmatmul.mubr.bf16.vlgmr.msra.gmra.mrb[28].mxu1 %v22237_v13  ;;  %v678_v13 = vld [vmem:[#allocation5 + $0x1258] sm:$0xff] }
 0x5e0   :  { %8622 = vmatpush1.bf16.msra.mxu1 %v18181_v62  ;;  %8653 = vmatprep.mubr.bf16.mxu1 %v22238_v27  ;;  %v654_v62 = vld [vmem:[#allocation5 + $0x1198] sm:$0xff] }
 0x5e1   :  { %16426 = vmatpush1.bf16.msra.mxu0 %v20769_v6  ;;  %8623 = vmatprep.subr.bf16.mxu1 %v18206_v63  ;;  %v666_v6 = vld [vmem:[#allocation5 + $0x11f8] sm:$0xff]  ;;  %v18325_v63 = vcombine.low %v630_v16, %v642_v42 }
 0x5e2   :  { %16427 = vmatprep.subr.bf16.mxu0 %v20774_v54  ;;  %v20787_v54 = vld [vmem:[#allocation8 + $0x19b0] ss:$24 sps:$4 sm:$0xff]   ;;  %v18350_v0 = vcombine.high %v654_v62, %v666_v6  ;;  %v18349_v27 = vcombine.low %v654_v62, %v666_v6  ;;  %v738_v19 = vld [vmem:[#allocation5 + $0x1438] sm:$0xff] }
 0x5e3   :  { %v750_v55 = vld [vmem:[#allocation5 + $0x1498] sm:$0xff] }
 0x5e4   :  { %8624 = vmatpush1.bf16.msra.mxu1 %v18205_v15  ;;  %v690_v15 = vld [vmem:[#allocation5 + $0x12b8] sm:$0xff] }
 0x5e5   :  { %16428 = vmatpush1.bf16.msra.mxu0 %v20772_v31  ;;  %8625 = vmatprep.subr.bf16.mxu1 %v18230_v56  ;;  %v20790_v31 = vld [vmem:[#allocation8 + $0x19e0] ss:$24 sps:$4 sm:$0xff]   ;;  %v18374_v56 = vcombine.high %v678_v13, %v690_v15 }
 0x5e6   :  { %16429 = vmatprep.subr.bf16.mxu0 %v20777_v61  ;;  %v20795_v61 = vld [vmem:[#allocation8 + $0x1a14] ss:$24 sps:$4 sm:$0xff]   ;;  %v762_v32 = vld [vmem:[#allocation5 + $0x14f8] sm:$0xff] }
 0x5e7   :  { %v774_v16 = vld [vmem:[#allocation5 + $0x1558] sm:$0xff] }
 0x5e8   :  { %8626 = vmatpush1.bf16.msra.mxu1 %v18229_v12  ;;  %v18373_v12 = vcombine.low %v678_v13, %v690_v15  ;;  %v786_v42 = vld [vmem:[#allocation5 + $0x15b8] sm:$0xff] }
 0x5e9   :  { %16430 = vmatpush1.bf16.msra.mxu0 %v20775_v48  ;;  %8627 = vmatprep.subr.bf16.mxu1 %v18254_v59  ;;  %v20793_v48 = vld [vmem:[#allocation8 + $0x1a10] ss:$24 sps:$4 sm:$0xff]   ;;  %v18398_v59 = vcombine.high %v702_v4, %v714_v20  ;;  %v798_v62 = vld [vmem:[#allocation5 + $0x1618] sm:$0xff] }
 0x5ea   :  { %16431 = vmatprep.subr.bf16.mxu0 %v20780_v1  ;;  %v20798_v1 = vld [vmem:[#allocation8 + $0x1a44] ss:$24 sps:$4 sm:$0xff]  }
 0x5eb   :  { %v810_v6 = vld [vmem:[#allocation5 + $0x1678] sm:$0xff] }
 0x5ec   :  { %8628 = vmatpush1.bf16.msra.mxu1 %v18253_v10  ;;  %v18397_v10 = vcombine.low %v702_v4, %v714_v20  ;;  %v834_v13 = vld [vmem:[#allocation5 + $0x1738] sm:$0xff]  ;;  %v20813_v20 = vld [vmem:[#allocation8 + $0x1b34] ss:$24 sps:$4 sm:$0xff]  }
 0x5ed   :  { %16432 = vmatpush1.bf16.msra.mxu0 %v20778_v5  ;;  %8629 = vmatprep.subr.bf16.mxu1 %v18278_v41  ;;  %v20796_v5 = vld [vmem:[#allocation8 + $0x1a40] ss:$24 sps:$4 sm:$0xff]   ;;  %v18422_v41 = vcombine.high %v726_v14, %v738_v19  ;;  %v20810_v15 = vld [vmem:[#allocation8 + $0x1b04] ss:$24 sps:$4 sm:$0xff]  }
 0x5ee   :  { %16433 = vmatprep.subr.bf16.mxu0 %v20783_v29  ;;  %v20801_v29 = vld [vmem:[#allocation8 + $0x1a74] ss:$24 sps:$4 sm:$0xff]   ;;  %v858_v4 = vld [vmem:[#allocation5 + $0x17f8] sm:$0xff] }
 0x5f0   :  { %8630 = vmatpush1.bf16.msra.mxu1 %v18277_v37  ;;  %v18421_v37 = vcombine.low %v726_v14, %v738_v19  ;;  %v882_v14 = vld [vmem:[#allocation5 + $0x18b8] sm:$0xff] }
 0x5f1   :  { %16434 = vmatpush1.bf16.msra.mxu0 %v20781_v50  ;;  %8631 = vmatprep.subr.bf16.mxu1 %v18302_v8  ;;  %v20799_v50 = vld [vmem:[#allocation8 + $0x1a70] ss:$24 sps:$4 sm:$0xff]   ;;  %v18446_v8 = vcombine.high %v750_v55, %v762_v32  ;;  %v20816_v19 = vld [vmem:[#allocation8 + $0x1b64] ss:$24 sps:$4 sm:$0xff]  }
 0x5f2   :  { %16435 = vmatprep.subr.bf16.mxu0 %v20786_v30  ;;  %v20804_v30 = vld [vmem:[#allocation8 + $0x1aa4] ss:$24 sps:$4 sm:$0xff]  }
 0x5f4   :  { %8632 = vmatpush1.bf16.msra.mxu1 %v18301_v17  ;;  %v18445_v17 = vcombine.low %v750_v55, %v762_v32  ;;  %v906_v55 = vld [vmem:[#allocation5 + $0x1978] sm:$0xff]  ;;  %v20819_v32 = vld [vmem:[#allocation8 + $0x1b94] ss:$24 sps:$4 sm:$0xff]  }
 0x5f5   :  { %16436 = vmatpush1.bf16.msra.mxu0 %v20784_v9  ;;  %8633 = vmatprep.subr.bf16.mxu1 %v18326_v7  ;;  %v20802_v9 = vld [vmem:[#allocation8 + $0x1aa0] ss:$24 sps:$4 sm:$0xff]   ;;  %v18470_v7 = vcombine.high %v774_v16, %v786_v42 }
 0x5f6   :  { %16437 = vmatprep.subr.bf16.mxu0 %v20789_v51  ;;  %v20807_v51 = vld [vmem:[#allocation8 + $0x1ad4] ss:$24 sps:$4 sm:$0xff]  }
 0x5f8   :  { %8634 = vmatpush1.bf16.msra.mxu1 %v18325_v63  ;;  %v18469_v63 = vcombine.low %v774_v16, %v786_v42  ;;  %v930_v16 = vld [vmem:[#allocation5 + $0x1a38] sm:$0xff] }
 0x5f9   :  { %16438 = vmatpush1.bf16.msra.mxu0 %v20787_v54  ;;  %8635 = vmatprep.subr.bf16.mxu1 %v18350_v0  ;;  %v20805_v54 = vld [vmem:[#allocation8 + $0x1ad0] ss:$24 sps:$4 sm:$0xff]   ;;  %v18494_v0 = vcombine.high %v798_v62, %v810_v6  ;;  %v20825_v42 = vld [vmem:[#allocation8 + $0x1bc4] ss:$24 sps:$4 sm:$0xff]  }
 0x5fa   :  { %16439 = vmatprep.subr.bf16.mxu0 %v20792_v11  ;;  %v822_v11 = vld [vmem:[#allocation5 + $0x16d8] sm:$0xff] }
 0x5fc   :  { %8636 = vmatpush1.bf16.msra.mxu1 %v18349_v27  ;;  %v18493_v27 = vcombine.low %v798_v62, %v810_v6  ;;  %v20823_v62 = vld [vmem:[#allocation8 + $0x1bc0] ss:$24 sps:$4 sm:$0xff]  }
 0x5fd   :  { %16440 = vmatpush1.bf16.msra.mxu0 %v20790_v31  ;;  %8637 = vmatprep.subr.bf16.mxu1 %v18374_v56  ;;  %v18518_v31 = vcombine.high %v822_v11, %v834_v13  ;;  %v20808_v56 = vld [vmem:[#allocation8 + $0x1b00] ss:$24 sps:$4 sm:$0xff]  }
 0x5fe   :  { %16441 = vmatprep.subr.bf16.mxu0 %v20795_v61  ;;  %v846_v61 = vld [vmem:[#allocation5 + $0x1798] sm:$0xff] }
 0x5ff   :  { %v942_v6 = vld [vmem:[#allocation5 + $0x1a98] sm:$0xff] }
 0x600   :  { %8638 = vmatpush1.bf16.msra.mxu1 %v18373_v12  ;;  %v18517_v12 = vcombine.low %v822_v11, %v834_v13  ;;  %v20829_v13 = vld [vmem:[#allocation8 + $0x1bf0] ss:$24 sps:$4 sm:$0xff]  }
 0x601   :  { %16442 = vmatpush1.bf16.msra.mxu0 %v20793_v48  ;;  %8639 = vmatprep.subr.bf16.mxu1 %v18398_v59  ;;  %v18542_v48 = vcombine.high %v846_v61, %v858_v4  ;;  %v20811_v59 = vld [vmem:[#allocation8 + $0x1b30] ss:$24 sps:$4 sm:$0xff]  }
 0x602   :  { %16443 = vmatprep.subr.bf16.mxu0 %v20798_v1  ;;  %v870_v1 = vld [vmem:[#allocation5 + $0x1858] sm:$0xff] }
 0x604   :  { %8640 = vmatpush1.bf16.msra.mxu1 %v18397_v10  ;;  %v18541_v10 = vcombine.low %v846_v61, %v858_v4  ;;  %v20835_v4 = vld [vmem:[#allocation8 + $0x1c20] ss:$24 sps:$4 sm:$0xff]  }
 0x605   :  { %16444 = vmatpush1.bf16.msra.mxu0 %v20796_v5  ;;  %8641 = vmatprep.subr.bf16.mxu1 %v18422_v41  ;;  %v18566_v5 = vcombine.high %v870_v1, %v882_v14  ;;  %v20814_v41 = vld [vmem:[#allocation8 + $0x1b60] ss:$24 sps:$4 sm:$0xff]  }
 0x606   :  { %16445 = vmatprep.subr.bf16.mxu0 %v20801_v29  ;;  %v894_v29 = vld [vmem:[#allocation5 + $0x1918] sm:$0xff] }
 0x608   :  { %8642 = vmatpush1.bf16.msra.mxu1 %v18421_v37  ;;  %v18565_v37 = vcombine.low %v870_v1, %v882_v14  ;;  %v20841_v14 = vld [vmem:[#allocation8 + $0x1c50] ss:$24 sps:$4 sm:$0xff]  }
 0x609   :  { %16446 = vmatpush1.bf16.msra.mxu0 %v20799_v50  ;;  %8643 = vmatprep.subr.bf16.mxu1 %v18446_v8  ;;  %v18590_v50 = vcombine.high %v894_v29, %v906_v55  ;;  %v20817_v8 = vld [vmem:[#allocation8 + $0x1b90] ss:$24 sps:$4 sm:$0xff]  }
 0x60a   :  { %16447 = vmatprep.subr.bf16.mxu0 %v20804_v30  ;;  %v918_v30 = vld [vmem:[#allocation5 + $0x19d8] sm:$0xff] }
 0x60c   :  { %8644 = vmatpush1.bf16.msra.mxu1 %v18445_v17  ;;  %v22239_v17 = vld [vmem:[#allocation2 + $0x8] ss:$24 sps:$4 sm:$0xff]  }
 0x60d   :  { %16448 = vmatpush1.bf16.msra.mxu0 %v20802_v9  ;;  %8645 = vmatprep.subr.bf16.mxu1 %v18470_v7  ;;  %v18589_v9 = vcombine.low %v894_v29, %v906_v55  ;;  %v22240_v7 = vld [vmem:[#allocation2 + $0x14] ss:$24 sps:$4 sm:$0xff]   ;;  %v20847_v55 = vld [vmem:[#allocation8 + $0x1c80] ss:$24 sps:$4 sm:$0xff]  }
 0x60e   :  { %16449 = vmatprep.subr.bf16.mxu0 %v20807_v51  ;;  %v18614_v51 = vcombine.high %v918_v30, %v930_v16 }
 0x610   :  { %8646 = vmatpush1.bf16.msra.mxu1 %v18469_v63  ;;  %v954_v63 = vld [vmem:[#allocation5 + $0x1af8] sm:$0xff] }
 0x611   :  { %16450 = vmatpush1.bf16.msra.mxu0 %v20805_v54  ;;  %8647 = vmatprep.subr.bf16.mxu1 %v18494_v0  ;;  %v20831_v54 = vld [vmem:[#allocation8 + $0x1bf4] ss:$24 sps:$4 sm:$0xff]   ;;  %v18613_v0 = vcombine.low %v918_v30, %v930_v16  ;;  %v18638_v11 = vcombine.high %v942_v6, %v954_v63  ;;  %v20853_v16 = vld [vmem:[#allocation8 + $0x1cb0] ss:$24 sps:$4 sm:$0xff]  }
 0x612   :  { %16462 = vmatprep.subr.bf16.mxu0 %v20810_v15  ;;  %v966_v15 = vld [vmem:[#allocation5 + $0x1b58] sm:$0xff] }
 0x614   :  { %16452 = vmatmul.mubr.bf16.vlgmr.msra.gmra.mrb[16].mxu0 %v22915_v34  ;;  %8648 = vmatpush1.bf16.msra.mxu1 %v18493_v27  ;;  %v978_v27 = vld [vmem:[#allocation5 + $0x1bb8] sm:$0xff] }
 0x615   :  { %8649 = vmatprep.subr.bf16.mxu1 %v18518_v31  ;;  %16463 = vmatpush1.bf16.msra.mxu0 %v20808_v56  ;;  %v20837_v31 = vld [vmem:[#allocation8 + $0x1c24] ss:$24 sps:$4 sm:$0xff]   ;;  %v18637_v56 = vcombine.low %v942_v6, %v954_v63  ;;  %v18662_v61 = vcombine.high %v966_v15, %v978_v27 }
 0x616   :  { %16464 = vmatprep.subr.bf16.mxu0 %v20813_v20  ;;  %v990_v20 = vld [vmem:[#allocation5 + $0x1c18] sm:$0xff] }
 0x617   :  { %v1086_v6 = vld [vmem:[#allocation5 + $0x1f18] sm:$0xff] }
 0x618   :  { %8650 = vmatpush1.bf16.msra.mxu1 %v18517_v12  ;;  %v1002_v12 = vld [vmem:[#allocation5 + $0x1c78] sm:$0xff] }
 0x619   :  { %8651 = vmatprep.subr.bf16.mxu1 %v18542_v48  ;;  %16465 = vmatpush1.bf16.msra.mxu0 %v20811_v59  ;;  %v20843_v48 = vld [vmem:[#allocation8 + $0x1c54] ss:$24 sps:$4 sm:$0xff]   ;;  %v18661_v59 = vcombine.low %v966_v15, %v978_v27  ;;  %v18686_v1 = vcombine.high %v990_v20, %v1002_v12  ;;  %v1098_v63 = vld [vmem:[#allocation5 + $0x1f78] sm:$0xff] }
 0x61a   :  { %16466 = vmatprep.subr.bf16.mxu0 %v20816_v19  ;;  %v1014_v19 = vld [vmem:[#allocation5 + $0x1cd8] sm:$0xff] }
 0x61b   :  { %v1110_v15 = vld [vmem:[#allocation5 + $0x1fd8] sm:$0xff] }
 0x61c   :  { %8652 = vmatpush1.bf16.msra.mxu1 %v18541_v10  ;;  %v1026_v10 = vld [vmem:[#allocation5 + $0x1d38] sm:$0xff] }
 0x61d   :  { %8664 = vmatprep.subr.bf16.mxu1 %v18566_v5  ;;  %16467 = vmatpush1.bf16.msra.mxu0 %v20814_v41  ;;  %v20849_v5 = vld [vmem:[#allocation8 + $0x1c84] ss:$24 sps:$4 sm:$0xff]   ;;  %v18685_v41 = vcombine.low %v990_v20, %v1002_v12  ;;  %v18710_v29 = vcombine.high %v1014_v19, %v1026_v10 }
 0x61e   :  { %16468 = vmatprep.subr.bf16.mxu0 %v20819_v32  ;;  %v1038_v32 = vld [vmem:[#allocation5 + $0x1d98] sm:$0xff] }
 0x61f   :  { %8654 = vmatmul.mubr.bf16.vlgmr.msra.gmra.mrb[28].mxu1 %v22239_v17  ;;  %v1074_v17 = vld [vmem:[#allocation5 + $0x1eb8] sm:$0xff] }
 0x620   :  { %8665 = vmatpush1.bf16.msra.mxu1 %v18565_v37  ;;  %8696 = vmatprep.mubr.bf16.mxu1 %v22240_v7  ;;  %v1050_v37 = vld [vmem:[#allocation5 + $0x1df8] sm:$0xff] }
 0x621   :  { %8666 = vmatprep.subr.bf16.mxu1 %v18590_v50  ;;  %16469 = vmatpush1.bf16.msra.mxu0 %v20817_v8  ;;  %v20855_v50 = vld [vmem:[#allocation8 + $0x1cb4] ss:$24 sps:$4 sm:$0xff]   ;;  %v18709_v8 = vcombine.low %v1014_v19, %v1026_v10  ;;  %v18734_v30 = vcombine.high %v1038_v32, %v1050_v37  ;;  %v18733_v7 = vcombine.low %v1038_v32, %v1050_v37  ;;  %v1122_v27 = vld [vmem:[#allocation5 + $0x2038] sm:$0xff] }
 0x622   :  { %16470 = vmatprep.subr.bf16.mxu0 %v20825_v42  ;;  %v1062_v42 = vld [vmem:[#allocation5 + $0x1e58] sm:$0xff] }
 0x623   :  { %v1134_v20 = vld [vmem:[#allocation5 + $0x2098] sm:$0xff] }
 0x624   :  { %8667 = vmatpush1.bf16.msra.mxu1 %v18589_v9  ;;  %v20861_v9 = vld [vmem:[#allocation8 + $0x1ce4] ss:$24 sps:$4 sm:$0xff]  }
 0x625   :  { %8668 = vmatprep.subr.bf16.mxu1 %v18614_v51  ;;  %16471 = vmatpush1.bf16.msra.mxu0 %v20823_v62  ;;  %v18758_v51 = vcombine.high %v1062_v42, %v1074_v17  ;;  %v20859_v62 = vld [vmem:[#allocation8 + $0x1ce0] ss:$24 sps:$4 sm:$0xff]  }
 0x626   :  { %16472 = vmatprep.subr.bf16.mxu0 %v20831_v54  ;;  %v20867_v54 = vld [vmem:[#allocation8 + $0x1d14] ss:$24 sps:$4 sm:$0xff]   ;;  %v1146_v12 = vld [vmem:[#allocation5 + $0x20f8] sm:$0xff] }
 0x627   :  { %v1158_v19 = vld [vmem:[#allocation5 + $0x2158] sm:$0xff] }
 0x628   :  { %8669 = vmatpush1.bf16.msra.mxu1 %v18613_v0  ;;  %v18757_v0 = vcombine.low %v1062_v42, %v1074_v17  ;;  %v1170_v10 = vld [vmem:[#allocation5 + $0x21b8] sm:$0xff] }
 0x629   :  { %8670 = vmatprep.subr.bf16.mxu1 %v18638_v11  ;;  %16473 = vmatpush1.bf16.msra.mxu0 %v20829_v13  ;;  %v18782_v11 = vcombine.high %v1086_v6, %v1098_v63  ;;  %v20865_v13 = vld [vmem:[#allocation8 + $0x1d10] ss:$24 sps:$4 sm:$0xff]   ;;  %v1182_v32 = vld [vmem:[#allocation5 + $0x2218] sm:$0xff] }
 0x62a   :  { %16474 = vmatprep.subr.bf16.mxu0 %v20837_v31  ;;  %v20873_v31 = vld [vmem:[#allocation8 + $0x1d44] ss:$24 sps:$4 sm:$0xff]  }
 0x62b   :  { %v1194_v37 = vld [vmem:[#allocation5 + $0x2278] sm:$0xff] }
 0x62c   :  { %8671 = vmatpush1.bf16.msra.mxu1 %v18637_v56  ;;  %v18781_v56 = vcombine.low %v1086_v6, %v1098_v63  ;;  %v1206_v42 = vld [vmem:[#allocation5 + $0x22d8] sm:$0xff] }
 0x62d   :  { %8672 = vmatprep.subr.bf16.mxu1 %v18662_v61  ;;  %16475 = vmatpush1.bf16.msra.mxu0 %v20835_v4  ;;  %v18806_v61 = vcombine.high %v1110_v15, %v1122_v27  ;;  %v20871_v4 = vld [vmem:[#allocation8 + $0x1d40] ss:$24 sps:$4 sm:$0xff]  }
 0x62e   :  { %16476 = vmatprep.subr.bf16.mxu0 %v20843_v48  ;;  %v20879_v48 = vld [vmem:[#allocation8 + $0x1d74] ss:$24 sps:$4 sm:$0xff]   ;;  %v1218_v17 = vld [vmem:[#allocation5 + $0x2338] sm:$0xff] }
 0x62f   :  { %v1242_v6 = vld [vmem:[#allocation5 + $0x23f8] sm:$0xff]  ;;  %v18901_v63 = vcombine.low %v1206_v42, %v1218_v17 }
 0x630   :  { %8673 = vmatpush1.bf16.msra.mxu1 %v18661_v59  ;;  %v18805_v59 = vcombine.low %v1110_v15, %v1122_v27  ;;  %v20828_v15 = vld [vmem:[#allocation8 + $0x3c] ss:$24 sps:$4 sm:$0xff]   ;;  %v22241_v27 = vld [vmem:[#allocation2 + $0x10] ss:$24 sps:$4 sm:$0xff]  }
 0x631   :  { %8674 = vmatprep.subr.bf16.mxu1 %v18686_v1  ;;  %16477 = vmatpush1.bf16.msra.mxu0 %v20841_v14  ;;  %v18830_v1 = vcombine.high %v1134_v20, %v1146_v12  ;;  %v20877_v14 = vld [vmem:[#allocation8 + $0x1d70] ss:$24 sps:$4 sm:$0xff]  }
 0x632   :  { %16478 = vmatprep.subr.bf16.mxu0 %v20849_v5  ;;  %v20885_v5 = vld [vmem:[#allocation8 + $0x1da4] ss:$24 sps:$4 sm:$0xff]  }
 0x634   :  { %8675 = vmatpush1.bf16.msra.mxu1 %v18685_v41  ;;  %v18829_v41 = vcombine.low %v1134_v20, %v1146_v12  ;;  %v20838_v20 = vld [vmem:[#allocation8 + $0x98] ss:$24 sps:$4 sm:$0xff]   ;;  %v20846_v12 = vld [vmem:[#allocation8 + $0xcc] ss:$24 sps:$4 sm:$0xff]  }
 0x635   :  { %8676 = vmatprep.subr.bf16.mxu1 %v18710_v29  ;;  %16479 = vmatpush1.bf16.msra.mxu0 %v20847_v55  ;;  %v18854_v29 = vcombine.high %v1158_v19, %v1170_v10  ;;  %v20883_v55 = vld [vmem:[#allocation8 + $0x1da0] ss:$24 sps:$4 sm:$0xff]  }
 0x636   :  { %16480 = vmatprep.subr.bf16.mxu0 %v20855_v50  ;;  %v20891_v50 = vld [vmem:[#allocation8 + $0x1dd4] ss:$24 sps:$4 sm:$0xff]  }
 0x638   :  { %8677 = vmatpush1.bf16.msra.mxu1 %v18709_v8  ;;  %v18853_v8 = vcombine.low %v1158_v19, %v1170_v10  ;;  %v20850_v10 = vld [vmem:[#allocation8 + $0xf8] ss:$24 sps:$4 sm:$0xff]  }
 0x639   :  { %8678 = vmatprep.subr.bf16.mxu1 %v18734_v30  ;;  %16481 = vmatpush1.bf16.msra.mxu0 %v20853_v16  ;;  %v18878_v30 = vcombine.high %v1182_v32, %v1194_v37  ;;  %v20889_v16 = vld [vmem:[#allocation8 + $0x1dd0] ss:$24 sps:$4 sm:$0xff]  }
 0x63a   :  { %16482 = vmatprep.subr.bf16.mxu0 %v20861_v9  ;;  %v20897_v9 = vld [vmem:[#allocation8 + $0x1e04] ss:$24 sps:$4 sm:$0xff]  }
 0x63c   :  { %8679 = vmatpush1.bf16.msra.mxu1 %v18733_v7  ;;  %v18877_v7 = vcombine.low %v1182_v32, %v1194_v37 }
 0x63d   :  { %8680 = vmatprep.subr.bf16.mxu1 %v18758_v51  ;;  %16483 = vmatpush1.bf16.msra.mxu0 %v20859_v62  ;;  %v18902_v51 = vcombine.high %v1206_v42, %v1218_v17  ;;  %v1230_v62 = vld [vmem:[#allocation5 + $0x2398] sm:$0xff]  ;;  %v20864_v42 = vld [vmem:[#allocation8 + $0x15c] ss:$24 sps:$4 sm:$0xff]  }
 0x63e   :  { %16484 = vmatprep.subr.bf16.mxu0 %v20867_v54  ;;  %v18926_v54 = vcombine.high %v1230_v62, %v1242_v6 }
 0x640   :  { %8681 = vmatpush1.bf16.msra.mxu1 %v18757_v0  ;;  %v18925_v0 = vcombine.low %v1230_v62, %v1242_v6 }
 0x641   :  { %8682 = vmatprep.subr.bf16.mxu1 %v18782_v11  ;;  %16485 = vmatpush1.bf16.msra.mxu0 %v20865_v13  ;;  %v20822_v11 = vld [vmem:[#allocation8 + $0xc] ss:$24 sps:$4 sm:$0xff]   ;;  %v20820_v13 = vld [vmem:[#allocation8 + $0x8] ss:$24 sps:$4 sm:$0xff]  }
 0x642   :  { %16486 = vmatprep.subr.bf16.mxu0 %v20873_v31  ;;  %v20826_v31 = vld [vmem:[#allocation8 + $0x38] ss:$24 sps:$4 sm:$0xff]  }
 0x644   :  { %8683 = vmatpush1.bf16.msra.mxu1 %v18781_v56  ;;  %v20834_v56 = vld [vmem:[#allocation8 + $0x6c] ss:$24 sps:$4 sm:$0xff]  }
 0x645   :  { %8684 = vmatprep.subr.bf16.mxu1 %v18806_v61  ;;  %16487 = vmatpush1.bf16.msra.mxu0 %v20871_v4  ;;  %v20832_v61 = vld [vmem:[#allocation8 + $0x68] ss:$24 sps:$4 sm:$0xff]   ;;  %v20840_v4 = vld [vmem:[#allocation8 + $0x9c] ss:$24 sps:$4 sm:$0xff]  }
 0x646   :  { %16488 = vmatprep.subr.bf16.mxu0 %v20879_v48  ;;  %v20844_v48 = vld [vmem:[#allocation8 + $0xc8] ss:$24 sps:$4 sm:$0xff]  }
 0x648   :  { %8685 = vmatpush1.bf16.msra.mxu1 %v18805_v59  ;;  %v20852_v59 = vld [vmem:[#allocation8 + $0xfc] ss:$24 sps:$4 sm:$0xff]  }
 0x649   :  { %8686 = vmatprep.subr.bf16.mxu1 %v18830_v1  ;;  %16489 = vmatpush1.bf16.msra.mxu0 %v20877_v14  ;;  %v23129_v1 = vld [vmem:[#allocation7 + $0x10] sm:$0xff] }
 0x64a   :  { %16490 = vmatprep.subr.bf16.mxu0 %v20885_v5  ;;  %v1324_v14 = vrot.slane %v23129_v1, %v22655_v24  ;;  %v1328_v19 = vrot.slane %v23129_v1, %v22658_v33  ;;  %v20858_v5 = vld [vmem:[#allocation8 + $0x12c] ss:$24 sps:$4 sm:$0xff]  }
 0x64c   :  { %8687 = vmatpush1.bf16.msra.mxu1 %v18829_v41 }
 0x64d   :  { %8688 = vmatprep.subr.bf16.mxu1 %v18854_v29  ;;  %16491 = vmatpush1.bf16.msra.mxu0 %v20883_v55 }
 0x64e   :  { %16492 = vmatprep.subr.bf16.mxu0 %v20891_v50  ;;  %v20856_v50 = vld [vmem:[#allocation8 + $0x128] ss:$24 sps:$4 sm:$0xff]  }
 0x650   :  { %8689 = vmatpush1.bf16.msra.mxu1 %v18853_v8 }
 0x651   :  { %8690 = vmatprep.subr.bf16.mxu1 %v18878_v30  ;;  %16493 = vmatpush1.bf16.msra.mxu0 %v20889_v16 }
 0x652   :  { %16505 = vmatprep.subr.bf16.mxu0 %v20897_v9 }
 0x654   :  { %8691 = vmatpush1.bf16.msra.mxu1 %v18877_v7 }
 0x655   :  { %8692 = vmatprep.subr.bf16.mxu1 %v18902_v51 }
 0x658   :  { %8693 = vmatpush1.bf16.msra.mxu1 %v18901_v63  ;;  %v20862_v63 = vld [vmem:[#allocation8 + $0x158] ss:$24 sps:$4 sm:$0xff]  }
 0x659   :  { %8694 = vmatprep.subr.bf16.mxu1 %v18926_v54 }
 0x65c   :  { %8695 = vmatpush1.bf16.msra.mxu1 %v18925_v0 }
 0x65d   :  { %16591 = vmatprep.subr.bf16.mxu1 %v20822_v11  ;;  %v20870_v11 = vld [vmem:[#allocation8 + $0x18c] ss:$24 sps:$4 sm:$0xff]  }
 0x65f   :  { %8697 = vmatmul.mubr.bf16.vlgmr.msra.gmra.mrb[28].mxu1 %v22241_v27 }
 0x660   :  { %16592 = vmatpush1.bf16.msra.mxu1 %v20820_v13  ;;  %16623 = vmatprep.mubr.bf16.mxu1 %v22646_v18 }
 0x661   :  { %16593 = vmatprep.subr.bf16.mxu1 %v20828_v15 }
 0x664   :  { %16594 = vmatpush1.bf16.msra.mxu1 %v20826_v31 }
 0x665   :  { %16595 = vmatprep.subr.bf16.mxu1 %v20834_v56 }
 0x668   :  { %16596 = vmatpush1.bf16.msra.mxu1 %v20832_v61 }
 0x669   :  { %16597 = vmatprep.subr.bf16.mxu1 %v20840_v4  ;;  %v20868_v4 = vld [vmem:[#allocation8 + $0x188] ss:$24 sps:$4 sm:$0xff]  }
 0x66c   :  { %16598 = vmatpush1.bf16.msra.mxu1 %v20838_v20 }
 0x66d   :  { %16599 = vmatprep.subr.bf16.mxu1 %v20846_v12 }
 0x670   :  { %16600 = vmatpush1.bf16.msra.mxu1 %v20844_v48  ;;  %v20876_v48 = vld [vmem:[#allocation8 + $0x1bc] ss:$24 sps:$4 sm:$0xff]  }
 0x671   :  { %16601 = vmatprep.subr.bf16.mxu1 %v20852_v59 }
 0x672   :  { %v8440_v41 = vpop.f32.mrb[24].mxu1 }
 0x673   :  { %v20115_v29 = vadd.f32 %v8440_v41, %v1324_v14  ;;  %v8442_v55 = vpop.f32.mrb[25].mxu1  ;;  %v20882_v41 = vld [vmem:[#allocation8 + $0x1ec] ss:$24 sps:$4 sm:$0xff]  }
 0x674   :  { %v23135_v32 = vadd.f32 %v8442_v55, %v1328_v19  ;;  %v8444_v37 = vpop.f32.mrb[26].mxu1  ;;  %16602 = vmatpush1.bf16.msra.mxu1 %v20850_v10  ;;  %v20880_v55 = vld [vmem:[#allocation8 + $0x1e8] ss:$24 sps:$4 sm:$0xff]  }
 0x675   :  { %v8773_v8 = vmul.f32 %v20115_v29, %v20115_v29  ;;  %v20117_v30 = vadd.f32 %v8444_v37, %v1324_v14  ;;  %v8446_v16 = vpop.f32.mrb[27].mxu1  ;;  %16603 = vmatprep.subr.bf16.mxu1 %v20858_v5  ;;  %v20874_v5 = vld [vmem:[#allocation8 + $0x1b8] ss:$24 sps:$4 sm:$0xff]   ;;  %v20888_v37 = vld [vmem:[#allocation8 + $0x21c] ss:$24 sps:$4 sm:$0xff]  }
 0x676   :  { %v8774_v17 = vmul.f32 %v23135_v32, %v23135_v32  ;;  %v20118_v9 = vadd.f32 %v8446_v16, %v1328_v19  ;;  %v20894_v16 = vld [vmem:[#allocation8 + $0x24c] ss:$24 sps:$4 sm:$0xff]  }
 0x677   :  { %v8821_v7 = vmul.f32 %v20115_v29, %v8773_v8  ;;  %v8797_v51 = vmul.f32 %v20117_v30, %v20117_v30 }
 0x678   :  { %v8822_v62 = vmul.f32 %v23135_v32, %v8774_v17  ;;  %v8798_v6 = vmul.f32 %v20118_v9, %v20118_v9  ;;  %16604 = vmatpush1.bf16.msra.mxu1 %v20856_v50  ;;  %v20886_v50 = vld [vmem:[#allocation8 + $0x218] ss:$24 sps:$4 sm:$0xff]  }
 0x679   :  { %v8869_v54 = vmul.f32 0.044715, %v8821_v7  ;;  %v8845_v0 = vmul.f32 %v20117_v30, %v8797_v51  ;;  %16605 = vmatprep.subr.bf16.mxu1 %v20864_v42 }
 0x67a   :  { %v8870_v13 = vmul.f32 0.044715, %v8822_v62  ;;  %v8846_v15 = vmul.f32 %v20118_v9, %v8798_v6  ;;  %v8725_v6 = vmul.f32 0.5, %v20115_v29 }
 0x67b   :  { %v8917_v27 = vadd.f32 %v20115_v29, %v8869_v54  ;;  %v8893_v31 = vmul.f32 0.044715, %v8845_v0  ;;  %v20892_v54 = vld [vmem:[#allocation8 + $0x248] ss:$24 sps:$4 sm:$0xff]  }
 0x67c   :  { %v8918_v56 = vadd.f32 %v23135_v32, %v8870_v13  ;;  %v8894_v61 = vmul.f32 0.044715, %v8846_v15  ;;  %16606 = vmatpush1.bf16.msra.mxu1 %v20862_v63  ;;  %v8749_v63 = vmul.f32 0.5, %v20117_v30  ;;  %v8750_v13 = vmul.f32 0.5, %v20118_v9  ;;  %v20895_v29 = vld [vmem:[#allocation8 + $0x1e00] ss:$24 sps:$4 sm:$0xff]  }
 0x67d   :  { %v8965_v20 = vmul.f32 0.7978846, %v8917_v27  ;;  %v8941_v12 = vadd.f32 %v20117_v30, %v8893_v31  ;;  %16607 = vmatprep.subr.bf16.mxu1 %v20870_v11  ;;  %v8726_v11 = vmul.f32 0.5, %v23135_v32  ;;  %v20900_v27 = vld [vmem:[#allocation8 + $0x27c] ss:$24 sps:$4 sm:$0xff]  }
 0x67e   :  { %v8966_v59 = vmul.f32 0.7978846, %v8918_v56  ;;  %v8942_v14 = vadd.f32 %v20118_v9, %v8894_v61  ;;  %v20903_v30 = vld [vmem:[#allocation8 + $0x1e34] ss:$24 sps:$4 sm:$0xff]   ;;  %v20904_v32 = vld [vmem:[#allocation8 + $0x2a8] ss:$24 sps:$4 sm:$0xff]  }
 0x67f   :  { %22184 = vtanh.f32 %v8965_v20  ;;  %v8989_v19 = vmul.f32 0.7978846, %v8941_v12  ;;  %v20898_v20 = vld [vmem:[#allocation8 + $0x278] ss:$24 sps:$4 sm:$0xff]  }
 0x680   :  { %22186 = vtanh.f32 %v8966_v59  ;;  %v8990_v10 = vmul.f32 0.7978846, %v8942_v14  ;;  %16608 = vmatpush1.bf16.msra.mxu1 %v20868_v4  ;;  %v20906_v59 = vld [vmem:[#allocation8 + $0x2ac] ss:$24 sps:$4 sm:$0xff]   ;;  %v20901_v9 = vld [vmem:[#allocation8 + $0x1e30] ss:$24 sps:$4 sm:$0xff]  }
 0x681   :  { %22188 = vtanh.f32 %v8989_v19  ;;  %16609 = vmatprep.subr.bf16.mxu1 %v20876_v48  ;;  %v20912_v14 = vld [vmem:[#allocation8 + $0x2dc] ss:$24 sps:$4 sm:$0xff]  }
 0x682   :  { %22190 = vtanh.f32 %v8990_v10  ;;  %v20909_v19 = vld [vmem:[#allocation8 + $0x1e64] ss:$24 sps:$4 sm:$0xff]   ;;  %v20910_v10 = vld [vmem:[#allocation8 + $0x2d8] ss:$24 sps:$4 sm:$0xff]  }
 0x684   :  { %16610 = vmatpush1.bf16.msra.mxu1 %v20874_v5  ;;  %v20907_v5 = vld [vmem:[#allocation8 + $0x1e60] ss:$24 sps:$4 sm:$0xff]  }
 0x685   :  { %16611 = vmatprep.subr.bf16.mxu1 %v20882_v41  ;;  %v20918_v41 = vld [vmem:[#allocation8 + $0x30c] ss:$24 sps:$4 sm:$0xff]  }
 0x688   :  { %16612 = vmatpush1.bf16.msra.mxu1 %v20880_v55  ;;  %v20915_v55 = vld [vmem:[#allocation8 + $0x1e94] ss:$24 sps:$4 sm:$0xff]  }
 0x689   :  { %v22185_v8 = vpop.eup %22184  ;;  %16613 = vmatprep.subr.bf16.mxu1 %v20888_v37  ;;  %v20916_v37 = vld [vmem:[#allocation8 + $0x308] ss:$24 sps:$4 sm:$0xff]  }
 0x68a   :  { %v22187_v42 = vpop.eup %22186  ;;  %v9061_v17 = vadd.f32 1.0, %v22185_v8  ;;  %v20924_v8 = vld [vmem:[#allocation8 + $0x33c] ss:$24 sps:$4 sm:$0xff]  }
 0x68b   :  { %v22189_v7 = vpop.eup %22188  ;;  %v9062_v51 = vadd.f32 1.0, %v22187_v42  ;;  %v20922_v42 = vld [vmem:[#allocation8 + $0x338] ss:$24 sps:$4 sm:$0xff]  }
 0x68c   :  { %v22191_v62 = vpop.eup %22190  ;;  %16614 = vmatpush1.bf16.msra.mxu1 %v20886_v50  ;;  %v9085_v0 = vadd.f32 1.0, %v22189_v7  ;;  %v9109_v31 = vmul.f32 %v9061_v17, %v8725_v6  ;;  %v20913_v50 = vld [vmem:[#allocation8 + $0x1e90] ss:$24 sps:$4 sm:$0xff]   ;;  %v20919_v17 = vld [vmem:[#allocation8 + $0x1ec0] ss:$24 sps:$4 sm:$0xff]  }
 0x68d   :  { %16615 = vmatprep.subr.bf16.mxu1 %v20894_v16  ;;  %v9086_v15 = vadd.f32 1.0, %v22191_v62  ;;  %v9110_v61 = vmul.f32 %v9062_v51, %v8726_v11  ;;  %v20921_v16 = vld [vmem:[#allocation8 + $0x1ec4] ss:$24 sps:$4 sm:$0xff]   ;;  %v20927_v51 = vld [vmem:[#allocation8 + $0x1ef4] ss:$24 sps:$4 sm:$0xff]  }
 0x68e   :  { %v9133_v56 = vmul.f32 %v9085_v0, %v8749_v63  ;;  %v20930_v7 = vld [vmem:[#allocation8 + $0x36c] ss:$24 sps:$4 sm:$0xff]   ;;  %v20928_v62 = vld [vmem:[#allocation8 + $0x368] ss:$24 sps:$4 sm:$0xff]   ;;  %v20936_v63 = vld [vmem:[#allocation8 + $0x39c] ss:$24 sps:$4 sm:$0xff]  }
 0x68f   :  { %v9134_v4 = vmul.f32 %v9086_v15, %v8750_v13  ;;  %v20925_v6 = vld [vmem:[#allocation8 + $0x1ef0] ss:$24 sps:$4 sm:$0xff]   ;;  %v20931_v11 = vld [vmem:[#allocation8 + $0x1f20] ss:$24 sps:$4 sm:$0xff]   ;;  %v20942_v13 = vld [vmem:[#allocation8 + $0x3cc] ss:$24 sps:$4 sm:$0xff]  }
 0x690   :  { %16616 = vmatpush1.bf16.msra.mxu1 %v20892_v54  ;;  %v23142_v12 = vpack.c.bf16 %v9133_v56, %v9109_v31  ;;  %v20933_v54 = vld [vmem:[#allocation8 + $0x1f24] ss:$24 sps:$4 sm:$0xff]   ;;  %v20934_v0 = vld [vmem:[#allocation8 + $0x398] ss:$24 sps:$4 sm:$0xff]   ;;  %v20939_v15 = vld [vmem:[#allocation8 + $0x1f54] ss:$24 sps:$4 sm:$0xff]  }
 0x691   :  { %v23144_v48 = vpack.c.bf16 %v9134_v4, %v9110_v61  ;;  %16617 = vmatprep.subr.bf16.mxu1 %v20900_v27  ;;  %v20940_v27 = vld [vmem:[#allocation8 + $0x3c8] ss:$24 sps:$4 sm:$0xff]   ;;  %v20948_v56 = vld [vmem:[#allocation8 + $0x3fc] ss:$24 sps:$4 sm:$0xff]   ;;  %v20946_v4 = vld [vmem:[#allocation8 + $0x3f8] ss:$24 sps:$4 sm:$0xff]  }
 0x692   :  { %v20937_v31 = vld [vmem:[#allocation8 + $0x1f50] ss:$24 sps:$4 sm:$0xff]   ;;  %v20945_v61 = vld [vmem:[#allocation8 + $0x1f84] ss:$24 sps:$4 sm:$0xff]  }
 0x693   :  { %16494 = vmatprep.mubr.bf16.mxu0 %v23144_v48 }
 0x694   :  { %16495 = vmatmul.mubr.bf16.vlgmr.msra.gmra.mrb[16].mxu0 %v23142_v12  ;;  %16618 = vmatpush1.bf16.msra.mxu1 %v20898_v20  ;;  %v20943_v20 = vld [vmem:[#allocation8 + $0x1f80] ss:$24 sps:$4 sm:$0xff]  }
 0x695   :  { %16506 = vmatpush1.bf16.msra.mxu0 %v20895_v29  ;;  %16537 = vmatprep.mubr.bf16.mxu0 %v23017_v26  ;;  %v20954_v29 = vld [vmem:[#allocation8 + $0x42c] ss:$24 sps:$4 sm:$0xff]  }
 0x696   :  { %16507 = vmatprep.subr.bf16.mxu0 %v20903_v30  ;;  %16619 = vmatprep.subr.bf16.mxu1 %v20906_v59  ;;  %v20951_v30 = vld [vmem:[#allocation8 + $0x1fb4] ss:$24 sps:$4 sm:$0xff]   ;;  %v20952_v59 = vld [vmem:[#allocation8 + $0x428] ss:$24 sps:$4 sm:$0xff]  }
 0x698   :  { %16620 = vmatpush1.bf16.msra.mxu1 %v20904_v32  ;;  %v20949_v32 = vld [vmem:[#allocation8 + $0x1fb0] ss:$24 sps:$4 sm:$0xff]  }
 0x699   :  { %16508 = vmatpush1.bf16.msra.mxu0 %v20901_v9  ;;  %16621 = vmatprep.subr.bf16.mxu1 %v20912_v14  ;;  %v20960_v9 = vld [vmem:[#allocation8 + $0x45c] ss:$24 sps:$4 sm:$0xff]  }
 0x69a   :  { %16509 = vmatprep.subr.bf16.mxu0 %v20909_v19  ;;  %v20957_v14 = vld [vmem:[#allocation8 + $0x1fe4] ss:$24 sps:$4 sm:$0xff]   ;;  %v20958_v19 = vld [vmem:[#allocation8 + $0x458] ss:$24 sps:$4 sm:$0xff]  }
 0x69c   :  { %16622 = vmatpush1.bf16.msra.mxu1 %v20910_v10  ;;  %v20955_v10 = vld [vmem:[#allocation8 + $0x1fe0] ss:$24 sps:$4 sm:$0xff]  }
 0x69d   :  { %16510 = vmatpush1.bf16.msra.mxu0 %v20907_v5  ;;  %16634 = vmatprep.subr.bf16.mxu1 %v20918_v41  ;;  %v20966_v5 = vld [vmem:[#allocation8 + $0x48c] ss:$24 sps:$4 sm:$0xff]  }
 0x69e   :  { %16511 = vmatprep.subr.bf16.mxu0 %v20915_v55  ;;  %v20963_v41 = vld [vmem:[#allocation8 + $0x2014] ss:$24 sps:$4 sm:$0xff]   ;;  %v20964_v55 = vld [vmem:[#allocation8 + $0x488] ss:$24 sps:$4 sm:$0xff]  }
 0x69f   :  { %16624 = vmatmul.mubr.bf16.vlgmr.msra.gmra.mrb[32].mxu1 %v22644_v44 }
 0x6a0   :  { %16635 = vmatpush1.bf16.msra.mxu1 %v20916_v37  ;;  %16666 = vmatprep.mubr.bf16.mxu1 %v22820_v36  ;;  %v20961_v37 = vld [vmem:[#allocation8 + $0x2010] ss:$24 sps:$4 sm:$0xff]  }
 0x6a1   :  { %16512 = vmatpush1.bf16.msra.mxu0 %v20913_v50  ;;  %16636 = vmatprep.subr.bf16.mxu1 %v20924_v8  ;;  %v20972_v50 = vld [vmem:[#allocation8 + $0x4bc] ss:$24 sps:$4 sm:$0xff]  }
 0x6a2   :  { %16513 = vmatprep.subr.bf16.mxu0 %v20921_v16  ;;  %v20969_v8 = vld [vmem:[#allocation8 + $0x2044] ss:$24 sps:$4 sm:$0xff]   ;;  %v20970_v16 = vld [vmem:[#allocation8 + $0x4b8] ss:$24 sps:$4 sm:$0xff]  }
 0x6a4   :  { %16637 = vmatpush1.bf16.msra.mxu1 %v20922_v42  ;;  %v20967_v42 = vld [vmem:[#allocation8 + $0x2040] ss:$24 sps:$4 sm:$0xff]  }
 0x6a5   :  { %16514 = vmatpush1.bf16.msra.mxu0 %v20919_v17  ;;  %16638 = vmatprep.subr.bf16.mxu1 %v20930_v7  ;;  %v20978_v17 = vld [vmem:[#allocation8 + $0x4ec] ss:$24 sps:$4 sm:$0xff]  }
 0x6a6   :  { %16515 = vmatprep.subr.bf16.mxu0 %v20927_v51  ;;  %v20975_v7 = vld [vmem:[#allocation8 + $0x2074] ss:$24 sps:$4 sm:$0xff]   ;;  %v20976_v51 = vld [vmem:[#allocation8 + $0x4e8] ss:$24 sps:$4 sm:$0xff]  }
 0x6a8   :  { %16639 = vmatpush1.bf16.msra.mxu1 %v20928_v62  ;;  %v20973_v62 = vld [vmem:[#allocation8 + $0x2070] ss:$24 sps:$4 sm:$0xff]  }
 0x6a9   :  { %16516 = vmatpush1.bf16.msra.mxu0 %v20925_v6  ;;  %16640 = vmatprep.subr.bf16.mxu1 %v20936_v63  ;;  %v20984_v6 = vld [vmem:[#allocation8 + $0x51c] ss:$24 sps:$4 sm:$0xff]  }
 0x6aa   :  { %16517 = vmatprep.subr.bf16.mxu0 %v20933_v54  ;;  %v20981_v63 = vld [vmem:[#allocation8 + $0x20a4] ss:$24 sps:$4 sm:$0xff]   ;;  %v20982_v54 = vld [vmem:[#allocation8 + $0x518] ss:$24 sps:$4 sm:$0xff]  }
 0x6ac   :  { %16641 = vmatpush1.bf16.msra.mxu1 %v20934_v0  ;;  %v20979_v0 = vld [vmem:[#allocation8 + $0x20a0] ss:$24 sps:$4 sm:$0xff]  }
 0x6ad   :  { %16518 = vmatpush1.bf16.msra.mxu0 %v20931_v11  ;;  %16642 = vmatprep.subr.bf16.mxu1 %v20942_v13  ;;  %v20990_v11 = vld [vmem:[#allocation8 + $0x54c] ss:$24 sps:$4 sm:$0xff]  }
 0x6ae   :  { %16519 = vmatprep.subr.bf16.mxu0 %v20939_v15  ;;  %v20987_v13 = vld [vmem:[#allocation8 + $0x20d4] ss:$24 sps:$4 sm:$0xff]   ;;  %v20988_v15 = vld [vmem:[#allocation8 + $0x548] ss:$24 sps:$4 sm:$0xff]  }
 0x6b0   :  { %16643 = vmatpush1.bf16.msra.mxu1 %v20940_v27  ;;  %v20985_v27 = vld [vmem:[#allocation8 + $0x20d0] ss:$24 sps:$4 sm:$0xff]  }
 0x6b1   :  { %16520 = vmatpush1.bf16.msra.mxu0 %v20937_v31  ;;  %16644 = vmatprep.subr.bf16.mxu1 %v20948_v56  ;;  %v20993_v31 = vld [vmem:[#allocation8 + $0x57c] ss:$24 sps:$4 sm:$0xff]  }
 0x6b2   :  { %16521 = vmatprep.subr.bf16.mxu0 %v20945_v61  ;;  %v21041_v56 = vld [vmem:[#allocation8 + $0x2104] ss:$24 sps:$4 sm:$0xff]   ;;  %v20991_v61 = vld [vmem:[#allocation8 + $0x578] ss:$24 sps:$4 sm:$0xff]  }
 0x6b4   :  { %16645 = vmatpush1.bf16.msra.mxu1 %v20946_v4  ;;  %v20996_v4 = vld [vmem:[#allocation8 + $0x5ac] ss:$24 sps:$4 sm:$0xff]  }
 0x6b5   :  { %16522 = vmatpush1.bf16.msra.mxu0 %v20943_v20  ;;  %16646 = vmatprep.subr.bf16.mxu1 %v20954_v29  ;;  %v21039_v20 = vld [vmem:[#allocation8 + $0x2100] ss:$24 sps:$4 sm:$0xff]   ;;  %v21047_v29 = vld [vmem:[#allocation8 + $0x2134] ss:$24 sps:$4 sm:$0xff]  }
 0x6b6   :  { %16523 = vmatprep.subr.bf16.mxu0 %v20951_v30  ;;  %v20994_v30 = vld [vmem:[#allocation8 + $0x5a8] ss:$24 sps:$4 sm:$0xff]  }
 0x6b8   :  { %16647 = vmatpush1.bf16.msra.mxu1 %v20952_v59  ;;  %v20999_v59 = vld [vmem:[#allocation8 + $0x5dc] ss:$24 sps:$4 sm:$0xff]  }
 0x6b9   :  { %16524 = vmatpush1.bf16.msra.mxu0 %v20949_v32  ;;  %16648 = vmatprep.subr.bf16.mxu1 %v20960_v9  ;;  %v21045_v32 = vld [vmem:[#allocation8 + $0x2130] ss:$24 sps:$4 sm:$0xff]   ;;  %v21053_v9 = vld [vmem:[#allocation8 + $0x2164] ss:$24 sps:$4 sm:$0xff]  }
 0x6ba   :  { %16525 = vmatprep.subr.bf16.mxu0 %v20957_v14  ;;  %v20997_v14 = vld [vmem:[#allocation8 + $0x5d8] ss:$24 sps:$4 sm:$0xff]  }
 0x6bc   :  { %16649 = vmatpush1.bf16.msra.mxu1 %v20958_v19  ;;  %v21002_v19 = vld [vmem:[#allocation8 + $0x60c] ss:$24 sps:$4 sm:$0xff]  }
 0x6bd   :  { %16526 = vmatpush1.bf16.msra.mxu0 %v20955_v10  ;;  %16650 = vmatprep.subr.bf16.mxu1 %v20966_v5  ;;  %v21051_v10 = vld [vmem:[#allocation8 + $0x2160] ss:$24 sps:$4 sm:$0xff]   ;;  %v21059_v5 = vld [vmem:[#allocation8 + $0x2194] ss:$24 sps:$4 sm:$0xff]  }
 0x6be   :  { %16527 = vmatprep.subr.bf16.mxu0 %v20963_v41  ;;  %v21000_v41 = vld [vmem:[#allocation8 + $0x608] ss:$24 sps:$4 sm:$0xff]  }
 0x6c0   :  { %16651 = vmatpush1.bf16.msra.mxu1 %v20964_v55  ;;  %v21005_v55 = vld [vmem:[#allocation8 + $0x63c] ss:$24 sps:$4 sm:$0xff]  }
 0x6c1   :  { %16528 = vmatpush1.bf16.msra.mxu0 %v20961_v37  ;;  %16652 = vmatprep.subr.bf16.mxu1 %v20972_v50  ;;  %v21057_v37 = vld [vmem:[#allocation8 + $0x2190] ss:$24 sps:$4 sm:$0xff]   ;;  %v21065_v50 = vld [vmem:[#allocation8 + $0x21c4] ss:$24 sps:$4 sm:$0xff]  }
 0x6c2   :  { %16529 = vmatprep.subr.bf16.mxu0 %v20969_v8  ;;  %v21003_v8 = vld [vmem:[#allocation8 + $0x638] ss:$24 sps:$4 sm:$0xff]  }
 0x6c4   :  { %16653 = vmatpush1.bf16.msra.mxu1 %v20970_v16  ;;  %v21008_v16 = vld [vmem:[#allocation8 + $0x66c] ss:$24 sps:$4 sm:$0xff]  }
 0x6c5   :  { %16530 = vmatpush1.bf16.msra.mxu0 %v20967_v42  ;;  %16654 = vmatprep.subr.bf16.mxu1 %v20978_v17  ;;  %v21063_v42 = vld [vmem:[#allocation8 + $0x21c0] ss:$24 sps:$4 sm:$0xff]   ;;  %v21071_v17 = vld [vmem:[#allocation8 + $0x21f4] ss:$24 sps:$4 sm:$0xff]  }
 0x6c6   :  { %16531 = vmatprep.subr.bf16.mxu0 %v20975_v7  ;;  %v21006_v7 = vld [vmem:[#allocation8 + $0x668] ss:$24 sps:$4 sm:$0xff]  }
 0x6c8   :  { %16655 = vmatpush1.bf16.msra.mxu1 %v20976_v51  ;;  %v21011_v51 = vld [vmem:[#allocation8 + $0x69c] ss:$24 sps:$4 sm:$0xff]  }
 0x6c9   :  { %16532 = vmatpush1.bf16.msra.mxu0 %v20973_v62  ;;  %16656 = vmatprep.subr.bf16.mxu1 %v20984_v6  ;;  %v21069_v62 = vld [vmem:[#allocation8 + $0x21f0] ss:$24 sps:$4 sm:$0xff]   ;;  %v21077_v6 = vld [vmem:[#allocation8 + $0x2224] ss:$24 sps:$4 sm:$0xff]  }
 0x6ca   :  { %16533 = vmatprep.subr.bf16.mxu0 %v20981_v63  ;;  %v21009_v63 = vld [vmem:[#allocation8 + $0x698] ss:$24 sps:$4 sm:$0xff]  }
 0x6cc   :  { %16657 = vmatpush1.bf16.msra.mxu1 %v20982_v54  ;;  %v21014_v54 = vld [vmem:[#allocation8 + $0x6cc] ss:$24 sps:$4 sm:$0xff]  }
 0x6cd   :  { %16534 = vmatpush1.bf16.msra.mxu0 %v20979_v0  ;;  %16658 = vmatprep.subr.bf16.mxu1 %v20990_v11  ;;  %v21075_v0 = vld [vmem:[#allocation8 + $0x2220] ss:$24 sps:$4 sm:$0xff]   ;;  %v21083_v11 = vld [vmem:[#allocation8 + $0x2254] ss:$24 sps:$4 sm:$0xff]  }
 0x6ce   :  { %16535 = vmatprep.subr.bf16.mxu0 %v20987_v13  ;;  %v21012_v13 = vld [vmem:[#allocation8 + $0x6c8] ss:$24 sps:$4 sm:$0xff]  }
 0x6d0   :  { %16659 = vmatpush1.bf16.msra.mxu1 %v20988_v15  ;;  %v21017_v15 = vld [vmem:[#allocation8 + $0x6fc] ss:$24 sps:$4 sm:$0xff]  }
 0x6d1   :  { %16536 = vmatpush1.bf16.msra.mxu0 %v20985_v27  ;;  %16660 = vmatprep.subr.bf16.mxu1 %v20993_v31  ;;  %v21081_v27 = vld [vmem:[#allocation8 + $0x2250] ss:$24 sps:$4 sm:$0xff]   ;;  %v21089_v31 = vld [vmem:[#allocation8 + $0x2284] ss:$24 sps:$4 sm:$0xff]  }
 0x6d2   :  { %16548 = vmatprep.subr.bf16.mxu0 %v21041_v56  ;;  %v21015_v56 = vld [vmem:[#allocation8 + $0x6f8] ss:$24 sps:$4 sm:$0xff]  }
 0x6d4   :  { %16538 = vmatmul.mubr.bf16.vlgmr.msra.gmra.mrb[16].mxu0 %v23015_v2  ;;  %16661 = vmatpush1.bf16.msra.mxu1 %v20991_v61  ;;  %v21020_v61 = vld [vmem:[#allocation8 + $0x72c] ss:$24 sps:$4 sm:$0xff]  }
 0x6d5   :  { %16662 = vmatprep.subr.bf16.mxu1 %v20996_v4  ;;  %16549 = vmatpush1.bf16.msra.mxu0 %v21039_v20  ;;  %v21087_v4 = vld [vmem:[#allocation8 + $0x2280] ss:$24 sps:$4 sm:$0xff]   ;;  %v21095_v20 = vld [vmem:[#allocation8 + $0x22b4] ss:$24 sps:$4 sm:$0xff]  }
 0x6d6   :  { %16550 = vmatprep.subr.bf16.mxu0 %v21047_v29  ;;  %v21018_v29 = vld [vmem:[#allocation8 + $0x728] ss:$24 sps:$4 sm:$0xff]  }
 0x6d8   :  { %16663 = vmatpush1.bf16.msra.mxu1 %v20994_v30  ;;  %v21023_v30 = vld [vmem:[#allocation8 + $0x75c] ss:$24 sps:$4 sm:$0xff]  }
 0x6d9   :  { %16664 = vmatprep.subr.bf16.mxu1 %v20999_v59  ;;  %16551 = vmatpush1.bf16.msra.mxu0 %v21045_v32  ;;  %v21093_v59 = vld [vmem:[#allocation8 + $0x22b0] ss:$24 sps:$4 sm:$0xff]   ;;  %v21101_v32 = vld [vmem:[#allocation8 + $0x22e4] ss:$24 sps:$4 sm:$0xff]  }
 0x6da   :  { %16552 = vmatprep.subr.bf16.mxu0 %v21053_v9  ;;  %v21021_v9 = vld [vmem:[#allocation8 + $0x758] ss:$24 sps:$4 sm:$0xff]  }
 0x6dc   :  { %16665 = vmatpush1.bf16.msra.mxu1 %v20997_v14  ;;  %v21026_v14 = vld [vmem:[#allocation8 + $0x78c] ss:$24 sps:$4 sm:$0xff]  }
 0x6dd   :  { %16677 = vmatprep.subr.bf16.mxu1 %v21002_v19  ;;  %16553 = vmatpush1.bf16.msra.mxu0 %v21051_v10  ;;  %v21099_v19 = vld [vmem:[#allocation8 + $0x22e0] ss:$24 sps:$4 sm:$0xff]   ;;  %v21107_v10 = vld [vmem:[#allocation8 + $0x2314] ss:$24 sps:$4 sm:$0xff]  }
 0x6de   :  { %16554 = vmatprep.subr.bf16.mxu0 %v21059_v5  ;;  %v21024_v5 = vld [vmem:[#allocation8 + $0x788] ss:$24 sps:$4 sm:$0xff]  }
 0x6df   :  { %16667 = vmatmul.mubr.bf16.vlgmr.msra.gmra.mrb[32].mxu1 %v22818_v23 }
 0x6e0   :  { %16678 = vmatpush1.bf16.msra.mxu1 %v21000_v41  ;;  %16709 = vmatprep.mubr.bf16.mxu1 %v22913_v38  ;;  %v21029_v41 = vld [vmem:[#allocation8 + $0x7bc] ss:$24 sps:$4 sm:$0xff]  }
 0x6e1   :  { %16679 = vmatprep.subr.bf16.mxu1 %v21005_v55  ;;  %16555 = vmatpush1.bf16.msra.mxu0 %v21057_v37  ;;  %v21105_v55 = vld [vmem:[#allocation8 + $0x2310] ss:$24 sps:$4 sm:$0xff]   ;;  %v21113_v37 = vld [vmem:[#allocation8 + $0x2344] ss:$24 sps:$4 sm:$0xff]  }
 0x6e2   :  { %16556 = vmatprep.subr.bf16.mxu0 %v21065_v50  ;;  %v21027_v50 = vld [vmem:[#allocation8 + $0x7b8] ss:$24 sps:$4 sm:$0xff]  }
 0x6e4   :  { %16680 = vmatpush1.bf16.msra.mxu1 %v21003_v8  ;;  %v21032_v8 = vld [vmem:[#allocation8 + $0x7ec] ss:$24 sps:$4 sm:$0xff]  }
 0x6e5   :  { %16681 = vmatprep.subr.bf16.mxu1 %v21008_v16  ;;  %16557 = vmatpush1.bf16.msra.mxu0 %v21063_v42  ;;  %v21111_v16 = vld [vmem:[#allocation8 + $0x2340] ss:$24 sps:$4 sm:$0xff]   ;;  %v21119_v42 = vld [vmem:[#allocation8 + $0x2374] ss:$24 sps:$4 sm:$0xff]  }
 0x6e6   :  { %16558 = vmatprep.subr.bf16.mxu0 %v21071_v17  ;;  %v21030_v17 = vld [vmem:[#allocation8 + $0x7e8] ss:$24 sps:$4 sm:$0xff]  }
 0x6e8   :  { %16682 = vmatpush1.bf16.msra.mxu1 %v21006_v7  ;;  %v21035_v7 = vld [vmem:[#allocation8 + $0x81c] ss:$24 sps:$4 sm:$0xff]  }
 0x6e9   :  { %16683 = vmatprep.subr.bf16.mxu1 %v21011_v51  ;;  %16559 = vmatpush1.bf16.msra.mxu0 %v21069_v62  ;;  %v21117_v51 = vld [vmem:[#allocation8 + $0x2370] ss:$24 sps:$4 sm:$0xff]   ;;  %v21125_v62 = vld [vmem:[#allocation8 + $0x23a4] ss:$24 sps:$4 sm:$0xff]  }
 0x6ea   :  { %16560 = vmatprep.subr.bf16.mxu0 %v21077_v6  ;;  %v21033_v6 = vld [vmem:[#allocation8 + $0x818] ss:$24 sps:$4 sm:$0xff]  }
 0x6ec   :  { %16684 = vmatpush1.bf16.msra.mxu1 %v21009_v63  ;;  %v21038_v63 = vld [vmem:[#allocation8 + $0x84c] ss:$24 sps:$4 sm:$0xff]  }
 0x6ed   :  { %16685 = vmatprep.subr.bf16.mxu1 %v21014_v54  ;;  %16561 = vmatpush1.bf16.msra.mxu0 %v21075_v0  ;;  %v21123_v54 = vld [vmem:[#allocation8 + $0x23a0] ss:$24 sps:$4 sm:$0xff]   ;;  %v21131_v0 = vld [vmem:[#allocation8 + $0x23d4] ss:$24 sps:$4 sm:$0xff]  }
 0x6ee   :  { %16562 = vmatprep.subr.bf16.mxu0 %v21083_v11  ;;  %v21036_v11 = vld [vmem:[#allocation8 + $0x848] ss:$24 sps:$4 sm:$0xff]  }
 0x6f0   :  { %16686 = vmatpush1.bf16.msra.mxu1 %v21012_v13  ;;  %v21044_v13 = vld [vmem:[#allocation8 + $0x87c] ss:$24 sps:$4 sm:$0xff]  }
 0x6f1   :  { %16687 = vmatprep.subr.bf16.mxu1 %v21017_v15  ;;  %16563 = vmatpush1.bf16.msra.mxu0 %v21081_v27  ;;  %v21129_v15 = vld [vmem:[#allocation8 + $0x23d0] ss:$24 sps:$4 sm:$0xff]   ;;  %v21140_v27 = vld [vmem:[#allocation8 + $0x14] ss:$24 sps:$4 sm:$0xff]  }
 0x6f2   :  { %16564 = vmatprep.subr.bf16.mxu0 %v21089_v31  ;;  %v21042_v31 = vld [vmem:[#allocation8 + $0x878] ss:$24 sps:$4 sm:$0xff]  }
 0x6f4   :  { %16688 = vmatpush1.bf16.msra.mxu1 %v21015_v56  ;;  %v21050_v56 = vld [vmem:[#allocation8 + $0x8ac] ss:$24 sps:$4 sm:$0xff]  }
 0x6f5   :  { %16689 = vmatprep.subr.bf16.mxu1 %v21020_v61  ;;  %16565 = vmatpush1.bf16.msra.mxu0 %v21087_v4  ;;  %v21048_v61 = vld [vmem:[#allocation8 + $0x8a8] ss:$24 sps:$4 sm:$0xff]   ;;  %v21056_v4 = vld [vmem:[#allocation8 + $0x8dc] ss:$24 sps:$4 sm:$0xff]  }
 0x6f6   :  { %16566 = vmatprep.subr.bf16.mxu0 %v21095_v20  ;;  %v21054_v20 = vld [vmem:[#allocation8 + $0x8d8] ss:$24 sps:$4 sm:$0xff]  }
 0x6f8   :  { %16690 = vmatpush1.bf16.msra.mxu1 %v21018_v29  ;;  %v21062_v29 = vld [vmem:[#allocation8 + $0x90c] ss:$24 sps:$4 sm:$0xff]  }
 0x6f9   :  { %16691 = vmatprep.subr.bf16.mxu1 %v21023_v30  ;;  %16567 = vmatpush1.bf16.msra.mxu0 %v21093_v59  ;;  %v21060_v30 = vld [vmem:[#allocation8 + $0x908] ss:$24 sps:$4 sm:$0xff]   ;;  %v21068_v59 = vld [vmem:[#allocation8 + $0x93c] ss:$24 sps:$4 sm:$0xff]  }
 0x6fa   :  { %16568 = vmatprep.subr.bf16.mxu0 %v21101_v32  ;;  %v21066_v32 = vld [vmem:[#allocation8 + $0x938] ss:$24 sps:$4 sm:$0xff]  }
 0x6fc   :  { %16692 = vmatpush1.bf16.msra.mxu1 %v21021_v9  ;;  %v21074_v9 = vld [vmem:[#allocation8 + $0x96c] ss:$24 sps:$4 sm:$0xff]  }
 0x6fd   :  { %16693 = vmatprep.subr.bf16.mxu1 %v21026_v14  ;;  %16569 = vmatpush1.bf16.msra.mxu0 %v21099_v19  ;;  %v21072_v14 = vld [vmem:[#allocation8 + $0x968] ss:$24 sps:$4 sm:$0xff]   ;;  %v21080_v19 = vld [vmem:[#allocation8 + $0x99c] ss:$24 sps:$4 sm:$0xff]  }
 0x6fe   :  { %16570 = vmatprep.subr.bf16.mxu0 %v21107_v10  ;;  %v21078_v10 = vld [vmem:[#allocation8 + $0x998] ss:$24 sps:$4 sm:$0xff]  }
 0x700   :  { %16694 = vmatpush1.bf16.msra.mxu1 %v21024_v5  ;;  %v21086_v5 = vld [vmem:[#allocation8 + $0x9cc] ss:$24 sps:$4 sm:$0xff]  }
 0x701   :  { %16695 = vmatprep.subr.bf16.mxu1 %v21029_v41  ;;  %16571 = vmatpush1.bf16.msra.mxu0 %v21105_v55  ;;  %v21084_v41 = vld [vmem:[#allocation8 + $0x9c8] ss:$24 sps:$4 sm:$0xff]   ;;  %v21092_v55 = vld [vmem:[#allocation8 + $0x9fc] ss:$24 sps:$4 sm:$0xff]  }
 0x702   :  { %16572 = vmatprep.subr.bf16.mxu0 %v21113_v37  ;;  %v1340_v37 = vrot.slane %v23129_v1, %v22925_v22  ;;  %v21104_v22 = vld [vmem:[#allocation8 + $0xa5c] ss:$24 sps:$4 sm:$0xff]  }
 0x704   :  { %16696 = vmatpush1.bf16.msra.mxu1 %v21027_v50  ;;  %v1344_v50 = vrot.slane %v23129_v1, %v22928_v35 }
 0x705   :  { %16697 = vmatprep.subr.bf16.mxu1 %v21032_v8  ;;  %16573 = vmatpush1.bf16.msra.mxu0 %v21111_v16  ;;  %v21090_v8 = vld [vmem:[#allocation8 + $0x9f8] ss:$24 sps:$4 sm:$0xff]   ;;  %v21098_v16 = vld [vmem:[#allocation8 + $0xa2c] ss:$24 sps:$4 sm:$0xff]  }
 0x706   :  { %16574 = vmatprep.subr.bf16.mxu0 %v21119_v42 }
 0x708   :  { %16698 = vmatpush1.bf16.msra.mxu1 %v21030_v17 }
 0x709   :  { %16699 = vmatprep.subr.bf16.mxu1 %v21035_v7  ;;  %16575 = vmatpush1.bf16.msra.mxu0 %v21117_v51 }
 0x70a   :  { %16576 = vmatprep.subr.bf16.mxu0 %v21125_v62 }
 0x70c   :  { %16700 = vmatpush1.bf16.msra.mxu1 %v21033_v6  ;;  %v21096_v6 = vld [vmem:[#allocation8 + $0xa28] ss:$24 sps:$4 sm:$0xff]  }
 0x70d   :  { %16701 = vmatprep.subr.bf16.mxu1 %v21038_v63  ;;  %16577 = vmatpush1.bf16.msra.mxu0 %v21123_v54 }
 0x70e   :  { %16578 = vmatprep.subr.bf16.mxu0 %v21131_v0 }
 0x710   :  { %16702 = vmatpush1.bf16.msra.mxu1 %v21036_v11 }
 0x711   :  { %16703 = vmatprep.subr.bf16.mxu1 %v21044_v13  ;;  %16579 = vmatpush1.bf16.msra.mxu0 %v21129_v15 }
 0x712   :  { %17107 = vmatprep.subr.bf16.mxu0 %v21140_v27 }
 0x714   :  { %16704 = vmatpush1.bf16.msra.mxu1 %v21042_v31  ;;  %v21102_v31 = vld [vmem:[#allocation8 + $0xa58] ss:$24 sps:$4 sm:$0xff]  }
 0x715   :  { %16705 = vmatprep.subr.bf16.mxu1 %v21050_v56 }
 0x718   :  { %16706 = vmatpush1.bf16.msra.mxu1 %v21048_v61 }
 0x719   :  { %16707 = vmatprep.subr.bf16.mxu1 %v21056_v4  ;;  %v21110_v4 = vld [vmem:[#allocation8 + $0xa8c] ss:$24 sps:$4 sm:$0xff]  }
 0x71c   :  { %16708 = vmatpush1.bf16.msra.mxu1 %v21054_v20 }
 0x71d   :  { %16720 = vmatprep.subr.bf16.mxu1 %v21062_v29 }
 0x71f   :  { %16710 = vmatmul.mubr.bf16.vlgmr.msra.gmra.mrb[32].mxu1 %v22911_v52 }
 0x720   :  { %16721 = vmatpush1.bf16.msra.mxu1 %v21060_v30  ;;  %16752 = vmatprep.mubr.bf16.mxu1 %v23012_v49 }
 0x721   :  { %16722 = vmatprep.subr.bf16.mxu1 %v21068_v59 }
 0x724   :  { %16723 = vmatpush1.bf16.msra.mxu1 %v21066_v32 }
 0x725   :  { %16724 = vmatprep.subr.bf16.mxu1 %v21074_v9 }
 0x728   :  { %16725 = vmatpush1.bf16.msra.mxu1 %v21072_v14  ;;  %v21108_v14 = vld [vmem:[#allocation8 + $0xa88] ss:$24 sps:$4 sm:$0xff]  }
 0x729   :  { %16726 = vmatprep.subr.bf16.mxu1 %v21080_v19 }
 0x72c   :  { %16727 = vmatpush1.bf16.msra.mxu1 %v21078_v10 }
 0x72d   :  { %16728 = vmatprep.subr.bf16.mxu1 %v21086_v5  ;;  %v21116_v5 = vld [vmem:[#allocation8 + $0xabc] ss:$24 sps:$4 sm:$0xff]  }
 0x730   :  { %16729 = vmatpush1.bf16.msra.mxu1 %v21084_v41 }
 0x731   :  { %16730 = vmatprep.subr.bf16.mxu1 %v21092_v55 }
 0x732   :  { %v8698_v42 = vpop.f32.mrb[28].mxu1 }
 0x733   :  { %v20123_v17 = vadd.f32 %v8698_v42, %v1340_v37  ;;  %v8700_v7 = vpop.f32.mrb[29].mxu1  ;;  %v21120_v42 = vld [vmem:[#allocation8 + $0xae8] ss:$24 sps:$4 sm:$0xff]  }
 0x734   :  { %v23160_v51 = vadd.f32 %v8700_v7, %v1344_v50  ;;  %v8702_v62 = vpop.f32.mrb[30].mxu1  ;;  %16731 = vmatpush1.bf16.msra.mxu1 %v21090_v8  ;;  %v21114_v8 = vld [vmem:[#allocation8 + $0xab8] ss:$24 sps:$4 sm:$0xff]   ;;  %v21128_v7 = vld [vmem:[#allocation8 + $0xb1c] ss:$24 sps:$4 sm:$0xff]  }
 0x735   :  { %v8777_v63 = vmul.f32 %v20123_v17, %v20123_v17  ;;  %v20125_v54 = vadd.f32 %v8702_v62, %v1340_v37  ;;  %v8704_v0 = vpop.f32.mrb[31].mxu1  ;;  %16732 = vmatprep.subr.bf16.mxu1 %v21098_v16  ;;  %v21122_v16 = vld [vmem:[#allocation8 + $0xaec] ss:$24 sps:$4 sm:$0xff]   ;;  %v21126_v62 = vld [vmem:[#allocation8 + $0xb18] ss:$24 sps:$4 sm:$0xff]  }
 0x736   :  { %v8778_v11 = vmul.f32 %v23160_v51, %v23160_v51  ;;  %v20126_v35 = vadd.f32 %v8704_v0, %v1344_v50 }
 0x737   :  { %v8825_v1 = vmul.f32 %v20123_v17, %v8777_v63  ;;  %v8801_v13 = vmul.f32 %v20125_v54, %v20125_v54  ;;  %v21134_v63 = vld [vmem:[#allocation8 + $0xb4c] ss:$24 sps:$4 sm:$0xff]  }
 0x738   :  { %v8826_v15 = vmul.f32 %v23160_v51, %v8778_v11  ;;  %v8802_v27 = vmul.f32 %v20126_v35, %v20126_v35  ;;  %16733 = vmatpush1.bf16.msra.mxu1 %v21096_v6 }
 0x739   :  { %v8873_v56 = vmul.f32 0.044715, %v8825_v1  ;;  %v8849_v61 = vmul.f32 %v20125_v54, %v8801_v13  ;;  %16734 = vmatprep.subr.bf16.mxu1 %v21104_v22 }
 0x73a   :  { %v8874_v20 = vmul.f32 0.044715, %v8826_v15  ;;  %v8850_v29 = vmul.f32 %v20126_v35, %v8802_v27  ;;  %v8729_v15 = vmul.f32 0.5, %v20123_v17  ;;  %v8753_v27 = vmul.f32 0.5, %v20125_v54 }
 0x73b   :  { %v8921_v30 = vadd.f32 %v20123_v17, %v8873_v56  ;;  %v8897_v59 = vmul.f32 0.044715, %v8849_v61  ;;  %v8730_v61 = vmul.f32 0.5, %v23160_v51  ;;  %v21138_v17 = vld [vmem:[#allocation8 + $0x10] ss:$24 sps:$4 sm:$0xff]  }
 0x73c   :  { %v8922_v32 = vadd.f32 %v23160_v51, %v8874_v20  ;;  %v8898_v9 = vmul.f32 0.044715, %v8850_v29  ;;  %16735 = vmatpush1.bf16.msra.mxu1 %v21102_v31  ;;  %v21132_v31 = vld [vmem:[#allocation8 + $0xb48] ss:$24 sps:$4 sm:$0xff]   ;;  %v21137_v29 = vld [vmem:[#allocation8 + $0xb7c] ss:$24 sps:$4 sm:$0xff]  }
 0x73d   :  { %v8969_v19 = vmul.f32 0.7978846, %v8921_v30  ;;  %v8945_v10 = vadd.f32 %v20125_v54, %v8897_v59  ;;  %16736 = vmatprep.subr.bf16.mxu1 %v21110_v4  ;;  %v8754_v4 = vmul.f32 0.5, %v20126_v35  ;;  %v21143_v54 = vld [vmem:[#allocation8 + $0xbac] ss:$24 sps:$4 sm:$0xff]  }
 0x73e   :  { %v8970_v41 = vmul.f32 0.7978846, %v8922_v32  ;;  %v8946_v55 = vadd.f32 %v20126_v35, %v8898_v9  ;;  %v21141_v51 = vld [vmem:[#allocation8 + $0xba8] ss:$24 sps:$4 sm:$0xff]  }
 0x73f   :  { %22192 = vtanh.f32 %v8969_v19  ;;  %v8993_v37 = vmul.f32 0.7978846, %v8945_v10  ;;  %v21144_v35 = vld [vmem:[#allocation8 + $0x40] ss:$24 sps:$4 sm:$0xff]  }
 0x740   :  { %22194 = vtanh.f32 %v8970_v41  ;;  %v8994_v50 = vmul.f32 0.7978846, %v8946_v55  ;;  %16737 = vmatpush1.bf16.msra.mxu1 %v21108_v14  ;;  %v21135_v14 = vld [vmem:[#allocation8 + $0xb78] ss:$24 sps:$4 sm:$0xff]   ;;  %v21149_v41 = vld [vmem:[#allocation8 + $0xbdc] ss:$24 sps:$4 sm:$0xff]  }
 0x741   :  { %22196 = vtanh.f32 %v8993_v37  ;;  %16738 = vmatprep.subr.bf16.mxu1 %v21116_v5  ;;  %v21146_v5 = vld [vmem:[#allocation8 + $0x44] ss:$24 sps:$4 sm:$0xff]   ;;  %v21152_v55 = vld [vmem:[#allocation8 + $0x74] ss:$24 sps:$4 sm:$0xff]   ;;  %v21147_v37 = vld [vmem:[#allocation8 + $0xbd8] ss:$24 sps:$4 sm:$0xff]  }
 0x742   :  { %22198 = vtanh.f32 %v8994_v50  ;;  %v21150_v50 = vld [vmem:[#allocation8 + $0x70] ss:$24 sps:$4 sm:$0xff]  }
 0x744   :  { %16739 = vmatpush1.bf16.msra.mxu1 %v21114_v8  ;;  %v21155_v8 = vld [vmem:[#allocation8 + $0xc0c] ss:$24 sps:$4 sm:$0xff]  }
 0x745   :  { %16740 = vmatprep.subr.bf16.mxu1 %v21122_v16  ;;  %v21158_v16 = vld [vmem:[#allocation8 + $0xa4] ss:$24 sps:$4 sm:$0xff]  }
 0x748   :  { %16741 = vmatpush1.bf16.msra.mxu1 %v21120_v42  ;;  %v21153_v42 = vld [vmem:[#allocation8 + $0xc08] ss:$24 sps:$4 sm:$0xff]  }
 0x749   :  { %v22193_v6 = vpop.eup %22192  ;;  %16742 = vmatprep.subr.bf16.mxu1 %v21128_v7  ;;  %v21156_v7 = vld [vmem:[#allocation8 + $0xa0] ss:$24 sps:$4 sm:$0xff]  }
 0x74a   :  { %v22195_v0 = vpop.eup %22194  ;;  %v9065_v22 = vadd.f32 1.0, %v22193_v6  ;;  %v21159_v6 = vld [vmem:[#allocation8 + $0xc38] ss:$24 sps:$4 sm:$0xff]  }
 0x74b   :  { %v22197_v11 = vpop.eup %22196  ;;  %v9066_v1 = vadd.f32 1.0, %v22195_v0  ;;  %v21167_v0 = vld [vmem:[#allocation8 + $0xc6c] ss:$24 sps:$4 sm:$0xff]  }
 0x74c   :  { %v22199_v13 = vpop.eup %22198  ;;  %16743 = vmatpush1.bf16.msra.mxu1 %v21126_v62  ;;  %v9089_v56 = vadd.f32 1.0, %v22197_v11  ;;  %v9113_v30 = vmul.f32 %v9065_v22, %v8729_v15  ;;  %v21161_v62 = vld [vmem:[#allocation8 + $0xc3c] ss:$24 sps:$4 sm:$0xff]   ;;  %v21165_v11 = vld [vmem:[#allocation8 + $0xc68] ss:$24 sps:$4 sm:$0xff]  }
 0x74d   :  { %16744 = vmatprep.subr.bf16.mxu1 %v21134_v63  ;;  %v9090_v20 = vadd.f32 1.0, %v22199_v13  ;;  %v9114_v32 = vmul.f32 %v9066_v1, %v8730_v61  ;;  %v21162_v63 = vld [vmem:[#allocation8 + $0xd0] ss:$24 sps:$4 sm:$0xff]   ;;  %v21170_v22 = vld [vmem:[#allocation8 + $0x104] ss:$24 sps:$4 sm:$0xff]  }
 0x74e   :  { %v9137_v59 = vmul.f32 %v9089_v56, %v8753_v27  ;;  %v21168_v1 = vld [vmem:[#allocation8 + $0x100] ss:$24 sps:$4 sm:$0xff]   ;;  %v21173_v13 = vld [vmem:[#allocation8 + $0xc9c] ss:$24 sps:$4 sm:$0xff]   ;;  %v21179_v56 = vld [vmem:[#allocation8 + $0xccc] ss:$24 sps:$4 sm:$0xff]  }
 0x74f   :  { %v9138_v9 = vmul.f32 %v9090_v20, %v8754_v4  ;;  %v21176_v15 = vld [vmem:[#allocation8 + $0x134] ss:$24 sps:$4 sm:$0xff]   ;;  %v21171_v27 = vld [vmem:[#allocation8 + $0xc98] ss:$24 sps:$4 sm:$0xff]   ;;  %v21182_v61 = vld [vmem:[#allocation8 + $0x164] ss:$24 sps:$4 sm:$0xff]  }
 0x750   :  { %16745 = vmatpush1.bf16.msra.mxu1 %v21132_v31  ;;  %v23167_v19 = vpack.c.bf16 %v9137_v59, %v9113_v30  ;;  %v21174_v31 = vld [vmem:[#allocation8 + $0x130] ss:$24 sps:$4 sm:$0xff]   ;;  %v21180_v20 = vld [vmem:[#allocation8 + $0x160] ss:$24 sps:$4 sm:$0xff]   ;;  %v21188_v30 = vld [vmem:[#allocation8 + $0x194] ss:$24 sps:$4 sm:$0xff]  }
 0x751   :  { %v23169_v10 = vpack.c.bf16 %v9138_v9, %v9114_v32  ;;  %16746 = vmatprep.subr.bf16.mxu1 %v21137_v29  ;;  %v21177_v4 = vld [vmem:[#allocation8 + $0xcc8] ss:$24 sps:$4 sm:$0xff]   ;;  %v21185_v29 = vld [vmem:[#allocation8 + $0xcfc] ss:$24 sps:$4 sm:$0xff]   ;;  %v21183_v59 = vld [vmem:[#allocation8 + $0xcf8] ss:$24 sps:$4 sm:$0xff]  }
 0x752   :  { %v21186_v32 = vld [vmem:[#allocation8 + $0x190] ss:$24 sps:$4 sm:$0xff]   ;;  %v21191_v9 = vld [vmem:[#allocation8 + $0xd2c] ss:$24 sps:$4 sm:$0xff]  }
 0x753   :  { %16580 = vmatprep.mubr.bf16.mxu0 %v23169_v10 }
 0x754   :  { %16581 = vmatmul.mubr.bf16.vlgmr.msra.gmra.mrb[16].mxu0 %v23167_v19  ;;  %16747 = vmatpush1.bf16.msra.mxu1 %v21135_v14  ;;  %v21194_v14 = vld [vmem:[#allocation8 + $0x1c4] ss:$24 sps:$4 sm:$0xff]  }
 0x755   :  { %17108 = vmatpush1.bf16.msra.mxu0 %v21138_v17  ;;  %17139 = vmatprep.mubr.bf16.mxu0 %v22646_v18  ;;  %v21164_v18 = vld [vmem:[#allocation8 + $0xd4] ss:$24 sps:$4 sm:$0xff]   ;;  %v21189_v17 = vld [vmem:[#allocation8 + $0xd28] ss:$24 sps:$4 sm:$0xff]  }
 0x756   :  { %16748 = vmatprep.subr.bf16.mxu1 %v21143_v54  ;;  %17109 = vmatprep.subr.bf16.mxu0 %v21146_v5  ;;  %v21192_v54 = vld [vmem:[#allocation8 + $0x1c0] ss:$24 sps:$4 sm:$0xff]   ;;  %v21197_v5 = vld [vmem:[#allocation8 + $0xd5c] ss:$24 sps:$4 sm:$0xff]  }
 0x758   :  { %16749 = vmatpush1.bf16.msra.mxu1 %v21141_v51  ;;  %v21200_v51 = vld [vmem:[#allocation8 + $0x1f4] ss:$24 sps:$4 sm:$0xff]  }
 0x759   :  { %17110 = vmatpush1.bf16.msra.mxu0 %v21144_v35  ;;  %16750 = vmatprep.subr.bf16.mxu1 %v21149_v41  ;;  %v21195_v35 = vld [vmem:[#allocation8 + $0xd58] ss:$24 sps:$4 sm:$0xff]  }
 0x75a   :  { %17111 = vmatprep.subr.bf16.mxu0 %v21152_v55  ;;  %v21198_v41 = vld [vmem:[#allocation8 + $0x1f0] ss:$24 sps:$4 sm:$0xff]   ;;  %v21203_v55 = vld [vmem:[#allocation8 + $0xd8c] ss:$24 sps:$4 sm:$0xff]  }
 0x75c   :  { %16751 = vmatpush1.bf16.msra.mxu1 %v21147_v37  ;;  %v21206_v37 = vld [vmem:[#allocation8 + $0x224] ss:$24 sps:$4 sm:$0xff]  }
 0x75d   :  { %17112 = vmatpush1.bf16.msra.mxu0 %v21150_v50  ;;  %16763 = vmatprep.subr.bf16.mxu1 %v21155_v8  ;;  %v21201_v50 = vld [vmem:[#allocation8 + $0xd88] ss:$24 sps:$4 sm:$0xff]  }
 0x75e   :  { %17113 = vmatprep.subr.bf16.mxu0 %v21158_v16  ;;  %v21204_v8 = vld [vmem:[#allocation8 + $0x220] ss:$24 sps:$4 sm:$0xff]   ;;  %v21209_v16 = vld [vmem:[#allocation8 + $0xdbc] ss:$24 sps:$4 sm:$0xff]  }
 0x75f   :  { %16753 = vmatmul.mubr.bf16.vlgmr.msra.gmra.mrb[32].mxu1 %v23009_v45 }
 0x760   :  { %16764 = vmatpush1.bf16.msra.mxu1 %v21153_v42  ;;  %16795 = vmatprep.mubr.bf16.mxu1 %v22650_v3  ;;  %v21212_v42 = vld [vmem:[#allocation8 + $0x254] ss:$24 sps:$4 sm:$0xff]  }
 0x761   :  { %17114 = vmatpush1.bf16.msra.mxu0 %v21156_v7  ;;  %16765 = vmatprep.subr.bf16.mxu1 %v21161_v62  ;;  %v21207_v7 = vld [vmem:[#allocation8 + $0xdb8] ss:$24 sps:$4 sm:$0xff]  }
 0x762   :  { %17115 = vmatprep.subr.bf16.mxu0 %v21164_v18  ;;  %v21210_v62 = vld [vmem:[#allocation8 + $0x250] ss:$24 sps:$4 sm:$0xff]   ;;  %v21215_v18 = vld [vmem:[#allocation8 + $0xdec] ss:$24 sps:$4 sm:$0xff]  }
 0x764   :  { %16766 = vmatpush1.bf16.msra.mxu1 %v21159_v6  ;;  %v21218_v6 = vld [vmem:[#allocation8 + $0x284] ss:$24 sps:$4 sm:$0xff]  }
 0x765   :  { %17116 = vmatpush1.bf16.msra.mxu0 %v21162_v63  ;;  %16767 = vmatprep.subr.bf16.mxu1 %v21167_v0  ;;  %v21213_v63 = vld [vmem:[#allocation8 + $0xde8] ss:$24 sps:$4 sm:$0xff]  }
 0x766   :  { %17117 = vmatprep.subr.bf16.mxu0 %v21170_v22  ;;  %v21216_v0 = vld [vmem:[#allocation8 + $0x280] ss:$24 sps:$4 sm:$0xff]   ;;  %v21221_v22 = vld [vmem:[#allocation8 + $0xe1c] ss:$24 sps:$4 sm:$0xff]  }
 0x768   :  { %16768 = vmatpush1.bf16.msra.mxu1 %v21165_v11  ;;  %v21224_v11 = vld [vmem:[#allocation8 + $0x2b4] ss:$24 sps:$4 sm:$0xff]  }
 0x769   :  { %17118 = vmatpush1.bf16.msra.mxu0 %v21168_v1  ;;  %16769 = vmatprep.subr.bf16.mxu1 %v21173_v13  ;;  %v21219_v1 = vld [vmem:[#allocation8 + $0xe18] ss:$24 sps:$4 sm:$0xff]  }
 0x76a   :  { %17119 = vmatprep.subr.bf16.mxu0 %v21176_v15  ;;  %v21222_v13 = vld [vmem:[#allocation8 + $0x2b0] ss:$24 sps:$4 sm:$0xff]   ;;  %v21227_v15 = vld [vmem:[#allocation8 + $0xe4c] ss:$24 sps:$4 sm:$0xff]  }
 0x76c   :  { %16770 = vmatpush1.bf16.msra.mxu1 %v21171_v27  ;;  %v21230_v27 = vld [vmem:[#allocation8 + $0x2e4] ss:$24 sps:$4 sm:$0xff]  }
 0x76d   :  { %17120 = vmatpush1.bf16.msra.mxu0 %v21174_v31  ;;  %16771 = vmatprep.subr.bf16.mxu1 %v21179_v56  ;;  %v21225_v31 = vld [vmem:[#allocation8 + $0xe48] ss:$24 sps:$4 sm:$0xff]  }
 0x76e   :  { %17121 = vmatprep.subr.bf16.mxu0 %v21182_v61  ;;  %v21228_v56 = vld [vmem:[#allocation8 + $0x2e0] ss:$24 sps:$4 sm:$0xff]   ;;  %v21233_v61 = vld [vmem:[#allocation8 + $0xe7c] ss:$24 sps:$4 sm:$0xff]  }
 0x770   :  { %16772 = vmatpush1.bf16.msra.mxu1 %v21177_v4  ;;  %v21236_v4 = vld [vmem:[#allocation8 + $0x314] ss:$24 sps:$4 sm:$0xff]  }
 0x771   :  { %17122 = vmatpush1.bf16.msra.mxu0 %v21180_v20  ;;  %16773 = vmatprep.subr.bf16.mxu1 %v21185_v29  ;;  %v21231_v20 = vld [vmem:[#allocation8 + $0xe78] ss:$24 sps:$4 sm:$0xff]  }
 0x772   :  { %17123 = vmatprep.subr.bf16.mxu0 %v21188_v30  ;;  %v21234_v29 = vld [vmem:[#allocation8 + $0x310] ss:$24 sps:$4 sm:$0xff]   ;;  %v21239_v30 = vld [vmem:[#allocation8 + $0xeac] ss:$24 sps:$4 sm:$0xff]  }
 0x774   :  { %16774 = vmatpush1.bf16.msra.mxu1 %v21183_v59  ;;  %v21242_v59 = vld [vmem:[#allocation8 + $0x344] ss:$24 sps:$4 sm:$0xff]  }
 0x775   :  { %17124 = vmatpush1.bf16.msra.mxu0 %v21186_v32  ;;  %16775 = vmatprep.subr.bf16.mxu1 %v21191_v9  ;;  %v21237_v32 = vld [vmem:[#allocation8 + $0xea8] ss:$24 sps:$4 sm:$0xff]  }
 0x776   :  { %17125 = vmatprep.subr.bf16.mxu0 %v21194_v14  ;;  %v21240_v9 = vld [vmem:[#allocation8 + $0x340] ss:$24 sps:$4 sm:$0xff]   ;;  %v21245_v14 = vld [vmem:[#allocation8 + $0xedc] ss:$24 sps:$4 sm:$0xff]  }
 0x778   :  { %16776 = vmatpush1.bf16.msra.mxu1 %v21189_v17  ;;  %v21248_v17 = vld [vmem:[#allocation8 + $0x374] ss:$24 sps:$4 sm:$0xff]  }
 0x779   :  { %17126 = vmatpush1.bf16.msra.mxu0 %v21192_v54  ;;  %16777 = vmatprep.subr.bf16.mxu1 %v21197_v5  ;;  %v21243_v54 = vld [vmem:[#allocation8 + $0xed8] ss:$24 sps:$4 sm:$0xff]  }
 0x77a   :  { %17127 = vmatprep.subr.bf16.mxu0 %v21200_v51  ;;  %v21246_v5 = vld [vmem:[#allocation8 + $0x370] ss:$24 sps:$4 sm:$0xff]   ;;  %v21251_v51 = vld [vmem:[#allocation8 + $0xf0c] ss:$24 sps:$4 sm:$0xff]  }
 0x77c   :  { %16778 = vmatpush1.bf16.msra.mxu1 %v21195_v35  ;;  %v21254_v35 = vld [vmem:[#allocation8 + $0x3a4] ss:$24 sps:$4 sm:$0xff]  }
 0x77d   :  { %17128 = vmatpush1.bf16.msra.mxu0 %v21198_v41  ;;  %16779 = vmatprep.subr.bf16.mxu1 %v21203_v55  ;;  %v21252_v41 = vld [vmem:[#allocation8 + $0x3a0] ss:$24 sps:$4 sm:$0xff]   ;;  %v21257_v55 = vld [vmem:[#allocation8 + $0xf3c] ss:$24 sps:$4 sm:$0xff]  }
 0x77e   :  { %17129 = vmatprep.subr.bf16.mxu0 %v21206_v37  ;;  %v21255_v37 = vld [vmem:[#allocation8 + $0xf38] ss:$24 sps:$4 sm:$0xff]  }
 0x780   :  { %16780 = vmatpush1.bf16.msra.mxu1 %v21201_v50  ;;  %v21258_v50 = vld [vmem:[#allocation8 + $0x3d0] ss:$24 sps:$4 sm:$0xff]  }
 0x781   :  { %17130 = vmatpush1.bf16.msra.mxu0 %v21204_v8  ;;  %16781 = vmatprep.subr.bf16.mxu1 %v21209_v16  ;;  %v21263_v8 = vld [vmem:[#allocation8 + $0xf6c] ss:$24 sps:$4 sm:$0xff]  }
 0x782   :  { %17131 = vmatprep.subr.bf16.mxu0 %v21212_v42  ;;  %v21266_v16 = vld [vmem:[#allocation8 + $0x404] ss:$24 sps:$4 sm:$0xff]   ;;  %v21261_v42 = vld [vmem:[#allocation8 + $0xf68] ss:$24 sps:$4 sm:$0xff]  }
 0x784   :  { %16782 = vmatpush1.bf16.msra.mxu1 %v21207_v7  ;;  %v21264_v7 = vld [vmem:[#allocation8 + $0x400] ss:$24 sps:$4 sm:$0xff]  }
 0x785   :  { %17132 = vmatpush1.bf16.msra.mxu0 %v21210_v62  ;;  %16783 = vmatprep.subr.bf16.mxu1 %v21215_v18  ;;  %v21269_v62 = vld [vmem:[#allocation8 + $0xf9c] ss:$24 sps:$4 sm:$0xff]  }
 0x786   :  { %17133 = vmatprep.subr.bf16.mxu0 %v21218_v6  ;;  %v21272_v18 = vld [vmem:[#allocation8 + $0x434] ss:$24 sps:$4 sm:$0xff]   ;;  %v21267_v6 = vld [vmem:[#allocation8 + $0xf98] ss:$24 sps:$4 sm:$0xff]  }
 0x788   :  { %16784 = vmatpush1.bf16.msra.mxu1 %v21213_v63  ;;  %v21270_v63 = vld [vmem:[#allocation8 + $0x430] ss:$24 sps:$4 sm:$0xff]  }
 0x789   :  { %17134 = vmatpush1.bf16.msra.mxu0 %v21216_v0  ;;  %16785 = vmatprep.subr.bf16.mxu1 %v21221_v22  ;;  %v21275_v0 = vld [vmem:[#allocation8 + $0xfcc] ss:$24 sps:$4 sm:$0xff]  }
 0x78a   :  { %17135 = vmatprep.subr.bf16.mxu0 %v21224_v11  ;;  %v21278_v22 = vld [vmem:[#allocation8 + $0x464] ss:$24 sps:$4 sm:$0xff]   ;;  %v21273_v11 = vld [vmem:[#allocation8 + $0xfc8] ss:$24 sps:$4 sm:$0xff]  }
 0x78c   :  { %16786 = vmatpush1.bf16.msra.mxu1 %v21219_v1  ;;  %v21276_v1 = vld [vmem:[#allocation8 + $0x460] ss:$24 sps:$4 sm:$0xff]  }
 0x78d   :  { %17136 = vmatpush1.bf16.msra.mxu0 %v21222_v13  ;;  %16787 = vmatprep.subr.bf16.mxu1 %v21227_v15  ;;  %v21281_v13 = vld [vmem:[#allocation8 + $0xffc] ss:$24 sps:$4 sm:$0xff]  }
 0x78e   :  { %17137 = vmatprep.subr.bf16.mxu0 %v21230_v27  ;;  %v21284_v15 = vld [vmem:[#allocation8 + $0x494] ss:$24 sps:$4 sm:$0xff]   ;;  %v21279_v27 = vld [vmem:[#allocation8 + $0xff8] ss:$24 sps:$4 sm:$0xff]  }
 0x790   :  { %16788 = vmatpush1.bf16.msra.mxu1 %v21225_v31  ;;  %v21282_v31 = vld [vmem:[#allocation8 + $0x490] ss:$24 sps:$4 sm:$0xff]  }
 0x791   :  { %17138 = vmatpush1.bf16.msra.mxu0 %v21228_v56  ;;  %16789 = vmatprep.subr.bf16.mxu1 %v21233_v61  ;;  %v21287_v56 = vld [vmem:[#allocation8 + $0x102c] ss:$24 sps:$4 sm:$0xff]  }
 0x792   :  { %17150 = vmatprep.subr.bf16.mxu0 %v21236_v4  ;;  %v21290_v61 = vld [vmem:[#allocation8 + $0x4c4] ss:$24 sps:$4 sm:$0xff]   ;;  %v21285_v4 = vld [vmem:[#allocation8 + $0x1028] ss:$24 sps:$4 sm:$0xff]  }
 0x794   :  { %17140 = vmatmul.mubr.bf16.vlgmr.msra.gmra.mrb[20].mxu0 %v22644_v44  ;;  %16790 = vmatpush1.bf16.msra.mxu1 %v21231_v20  ;;  %v21249_v44 = vld [vmem:[#allocation8 + $0xf08] ss:$24 sps:$4 sm:$0xff]  }
 0x795   :  { %17151 = vmatpush1.bf16.msra.mxu0 %v21234_v29  ;;  %17182 = vmatprep.mubr.bf16.mxu0 %v22820_v36  ;;  %v21260_v36 = vld [vmem:[#allocation8 + $0x3d4] ss:$24 sps:$4 sm:$0xff]   ;;  %v21288_v20 = vld [vmem:[#allocation8 + $0x4c0] ss:$24 sps:$4 sm:$0xff]  }
 0x796   :  { %16791 = vmatprep.subr.bf16.mxu1 %v21239_v30  ;;  %17152 = vmatprep.subr.bf16.mxu0 %v21242_v59  ;;  %v21293_v29 = vld [vmem:[#allocation8 + $0x105c] ss:$24 sps:$4 sm:$0xff]   ;;  %v21291_v59 = vld [vmem:[#allocation8 + $0x1058] ss:$24 sps:$4 sm:$0xff]  }
 0x797   :  { %v21296_v30 = vld [vmem:[#allocation8 + $0x4f4] ss:$24 sps:$4 sm:$0xff]  }
 0x798   :  { %16792 = vmatpush1.bf16.msra.mxu1 %v21237_v32  ;;  %v21294_v32 = vld [vmem:[#allocation8 + $0x4f0] ss:$24 sps:$4 sm:$0xff]  }
 0x799   :  { %17153 = vmatpush1.bf16.msra.mxu0 %v21240_v9  ;;  %16793 = vmatprep.subr.bf16.mxu1 %v21245_v14  ;;  %v21299_v9 = vld [vmem:[#allocation8 + $0x108c] ss:$24 sps:$4 sm:$0xff]  }
 0x79a   :  { %17154 = vmatprep.subr.bf16.mxu0 %v21248_v17  ;;  %v21302_v14 = vld [vmem:[#allocation8 + $0x524] ss:$24 sps:$4 sm:$0xff]   ;;  %v21297_v17 = vld [vmem:[#allocation8 + $0x1088] ss:$24 sps:$4 sm:$0xff]  }
 0x79c   :  { %16794 = vmatpush1.bf16.msra.mxu1 %v21243_v54  ;;  %v21300_v54 = vld [vmem:[#allocation8 + $0x520] ss:$24 sps:$4 sm:$0xff]  }
 0x79d   :  { %17155 = vmatpush1.bf16.msra.mxu0 %v21246_v5  ;;  %16806 = vmatprep.subr.bf16.mxu1 %v21251_v51  ;;  %v21305_v5 = vld [vmem:[#allocation8 + $0x10bc] ss:$24 sps:$4 sm:$0xff]  }
 0x79e   :  { %17156 = vmatprep.subr.bf16.mxu0 %v21254_v35  ;;  %v21308_v51 = vld [vmem:[#allocation8 + $0x554] ss:$24 sps:$4 sm:$0xff]   ;;  %v21303_v35 = vld [vmem:[#allocation8 + $0x10b8] ss:$24 sps:$4 sm:$0xff]  }
 0x79f   :  { %16796 = vmatmul.mubr.bf16.vlgmr.msra.gmra.mrb[32].mxu1 %v22648_v57 }
 0x7a0   :  { %16807 = vmatpush1.bf16.msra.mxu1 %v21249_v44  ;;  %16838 = vmatprep.mubr.bf16.mxu1 %v23076_v39  ;;  %v21306_v44 = vld [vmem:[#allocation8 + $0x550] ss:$24 sps:$4 sm:$0xff]  }
 0x7a1   :  { %17157 = vmatpush1.bf16.msra.mxu0 %v21252_v41  ;;  %16808 = vmatprep.subr.bf16.mxu1 %v21257_v55  ;;  %v21311_v41 = vld [vmem:[#allocation8 + $0x10ec] ss:$24 sps:$4 sm:$0xff]  }
 0x7a2   :  { %17158 = vmatprep.subr.bf16.mxu0 %v21260_v36  ;;  %v21314_v55 = vld [vmem:[#allocation8 + $0x584] ss:$24 sps:$4 sm:$0xff]   ;;  %v21309_v36 = vld [vmem:[#allocation8 + $0x10e8] ss:$24 sps:$4 sm:$0xff]  }
 0x7a4   :  { %16809 = vmatpush1.bf16.msra.mxu1 %v21255_v37  ;;  %v21312_v37 = vld [vmem:[#allocation8 + $0x580] ss:$24 sps:$4 sm:$0xff]  }
 0x7a5   :  { %17159 = vmatpush1.bf16.msra.mxu0 %v21258_v50  ;;  %16810 = vmatprep.subr.bf16.mxu1 %v21263_v8  ;;  %v21317_v50 = vld [vmem:[#allocation8 + $0x111c] ss:$24 sps:$4 sm:$0xff]  }
 0x7a6   :  { %17160 = vmatprep.subr.bf16.mxu0 %v21266_v16  ;;  %v21320_v8 = vld [vmem:[#allocation8 + $0x5b4] ss:$24 sps:$4 sm:$0xff]   ;;  %v21315_v16 = vld [vmem:[#allocation8 + $0x1118] ss:$24 sps:$4 sm:$0xff]  }
 0x7a8   :  { %16811 = vmatpush1.bf16.msra.mxu1 %v21261_v42  ;;  %v21318_v42 = vld [vmem:[#allocation8 + $0x5b0] ss:$24 sps:$4 sm:$0xff]  }
 0x7a9   :  { %17161 = vmatpush1.bf16.msra.mxu0 %v21264_v7  ;;  %16812 = vmatprep.subr.bf16.mxu1 %v21269_v62  ;;  %v21323_v7 = vld [vmem:[#allocation8 + $0x114c] ss:$24 sps:$4 sm:$0xff]  }
 0x7aa   :  { %17162 = vmatprep.subr.bf16.mxu0 %v21272_v18  ;;  %v21326_v62 = vld [vmem:[#allocation8 + $0x5e4] ss:$24 sps:$4 sm:$0xff]   ;;  %v21321_v18 = vld [vmem:[#allocation8 + $0x1148] ss:$24 sps:$4 sm:$0xff]  }
 0x7ac   :  { %16813 = vmatpush1.bf16.msra.mxu1 %v21267_v6  ;;  %v21324_v6 = vld [vmem:[#allocation8 + $0x5e0] ss:$24 sps:$4 sm:$0xff]  }
 0x7ad   :  { %17163 = vmatpush1.bf16.msra.mxu0 %v21270_v63  ;;  %16814 = vmatprep.subr.bf16.mxu1 %v21275_v0  ;;  %v21329_v63 = vld [vmem:[#allocation8 + $0x117c] ss:$24 sps:$4 sm:$0xff]  }
 0x7ae   :  { %17164 = vmatprep.subr.bf16.mxu0 %v21278_v22  ;;  %v21332_v0 = vld [vmem:[#allocation8 + $0x614] ss:$24 sps:$4 sm:$0xff]   ;;  %v21327_v22 = vld [vmem:[#allocation8 + $0x1178] ss:$24 sps:$4 sm:$0xff]  }
 0x7b0   :  { %16815 = vmatpush1.bf16.msra.mxu1 %v21273_v11  ;;  %v21330_v11 = vld [vmem:[#allocation8 + $0x610] ss:$24 sps:$4 sm:$0xff]  }
 0x7b1   :  { %17165 = vmatpush1.bf16.msra.mxu0 %v21276_v1  ;;  %16816 = vmatprep.subr.bf16.mxu1 %v21281_v13  ;;  %v21335_v1 = vld [vmem:[#allocation8 + $0x11ac] ss:$24 sps:$4 sm:$0xff]  }
 0x7b2   :  { %17166 = vmatprep.subr.bf16.mxu0 %v21284_v15  ;;  %v21338_v13 = vld [vmem:[#allocation8 + $0x644] ss:$24 sps:$4 sm:$0xff]   ;;  %v21333_v15 = vld [vmem:[#allocation8 + $0x11a8] ss:$24 sps:$4 sm:$0xff]  }
 0x7b4   :  { %16817 = vmatpush1.bf16.msra.mxu1 %v21279_v27  ;;  %v21336_v27 = vld [vmem:[#allocation8 + $0x640] ss:$24 sps:$4 sm:$0xff]  }
 0x7b5   :  { %17167 = vmatpush1.bf16.msra.mxu0 %v21282_v31  ;;  %16818 = vmatprep.subr.bf16.mxu1 %v21287_v56  ;;  %v21341_v31 = vld [vmem:[#allocation8 + $0x11dc] ss:$24 sps:$4 sm:$0xff]  }
 0x7b6   :  { %17168 = vmatprep.subr.bf16.mxu0 %v21290_v61  ;;  %v21344_v56 = vld [vmem:[#allocation8 + $0x674] ss:$24 sps:$4 sm:$0xff]   ;;  %v21339_v61 = vld [vmem:[#allocation8 + $0x11d8] ss:$24 sps:$4 sm:$0xff]  }
 0x7b8   :  { %16819 = vmatpush1.bf16.msra.mxu1 %v21285_v4  ;;  %v21342_v4 = vld [vmem:[#allocation8 + $0x670] ss:$24 sps:$4 sm:$0xff]  }
 0x7b9   :  { %17169 = vmatpush1.bf16.msra.mxu0 %v21288_v20  ;;  %16820 = vmatprep.subr.bf16.mxu1 %v21293_v29  ;;  %v21347_v20 = vld [vmem:[#allocation8 + $0x120c] ss:$24 sps:$4 sm:$0xff]  }
 0x7ba   :  { %17170 = vmatprep.subr.bf16.mxu0 %v21296_v30  ;;  %v21350_v29 = vld [vmem:[#allocation8 + $0x6a4] ss:$24 sps:$4 sm:$0xff]   ;;  %v21348_v30 = vld [vmem:[#allocation8 + $0x6a0] ss:$24 sps:$4 sm:$0xff]  }
 0x7bc   :  { %16821 = vmatpush1.bf16.msra.mxu1 %v21291_v59  ;;  %v21353_v59 = vld [vmem:[#allocation8 + $0x123c] ss:$24 sps:$4 sm:$0xff]  }
 0x7bd   :  { %17171 = vmatpush1.bf16.msra.mxu0 %v21294_v32  ;;  %16822 = vmatprep.subr.bf16.mxu1 %v21299_v9  ;;  %v21351_v32 = vld [vmem:[#allocation8 + $0x1238] ss:$24 sps:$4 sm:$0xff]  }
 0x7be   :  { %17172 = vmatprep.subr.bf16.mxu0 %v21302_v14  ;;  %v21354_v9 = vld [vmem:[#allocation8 + $0x6d0] ss:$24 sps:$4 sm:$0xff]   ;;  %v21359_v14 = vld [vmem:[#allocation8 + $0x126c] ss:$24 sps:$4 sm:$0xff]  }
 0x7c0   :  { %16823 = vmatpush1.bf16.msra.mxu1 %v21297_v17  ;;  %v21362_v17 = vld [vmem:[#allocation8 + $0x704] ss:$24 sps:$4 sm:$0xff]  }
 0x7c1   :  { %17173 = vmatpush1.bf16.msra.mxu0 %v21300_v54  ;;  %16824 = vmatprep.subr.bf16.mxu1 %v21305_v5  ;;  %v21357_v54 = vld [vmem:[#allocation8 + $0x1268] ss:$24 sps:$4 sm:$0xff]  }
 0x7c2   :  { %17174 = vmatprep.subr.bf16.mxu0 %v21308_v51  ;;  %v21360_v5 = vld [vmem:[#allocation8 + $0x700] ss:$24 sps:$4 sm:$0xff]   ;;  %v21365_v51 = vld [vmem:[#allocation8 + $0x129c] ss:$24 sps:$4 sm:$0xff]  }
 0x7c4   :  { %16825 = vmatpush1.bf16.msra.mxu1 %v21303_v35  ;;  %v21368_v35 = vld [vmem:[#allocation8 + $0x734] ss:$24 sps:$4 sm:$0xff]  }
 0x7c5   :  { %17175 = vmatpush1.bf16.msra.mxu0 %v21306_v44  ;;  %16826 = vmatprep.subr.bf16.mxu1 %v21311_v41  ;;  %v21363_v44 = vld [vmem:[#allocation8 + $0x1298] ss:$24 sps:$4 sm:$0xff]  }
 0x7c6   :  { %17176 = vmatprep.subr.bf16.mxu0 %v21314_v55  ;;  %v21366_v41 = vld [vmem:[#allocation8 + $0x730] ss:$24 sps:$4 sm:$0xff]   ;;  %v21371_v55 = vld [vmem:[#allocation8 + $0x12cc] ss:$24 sps:$4 sm:$0xff]  }
 0x7c8   :  { %16827 = vmatpush1.bf16.msra.mxu1 %v21309_v36  ;;  %v21374_v36 = vld [vmem:[#allocation8 + $0x764] ss:$24 sps:$4 sm:$0xff]  }
 0x7c9   :  { %17177 = vmatpush1.bf16.msra.mxu0 %v21312_v37  ;;  %16828 = vmatprep.subr.bf16.mxu1 %v21317_v50  ;;  %v21369_v37 = vld [vmem:[#allocation8 + $0x12c8] ss:$24 sps:$4 sm:$0xff]  }
 0x7ca   :  { %17178 = vmatprep.subr.bf16.mxu0 %v21320_v8  ;;  %v21372_v50 = vld [vmem:[#allocation8 + $0x760] ss:$24 sps:$4 sm:$0xff]   ;;  %v21377_v8 = vld [vmem:[#allocation8 + $0x12fc] ss:$24 sps:$4 sm:$0xff]  }
 0x7cc   :  { %16829 = vmatpush1.bf16.msra.mxu1 %v21315_v16  ;;  %v21380_v16 = vld [vmem:[#allocation8 + $0x794] ss:$24 sps:$4 sm:$0xff]  }
 0x7cd   :  { %17179 = vmatpush1.bf16.msra.mxu0 %v21318_v42  ;;  %16830 = vmatprep.subr.bf16.mxu1 %v21323_v7  ;;  %v21375_v42 = vld [vmem:[#allocation8 + $0x12f8] ss:$24 sps:$4 sm:$0xff]  }
 0x7ce   :  { %17180 = vmatprep.subr.bf16.mxu0 %v21326_v62  ;;  %v21378_v7 = vld [vmem:[#allocation8 + $0x790] ss:$24 sps:$4 sm:$0xff]   ;;  %v21383_v62 = vld [vmem:[#allocation8 + $0x132c] ss:$24 sps:$4 sm:$0xff]  }
 0x7d0   :  { %16831 = vmatpush1.bf16.msra.mxu1 %v21321_v18  ;;  %v21386_v18 = vld [vmem:[#allocation8 + $0x7c4] ss:$24 sps:$4 sm:$0xff]  }
 0x7d1   :  { %17181 = vmatpush1.bf16.msra.mxu0 %v21324_v6  ;;  %16832 = vmatprep.subr.bf16.mxu1 %v21329_v63  ;;  %v21381_v6 = vld [vmem:[#allocation8 + $0x1328] ss:$24 sps:$4 sm:$0xff]  }
 0x7d2   :  { %17193 = vmatprep.subr.bf16.mxu0 %v21332_v0  ;;  %v21384_v63 = vld [vmem:[#allocation8 + $0x7c0] ss:$24 sps:$4 sm:$0xff]   ;;  %v21389_v0 = vld [vmem:[#allocation8 + $0x135c] ss:$24 sps:$4 sm:$0xff]  }
 0x7d4   :  { %17183 = vmatmul.mubr.bf16.vlgmr.msra.gmra.mrb[20].mxu0 %v22818_v23  ;;  %16833 = vmatpush1.bf16.msra.mxu1 %v21327_v22  ;;  %v21345_v23 = vld [vmem:[#allocation8 + $0x1208] ss:$24 sps:$4 sm:$0xff]   ;;  %v21392_v22 = vld [vmem:[#allocation8 + $0x7f4] ss:$24 sps:$4 sm:$0xff]  }
 0x7d5   :  { %17194 = vmatpush1.bf16.msra.mxu0 %v21330_v11  ;;  %17225 = vmatprep.mubr.bf16.mxu0 %v22913_v38  ;;  %v21356_v38 = vld [vmem:[#allocation8 + $0x6d4] ss:$24 sps:$4 sm:$0xff]   ;;  %v21387_v11 = vld [vmem:[#allocation8 + $0x1358] ss:$24 sps:$4 sm:$0xff]  }
 0x7d6   :  { %16834 = vmatprep.subr.bf16.mxu1 %v21335_v1  ;;  %17195 = vmatprep.subr.bf16.mxu0 %v21338_v13  ;;  %v21390_v1 = vld [vmem:[#allocation8 + $0x7f0] ss:$24 sps:$4 sm:$0xff]   ;;  %v21395_v13 = vld [vmem:[#allocation8 + $0x138c] ss:$24 sps:$4 sm:$0xff]  }
 0x7d8   :  { %16835 = vmatpush1.bf16.msra.mxu1 %v21333_v15  ;;  %v21398_v15 = vld [vmem:[#allocation8 + $0x824] ss:$24 sps:$4 sm:$0xff]  }
 0x7d9   :  { %17196 = vmatpush1.bf16.msra.mxu0 %v21336_v27  ;;  %16836 = vmatprep.subr.bf16.mxu1 %v21341_v31  ;;  %v21393_v27 = vld [vmem:[#allocation8 + $0x1388] ss:$24 sps:$4 sm:$0xff]  }
 0x7da   :  { %17197 = vmatprep.subr.bf16.mxu0 %v21344_v56  ;;  %v21396_v31 = vld [vmem:[#allocation8 + $0x820] ss:$24 sps:$4 sm:$0xff]   ;;  %v21401_v56 = vld [vmem:[#allocation8 + $0x13bc] ss:$24 sps:$4 sm:$0xff]  }
 0x7dc   :  { %16837 = vmatpush1.bf16.msra.mxu1 %v21339_v61  ;;  %v21404_v61 = vld [vmem:[#allocation8 + $0x854] ss:$24 sps:$4 sm:$0xff]  }
 0x7dd   :  { %17198 = vmatpush1.bf16.msra.mxu0 %v21342_v4  ;;  %16849 = vmatprep.subr.bf16.mxu1 %v21347_v20  ;;  %v21399_v4 = vld [vmem:[#allocation8 + $0x13b8] ss:$24 sps:$4 sm:$0xff]  }
 0x7de   :  { %17199 = vmatprep.subr.bf16.mxu0 %v21350_v29  ;;  %v21402_v20 = vld [vmem:[#allocation8 + $0x850] ss:$24 sps:$4 sm:$0xff]   ;;  %v21407_v29 = vld [vmem:[#allocation8 + $0x13ec] ss:$24 sps:$4 sm:$0xff]  }
 0x7df   :  { %16839 = vmatmul.mubr.bf16.vlgmr.msra.gmra.mrb[32].mxu1 %v23074_v28 }
 0x7e0   :  { %16850 = vmatpush1.bf16.msra.mxu1 %v21345_v23  ;;  %16881 = vmatprep.mubr.bf16.mxu1 %v22824_v21  ;;  %v21410_v23 = vld [vmem:[#allocation8 + $0x884] ss:$24 sps:$4 sm:$0xff]  }
 0x7e1   :  { %17200 = vmatpush1.bf16.msra.mxu0 %v21348_v30  ;;  %16851 = vmatprep.subr.bf16.mxu1 %v21353_v59  ;;  %v21405_v30 = vld [vmem:[#allocation8 + $0x13e8] ss:$24 sps:$4 sm:$0xff]  }
 0x7e2   :  { %17201 = vmatprep.subr.bf16.mxu0 %v21356_v38  ;;  %v21408_v59 = vld [vmem:[#allocation8 + $0x880] ss:$24 sps:$4 sm:$0xff]   ;;  %v21413_v38 = vld [vmem:[#allocation8 + $0x141c] ss:$24 sps:$4 sm:$0xff]  }
 0x7e4   :  { %16852 = vmatpush1.bf16.msra.mxu1 %v21351_v32  ;;  %v21416_v32 = vld [vmem:[#allocation8 + $0x8b4] ss:$24 sps:$4 sm:$0xff]  }
 0x7e5   :  { %17202 = vmatpush1.bf16.msra.mxu0 %v21354_v9  ;;  %16853 = vmatprep.subr.bf16.mxu1 %v21359_v14  ;;  %v21411_v9 = vld [vmem:[#allocation8 + $0x1418] ss:$24 sps:$4 sm:$0xff]  }
 0x7e6   :  { %17203 = vmatprep.subr.bf16.mxu0 %v21362_v17  ;;  %v21414_v14 = vld [vmem:[#allocation8 + $0x8b0] ss:$24 sps:$4 sm:$0xff]   ;;  %v21419_v17 = vld [vmem:[#allocation8 + $0x144c] ss:$24 sps:$4 sm:$0xff]  }
 0x7e8   :  { %16854 = vmatpush1.bf16.msra.mxu1 %v21357_v54  ;;  %v21422_v54 = vld [vmem:[#allocation8 + $0x8e4] ss:$24 sps:$4 sm:$0xff]  }
 0x7e9   :  { %17204 = vmatpush1.bf16.msra.mxu0 %v21360_v5  ;;  %16855 = vmatprep.subr.bf16.mxu1 %v21365_v51  ;;  %v21417_v5 = vld [vmem:[#allocation8 + $0x1448] ss:$24 sps:$4 sm:$0xff]  }
 0x7ea   :  { %17205 = vmatprep.subr.bf16.mxu0 %v21368_v35  ;;  %v21420_v51 = vld [vmem:[#allocation8 + $0x8e0] ss:$24 sps:$4 sm:$0xff]   ;;  %v21425_v35 = vld [vmem:[#allocation8 + $0x147c] ss:$24 sps:$4 sm:$0xff]  }
 0x7ec   :  { %16856 = vmatpush1.bf16.msra.mxu1 %v21363_v44  ;;  %v21428_v44 = vld [vmem:[#allocation8 + $0x914] ss:$24 sps:$4 sm:$0xff]  }
 0x7ed   :  { %17206 = vmatpush1.bf16.msra.mxu0 %v21366_v41  ;;  %16857 = vmatprep.subr.bf16.mxu1 %v21371_v55  ;;  %v21423_v41 = vld [vmem:[#allocation8 + $0x1478] ss:$24 sps:$4 sm:$0xff]  }
 0x7ee   :  { %17207 = vmatprep.subr.bf16.mxu0 %v21374_v36  ;;  %v21426_v55 = vld [vmem:[#allocation8 + $0x910] ss:$24 sps:$4 sm:$0xff]   ;;  %v21431_v36 = vld [vmem:[#allocation8 + $0x14ac] ss:$24 sps:$4 sm:$0xff]  }
 0x7f0   :  { %16858 = vmatpush1.bf16.msra.mxu1 %v21369_v37  ;;  %v21434_v37 = vld [vmem:[#allocation8 + $0x944] ss:$24 sps:$4 sm:$0xff]  }
 0x7f1   :  { %17208 = vmatpush1.bf16.msra.mxu0 %v21372_v50  ;;  %16859 = vmatprep.subr.bf16.mxu1 %v21377_v8  ;;  %v21429_v50 = vld [vmem:[#allocation8 + $0x14a8] ss:$24 sps:$4 sm:$0xff]  }
 0x7f2   :  { %17209 = vmatprep.subr.bf16.mxu0 %v21380_v16  ;;  %v21432_v8 = vld [vmem:[#allocation8 + $0x940] ss:$24 sps:$4 sm:$0xff]   ;;  %v21437_v16 = vld [vmem:[#allocation8 + $0x14dc] ss:$24 sps:$4 sm:$0xff]  }
 0x7f4   :  { %16860 = vmatpush1.bf16.msra.mxu1 %v21375_v42  ;;  %v21440_v42 = vld [vmem:[#allocation8 + $0x974] ss:$24 sps:$4 sm:$0xff]  }
 0x7f5   :  { %17210 = vmatpush1.bf16.msra.mxu0 %v21378_v7  ;;  %16861 = vmatprep.subr.bf16.mxu1 %v21383_v62  ;;  %v21435_v7 = vld [vmem:[#allocation8 + $0x14d8] ss:$24 sps:$4 sm:$0xff]  }
 0x7f6   :  { %17211 = vmatprep.subr.bf16.mxu0 %v21386_v18  ;;  %v21438_v62 = vld [vmem:[#allocation8 + $0x970] ss:$24 sps:$4 sm:$0xff]   ;;  %v21443_v18 = vld [vmem:[#allocation8 + $0x150c] ss:$24 sps:$4 sm:$0xff]  }
 0x7f8   :  { %16862 = vmatpush1.bf16.msra.mxu1 %v21381_v6  ;;  %v21446_v6 = vld [vmem:[#allocation8 + $0x9a4] ss:$24 sps:$4 sm:$0xff]  }
 0x7f9   :  { %17212 = vmatpush1.bf16.msra.mxu0 %v21384_v63  ;;  %16863 = vmatprep.subr.bf16.mxu1 %v21389_v0  ;;  %v21444_v63 = vld [vmem:[#allocation8 + $0x9a0] ss:$24 sps:$4 sm:$0xff]   ;;  %v21449_v0 = vld [vmem:[#allocation8 + $0x153c] ss:$24 sps:$4 sm:$0xff]  }
 0x7fa   :  { %17213 = vmatprep.subr.bf16.mxu0 %v21392_v22  ;;  %v21447_v22 = vld [vmem:[#allocation8 + $0x1538] ss:$24 sps:$4 sm:$0xff]  }
 0x7fc   :  { %16864 = vmatpush1.bf16.msra.mxu1 %v21387_v11  ;;  %v21450_v11 = vld [vmem:[#allocation8 + $0x9d0] ss:$24 sps:$4 sm:$0xff]  }
 0x7fd   :  { %17214 = vmatpush1.bf16.msra.mxu0 %v21390_v1  ;;  %16865 = vmatprep.subr.bf16.mxu1 %v21395_v13  ;;  %v17694_v1 = vld [vmem:[#allocation10] sm:$0x3f] }
 0x7fe   :  { %17215 = vmatprep.subr.bf16.mxu0 %v21398_v15  ;;  %v21455_v13 = vld [vmem:[#allocation8 + $0x156c] ss:$24 sps:$4 sm:$0xff]  }
 0x7ff   :  { %v21458_v15 = vld [vmem:[#allocation8 + $0xa04] ss:$24 sps:$4 sm:$0xff]  }
 0x800   :  { %16866 = vmatpush1.bf16.msra.mxu1 %v21393_v27  ;;  %v17699_v27 = vrot.slane %v17694_v1, %v22489_v58  ;;  %v21467_v58 = vld [vmem:[#allocation8 + $0x15cc] ss:$24 sps:$4 sm:$0xff]  }
 0x801   :  { %17216 = vmatpush1.bf16.msra.mxu0 %v21396_v31  ;;  %16867 = vmatprep.subr.bf16.mxu1 %v21401_v56  ;;  %v21453_v31 = vld [vmem:[#allocation8 + $0x1568] ss:$24 sps:$4 sm:$0xff]  }
 0x802   :  { %17217 = vmatprep.subr.bf16.mxu0 %v21404_v61  ;;  %v21456_v56 = vld [vmem:[#allocation8 + $0xa00] ss:$24 sps:$4 sm:$0xff]   ;;  %v17703_v61 = vrot.slane %v17694_v1, %v22492_v60  ;;  %v21503_v1 = vld [vmem:[#allocation8 + $0x16ec] ss:$24 sps:$4 sm:$0xff]  }
 0x804   :  { %16868 = vmatpush1.bf16.msra.mxu1 %v21399_v4  ;;  %v21461_v4 = vld [vmem:[#allocation8 + $0x159c] ss:$24 sps:$4 sm:$0xff]  }
 0x805   :  { %17218 = vmatpush1.bf16.msra.mxu0 %v21402_v20  ;;  %16869 = vmatprep.subr.bf16.mxu1 %v21407_v29  ;;  %v21464_v20 = vld [vmem:[#allocation8 + $0xa34] ss:$24 sps:$4 sm:$0xff]  }
 0x806   :  { %17219 = vmatprep.subr.bf16.mxu0 %v21410_v23 }
 0x808   :  { %16870 = vmatpush1.bf16.msra.mxu1 %v21405_v30 }
 0x809   :  { %17220 = vmatpush1.bf16.msra.mxu0 %v21408_v59  ;;  %16871 = vmatprep.subr.bf16.mxu1 %v21413_v38  ;;  %v21459_v59 = vld [vmem:[#allocation8 + $0x1598] ss:$24 sps:$4 sm:$0xff]  }
 0x80a   :  { %17221 = vmatprep.subr.bf16.mxu0 %v21416_v32 }
 0x80c   :  { %16872 = vmatpush1.bf16.msra.mxu1 %v21411_v9  ;;  %v21462_v9 = vld [vmem:[#allocation8 + $0xa30] ss:$24 sps:$4 sm:$0xff]  }
 0x80d   :  { %17222 = vmatpush1.bf16.msra.mxu0 %v21414_v14  ;;  %16873 = vmatprep.subr.bf16.mxu1 %v21419_v17 }
 0x80e   :  { %17223 = vmatprep.subr.bf16.mxu0 %v21422_v54  ;;  %v21470_v54 = vld [vmem:[#allocation8 + $0xa64] ss:$24 sps:$4 sm:$0xff]  }
 0x810   :  { %16874 = vmatpush1.bf16.msra.mxu1 %v21417_v5  ;;  %v21465_v5 = vld [vmem:[#allocation8 + $0x15c8] ss:$24 sps:$4 sm:$0xff]  }
 0x811   :  { %17224 = vmatpush1.bf16.msra.mxu0 %v21420_v51  ;;  %16875 = vmatprep.subr.bf16.mxu1 %v21425_v35  ;;  %v21468_v51 = vld [vmem:[#allocation8 + $0xa60] ss:$24 sps:$4 sm:$0xff]   ;;  %v21473_v35 = vld [vmem:[#allocation8 + $0x15fc] ss:$24 sps:$4 sm:$0xff]  }
 0x812   :  { %17236 = vmatprep.subr.bf16.mxu0 %v21428_v44  ;;  %v21476_v44 = vld [vmem:[#allocation8 + $0xa94] ss:$24 sps:$4 sm:$0xff]  }
 0x814   :  { %17226 = vmatmul.mubr.bf16.vlgmr.msra.gmra.mrb[20].mxu0 %v22911_v52  ;;  %16876 = vmatpush1.bf16.msra.mxu1 %v21423_v41  ;;  %v21441_v52 = vld [vmem:[#allocation8 + $0x1508] ss:$24 sps:$4 sm:$0xff]   ;;  %v21471_v41 = vld [vmem:[#allocation8 + $0x15f8] ss:$24 sps:$4 sm:$0xff]  }
 0x815   :  { %17237 = vmatpush1.bf16.msra.mxu0 %v21426_v55  ;;  %17268 = vmatprep.mubr.bf16.mxu0 %v23012_v49  ;;  %v21452_v49 = vld [vmem:[#allocation8 + $0x9d4] ss:$24 sps:$4 sm:$0xff]   ;;  %v21474_v55 = vld [vmem:[#allocation8 + $0xa90] ss:$24 sps:$4 sm:$0xff]  }
 0x816   :  { %16877 = vmatprep.subr.bf16.mxu1 %v21431_v36  ;;  %17238 = vmatprep.subr.bf16.mxu0 %v21434_v37  ;;  %v21479_v36 = vld [vmem:[#allocation8 + $0x162c] ss:$24 sps:$4 sm:$0xff]  }
 0x817   :  { %v21482_v37 = vld [vmem:[#allocation8 + $0xac4] ss:$24 sps:$4 sm:$0xff]  }
 0x818   :  { %16878 = vmatpush1.bf16.msra.mxu1 %v21429_v50  ;;  %v21477_v50 = vld [vmem:[#allocation8 + $0x1628] ss:$24 sps:$4 sm:$0xff]  }
 0x819   :  { %17239 = vmatpush1.bf16.msra.mxu0 %v21432_v8  ;;  %16879 = vmatprep.subr.bf16.mxu1 %v21437_v16  ;;  %v21480_v8 = vld [vmem:[#allocation8 + $0xac0] ss:$24 sps:$4 sm:$0xff]   ;;  %v21485_v16 = vld [vmem:[#allocation8 + $0x165c] ss:$24 sps:$4 sm:$0xff]  }
 0x81a   :  { %17240 = vmatprep.subr.bf16.mxu0 %v21440_v42  ;;  %v21488_v42 = vld [vmem:[#allocation8 + $0xaf4] ss:$24 sps:$4 sm:$0xff]  }
 0x81c   :  { %16880 = vmatpush1.bf16.msra.mxu1 %v21435_v7  ;;  %v21483_v7 = vld [vmem:[#allocation8 + $0x1658] ss:$24 sps:$4 sm:$0xff]  }
 0x81d   :  { %17241 = vmatpush1.bf16.msra.mxu0 %v21438_v62  ;;  %16892 = vmatprep.subr.bf16.mxu1 %v21443_v18  ;;  %v21486_v62 = vld [vmem:[#allocation8 + $0xaf0] ss:$24 sps:$4 sm:$0xff]   ;;  %v21491_v18 = vld [vmem:[#allocation8 + $0x168c] ss:$24 sps:$4 sm:$0xff]  }
 0x81e   :  { %17242 = vmatprep.subr.bf16.mxu0 %v21446_v6  ;;  %v21494_v6 = vld [vmem:[#allocation8 + $0xb24] ss:$24 sps:$4 sm:$0xff]  }
 0x81f   :  { %16882 = vmatmul.mubr.bf16.vlgmr.msra.gmra.mrb[32].mxu1 %v22822_v43 }
 0x820   :  { %16893 = vmatpush1.bf16.msra.mxu1 %v21441_v52  ;;  %16924 = vmatprep.mubr.bf16.mxu1 %v23122_v47  ;;  %v21489_v52 = vld [vmem:[#allocation8 + $0x1688] ss:$24 sps:$4 sm:$0xff]  }
 0x821   :  { %17243 = vmatpush1.bf16.msra.mxu0 %v21444_v63  ;;  %16894 = vmatprep.subr.bf16.mxu1 %v21449_v0  ;;  %v21492_v63 = vld [vmem:[#allocation8 + $0xb20] ss:$24 sps:$4 sm:$0xff]   ;;  %v21497_v0 = vld [vmem:[#allocation8 + $0x16bc] ss:$24 sps:$4 sm:$0xff]  }
 0x822   :  { %17244 = vmatprep.subr.bf16.mxu0 %v21452_v49  ;;  %v21500_v49 = vld [vmem:[#allocation8 + $0xb54] ss:$24 sps:$4 sm:$0xff]  }
 0x824   :  { %16895 = vmatpush1.bf16.msra.mxu1 %v21447_v22  ;;  %v21495_v22 = vld [vmem:[#allocation8 + $0x16b8] ss:$24 sps:$4 sm:$0xff]  }
 0x825   :  { %17245 = vmatpush1.bf16.msra.mxu0 %v21450_v11  ;;  %16896 = vmatprep.subr.bf16.mxu1 %v21455_v13  ;;  %v21498_v11 = vld [vmem:[#allocation8 + $0xb50] ss:$24 sps:$4 sm:$0xff]   ;;  %v21506_v13 = vld [vmem:[#allocation8 + $0xb84] ss:$24 sps:$4 sm:$0xff]  }
 0x826   :  { %17246 = vmatprep.subr.bf16.mxu0 %v21458_v15  ;;  %v21501_v15 = vld [vmem:[#allocation8 + $0x16e8] ss:$24 sps:$4 sm:$0xff]  }
 0x827   :  { %v16582_v29 = vpop.f32.mrb[16].mxu0 }
 0x828   :  { %v17726_v23 = vadd.f32 %v17699_v27, %v16582_v29  ;;  %v16584_v30 = vpop.f32.mrb[17].mxu0  ;;  %16897 = vmatpush1.bf16.msra.mxu1 %v21453_v31  ;;  %v21509_v31 = vld [vmem:[#allocation8 + $0x171c] ss:$24 sps:$4 sm:$0xff]  }
 0x829   :  { %v17727_v38 = vadd.f32 %v17703_v61, %v16584_v30  ;;  %17247 = vmatpush1.bf16.msra.mxu0 %v21456_v56  ;;  %v16586_v32 = vpop.f32.mrb[18].mxu0  ;;  %16898 = vmatprep.subr.bf16.mxu1 %v21461_v4  ;;  %v21512_v56 = vld [vmem:[#allocation8 + $0xbb4] ss:$24 sps:$4 sm:$0xff]   ;;  %v21510_v4 = vld [vmem:[#allocation8 + $0xbb0] ss:$24 sps:$4 sm:$0xff]  }
 0x82a   :  { %17738 = vst [vmem:[#allocation11] sm:$0xff] %v17726_v23  ;;  %v17732_v14 = vadd.f32 %v17699_v27, %v16586_v32  ;;  %v16588_v17 = vpop.f32.mrb[19].mxu0  ;;  %17248 = vmatprep.subr.bf16.mxu0 %v21464_v20  ;;  %v21504_v27 = vld [vmem:[#allocation8 + $0xb80] ss:$24 sps:$4 sm:$0xff]   ;;  %v21515_v20 = vld [vmem:[#allocation8 + $0x174c] ss:$24 sps:$4 sm:$0xff]  }
 0x82b   :  { %17739 = vst [vmem:[#allocation11 + $0x8] sm:$0xff] %v17727_v38  ;;  %v17733_v60 = vadd.f32 %v17703_v61, %v16588_v17  ;;  %v21507_v61 = vld [vmem:[#allocation8 + $0x1718] ss:$24 sps:$4 sm:$0xff]   ;;  %v21518_v29 = vld [vmem:[#allocation8 + $0xbe4] ss:$24 sps:$4 sm:$0xff]  }
 0x82c   :  { %17744 = vst [vmem:[#allocation11 + $0x30] sm:$0xff] %v17732_v14  ;;  %16899 = vmatpush1.bf16.msra.mxu1 %v21459_v59  ;;  %v21513_v23 = vld [vmem:[#allocation8 + $0x1748] ss:$24 sps:$4 sm:$0xff]   ;;  %v21521_v59 = vld [vmem:[#allocation8 + $0x177c] ss:$24 sps:$4 sm:$0xff]  }
 0x82d   :  { %17745 = vst [vmem:[#allocation11 + $0x38] sm:$0xff] %v17733_v60  ;;  %17249 = vmatpush1.bf16.msra.mxu0 %v21462_v9  ;;  %16900 = vmatprep.subr.bf16.mxu1 %v21467_v58  ;;  %v21516_v30 = vld [vmem:[#allocation8 + $0xbe0] ss:$24 sps:$4 sm:$0xff]   ;;  %v21524_v38 = vld [vmem:[#allocation8 + $0xc14] ss:$24 sps:$4 sm:$0xff]  }
 0x82e   :  { %17250 = vmatprep.subr.bf16.mxu0 %v21470_v54  ;;  %v21519_v32 = vld [vmem:[#allocation8 + $0x1778] ss:$24 sps:$4 sm:$0xff]   ;;  %v21527_v58 = vld [vmem:[#allocation8 + $0x17ac] ss:$24 sps:$4 sm:$0xff]   ;;  %v21525_v17 = vld [vmem:[#allocation8 + $0x17a8] ss:$24 sps:$4 sm:$0xff]  }
 0x82f   :  { %v21522_v9 = vld [vmem:[#allocation8 + $0xc10] ss:$24 sps:$4 sm:$0xff]   ;;  %v21530_v14 = vld [vmem:[#allocation8 + $0xc44] ss:$24 sps:$4 sm:$0xff]   ;;  %v21528_v54 = vld [vmem:[#allocation8 + $0xc40] ss:$24 sps:$4 sm:$0xff]  }
 0x830   :  { %16901 = vmatpush1.bf16.msra.mxu1 %v21465_v5  ;;  %v21533_v60 = vld [vmem:[#allocation8 + $0x17dc] ss:$24 sps:$4 sm:$0xff]  }
 0x831   :  { %17251 = vmatpush1.bf16.msra.mxu0 %v21468_v51  ;;  %16902 = vmatprep.subr.bf16.mxu1 %v21473_v35  ;;  %v21536_v5 = vld [vmem:[#allocation8 + $0xc74] ss:$24 sps:$4 sm:$0xff]   ;;  %v21531_v51 = vld [vmem:[#allocation8 + $0x17d8] ss:$24 sps:$4 sm:$0xff]  }
 0x832   :  { %17252 = vmatprep.subr.bf16.mxu0 %v21476_v44  ;;  %v21534_v35 = vld [vmem:[#allocation8 + $0xc70] ss:$24 sps:$4 sm:$0xff]   ;;  %v21539_v44 = vld [vmem:[#allocation8 + $0x180c] ss:$24 sps:$4 sm:$0xff]  }
 0x834   :  { %16903 = vmatpush1.bf16.msra.mxu1 %v21471_v41  ;;  %v21542_v41 = vld [vmem:[#allocation8 + $0xca4] ss:$24 sps:$4 sm:$0xff]  }
 0x835   :  { %17253 = vmatpush1.bf16.msra.mxu0 %v21474_v55  ;;  %16904 = vmatprep.subr.bf16.mxu1 %v21479_v36  ;;  %v21540_v55 = vld [vmem:[#allocation8 + $0xca0] ss:$24 sps:$4 sm:$0xff]   ;;  %v21545_v36 = vld [vmem:[#allocation8 + $0x183c] ss:$24 sps:$4 sm:$0xff]  }
 0x836   :  { %17254 = vmatprep.subr.bf16.mxu0 %v21482_v37  ;;  %v21543_v37 = vld [vmem:[#allocation8 + $0x1838] ss:$24 sps:$4 sm:$0xff]  }
 0x838   :  { %16905 = vmatpush1.bf16.msra.mxu1 %v21477_v50  ;;  %v21546_v50 = vld [vmem:[#allocation8 + $0xcd0] ss:$24 sps:$4 sm:$0xff]  }
 0x839   :  { %17255 = vmatpush1.bf16.msra.mxu0 %v21480_v8  ;;  %16906 = vmatprep.subr.bf16.mxu1 %v21485_v16  ;;  %v21551_v8 = vld [vmem:[#allocation8 + $0x186c] ss:$24 sps:$4 sm:$0xff]  }
 0x83a   :  { %17256 = vmatprep.subr.bf16.mxu0 %v21488_v42  ;;  %v21554_v16 = vld [vmem:[#allocation8 + $0xd04] ss:$24 sps:$4 sm:$0xff]   ;;  %v21549_v42 = vld [vmem:[#allocation8 + $0x1868] ss:$24 sps:$4 sm:$0xff]  }
 0x83c   :  { %16907 = vmatpush1.bf16.msra.mxu1 %v21483_v7  ;;  %v21552_v7 = vld [vmem:[#allocation8 + $0xd00] ss:$24 sps:$4 sm:$0xff]  }
 0x83d   :  { %17257 = vmatpush1.bf16.msra.mxu0 %v21486_v62  ;;  %16908 = vmatprep.subr.bf16.mxu1 %v21491_v18  ;;  %v21557_v62 = vld [vmem:[#allocation8 + $0x189c] ss:$24 sps:$4 sm:$0xff]  }
 0x83e   :  { %17258 = vmatprep.subr.bf16.mxu0 %v21494_v6  ;;  %v21560_v18 = vld [vmem:[#allocation8 + $0xd34] ss:$24 sps:$4 sm:$0xff]   ;;  %v21555_v6 = vld [vmem:[#allocation8 + $0x1898] ss:$24 sps:$4 sm:$0xff]  }
 0x840   :  { %16909 = vmatpush1.bf16.msra.mxu1 %v21489_v52  ;;  %v21558_v52 = vld [vmem:[#allocation8 + $0xd30] ss:$24 sps:$4 sm:$0xff]  }
 0x841   :  { %17259 = vmatpush1.bf16.msra.mxu0 %v21492_v63  ;;  %16910 = vmatprep.subr.bf16.mxu1 %v21497_v0  ;;  %v21563_v63 = vld [vmem:[#allocation8 + $0x18cc] ss:$24 sps:$4 sm:$0xff]  }
 0x842   :  { %17260 = vmatprep.subr.bf16.mxu0 %v21500_v49  ;;  %v21566_v0 = vld [vmem:[#allocation8 + $0xd64] ss:$24 sps:$4 sm:$0xff]   ;;  %v21561_v49 = vld [vmem:[#allocation8 + $0x18c8] ss:$24 sps:$4 sm:$0xff]  }
 0x844   :  { %16911 = vmatpush1.bf16.msra.mxu1 %v21495_v22  ;;  %v21564_v22 = vld [vmem:[#allocation8 + $0xd60] ss:$24 sps:$4 sm:$0xff]  }
 0x845   :  { %17261 = vmatpush1.bf16.msra.mxu0 %v21498_v11  ;;  %16912 = vmatprep.subr.bf16.mxu1 %v21503_v1  ;;  %v21569_v11 = vld [vmem:[#allocation8 + $0x18fc] ss:$24 sps:$4 sm:$0xff]  }
 0x846   :  { %17262 = vmatprep.subr.bf16.mxu0 %v21506_v13  ;;  %v21572_v1 = vld [vmem:[#allocation8 + $0xd94] ss:$24 sps:$4 sm:$0xff]   ;;  %v21567_v13 = vld [vmem:[#allocation8 + $0x18f8] ss:$24 sps:$4 sm:$0xff]  }
 0x848   :  { %16913 = vmatpush1.bf16.msra.mxu1 %v21501_v15  ;;  %v21570_v15 = vld [vmem:[#allocation8 + $0xd90] ss:$24 sps:$4 sm:$0xff]  }
 0x849   :  { %17263 = vmatpush1.bf16.msra.mxu0 %v21504_v27  ;;  %16914 = vmatprep.subr.bf16.mxu1 %v21509_v31  ;;  %v21575_v27 = vld [vmem:[#allocation8 + $0x192c] ss:$24 sps:$4 sm:$0xff]  }
 0x84a   :  { %17264 = vmatprep.subr.bf16.mxu0 %v21512_v56  ;;  %v21578_v31 = vld [vmem:[#allocation8 + $0xdc4] ss:$24 sps:$4 sm:$0xff]   ;;  %v21573_v56 = vld [vmem:[#allocation8 + $0x1928] ss:$24 sps:$4 sm:$0xff]  }
 0x84c   :  { %16915 = vmatpush1.bf16.msra.mxu1 %v21507_v61  ;;  %v21576_v61 = vld [vmem:[#allocation8 + $0xdc0] ss:$24 sps:$4 sm:$0xff]  }
 0x84d   :  { %17265 = vmatpush1.bf16.msra.mxu0 %v21510_v4  ;;  %16916 = vmatprep.subr.bf16.mxu1 %v21515_v20  ;;  %v21581_v4 = vld [vmem:[#allocation8 + $0x195c] ss:$24 sps:$4 sm:$0xff]  }
 0x84e   :  { %17266 = vmatprep.subr.bf16.mxu0 %v21518_v29  ;;  %v21584_v20 = vld [vmem:[#allocation8 + $0xdf4] ss:$24 sps:$4 sm:$0xff]   ;;  %v21579_v29 = vld [vmem:[#allocation8 + $0x1958] ss:$24 sps:$4 sm:$0xff]  }
 0x850   :  { %16917 = vmatpush1.bf16.msra.mxu1 %v21513_v23  ;;  %v21582_v23 = vld [vmem:[#allocation8 + $0xdf0] ss:$24 sps:$4 sm:$0xff]  }
 0x851   :  { %17267 = vmatpush1.bf16.msra.mxu0 %v21516_v30  ;;  %16918 = vmatprep.subr.bf16.mxu1 %v21521_v59  ;;  %v21587_v30 = vld [vmem:[#allocation8 + $0x198c] ss:$24 sps:$4 sm:$0xff]  }
 0x852   :  { %17279 = vmatprep.subr.bf16.mxu0 %v21524_v38  ;;  %v21590_v59 = vld [vmem:[#allocation8 + $0xe24] ss:$24 sps:$4 sm:$0xff]   ;;  %v21585_v38 = vld [vmem:[#allocation8 + $0x1988] ss:$24 sps:$4 sm:$0xff]  }
 0x854   :  { %17269 = vmatmul.mubr.bf16.vlgmr.msra.gmra.mrb[20].mxu0 %v23009_v45  ;;  %16919 = vmatpush1.bf16.msra.mxu1 %v21519_v32  ;;  %v21537_v45 = vld [vmem:[#allocation8 + $0x1808] ss:$24 sps:$4 sm:$0xff]  }
 0x855   :  { %17280 = vmatpush1.bf16.msra.mxu0 %v21522_v9  ;;  %17311 = vmatprep.mubr.bf16.mxu0 %v22650_v3  ;;  %v21548_v3 = vld [vmem:[#allocation8 + $0xcd4] ss:$24 sps:$4 sm:$0xff]   ;;  %v21588_v32 = vld [vmem:[#allocation8 + $0xe20] ss:$24 sps:$4 sm:$0xff]  }
 0x856   :  { %16920 = vmatprep.subr.bf16.mxu1 %v21527_v58  ;;  %17281 = vmatprep.subr.bf16.mxu0 %v21530_v14  ;;  %v21593_v9 = vld [vmem:[#allocation8 + $0x19bc] ss:$24 sps:$4 sm:$0xff]   ;;  %v21591_v14 = vld [vmem:[#allocation8 + $0x19b8] ss:$24 sps:$4 sm:$0xff]  }
 0x857   :  { %v21596_v58 = vld [vmem:[#allocation8 + $0xe54] ss:$24 sps:$4 sm:$0xff]  }
 0x858   :  { %16921 = vmatpush1.bf16.msra.mxu1 %v21525_v17  ;;  %v21594_v17 = vld [vmem:[#allocation8 + $0xe50] ss:$24 sps:$4 sm:$0xff]  }
 0x859   :  { %17282 = vmatpush1.bf16.msra.mxu0 %v21528_v54  ;;  %16922 = vmatprep.subr.bf16.mxu1 %v21533_v60  ;;  %v21599_v54 = vld [vmem:[#allocation8 + $0x19ec] ss:$24 sps:$4 sm:$0xff]  }
 0x85a   :  { %17283 = vmatprep.subr.bf16.mxu0 %v21536_v5  ;;  %v21602_v60 = vld [vmem:[#allocation8 + $0xe84] ss:$24 sps:$4 sm:$0xff]   ;;  %v21597_v5 = vld [vmem:[#allocation8 + $0x19e8] ss:$24 sps:$4 sm:$0xff]  }
 0x85c   :  { %16923 = vmatpush1.bf16.msra.mxu1 %v21531_v51  ;;  %v21600_v51 = vld [vmem:[#allocation8 + $0xe80] ss:$24 sps:$4 sm:$0xff]  }
 0x85d   :  { %17284 = vmatpush1.bf16.msra.mxu0 %v21534_v35  ;;  %16935 = vmatprep.subr.bf16.mxu1 %v21539_v44  ;;  %v21605_v35 = vld [vmem:[#allocation8 + $0x1a1c] ss:$24 sps:$4 sm:$0xff]  }
 0x85e   :  { %17285 = vmatprep.subr.bf16.mxu0 %v21542_v41  ;;  %v21608_v44 = vld [vmem:[#allocation8 + $0xeb4] ss:$24 sps:$4 sm:$0xff]   ;;  %v21603_v41 = vld [vmem:[#allocation8 + $0x1a18] ss:$24 sps:$4 sm:$0xff]  }
 0x85f   :  { %16925 = vmatmul.mubr.bf16.vlgmr.msra.gmra.mrb[32].mxu1 %v23120_v25 }
 0x860   :  { %16936 = vmatpush1.bf16.msra.mxu1 %v21537_v45  ;;  %16967 = vmatprep.mubr.bf16.mxu1 %v22917_v53  ;;  %v21606_v45 = vld [vmem:[#allocation8 + $0xeb0] ss:$24 sps:$4 sm:$0xff]  }
 0x861   :  { %17286 = vmatpush1.bf16.msra.mxu0 %v21540_v55  ;;  %16937 = vmatprep.subr.bf16.mxu1 %v21545_v36  ;;  %v21611_v55 = vld [vmem:[#allocation8 + $0x1a4c] ss:$24 sps:$4 sm:$0xff]  }
 0x862   :  { %17287 = vmatprep.subr.bf16.mxu0 %v21548_v3  ;;  %v21614_v36 = vld [vmem:[#allocation8 + $0xee4] ss:$24 sps:$4 sm:$0xff]   ;;  %v21609_v3 = vld [vmem:[#allocation8 + $0x1a48] ss:$24 sps:$4 sm:$0xff]  }
 0x864   :  { %16938 = vmatpush1.bf16.msra.mxu1 %v21543_v37  ;;  %v21612_v37 = vld [vmem:[#allocation8 + $0xee0] ss:$24 sps:$4 sm:$0xff]  }
 0x865   :  { %17288 = vmatpush1.bf16.msra.mxu0 %v21546_v50  ;;  %16939 = vmatprep.subr.bf16.mxu1 %v21551_v8  ;;  %v21617_v50 = vld [vmem:[#allocation8 + $0x1a7c] ss:$24 sps:$4 sm:$0xff]  }
 0x866   :  { %17289 = vmatprep.subr.bf16.mxu0 %v21554_v16  ;;  %v21620_v8 = vld [vmem:[#allocation8 + $0xf14] ss:$24 sps:$4 sm:$0xff]   ;;  %v21615_v16 = vld [vmem:[#allocation8 + $0x1a78] ss:$24 sps:$4 sm:$0xff]  }
 0x868   :  { %16940 = vmatpush1.bf16.msra.mxu1 %v21549_v42  ;;  %v21618_v42 = vld [vmem:[#allocation8 + $0xf10] ss:$24 sps:$4 sm:$0xff]  }
 0x869   :  { %17290 = vmatpush1.bf16.msra.mxu0 %v21552_v7  ;;  %16941 = vmatprep.subr.bf16.mxu1 %v21557_v62  ;;  %v21623_v7 = vld [vmem:[#allocation8 + $0x1aac] ss:$24 sps:$4 sm:$0xff]  }
 0x86a   :  { %17291 = vmatprep.subr.bf16.mxu0 %v21560_v18  ;;  %v21626_v62 = vld [vmem:[#allocation8 + $0xf44] ss:$24 sps:$4 sm:$0xff]   ;;  %v21621_v18 = vld [vmem:[#allocation8 + $0x1aa8] ss:$24 sps:$4 sm:$0xff]  }
 0x86c   :  { %16942 = vmatpush1.bf16.msra.mxu1 %v21555_v6  ;;  %v21624_v6 = vld [vmem:[#allocation8 + $0xf40] ss:$24 sps:$4 sm:$0xff]  }
 0x86d   :  { %17292 = vmatpush1.bf16.msra.mxu0 %v21558_v52  ;;  %16943 = vmatprep.subr.bf16.mxu1 %v21563_v63  ;;  %v21629_v52 = vld [vmem:[#allocation8 + $0x1adc] ss:$24 sps:$4 sm:$0xff]  }
 0x86e   :  { %17293 = vmatprep.subr.bf16.mxu0 %v21566_v0  ;;  %v21632_v63 = vld [vmem:[#allocation8 + $0xf74] ss:$24 sps:$4 sm:$0xff]   ;;  %v21627_v0 = vld [vmem:[#allocation8 + $0x1ad8] ss:$24 sps:$4 sm:$0xff]  }
 0x870   :  { %16944 = vmatpush1.bf16.msra.mxu1 %v21561_v49  ;;  %v21630_v49 = vld [vmem:[#allocation8 + $0xf70] ss:$24 sps:$4 sm:$0xff]  }
 0x871   :  { %17294 = vmatpush1.bf16.msra.mxu0 %v21564_v22  ;;  %16945 = vmatprep.subr.bf16.mxu1 %v21569_v11  ;;  %v21635_v22 = vld [vmem:[#allocation8 + $0x1b0c] ss:$24 sps:$4 sm:$0xff]  }
 0x872   :  { %17295 = vmatprep.subr.bf16.mxu0 %v21572_v1  ;;  %v21638_v11 = vld [vmem:[#allocation8 + $0xfa4] ss:$24 sps:$4 sm:$0xff]   ;;  %v21636_v1 = vld [vmem:[#allocation8 + $0xfa0] ss:$24 sps:$4 sm:$0xff]  }
 0x874   :  { %16946 = vmatpush1.bf16.msra.mxu1 %v21567_v13  ;;  %v21641_v13 = vld [vmem:[#allocation8 + $0x1b3c] ss:$24 sps:$4 sm:$0xff]  }
 0x875   :  { %17296 = vmatpush1.bf16.msra.mxu0 %v21570_v15  ;;  %16947 = vmatprep.subr.bf16.mxu1 %v21575_v27  ;;  %v21639_v15 = vld [vmem:[#allocation8 + $0x1b38] ss:$24 sps:$4 sm:$0xff]  }
 0x876   :  { %17297 = vmatprep.subr.bf16.mxu0 %v21578_v31  ;;  %v21642_v27 = vld [vmem:[#allocation8 + $0xfd0] ss:$24 sps:$4 sm:$0xff]   ;;  %v21647_v31 = vld [vmem:[#allocation8 + $0x1b6c] ss:$24 sps:$4 sm:$0xff]  }
 0x878   :  { %16948 = vmatpush1.bf16.msra.mxu1 %v21573_v56  ;;  %v21650_v56 = vld [vmem:[#allocation8 + $0x1004] ss:$24 sps:$4 sm:$0xff]  }
 0x879   :  { %17298 = vmatpush1.bf16.msra.mxu0 %v21576_v61  ;;  %16949 = vmatprep.subr.bf16.mxu1 %v21581_v4  ;;  %v21645_v61 = vld [vmem:[#allocation8 + $0x1b68] ss:$24 sps:$4 sm:$0xff]  }
 0x87a   :  { %17299 = vmatprep.subr.bf16.mxu0 %v21584_v20  ;;  %v21648_v4 = vld [vmem:[#allocation8 + $0x1000] ss:$24 sps:$4 sm:$0xff]   ;;  %v21653_v20 = vld [vmem:[#allocation8 + $0x1b9c] ss:$24 sps:$4 sm:$0xff]  }
 0x87c   :  { %16950 = vmatpush1.bf16.msra.mxu1 %v21579_v29  ;;  %v21656_v29 = vld [vmem:[#allocation8 + $0x1034] ss:$24 sps:$4 sm:$0xff]  }
 0x87d   :  { %17300 = vmatpush1.bf16.msra.mxu0 %v21582_v23  ;;  %16951 = vmatprep.subr.bf16.mxu1 %v21587_v30  ;;  %v21651_v23 = vld [vmem:[#allocation8 + $0x1b98] ss:$24 sps:$4 sm:$0xff]  }
 0x87e   :  { %17301 = vmatprep.subr.bf16.mxu0 %v21590_v59  ;;  %v21654_v30 = vld [vmem:[#allocation8 + $0x1030] ss:$24 sps:$4 sm:$0xff]   ;;  %v21659_v59 = vld [vmem:[#allocation8 + $0x1bcc] ss:$24 sps:$4 sm:$0xff]  }
 0x880   :  { %16952 = vmatpush1.bf16.msra.mxu1 %v21585_v38  ;;  %v21662_v38 = vld [vmem:[#allocation8 + $0x1064] ss:$24 sps:$4 sm:$0xff]  }
 0x881   :  { %17302 = vmatpush1.bf16.msra.mxu0 %v21588_v32  ;;  %16953 = vmatprep.subr.bf16.mxu1 %v21593_v9  ;;  %v21657_v32 = vld [vmem:[#allocation8 + $0x1bc8] ss:$24 sps:$4 sm:$0xff]  }
 0x882   :  { %17303 = vmatprep.subr.bf16.mxu0 %v21596_v58  ;;  %v21660_v9 = vld [vmem:[#allocation8 + $0x1060] ss:$24 sps:$4 sm:$0xff]   ;;  %v21665_v58 = vld [vmem:[#allocation8 + $0x1bfc] ss:$24 sps:$4 sm:$0xff]  }
 0x884   :  { %16954 = vmatpush1.bf16.msra.mxu1 %v21591_v14  ;;  %v21668_v14 = vld [vmem:[#allocation8 + $0x1094] ss:$24 sps:$4 sm:$0xff]  }
 0x885   :  { %17304 = vmatpush1.bf16.msra.mxu0 %v21594_v17  ;;  %16955 = vmatprep.subr.bf16.mxu1 %v21599_v54  ;;  %v21663_v17 = vld [vmem:[#allocation8 + $0x1bf8] ss:$24 sps:$4 sm:$0xff]  }
 0x886   :  { %17305 = vmatprep.subr.bf16.mxu0 %v21602_v60  ;;  %v21666_v54 = vld [vmem:[#allocation8 + $0x1090] ss:$24 sps:$4 sm:$0xff]   ;;  %v21671_v60 = vld [vmem:[#allocation8 + $0x1c2c] ss:$24 sps:$4 sm:$0xff]  }
 0x888   :  { %16956 = vmatpush1.bf16.msra.mxu1 %v21597_v5  ;;  %v21674_v5 = vld [vmem:[#allocation8 + $0x10c4] ss:$24 sps:$4 sm:$0xff]  }
 0x889   :  { %17306 = vmatpush1.bf16.msra.mxu0 %v21600_v51  ;;  %16957 = vmatprep.subr.bf16.mxu1 %v21605_v35  ;;  %v21669_v51 = vld [vmem:[#allocation8 + $0x1c28] ss:$24 sps:$4 sm:$0xff]  }
 0x88a   :  { %17307 = vmatprep.subr.bf16.mxu0 %v21608_v44  ;;  %v21672_v35 = vld [vmem:[#allocation8 + $0x10c0] ss:$24 sps:$4 sm:$0xff]   ;;  %v21677_v44 = vld [vmem:[#allocation8 + $0x1c5c] ss:$24 sps:$4 sm:$0xff]  }
 0x88c   :  { %16958 = vmatpush1.bf16.msra.mxu1 %v21603_v41  ;;  %v21680_v41 = vld [vmem:[#allocation8 + $0x10f4] ss:$24 sps:$4 sm:$0xff]  }
 0x88d   :  { %17308 = vmatpush1.bf16.msra.mxu0 %v21606_v45  ;;  %16959 = vmatprep.subr.bf16.mxu1 %v21611_v55  ;;  %v21675_v45 = vld [vmem:[#allocation8 + $0x1c58] ss:$24 sps:$4 sm:$0xff]  }
 0x88e   :  { %17309 = vmatprep.subr.bf16.mxu0 %v21614_v36  ;;  %v21678_v55 = vld [vmem:[#allocation8 + $0x10f0] ss:$24 sps:$4 sm:$0xff]   ;;  %v21683_v36 = vld [vmem:[#allocation8 + $0x1c8c] ss:$24 sps:$4 sm:$0xff]  }
 0x890   :  { %16960 = vmatpush1.bf16.msra.mxu1 %v21609_v3  ;;  %v21686_v3 = vld [vmem:[#allocation8 + $0x1124] ss:$24 sps:$4 sm:$0xff]  }
 0x891   :  { %17310 = vmatpush1.bf16.msra.mxu0 %v21612_v37  ;;  %16961 = vmatprep.subr.bf16.mxu1 %v21617_v50  ;;  %v21681_v37 = vld [vmem:[#allocation8 + $0x1c88] ss:$24 sps:$4 sm:$0xff]  }
 0x892   :  { %17322 = vmatprep.subr.bf16.mxu0 %v21620_v8  ;;  %v21684_v50 = vld [vmem:[#allocation8 + $0x1120] ss:$24 sps:$4 sm:$0xff]   ;;  %v21689_v8 = vld [vmem:[#allocation8 + $0x1cbc] ss:$24 sps:$4 sm:$0xff]  }
 0x894   :  { %17312 = vmatmul.mubr.bf16.vlgmr.msra.gmra.mrb[20].mxu0 %v22648_v57  ;;  %16962 = vmatpush1.bf16.msra.mxu1 %v21615_v16  ;;  %v21633_v57 = vld [vmem:[#allocation8 + $0x1b08] ss:$24 sps:$4 sm:$0xff]   ;;  %v21692_v16 = vld [vmem:[#allocation8 + $0x1154] ss:$24 sps:$4 sm:$0xff]  }
 0x895   :  { %17323 = vmatpush1.bf16.msra.mxu0 %v21618_v42  ;;  %17354 = vmatprep.mubr.bf16.mxu0 %v23076_v39  ;;  %v21644_v39 = vld [vmem:[#allocation8 + $0xfd4] ss:$24 sps:$4 sm:$0xff]   ;;  %v21687_v42 = vld [vmem:[#allocation8 + $0x1cb8] ss:$24 sps:$4 sm:$0xff]  }
 0x896   :  { %16963 = vmatprep.subr.bf16.mxu1 %v21623_v7  ;;  %17324 = vmatprep.subr.bf16.mxu0 %v21626_v62  ;;  %v21690_v7 = vld [vmem:[#allocation8 + $0x1150] ss:$24 sps:$4 sm:$0xff]   ;;  %v21695_v62 = vld [vmem:[#allocation8 + $0x1cec] ss:$24 sps:$4 sm:$0xff]  }
 0x898   :  { %16964 = vmatpush1.bf16.msra.mxu1 %v21621_v18  ;;  %v21698_v18 = vld [vmem:[#allocation8 + $0x1184] ss:$24 sps:$4 sm:$0xff]  }
 0x899   :  { %17325 = vmatpush1.bf16.msra.mxu0 %v21624_v6  ;;  %16965 = vmatprep.subr.bf16.mxu1 %v21629_v52  ;;  %v21693_v6 = vld [vmem:[#allocation8 + $0x1ce8] ss:$24 sps:$4 sm:$0xff]  }
 0x89a   :  { %17326 = vmatprep.subr.bf16.mxu0 %v21632_v63  ;;  %v21696_v52 = vld [vmem:[#allocation8 + $0x1180] ss:$24 sps:$4 sm:$0xff]   ;;  %v21701_v63 = vld [vmem:[#allocation8 + $0x1d1c] ss:$24 sps:$4 sm:$0xff]  }
 0x89c   :  { %16966 = vmatpush1.bf16.msra.mxu1 %v21627_v0  ;;  %v21704_v0 = vld [vmem:[#allocation8 + $0x11b4] ss:$24 sps:$4 sm:$0xff]  }
 0x89d   :  { %17327 = vmatpush1.bf16.msra.mxu0 %v21630_v49  ;;  %16978 = vmatprep.subr.bf16.mxu1 %v21635_v22  ;;  %v21699_v49 = vld [vmem:[#allocation8 + $0x1d18] ss:$24 sps:$4 sm:$0xff]  }
 0x89e   :  { %17328 = vmatprep.subr.bf16.mxu0 %v21638_v11  ;;  %v21702_v22 = vld [vmem:[#allocation8 + $0x11b0] ss:$24 sps:$4 sm:$0xff]   ;;  %v21707_v11 = vld [vmem:[#allocation8 + $0x1d4c] ss:$24 sps:$4 sm:$0xff]  }
 0x89f   :  { %16968 = vmatmul.mubr.bf16.vlgmr.msra.gmra.mrb[32].mxu1 %v22915_v34 }
 0x8a0   :  { %16979 = vmatpush1.bf16.msra.mxu1 %v21633_v57  ;;  %17010 = vmatprep.mubr.bf16.mxu1 %v23144_v48  ;;  %v21710_v57 = vld [vmem:[#allocation8 + $0x11e4] ss:$24 sps:$4 sm:$0xff]  }
 0x8a1   :  { %17329 = vmatpush1.bf16.msra.mxu0 %v21636_v1  ;;  %16980 = vmatprep.subr.bf16.mxu1 %v21641_v13  ;;  %v21705_v1 = vld [vmem:[#allocation8 + $0x1d48] ss:$24 sps:$4 sm:$0xff]  }
 0x8a2   :  { %17330 = vmatprep.subr.bf16.mxu0 %v21644_v39  ;;  %v21708_v13 = vld [vmem:[#allocation8 + $0x11e0] ss:$24 sps:$4 sm:$0xff]   ;;  %v21713_v39 = vld [vmem:[#allocation8 + $0x1d7c] ss:$24 sps:$4 sm:$0xff]  }
 0x8a4   :  { %16981 = vmatpush1.bf16.msra.mxu1 %v21639_v15  ;;  %v21716_v15 = vld [vmem:[#allocation8 + $0x1214] ss:$24 sps:$4 sm:$0xff]  }
 0x8a5   :  { %17331 = vmatpush1.bf16.msra.mxu0 %v21642_v27  ;;  %16982 = vmatprep.subr.bf16.mxu1 %v21647_v31  ;;  %v21711_v27 = vld [vmem:[#allocation8 + $0x1d78] ss:$24 sps:$4 sm:$0xff]  }
 0x8a6   :  { %17332 = vmatprep.subr.bf16.mxu0 %v21650_v56  ;;  %v21714_v31 = vld [vmem:[#allocation8 + $0x1210] ss:$24 sps:$4 sm:$0xff]   ;;  %v21719_v56 = vld [vmem:[#allocation8 + $0x1dac] ss:$24 sps:$4 sm:$0xff]  }
 0x8a8   :  { %16983 = vmatpush1.bf16.msra.mxu1 %v21645_v61  ;;  %v21722_v61 = vld [vmem:[#allocation8 + $0x1244] ss:$24 sps:$4 sm:$0xff]  }
 0x8a9   :  { %17333 = vmatpush1.bf16.msra.mxu0 %v21648_v4  ;;  %16984 = vmatprep.subr.bf16.mxu1 %v21653_v20  ;;  %v21717_v4 = vld [vmem:[#allocation8 + $0x1da8] ss:$24 sps:$4 sm:$0xff]  }
 0x8aa   :  { %17334 = vmatprep.subr.bf16.mxu0 %v21656_v29  ;;  %v21720_v20 = vld [vmem:[#allocation8 + $0x1240] ss:$24 sps:$4 sm:$0xff]   ;;  %v21725_v29 = vld [vmem:[#allocation8 + $0x1ddc] ss:$24 sps:$4 sm:$0xff]  }
 0x8ac   :  { %16985 = vmatpush1.bf16.msra.mxu1 %v21651_v23  ;;  %v21728_v23 = vld [vmem:[#allocation8 + $0x1274] ss:$24 sps:$4 sm:$0xff]  }
 0x8ad   :  { %17335 = vmatpush1.bf16.msra.mxu0 %v21654_v30  ;;  %16986 = vmatprep.subr.bf16.mxu1 %v21659_v59  ;;  %v21723_v30 = vld [vmem:[#allocation8 + $0x1dd8] ss:$24 sps:$4 sm:$0xff]  }
 0x8ae   :  { %17336 = vmatprep.subr.bf16.mxu0 %v21662_v38  ;;  %v21726_v59 = vld [vmem:[#allocation8 + $0x1270] ss:$24 sps:$4 sm:$0xff]   ;;  %v21731_v38 = vld [vmem:[#allocation8 + $0x1e0c] ss:$24 sps:$4 sm:$0xff]  }
 0x8b0   :  { %16987 = vmatpush1.bf16.msra.mxu1 %v21657_v32  ;;  %v21734_v32 = vld [vmem:[#allocation8 + $0x12a4] ss:$24 sps:$4 sm:$0xff]  }
 0x8b1   :  { %17337 = vmatpush1.bf16.msra.mxu0 %v21660_v9  ;;  %16988 = vmatprep.subr.bf16.mxu1 %v21665_v58  ;;  %v21732_v9 = vld [vmem:[#allocation8 + $0x12a0] ss:$24 sps:$4 sm:$0xff]   ;;  %v21737_v58 = vld [vmem:[#allocation8 + $0x1e3c] ss:$24 sps:$4 sm:$0xff]  }
 0x8b2   :  { %17338 = vmatprep.subr.bf16.mxu0 %v21668_v14  ;;  %v21735_v14 = vld [vmem:[#allocation8 + $0x1e38] ss:$24 sps:$4 sm:$0xff]  }
 0x8b4   :  { %16989 = vmatpush1.bf16.msra.mxu1 %v21663_v17  ;;  %v21738_v17 = vld [vmem:[#allocation8 + $0x12d0] ss:$24 sps:$4 sm:$0xff]  }
 0x8b5   :  { %17339 = vmatpush1.bf16.msra.mxu0 %v21666_v54  ;;  %16990 = vmatprep.subr.bf16.mxu1 %v21671_v60  ;;  %v21743_v54 = vld [vmem:[#allocation8 + $0x1e6c] ss:$24 sps:$4 sm:$0xff]  }
 0x8b6   :  { %17340 = vmatprep.subr.bf16.mxu0 %v21674_v5  ;;  %v21746_v60 = vld [vmem:[#allocation8 + $0x1304] ss:$24 sps:$4 sm:$0xff]   ;;  %v21741_v5 = vld [vmem:[#allocation8 + $0x1e68] ss:$24 sps:$4 sm:$0xff]  }
 0x8b8   :  { %16991 = vmatpush1.bf16.msra.mxu1 %v21669_v51  ;;  %v21744_v51 = vld [vmem:[#allocation8 + $0x1300] ss:$24 sps:$4 sm:$0xff]  }
 0x8b9   :  { %17341 = vmatpush1.bf16.msra.mxu0 %v21672_v35  ;;  %16992 = vmatprep.subr.bf16.mxu1 %v21677_v44  ;;  %v21749_v35 = vld [vmem:[#allocation8 + $0x1e9c] ss:$24 sps:$4 sm:$0xff]  }
 0x8ba   :  { %17342 = vmatprep.subr.bf16.mxu0 %v21680_v41  ;;  %v21752_v44 = vld [vmem:[#allocation8 + $0x1334] ss:$24 sps:$4 sm:$0xff]   ;;  %v21747_v41 = vld [vmem:[#allocation8 + $0x1e98] ss:$24 sps:$4 sm:$0xff]  }
 0x8bc   :  { %16993 = vmatpush1.bf16.msra.mxu1 %v21675_v45  ;;  %v21750_v45 = vld [vmem:[#allocation8 + $0x1330] ss:$24 sps:$4 sm:$0xff]  }
 0x8bd   :  { %17343 = vmatpush1.bf16.msra.mxu0 %v21678_v55  ;;  %16994 = vmatprep.subr.bf16.mxu1 %v21683_v36  ;;  %v21755_v55 = vld [vmem:[#allocation8 + $0x1ecc] ss:$24 sps:$4 sm:$0xff]  }
 0x8be   :  { %17344 = vmatprep.subr.bf16.mxu0 %v21686_v3  ;;  %v21758_v36 = vld [vmem:[#allocation8 + $0x1364] ss:$24 sps:$4 sm:$0xff]   ;;  %v21753_v3 = vld [vmem:[#allocation8 + $0x1ec8] ss:$24 sps:$4 sm:$0xff]  }
 0x8c0   :  { %16995 = vmatpush1.bf16.msra.mxu1 %v21681_v37  ;;  %v21756_v37 = vld [vmem:[#allocation8 + $0x1360] ss:$24 sps:$4 sm:$0xff]  }
 0x8c1   :  { %17345 = vmatpush1.bf16.msra.mxu0 %v21684_v50  ;;  %16996 = vmatprep.subr.bf16.mxu1 %v21689_v8  ;;  %v21761_v50 = vld [vmem:[#allocation8 + $0x1efc] ss:$24 sps:$4 sm:$0xff]  }
 0x8c2   :  { %17346 = vmatprep.subr.bf16.mxu0 %v21692_v16  ;;  %v21764_v8 = vld [vmem:[#allocation8 + $0x1394] ss:$24 sps:$4 sm:$0xff]   ;;  %v21759_v16 = vld [vmem:[#allocation8 + $0x1ef8] ss:$24 sps:$4 sm:$0xff]  }
 0x8c4   :  { %16997 = vmatpush1.bf16.msra.mxu1 %v21687_v42  ;;  %v21762_v42 = vld [vmem:[#allocation8 + $0x1390] ss:$24 sps:$4 sm:$0xff]  }
 0x8c5   :  { %17347 = vmatpush1.bf16.msra.mxu0 %v21690_v7  ;;  %16998 = vmatprep.subr.bf16.mxu1 %v21695_v62  ;;  %v21767_v7 = vld [vmem:[#allocation8 + $0x1f2c] ss:$24 sps:$4 sm:$0xff]  }
 0x8c6   :  { %17348 = vmatprep.subr.bf16.mxu0 %v21698_v18  ;;  %v21770_v62 = vld [vmem:[#allocation8 + $0x13c4] ss:$24 sps:$4 sm:$0xff]   ;;  %v21765_v18 = vld [vmem:[#allocation8 + $0x1f28] ss:$24 sps:$4 sm:$0xff]  }
 0x8c8   :  { %16999 = vmatpush1.bf16.msra.mxu1 %v21693_v6  ;;  %v21768_v6 = vld [vmem:[#allocation8 + $0x13c0] ss:$24 sps:$4 sm:$0xff]  }
 0x8c9   :  { %17349 = vmatpush1.bf16.msra.mxu0 %v21696_v52  ;;  %17000 = vmatprep.subr.bf16.mxu1 %v21701_v63  ;;  %v21773_v52 = vld [vmem:[#allocation8 + $0x1f5c] ss:$24 sps:$4 sm:$0xff]  }
 0x8ca   :  { %17350 = vmatprep.subr.bf16.mxu0 %v21704_v0  ;;  %v21776_v63 = vld [vmem:[#allocation8 + $0x13f4] ss:$24 sps:$4 sm:$0xff]   ;;  %v21771_v0 = vld [vmem:[#allocation8 + $0x1f58] ss:$24 sps:$4 sm:$0xff]  }
 0x8cc   :  { %17001 = vmatpush1.bf16.msra.mxu1 %v21699_v49  ;;  %v21774_v49 = vld [vmem:[#allocation8 + $0x13f0] ss:$24 sps:$4 sm:$0xff]  }
 0x8cd   :  { %17351 = vmatpush1.bf16.msra.mxu0 %v21702_v22  ;;  %17002 = vmatprep.subr.bf16.mxu1 %v21707_v11  ;;  %v21779_v22 = vld [vmem:[#allocation8 + $0x1f8c] ss:$24 sps:$4 sm:$0xff]  }
 0x8ce   :  { %17352 = vmatprep.subr.bf16.mxu0 %v21710_v57  ;;  %v21782_v11 = vld [vmem:[#allocation8 + $0x1424] ss:$24 sps:$4 sm:$0xff]   ;;  %v21777_v57 = vld [vmem:[#allocation8 + $0x1f88] ss:$24 sps:$4 sm:$0xff]  }
 0x8d0   :  { %17003 = vmatpush1.bf16.msra.mxu1 %v21705_v1  ;;  %v21780_v1 = vld [vmem:[#allocation8 + $0x1420] ss:$24 sps:$4 sm:$0xff]  }
 0x8d1   :  { %17353 = vmatpush1.bf16.msra.mxu0 %v21708_v13  ;;  %17004 = vmatprep.subr.bf16.mxu1 %v21713_v39  ;;  %v21785_v13 = vld [vmem:[#allocation8 + $0x1fbc] ss:$24 sps:$4 sm:$0xff]  }
 0x8d2   :  { %17365 = vmatprep.subr.bf16.mxu0 %v21716_v15  ;;  %v21788_v39 = vld [vmem:[#allocation8 + $0x1454] ss:$24 sps:$4 sm:$0xff]   ;;  %v21783_v15 = vld [vmem:[#allocation8 + $0x1fb8] ss:$24 sps:$4 sm:$0xff]  }
 0x8d4   :  { %17355 = vmatmul.mubr.bf16.vlgmr.msra.gmra.mrb[20].mxu0 %v23074_v28  ;;  %17005 = vmatpush1.bf16.msra.mxu1 %v21711_v27  ;;  %v21729_v28 = vld [vmem:[#allocation8 + $0x1e08] ss:$24 sps:$4 sm:$0xff]  }
 0x8d5   :  { %17366 = vmatpush1.bf16.msra.mxu0 %v21714_v31  ;;  %17397 = vmatprep.mubr.bf16.mxu0 %v22824_v21  ;;  %v21740_v21 = vld [vmem:[#allocation8 + $0x12d4] ss:$24 sps:$4 sm:$0xff]   ;;  %v21786_v27 = vld [vmem:[#allocation8 + $0x1450] ss:$24 sps:$4 sm:$0xff]  }
 0x8d6   :  { %17006 = vmatprep.subr.bf16.mxu1 %v21719_v56  ;;  %17367 = vmatprep.subr.bf16.mxu0 %v21722_v61  ;;  %v21791_v31 = vld [vmem:[#allocation8 + $0x1fec] ss:$24 sps:$4 sm:$0xff]   ;;  %v21789_v61 = vld [vmem:[#allocation8 + $0x1fe8] ss:$24 sps:$4 sm:$0xff]  }
 0x8d7   :  { %v21794_v56 = vld [vmem:[#allocation8 + $0x1484] ss:$24 sps:$4 sm:$0xff]  }
 0x8d8   :  { %17007 = vmatpush1.bf16.msra.mxu1 %v21717_v4  ;;  %v21792_v4 = vld [vmem:[#allocation8 + $0x1480] ss:$24 sps:$4 sm:$0xff]  }
 0x8d9   :  { %17368 = vmatpush1.bf16.msra.mxu0 %v21720_v20  ;;  %17008 = vmatprep.subr.bf16.mxu1 %v21725_v29  ;;  %v21797_v20 = vld [vmem:[#allocation8 + $0x201c] ss:$24 sps:$4 sm:$0xff]  }
 0x8da   :  { %17369 = vmatprep.subr.bf16.mxu0 %v21728_v23  ;;  %v21800_v29 = vld [vmem:[#allocation8 + $0x14b4] ss:$24 sps:$4 sm:$0xff]   ;;  %v21795_v23 = vld [vmem:[#allocation8 + $0x2018] ss:$24 sps:$4 sm:$0xff]  }
 0x8dc   :  { %17009 = vmatpush1.bf16.msra.mxu1 %v21723_v30  ;;  %v21798_v30 = vld [vmem:[#allocation8 + $0x14b0] ss:$24 sps:$4 sm:$0xff]  }
 0x8dd   :  { %17370 = vmatpush1.bf16.msra.mxu0 %v21726_v59  ;;  %17021 = vmatprep.subr.bf16.mxu1 %v21731_v38  ;;  %v21803_v59 = vld [vmem:[#allocation8 + $0x204c] ss:$24 sps:$4 sm:$0xff]  }
 0x8de   :  { %17371 = vmatprep.subr.bf16.mxu0 %v21734_v32  ;;  %v21806_v38 = vld [vmem:[#allocation8 + $0x14e4] ss:$24 sps:$4 sm:$0xff]   ;;  %v21801_v32 = vld [vmem:[#allocation8 + $0x2048] ss:$24 sps:$4 sm:$0xff]  }
 0x8df   :  { %17011 = vmatmul.mubr.bf16.vlgmr.msra.gmra.mrb[32].mxu1 %v23142_v12 }
 0x8e0   :  { %17022 = vmatpush1.bf16.msra.mxu1 %v21729_v28  ;;  %17053 = vmatprep.mubr.bf16.mxu1 %v23017_v26  ;;  %v21804_v28 = vld [vmem:[#allocation8 + $0x14e0] ss:$24 sps:$4 sm:$0xff]  }
 0x8e1   :  { %17372 = vmatpush1.bf16.msra.mxu0 %v21732_v9  ;;  %17023 = vmatprep.subr.bf16.mxu1 %v21737_v58  ;;  %v21809_v9 = vld [vmem:[#allocation8 + $0x207c] ss:$24 sps:$4 sm:$0xff]  }
 0x8e2   :  { %17373 = vmatprep.subr.bf16.mxu0 %v21740_v21  ;;  %v21812_v58 = vld [vmem:[#allocation8 + $0x1514] ss:$24 sps:$4 sm:$0xff]   ;;  %v21807_v21 = vld [vmem:[#allocation8 + $0x2078] ss:$24 sps:$4 sm:$0xff]  }
 0x8e4   :  { %17024 = vmatpush1.bf16.msra.mxu1 %v21735_v14  ;;  %v21810_v14 = vld [vmem:[#allocation8 + $0x1510] ss:$24 sps:$4 sm:$0xff]  }
 0x8e5   :  { %17374 = vmatpush1.bf16.msra.mxu0 %v21738_v17  ;;  %17025 = vmatprep.subr.bf16.mxu1 %v21743_v54  ;;  %v21815_v17 = vld [vmem:[#allocation8 + $0x20ac] ss:$24 sps:$4 sm:$0xff]  }
 0x8e6   :  { %17375 = vmatprep.subr.bf16.mxu0 %v21746_v60  ;;  %v21818_v54 = vld [vmem:[#allocation8 + $0x1544] ss:$24 sps:$4 sm:$0xff]   ;;  %v21813_v60 = vld [vmem:[#allocation8 + $0x20a8] ss:$24 sps:$4 sm:$0xff]  }
 0x8e8   :  { %17026 = vmatpush1.bf16.msra.mxu1 %v21741_v5  ;;  %v21816_v5 = vld [vmem:[#allocation8 + $0x1540] ss:$24 sps:$4 sm:$0xff]  }
 0x8e9   :  { %17376 = vmatpush1.bf16.msra.mxu0 %v21744_v51  ;;  %17027 = vmatprep.subr.bf16.mxu1 %v21749_v35  ;;  %v21821_v51 = vld [vmem:[#allocation8 + $0x20dc] ss:$24 sps:$4 sm:$0xff]  }
 0x8ea   :  { %17377 = vmatprep.subr.bf16.mxu0 %v21752_v44  ;;  %v21824_v35 = vld [vmem:[#allocation8 + $0x1574] ss:$24 sps:$4 sm:$0xff]   ;;  %v21819_v44 = vld [vmem:[#allocation8 + $0x20d8] ss:$24 sps:$4 sm:$0xff]  }
 0x8ec   :  { %17028 = vmatpush1.bf16.msra.mxu1 %v21747_v41  ;;  %v21822_v41 = vld [vmem:[#allocation8 + $0x1570] ss:$24 sps:$4 sm:$0xff]  }
 0x8ed   :  { %17378 = vmatpush1.bf16.msra.mxu0 %v21750_v45  ;;  %17029 = vmatprep.subr.bf16.mxu1 %v21755_v55  ;;  %v21827_v45 = vld [vmem:[#allocation8 + $0x210c] ss:$24 sps:$4 sm:$0xff]  }
 0x8ee   :  { %17379 = vmatprep.subr.bf16.mxu0 %v21758_v36  ;;  %v21830_v55 = vld [vmem:[#allocation8 + $0x15a4] ss:$24 sps:$4 sm:$0xff]   ;;  %v21828_v36 = vld [vmem:[#allocation8 + $0x15a0] ss:$24 sps:$4 sm:$0xff]  }
 0x8f0   :  { %17030 = vmatpush1.bf16.msra.mxu1 %v21753_v3  ;;  %v21833_v3 = vld [vmem:[#allocation8 + $0x213c] ss:$24 sps:$4 sm:$0xff]  }
 0x8f1   :  { %17380 = vmatpush1.bf16.msra.mxu0 %v21756_v37  ;;  %17031 = vmatprep.subr.bf16.mxu1 %v21761_v50  ;;  %v21831_v37 = vld [vmem:[#allocation8 + $0x2138] ss:$24 sps:$4 sm:$0xff]  }
 0x8f2   :  { %17381 = vmatprep.subr.bf16.mxu0 %v21764_v8  ;;  %v21834_v50 = vld [vmem:[#allocation8 + $0x15d0] ss:$24 sps:$4 sm:$0xff]   ;;  %v21839_v8 = vld [vmem:[#allocation8 + $0x216c] ss:$24 sps:$4 sm:$0xff]  }
 0x8f4   :  { %17032 = vmatpush1.bf16.msra.mxu1 %v21759_v16  ;;  %v21842_v16 = vld [vmem:[#allocation8 + $0x1604] ss:$24 sps:$4 sm:$0xff]  }
 0x8f5   :  { %17382 = vmatpush1.bf16.msra.mxu0 %v21762_v42  ;;  %17033 = vmatprep.subr.bf16.mxu1 %v21767_v7  ;;  %v21837_v42 = vld [vmem:[#allocation8 + $0x2168] ss:$24 sps:$4 sm:$0xff]  }
 0x8f6   :  { %17383 = vmatprep.subr.bf16.mxu0 %v21770_v62  ;;  %v21840_v7 = vld [vmem:[#allocation8 + $0x1600] ss:$24 sps:$4 sm:$0xff]   ;;  %v21845_v62 = vld [vmem:[#allocation8 + $0x219c] ss:$24 sps:$4 sm:$0xff]  }
 0x8f8   :  { %17034 = vmatpush1.bf16.msra.mxu1 %v21765_v18  ;;  %v21848_v18 = vld [vmem:[#allocation8 + $0x1634] ss:$24 sps:$4 sm:$0xff]  }
 0x8f9   :  { %17384 = vmatpush1.bf16.msra.mxu0 %v21768_v6  ;;  %17035 = vmatprep.subr.bf16.mxu1 %v21773_v52  ;;  %v21843_v6 = vld [vmem:[#allocation8 + $0x2198] ss:$24 sps:$4 sm:$0xff]  }
 0x8fa   :  { %17385 = vmatprep.subr.bf16.mxu0 %v21776_v63  ;;  %v21846_v52 = vld [vmem:[#allocation8 + $0x1630] ss:$24 sps:$4 sm:$0xff]   ;;  %v21851_v63 = vld [vmem:[#allocation8 + $0x21cc] ss:$24 sps:$4 sm:$0xff]  }
 0x8fc   :  { %17036 = vmatpush1.bf16.msra.mxu1 %v21771_v0  ;;  %v21854_v0 = vld [vmem:[#allocation8 + $0x1664] ss:$24 sps:$4 sm:$0xff]  }
 0x8fd   :  { %17386 = vmatpush1.bf16.msra.mxu0 %v21774_v49  ;;  %17037 = vmatprep.subr.bf16.mxu1 %v21779_v22  ;;  %v21849_v49 = vld [vmem:[#allocation8 + $0x21c8] ss:$24 sps:$4 sm:$0xff]  }
 0x8fe   :  { %17387 = vmatprep.subr.bf16.mxu0 %v21782_v11  ;;  %v21852_v22 = vld [vmem:[#allocation8 + $0x1660] ss:$24 sps:$4 sm:$0xff]   ;;  %v21857_v11 = vld [vmem:[#allocation8 + $0x21fc] ss:$24 sps:$4 sm:$0xff]  }
 0x900   :  { %17038 = vmatpush1.bf16.msra.mxu1 %v21777_v57  ;;  %v21860_v57 = vld [vmem:[#allocation8 + $0x1694] ss:$24 sps:$4 sm:$0xff]  }
 0x901   :  { %17388 = vmatpush1.bf16.msra.mxu0 %v21780_v1  ;;  %17039 = vmatprep.subr.bf16.mxu1 %v21785_v13  ;;  %v21855_v1 = vld [vmem:[#allocation8 + $0x21f8] ss:$24 sps:$4 sm:$0xff]  }
 0x902   :  { %17389 = vmatprep.subr.bf16.mxu0 %v21788_v39  ;;  %v21858_v13 = vld [vmem:[#allocation8 + $0x1690] ss:$24 sps:$4 sm:$0xff]   ;;  %v21863_v39 = vld [vmem:[#allocation8 + $0x222c] ss:$24 sps:$4 sm:$0xff]  }
 0x904   :  { %17040 = vmatpush1.bf16.msra.mxu1 %v21783_v15  ;;  %v21866_v15 = vld [vmem:[#allocation8 + $0x16c4] ss:$24 sps:$4 sm:$0xff]  }
 0x905   :  { %17390 = vmatpush1.bf16.msra.mxu0 %v21786_v27  ;;  %17041 = vmatprep.subr.bf16.mxu1 %v21791_v31  ;;  %v21861_v27 = vld [vmem:[#allocation8 + $0x2228] ss:$24 sps:$4 sm:$0xff]  }
 0x906   :  { %17391 = vmatprep.subr.bf16.mxu0 %v21794_v56  ;;  %v21864_v31 = vld [vmem:[#allocation8 + $0x16c0] ss:$24 sps:$4 sm:$0xff]   ;;  %v21869_v56 = vld [vmem:[#allocation8 + $0x225c] ss:$24 sps:$4 sm:$0xff]  }
 0x908   :  { %17042 = vmatpush1.bf16.msra.mxu1 %v21789_v61  ;;  %v21872_v61 = vld [vmem:[#allocation8 + $0x16f4] ss:$24 sps:$4 sm:$0xff]  }
 0x909   :  { %17392 = vmatpush1.bf16.msra.mxu0 %v21792_v4  ;;  %17043 = vmatprep.subr.bf16.mxu1 %v21797_v20  ;;  %v21867_v4 = vld [vmem:[#allocation8 + $0x2258] ss:$24 sps:$4 sm:$0xff]  }
 0x90a   :  { %17393 = vmatprep.subr.bf16.mxu0 %v21800_v29  ;;  %v21870_v20 = vld [vmem:[#allocation8 + $0x16f0] ss:$24 sps:$4 sm:$0xff]   ;;  %v21875_v29 = vld [vmem:[#allocation8 + $0x228c] ss:$24 sps:$4 sm:$0xff]  }
 0x90c   :  { %17044 = vmatpush1.bf16.msra.mxu1 %v21795_v23  ;;  %v21878_v23 = vld [vmem:[#allocation8 + $0x1724] ss:$24 sps:$4 sm:$0xff]  }
 0x90d   :  { %17394 = vmatpush1.bf16.msra.mxu0 %v21798_v30  ;;  %17045 = vmatprep.subr.bf16.mxu1 %v21803_v59  ;;  %v21873_v30 = vld [vmem:[#allocation8 + $0x2288] ss:$24 sps:$4 sm:$0xff]  }
 0x90e   :  { %17395 = vmatprep.subr.bf16.mxu0 %v21806_v38  ;;  %v21876_v59 = vld [vmem:[#allocation8 + $0x1720] ss:$24 sps:$4 sm:$0xff]   ;;  %v21881_v38 = vld [vmem:[#allocation8 + $0x22bc] ss:$24 sps:$4 sm:$0xff]  }
 0x910   :  { %17046 = vmatpush1.bf16.msra.mxu1 %v21801_v32  ;;  %v21884_v32 = vld [vmem:[#allocation8 + $0x1754] ss:$24 sps:$4 sm:$0xff]  }
 0x911   :  { %17396 = vmatpush1.bf16.msra.mxu0 %v21804_v28  ;;  %17047 = vmatprep.subr.bf16.mxu1 %v21809_v9  ;;  %v21879_v28 = vld [vmem:[#allocation8 + $0x22b8] ss:$24 sps:$4 sm:$0xff]  }
 0x912   :  { %17408 = vmatprep.subr.bf16.mxu0 %v21812_v58  ;;  %v21882_v9 = vld [vmem:[#allocation8 + $0x1750] ss:$24 sps:$4 sm:$0xff]   ;;  %v21887_v58 = vld [vmem:[#allocation8 + $0x22ec] ss:$24 sps:$4 sm:$0xff]  }
 0x914   :  { %17398 = vmatmul.mubr.bf16.vlgmr.msra.gmra.mrb[20].mxu0 %v22822_v43  ;;  %17048 = vmatpush1.bf16.msra.mxu1 %v21807_v21  ;;  %v21825_v43 = vld [vmem:[#allocation8 + $0x2108] ss:$24 sps:$4 sm:$0xff]   ;;  %v21890_v21 = vld [vmem:[#allocation8 + $0x1784] ss:$24 sps:$4 sm:$0xff]  }
 0x915   :  { %17409 = vmatpush1.bf16.msra.mxu0 %v21810_v14  ;;  %17440 = vmatprep.mubr.bf16.mxu0 %v23122_v47  ;;  %v21836_v47 = vld [vmem:[#allocation8 + $0x15d4] ss:$24 sps:$4 sm:$0xff]   ;;  %v21885_v14 = vld [vmem:[#allocation8 + $0x22e8] ss:$24 sps:$4 sm:$0xff]  }
 0x916   :  { %17049 = vmatprep.subr.bf16.mxu1 %v21815_v17  ;;  %17410 = vmatprep.subr.bf16.mxu0 %v21818_v54  ;;  %v21888_v17 = vld [vmem:[#allocation8 + $0x1780] ss:$24 sps:$4 sm:$0xff]   ;;  %v21893_v54 = vld [vmem:[#allocation8 + $0x231c] ss:$24 sps:$4 sm:$0xff]  }
 0x918   :  { %17050 = vmatpush1.bf16.msra.mxu1 %v21813_v60  ;;  %v21896_v60 = vld [vmem:[#allocation8 + $0x17b4] ss:$24 sps:$4 sm:$0xff]  }
 0x919   :  { %17411 = vmatpush1.bf16.msra.mxu0 %v21816_v5  ;;  %17051 = vmatprep.subr.bf16.mxu1 %v21821_v51  ;;  %v21891_v5 = vld [vmem:[#allocation8 + $0x2318] ss:$24 sps:$4 sm:$0xff]  }
 0x91a   :  { %17412 = vmatprep.subr.bf16.mxu0 %v21824_v35  ;;  %v21894_v51 = vld [vmem:[#allocation8 + $0x17b0] ss:$24 sps:$4 sm:$0xff]   ;;  %v21899_v35 = vld [vmem:[#allocation8 + $0x234c] ss:$24 sps:$4 sm:$0xff]  }
 0x91c   :  { %17052 = vmatpush1.bf16.msra.mxu1 %v21819_v44  ;;  %v21902_v44 = vld [vmem:[#allocation8 + $0x17e4] ss:$24 sps:$4 sm:$0xff]  }
 0x91d   :  { %17413 = vmatpush1.bf16.msra.mxu0 %v21822_v41  ;;  %17064 = vmatprep.subr.bf16.mxu1 %v21827_v45  ;;  %v21897_v41 = vld [vmem:[#allocation8 + $0x2348] ss:$24 sps:$4 sm:$0xff]  }
 0x91e   :  { %17414 = vmatprep.subr.bf16.mxu0 %v21830_v55  ;;  %v21900_v45 = vld [vmem:[#allocation8 + $0x17e0] ss:$24 sps:$4 sm:$0xff]   ;;  %v21905_v55 = vld [vmem:[#allocation8 + $0x237c] ss:$24 sps:$4 sm:$0xff]  }
 0x91f   :  { %17054 = vmatmul.mubr.bf16.vlgmr.msra.gmra.mrb[32].mxu1 %v23015_v2 }
 0x920   :  { %17065 = vmatpush1.bf16.msra.mxu1 %v21825_v43  ;;  %17096 = vmatprep.mubr.bf16.mxu1 %v23169_v10  ;;  %v21908_v43 = vld [vmem:[#allocation8 + $0x1814] ss:$24 sps:$4 sm:$0xff]  }
 0x921   :  { %17415 = vmatpush1.bf16.msra.mxu0 %v21828_v36  ;;  %17066 = vmatprep.subr.bf16.mxu1 %v21833_v3  ;;  %v21903_v36 = vld [vmem:[#allocation8 + $0x2378] ss:$24 sps:$4 sm:$0xff]  }
 0x922   :  { %17416 = vmatprep.subr.bf16.mxu0 %v21836_v47  ;;  %v21906_v3 = vld [vmem:[#allocation8 + $0x1810] ss:$24 sps:$4 sm:$0xff]   ;;  %v21911_v47 = vld [vmem:[#allocation8 + $0x23ac] ss:$24 sps:$4 sm:$0xff]  }
 0x924   :  { %17067 = vmatpush1.bf16.msra.mxu1 %v21831_v37  ;;  %v21914_v37 = vld [vmem:[#allocation8 + $0x1844] ss:$24 sps:$4 sm:$0xff]  }
 0x925   :  { %17417 = vmatpush1.bf16.msra.mxu0 %v21834_v50  ;;  %17068 = vmatprep.subr.bf16.mxu1 %v21839_v8  ;;  %v21909_v50 = vld [vmem:[#allocation8 + $0x23a8] ss:$24 sps:$4 sm:$0xff]  }
 0x926   :  { %17418 = vmatprep.subr.bf16.mxu0 %v21842_v16  ;;  %v21912_v8 = vld [vmem:[#allocation8 + $0x1840] ss:$24 sps:$4 sm:$0xff]   ;;  %v21917_v16 = vld [vmem:[#allocation8 + $0x23dc] ss:$24 sps:$4 sm:$0xff]  }
 0x928   :  { %17069 = vmatpush1.bf16.msra.mxu1 %v21837_v42  ;;  %v21920_v42 = vld [vmem:[#allocation8 + $0x1874] ss:$24 sps:$4 sm:$0xff]  }
 0x929   :  { %17419 = vmatpush1.bf16.msra.mxu0 %v21840_v7  ;;  %17070 = vmatprep.subr.bf16.mxu1 %v21845_v62  ;;  %v21915_v7 = vld [vmem:[#allocation8 + $0x23d8] ss:$24 sps:$4 sm:$0xff]  }
 0x92a   :  { %17420 = vmatprep.subr.bf16.mxu0 %v21848_v18  ;;  %v21918_v62 = vld [vmem:[#allocation8 + $0x1870] ss:$24 sps:$4 sm:$0xff]   ;;  %v21923_v18 = vld [vmem:[#allocation8 + $0x18a4] ss:$24 sps:$4 sm:$0xff]  }
 0x92c   :  { %17071 = vmatpush1.bf16.msra.mxu1 %v21843_v6  ;;  %v21926_v6 = vld [vmem:[#allocation8 + $0x18d4] ss:$24 sps:$4 sm:$0xff]  }
 0x92d   :  { %17421 = vmatpush1.bf16.msra.mxu0 %v21846_v52  ;;  %17072 = vmatprep.subr.bf16.mxu1 %v21851_v63  ;;  %v21929_v52 = vld [vmem:[#allocation8 + $0x1904] ss:$24 sps:$4 sm:$0xff]   ;;  %v21927_v63 = vld [vmem:[#allocation8 + $0x1900] ss:$24 sps:$4 sm:$0xff]  }
 0x92e   :  { %17422 = vmatprep.subr.bf16.mxu0 %v21854_v0  ;;  %v21932_v0 = vld [vmem:[#allocation8 + $0x1934] ss:$24 sps:$4 sm:$0xff]  }
 0x930   :  { %17073 = vmatpush1.bf16.msra.mxu1 %v21849_v49  ;;  %v21930_v49 = vld [vmem:[#allocation8 + $0x1930] ss:$24 sps:$4 sm:$0xff]  }
 0x931   :  { %17423 = vmatpush1.bf16.msra.mxu0 %v21852_v22  ;;  %17074 = vmatprep.subr.bf16.mxu1 %v21857_v11  ;;  %v21935_v22 = vld [vmem:[#allocation8 + $0x1964] ss:$24 sps:$4 sm:$0xff]   ;;  %v21933_v11 = vld [vmem:[#allocation8 + $0x1960] ss:$24 sps:$4 sm:$0xff]  }
 0x932   :  { %17424 = vmatprep.subr.bf16.mxu0 %v21860_v57  ;;  %v21938_v57 = vld [vmem:[#allocation8 + $0x1994] ss:$24 sps:$4 sm:$0xff]  }
 0x934   :  { %17075 = vmatpush1.bf16.msra.mxu1 %v21855_v1  ;;  %v21936_v1 = vld [vmem:[#allocation8 + $0x1990] ss:$24 sps:$4 sm:$0xff]  }
 0x935   :  { %17425 = vmatpush1.bf16.msra.mxu0 %v21858_v13  ;;  %17076 = vmatprep.subr.bf16.mxu1 %v21863_v39  ;;  %v21941_v13 = vld [vmem:[#allocation8 + $0x19c4] ss:$24 sps:$4 sm:$0xff]   ;;  %v21939_v39 = vld [vmem:[#allocation8 + $0x19c0] ss:$24 sps:$4 sm:$0xff]  }
 0x936   :  { %17426 = vmatprep.subr.bf16.mxu0 %v21866_v15  ;;  %v21944_v15 = vld [vmem:[#allocation8 + $0x19f4] ss:$24 sps:$4 sm:$0xff]  }
 0x938   :  { %17077 = vmatpush1.bf16.msra.mxu1 %v21861_v27  ;;  %v21942_v27 = vld [vmem:[#allocation8 + $0x19f0] ss:$24 sps:$4 sm:$0xff]  }
 0x939   :  { %17427 = vmatpush1.bf16.msra.mxu0 %v21864_v31  ;;  %17078 = vmatprep.subr.bf16.mxu1 %v21869_v56  ;;  %v21947_v31 = vld [vmem:[#allocation8 + $0x1a24] ss:$24 sps:$4 sm:$0xff]   ;;  %v21945_v56 = vld [vmem:[#allocation8 + $0x1a20] ss:$24 sps:$4 sm:$0xff]  }
 0x93a   :  { %17428 = vmatprep.subr.bf16.mxu0 %v21872_v61  ;;  %v21950_v61 = vld [vmem:[#allocation8 + $0x1a54] ss:$24 sps:$4 sm:$0xff]  }
 0x93c   :  { %17079 = vmatpush1.bf16.msra.mxu1 %v21867_v4  ;;  %v21948_v4 = vld [vmem:[#allocation8 + $0x1a50] ss:$24 sps:$4 sm:$0xff]  }
 0x93d   :  { %17429 = vmatpush1.bf16.msra.mxu0 %v21870_v20  ;;  %17080 = vmatprep.subr.bf16.mxu1 %v21875_v29  ;;  %v21953_v20 = vld [vmem:[#allocation8 + $0x1a84] ss:$24 sps:$4 sm:$0xff]   ;;  %v21951_v29 = vld [vmem:[#allocation8 + $0x1a80] ss:$24 sps:$4 sm:$0xff]  }
 0x93e   :  { %17430 = vmatprep.subr.bf16.mxu0 %v21878_v23  ;;  %v21956_v23 = vld [vmem:[#allocation8 + $0x1ab4] ss:$24 sps:$4 sm:$0xff]  }
 0x940   :  { %17081 = vmatpush1.bf16.msra.mxu1 %v21873_v30  ;;  %v21954_v30 = vld [vmem:[#allocation8 + $0x1ab0] ss:$24 sps:$4 sm:$0xff]  }
 0x941   :  { %17431 = vmatpush1.bf16.msra.mxu0 %v21876_v59  ;;  %17082 = vmatprep.subr.bf16.mxu1 %v21881_v38  ;;  %v21959_v59 = vld [vmem:[#allocation8 + $0x1ae4] ss:$24 sps:$4 sm:$0xff]   ;;  %v21957_v38 = vld [vmem:[#allocation8 + $0x1ae0] ss:$24 sps:$4 sm:$0xff]  }
 0x942   :  { %17432 = vmatprep.subr.bf16.mxu0 %v21884_v32  ;;  %v21962_v32 = vld [vmem:[#allocation8 + $0x1b14] ss:$24 sps:$4 sm:$0xff]  }
 0x944   :  { %17083 = vmatpush1.bf16.msra.mxu1 %v21879_v28  ;;  %v21960_v28 = vld [vmem:[#allocation8 + $0x1b10] ss:$24 sps:$4 sm:$0xff]  }
 0x945   :  { %17433 = vmatpush1.bf16.msra.mxu0 %v21882_v9  ;;  %17084 = vmatprep.subr.bf16.mxu1 %v21887_v58  ;;  %v21965_v9 = vld [vmem:[#allocation8 + $0x1b44] ss:$24 sps:$4 sm:$0xff]   ;;  %v21963_v58 = vld [vmem:[#allocation8 + $0x1b40] ss:$24 sps:$4 sm:$0xff]  }
 0x946   :  { %17434 = vmatprep.subr.bf16.mxu0 %v21890_v21  ;;  %v21968_v21 = vld [vmem:[#allocation8 + $0x1b74] ss:$24 sps:$4 sm:$0xff]  }
 0x948   :  { %17085 = vmatpush1.bf16.msra.mxu1 %v21885_v14  ;;  %v21966_v14 = vld [vmem:[#allocation8 + $0x1b70] ss:$24 sps:$4 sm:$0xff]  }
 0x949   :  { %17435 = vmatpush1.bf16.msra.mxu0 %v21888_v17  ;;  %17086 = vmatprep.subr.bf16.mxu1 %v21893_v54  ;;  %v21971_v17 = vld [vmem:[#allocation8 + $0x1ba4] ss:$24 sps:$4 sm:$0xff]   ;;  %v21969_v54 = vld [vmem:[#allocation8 + $0x1ba0] ss:$24 sps:$4 sm:$0xff]  }
 0x94a   :  { %17436 = vmatprep.subr.bf16.mxu0 %v21896_v60  ;;  %v21974_v60 = vld [vmem:[#allocation8 + $0x1bd4] ss:$24 sps:$4 sm:$0xff]  }
 0x94c   :  { %17087 = vmatpush1.bf16.msra.mxu1 %v21891_v5  ;;  %v21972_v5 = vld [vmem:[#allocation8 + $0x1bd0] ss:$24 sps:$4 sm:$0xff]  }
 0x94d   :  { %17437 = vmatpush1.bf16.msra.mxu0 %v21894_v51  ;;  %17088 = vmatprep.subr.bf16.mxu1 %v21899_v35  ;;  %v21977_v51 = vld [vmem:[#allocation8 + $0x1c04] ss:$24 sps:$4 sm:$0xff]   ;;  %v21980_v35 = vld [vmem:[#allocation8 + $0x1c34] ss:$24 sps:$4 sm:$0xff]  }
 0x94e   :  { %17438 = vmatprep.subr.bf16.mxu0 %v21902_v44  ;;  %v21983_v44 = vld [vmem:[#allocation8 + $0x1c64] ss:$24 sps:$4 sm:$0xff]  }
 0x950   :  { %17089 = vmatpush1.bf16.msra.mxu1 %v21897_v41  ;;  %v21981_v41 = vld [vmem:[#allocation8 + $0x1c60] ss:$24 sps:$4 sm:$0xff]  }
 0x951   :  { %17439 = vmatpush1.bf16.msra.mxu0 %v21900_v45  ;;  %17090 = vmatprep.subr.bf16.mxu1 %v21905_v55  ;;  %v21986_v45 = vld [vmem:[#allocation8 + $0x1c94] ss:$24 sps:$4 sm:$0xff]   ;;  %v21984_v55 = vld [vmem:[#allocation8 + $0x1c90] ss:$24 sps:$4 sm:$0xff]  }
 0x952   :  { %17451 = vmatprep.subr.bf16.mxu0 %v21908_v43  ;;  %v21989_v43 = vld [vmem:[#allocation8 + $0x1cc4] ss:$24 sps:$4 sm:$0xff]  }
 0x954   :  { %17441 = vmatmul.mubr.bf16.vlgmr.msra.gmra.mrb[20].mxu0 %v23120_v25  ;;  %17091 = vmatpush1.bf16.msra.mxu1 %v21903_v36  ;;  %v21921_v25 = vld [vmem:[#allocation8 + $0x18a0] ss:$24 sps:$4 sm:$0xff]  }
 0x955   :  { %17452 = vmatpush1.bf16.msra.mxu0 %v21906_v3  ;;  %17483 = vmatprep.mubr.bf16.mxu0 %v22917_v53  ;;  %v21924_v53 = vld [vmem:[#allocation8 + $0x18d0] ss:$24 sps:$4 sm:$0xff]   ;;  %v21987_v36 = vld [vmem:[#allocation8 + $0x1cc0] ss:$24 sps:$4 sm:$0xff]   ;;  %v21992_v3 = vld [vmem:[#allocation8 + $0x1cf4] ss:$24 sps:$4 sm:$0xff]  }
 0x956   :  { %17092 = vmatprep.subr.bf16.mxu1 %v21911_v47  ;;  %17453 = vmatprep.subr.bf16.mxu0 %v21914_v37  ;;  %v21990_v47 = vld [vmem:[#allocation8 + $0x1cf0] ss:$24 sps:$4 sm:$0xff]   ;;  %v21995_v37 = vld [vmem:[#allocation8 + $0x1d24] ss:$24 sps:$4 sm:$0xff]  }
 0x958   :  { %17093 = vmatpush1.bf16.msra.mxu1 %v21909_v50  ;;  %v21993_v50 = vld [vmem:[#allocation8 + $0x1d20] ss:$24 sps:$4 sm:$0xff]  }
 0x959   :  { %17454 = vmatpush1.bf16.msra.mxu0 %v21912_v8  ;;  %17094 = vmatprep.subr.bf16.mxu1 %v21917_v16  ;;  %v21998_v8 = vld [vmem:[#allocation8 + $0x1d54] ss:$24 sps:$4 sm:$0xff]   ;;  %v21996_v16 = vld [vmem:[#allocation8 + $0x1d50] ss:$24 sps:$4 sm:$0xff]  }
 0x95a   :  { %17455 = vmatprep.subr.bf16.mxu0 %v21920_v42  ;;  %v22001_v42 = vld [vmem:[#allocation8 + $0x1d84] ss:$24 sps:$4 sm:$0xff]  }
 0x95c   :  { %17095 = vmatpush1.bf16.msra.mxu1 %v21915_v7  ;;  %v21999_v7 = vld [vmem:[#allocation8 + $0x1d80] ss:$24 sps:$4 sm:$0xff]  }
 0x95d   :  { %17456 = vmatpush1.bf16.msra.mxu0 %v21918_v62  ;;  %v22004_v62 = vld [vmem:[#allocation8 + $0x1db4] ss:$24 sps:$4 sm:$0xff]  }
 0x95e   :  { %17457 = vmatprep.subr.bf16.mxu0 %v21923_v18  ;;  %v22002_v18 = vld [vmem:[#allocation8 + $0x1db0] ss:$24 sps:$4 sm:$0xff]  }
 0x95f   :  { %17097 = vmatmul.mubr.bf16.vlgmr.msra.gmra.mrb[32].mxu1 %v23167_v19 }
 0x961   :  { %17458 = vmatpush1.bf16.msra.mxu0 %v21921_v25  ;;  %v22007_v25 = vld [vmem:[#allocation8 + $0x1de4] ss:$24 sps:$4 sm:$0xff]  }
 0x962   :  { %17459 = vmatprep.subr.bf16.mxu0 %v21926_v6  ;;  %v22005_v6 = vld [vmem:[#allocation8 + $0x1de0] ss:$24 sps:$4 sm:$0xff]  }
 0x965   :  { %17460 = vmatpush1.bf16.msra.mxu0 %v21924_v53  ;;  %v22010_v53 = vld [vmem:[#allocation8 + $0x1e14] ss:$24 sps:$4 sm:$0xff]  }
 0x966   :  { %17461 = vmatprep.subr.bf16.mxu0 %v21929_v52  ;;  %v22008_v52 = vld [vmem:[#allocation8 + $0x1e10] ss:$24 sps:$4 sm:$0xff]  }
 0x969   :  { %17462 = vmatpush1.bf16.msra.mxu0 %v21927_v63  ;;  %v22013_v63 = vld [vmem:[#allocation8 + $0x1e44] ss:$24 sps:$4 sm:$0xff]  }
 0x96a   :  { %17463 = vmatprep.subr.bf16.mxu0 %v21932_v0  ;;  %v22011_v0 = vld [vmem:[#allocation8 + $0x1e40] ss:$24 sps:$4 sm:$0xff]  }
 0x96d   :  { %17464 = vmatpush1.bf16.msra.mxu0 %v21930_v49  ;;  %v22016_v49 = vld [vmem:[#allocation8 + $0x1e74] ss:$24 sps:$4 sm:$0xff]  }
 0x96e   :  { %17465 = vmatprep.subr.bf16.mxu0 %v21935_v22  ;;  %v22014_v22 = vld [vmem:[#allocation8 + $0x1e70] ss:$24 sps:$4 sm:$0xff]  }
 0x971   :  { %17466 = vmatpush1.bf16.msra.mxu0 %v21933_v11  ;;  %v22019_v11 = vld [vmem:[#allocation8 + $0x1ea4] ss:$24 sps:$4 sm:$0xff]  }
 0x972   :  { %17467 = vmatprep.subr.bf16.mxu0 %v21938_v57  ;;  %v22017_v57 = vld [vmem:[#allocation8 + $0x1ea0] ss:$24 sps:$4 sm:$0xff]  }
 0x975   :  { %17468 = vmatpush1.bf16.msra.mxu0 %v21936_v1  ;;  %v22022_v1 = vld [vmem:[#allocation8 + $0x1ed4] ss:$24 sps:$4 sm:$0xff]  }
 0x976   :  { %17469 = vmatprep.subr.bf16.mxu0 %v21941_v13  ;;  %v22020_v13 = vld [vmem:[#allocation8 + $0x1ed0] ss:$24 sps:$4 sm:$0xff]  }
 0x979   :  { %17470 = vmatpush1.bf16.msra.mxu0 %v21939_v39  ;;  %v22025_v39 = vld [vmem:[#allocation8 + $0x1f04] ss:$24 sps:$4 sm:$0xff]  }
 0x97a   :  { %17471 = vmatprep.subr.bf16.mxu0 %v21944_v15  ;;  %v22028_v15 = vld [vmem:[#allocation8 + $0x1f34] ss:$24 sps:$4 sm:$0xff]  }
 0x97d   :  { %17472 = vmatpush1.bf16.msra.mxu0 %v21942_v27  ;;  %v22031_v27 = vld [vmem:[#allocation8 + $0x1f64] ss:$24 sps:$4 sm:$0xff]  }
 0x97e   :  { %17473 = vmatprep.subr.bf16.mxu0 %v21947_v31  ;;  %v22029_v31 = vld [vmem:[#allocation8 + $0x1f60] ss:$24 sps:$4 sm:$0xff]  }
 0x981   :  { %17474 = vmatpush1.bf16.msra.mxu0 %v21945_v56  ;;  %v22034_v56 = vld [vmem:[#allocation8 + $0x1f94] ss:$24 sps:$4 sm:$0xff]  }
 0x982   :  { %17475 = vmatprep.subr.bf16.mxu0 %v21950_v61  ;;  %v22032_v61 = vld [vmem:[#allocation8 + $0x1f90] ss:$24 sps:$4 sm:$0xff]  }
 0x985   :  { %17476 = vmatpush1.bf16.msra.mxu0 %v21948_v4  ;;  %v22037_v4 = vld [vmem:[#allocation8 + $0x1fc4] ss:$24 sps:$4 sm:$0xff]  }
 0x986   :  { %17477 = vmatprep.subr.bf16.mxu0 %v21953_v20  ;;  %v22035_v20 = vld [vmem:[#allocation8 + $0x1fc0] ss:$24 sps:$4 sm:$0xff]  }
 0x989   :  { %17478 = vmatpush1.bf16.msra.mxu0 %v21951_v29  ;;  %v22040_v29 = vld [vmem:[#allocation8 + $0x1ff4] ss:$24 sps:$4 sm:$0xff]  }
 0x98a   :  { %17479 = vmatprep.subr.bf16.mxu0 %v21956_v23  ;;  %v22038_v23 = vld [vmem:[#allocation8 + $0x1ff0] ss:$24 sps:$4 sm:$0xff]  }
 0x98d   :  { %17480 = vmatpush1.bf16.msra.mxu0 %v21954_v30  ;;  %v22043_v30 = vld [vmem:[#allocation8 + $0x2024] ss:$24 sps:$4 sm:$0xff]  }
 0x98e   :  { %17481 = vmatprep.subr.bf16.mxu0 %v21959_v59  ;;  %v22041_v59 = vld [vmem:[#allocation8 + $0x2020] ss:$24 sps:$4 sm:$0xff]  }
 0x991   :  { %17482 = vmatpush1.bf16.msra.mxu0 %v21957_v38  ;;  %v22046_v38 = vld [vmem:[#allocation8 + $0x2054] ss:$24 sps:$4 sm:$0xff]  }
 0x992   :  { %17494 = vmatprep.subr.bf16.mxu0 %v21962_v32  ;;  %v22044_v32 = vld [vmem:[#allocation8 + $0x2050] ss:$24 sps:$4 sm:$0xff]  }
 0x994   :  { %17484 = vmatmul.mubr.bf16.vlgmr.msra.gmra.mrb[20].mxu0 %v22915_v34  ;;  %v21975_v34 = vld [vmem:[#allocation8 + $0x1c00] ss:$24 sps:$4 sm:$0xff]  }
 0x995   :  { %17495 = vmatpush1.bf16.msra.mxu0 %v21960_v28  ;;  %17526 = vmatprep.mubr.bf16.mxu0 %v23144_v48  ;;  %v21978_v48 = vld [vmem:[#allocation8 + $0x1c30] ss:$24 sps:$4 sm:$0xff]   ;;  %v22049_v28 = vld [vmem:[#allocation8 + $0x2084] ss:$24 sps:$4 sm:$0xff]  }
 0x996   :  { %17496 = vmatprep.subr.bf16.mxu0 %v21965_v9  ;;  %v22047_v9 = vld [vmem:[#allocation8 + $0x2080] ss:$24 sps:$4 sm:$0xff]  }
 0x999   :  { %17497 = vmatpush1.bf16.msra.mxu0 %v21963_v58  ;;  %v22052_v58 = vld [vmem:[#allocation8 + $0x20b4] ss:$24 sps:$4 sm:$0xff]  }
 0x99a   :  { %17498 = vmatprep.subr.bf16.mxu0 %v21968_v21  ;;  %v22050_v21 = vld [vmem:[#allocation8 + $0x20b0] ss:$24 sps:$4 sm:$0xff]  }
 0x99d   :  { %17499 = vmatpush1.bf16.msra.mxu0 %v21966_v14  ;;  %v22055_v14 = vld [vmem:[#allocation8 + $0x20e4] ss:$24 sps:$4 sm:$0xff]  }
 0x99e   :  { %17500 = vmatprep.subr.bf16.mxu0 %v21971_v17  ;;  %v22053_v17 = vld [vmem:[#allocation8 + $0x20e0] ss:$24 sps:$4 sm:$0xff]  }
 0x9a1   :  { %17501 = vmatpush1.bf16.msra.mxu0 %v21969_v54  ;;  %v22058_v54 = vld [vmem:[#allocation8 + $0x2114] ss:$24 sps:$4 sm:$0xff]  }
 0x9a2   :  { %17502 = vmatprep.subr.bf16.mxu0 %v21974_v60  ;;  %v22056_v60 = vld [vmem:[#allocation8 + $0x2110] ss:$24 sps:$4 sm:$0xff]  }
 0x9a5   :  { %17503 = vmatpush1.bf16.msra.mxu0 %v21972_v5  ;;  %v22061_v5 = vld [vmem:[#allocation8 + $0x2144] ss:$24 sps:$4 sm:$0xff]  }
 0x9a6   :  { %17504 = vmatprep.subr.bf16.mxu0 %v21977_v51  ;;  %v22059_v51 = vld [vmem:[#allocation8 + $0x2140] ss:$24 sps:$4 sm:$0xff]  }
 0x9a9   :  { %17505 = vmatpush1.bf16.msra.mxu0 %v21975_v34  ;;  %v22064_v34 = vld [vmem:[#allocation8 + $0x2174] ss:$24 sps:$4 sm:$0xff]  }
 0x9aa   :  { %17506 = vmatprep.subr.bf16.mxu0 %v21980_v35  ;;  %v22062_v35 = vld [vmem:[#allocation8 + $0x2170] ss:$24 sps:$4 sm:$0xff]  }
 0x9ad   :  { %17507 = vmatpush1.bf16.msra.mxu0 %v21978_v48  ;;  %v22067_v48 = vld [vmem:[#allocation8 + $0x21a4] ss:$24 sps:$4 sm:$0xff]  }
 0x9ae   :  { %17508 = vmatprep.subr.bf16.mxu0 %v21983_v44  ;;  %v22065_v44 = vld [vmem:[#allocation8 + $0x21a0] ss:$24 sps:$4 sm:$0xff]  }
 0x9b1   :  { %17509 = vmatpush1.bf16.msra.mxu0 %v21981_v41  ;;  %v22070_v41 = vld [vmem:[#allocation8 + $0x21d4] ss:$24 sps:$4 sm:$0xff]  }
 0x9b2   :  { %17510 = vmatprep.subr.bf16.mxu0 %v21986_v45  ;;  %v22068_v45 = vld [vmem:[#allocation8 + $0x21d0] ss:$24 sps:$4 sm:$0xff]  }
 0x9b5   :  { %17511 = vmatpush1.bf16.msra.mxu0 %v21984_v55  ;;  %v22073_v55 = vld [vmem:[#allocation8 + $0x2204] ss:$24 sps:$4 sm:$0xff]  }
 0x9b6   :  { %17512 = vmatprep.subr.bf16.mxu0 %v21989_v43  ;;  %v22076_v43 = vld [vmem:[#allocation8 + $0x2234] ss:$24 sps:$4 sm:$0xff]  }
 0x9b9   :  { %17513 = vmatpush1.bf16.msra.mxu0 %v21987_v36  ;;  %v22079_v36 = vld [vmem:[#allocation8 + $0x2264] ss:$24 sps:$4 sm:$0xff]  }
 0x9ba   :  { %17514 = vmatprep.subr.bf16.mxu0 %v21992_v3  ;;  %v22077_v3 = vld [vmem:[#allocation8 + $0x2260] ss:$24 sps:$4 sm:$0xff]  }
 0x9bd   :  { %17515 = vmatpush1.bf16.msra.mxu0 %v21990_v47  ;;  %v22082_v47 = vld [vmem:[#allocation8 + $0x2294] ss:$24 sps:$4 sm:$0xff]  }
 0x9be   :  { %17516 = vmatprep.subr.bf16.mxu0 %v21995_v37  ;;  %v22243_v37 = vld [vmem:[#allocation10] sm:$0x3f] }
 0x9c1   :  { %17517 = vmatpush1.bf16.msra.mxu0 %v21993_v50  ;;  %v17707_v50 = vrot.slane %v22243_v37, %v22655_v24  ;;  %v22088_v24 = vld [vmem:[#allocation8 + $0x22f4] ss:$24 sps:$4 sm:$0xff]  }
 0x9c2   :  { %17518 = vmatprep.subr.bf16.mxu0 %v21998_v8  ;;  %v17711_v8 = vrot.slane %v22243_v37, %v22658_v33  ;;  %v22086_v33 = vld [vmem:[#allocation8 + $0x22f0] ss:$24 sps:$4 sm:$0xff]  }
 0x9c5   :  { %17519 = vmatpush1.bf16.msra.mxu0 %v21996_v16  ;;  %v22080_v16 = vld [vmem:[#allocation8 + $0x2290] ss:$24 sps:$4 sm:$0xff]  }
 0x9c6   :  { %17520 = vmatprep.subr.bf16.mxu0 %v22001_v42 }
 0x9c9   :  { %17521 = vmatpush1.bf16.msra.mxu0 %v21999_v7  ;;  %v22085_v7 = vld [vmem:[#allocation8 + $0x22c4] ss:$24 sps:$4 sm:$0xff]  }
 0x9ca   :  { %17522 = vmatprep.subr.bf16.mxu0 %v22004_v62 }
 0x9cd   :  { %17523 = vmatpush1.bf16.msra.mxu0 %v22002_v18 }
 0x9ce   :  { %17524 = vmatprep.subr.bf16.mxu0 %v22007_v25 }
 0x9d1   :  { %17525 = vmatpush1.bf16.msra.mxu0 %v22005_v6 }
 0x9d2   :  { %17537 = vmatprep.subr.bf16.mxu0 %v22010_v53 }
 0x9d4   :  { %17527 = vmatmul.mubr.bf16.vlgmr.msra.gmra.mrb[20].mxu0 %v23142_v12  ;;  %v22023_v12 = vld [vmem:[#allocation8 + $0x1f00] ss:$24 sps:$4 sm:$0xff]  }
 0x9d5   :  { %17538 = vmatpush1.bf16.msra.mxu0 %v22008_v52  ;;  %17569 = vmatprep.mubr.bf16.mxu0 %v23017_v26  ;;  %v22026_v26 = vld [vmem:[#allocation8 + $0x1f30] ss:$24 sps:$4 sm:$0xff]  }
 0x9d6   :  { %17539 = vmatprep.subr.bf16.mxu0 %v22013_v63  ;;  %v22083_v63 = vld [vmem:[#allocation8 + $0x22c0] ss:$24 sps:$4 sm:$0xff]  }
 0x9d9   :  { %17540 = vmatpush1.bf16.msra.mxu0 %v22011_v0 }
 0x9da   :  { %17541 = vmatprep.subr.bf16.mxu0 %v22016_v49  ;;  %v22091_v49 = vld [vmem:[#allocation8 + $0x2324] ss:$24 sps:$4 sm:$0xff]  }
 0x9dd   :  { %17542 = vmatpush1.bf16.msra.mxu0 %v22014_v22  ;;  %v22089_v22 = vld [vmem:[#allocation8 + $0x2320] ss:$24 sps:$4 sm:$0xff]  }
 0x9de   :  { %17543 = vmatprep.subr.bf16.mxu0 %v22019_v11  ;;  %v22094_v11 = vld [vmem:[#allocation8 + $0x2354] ss:$24 sps:$4 sm:$0xff]  }
 0x9e1   :  { %17544 = vmatpush1.bf16.msra.mxu0 %v22017_v57  ;;  %v22092_v57 = vld [vmem:[#allocation8 + $0x2350] ss:$24 sps:$4 sm:$0xff]  }
 0x9e2   :  { %17545 = vmatprep.subr.bf16.mxu0 %v22022_v1  ;;  %v22097_v1 = vld [vmem:[#allocation8 + $0x2384] ss:$24 sps:$4 sm:$0xff]  }
 0x9e5   :  { %17546 = vmatpush1.bf16.msra.mxu0 %v22020_v13  ;;  %v22095_v13 = vld [vmem:[#allocation8 + $0x2380] ss:$24 sps:$4 sm:$0xff]  }
 0x9e6   :  { %17547 = vmatprep.subr.bf16.mxu0 %v22025_v39  ;;  %v22100_v39 = vld [vmem:[#allocation8 + $0x23b4] ss:$24 sps:$4 sm:$0xff]  }
 0x9e9   :  { %17548 = vmatpush1.bf16.msra.mxu0 %v22023_v12  ;;  %v22098_v12 = vld [vmem:[#allocation8 + $0x23b0] ss:$24 sps:$4 sm:$0xff]  }
 0x9ea   :  { %17549 = vmatprep.subr.bf16.mxu0 %v22028_v15  ;;  %v22103_v15 = vld [vmem:[#allocation8 + $0x23e4] ss:$24 sps:$4 sm:$0xff]  }
 0x9ed   :  { %17550 = vmatpush1.bf16.msra.mxu0 %v22026_v26  ;;  %v22101_v26 = vld [vmem:[#allocation8 + $0x23e0] ss:$24 sps:$4 sm:$0xff]  }
 0x9ee   :  { %17551 = vmatprep.subr.bf16.mxu0 %v22031_v27  ;;  %v17715_v27 = vrot.slane %v22243_v37, %v22665_v40 }
 0x9f1   :  { %17552 = vmatpush1.bf16.msra.mxu0 %v22029_v31  ;;  %v17719_v31 = vrot.slane %v22243_v37, %v22676_v46 }
 0x9f2   :  { %17553 = vmatprep.subr.bf16.mxu0 %v22034_v56 }
 0x9f5   :  { %17554 = vmatpush1.bf16.msra.mxu0 %v22032_v61 }
 0x9f6   :  { %17555 = vmatprep.subr.bf16.mxu0 %v22037_v4 }
 0x9f9   :  { %17556 = vmatpush1.bf16.msra.mxu0 %v22035_v20 }
 0x9fa   :  { %17557 = vmatprep.subr.bf16.mxu0 %v22040_v29 }
 0x9fd   :  { %17558 = vmatpush1.bf16.msra.mxu0 %v22038_v23 }
 0x9fe   :  { %17559 = vmatprep.subr.bf16.mxu0 %v22043_v30 }
 0xa01   :  { %17560 = vmatpush1.bf16.msra.mxu0 %v22041_v59 }
 0xa02   :  { %17561 = vmatprep.subr.bf16.mxu0 %v22046_v38 }
 0xa05   :  { %17562 = vmatpush1.bf16.msra.mxu0 %v22044_v32 }
 0xa06   :  { %17563 = vmatprep.subr.bf16.mxu0 %v22049_v28 }
 0xa09   :  { %17564 = vmatpush1.bf16.msra.mxu0 %v22047_v9 }
 0xa0a   :  { %17565 = vmatprep.subr.bf16.mxu0 %v22052_v58 }
 0xa0d   :  { %17566 = vmatpush1.bf16.msra.mxu0 %v22050_v21 }
 0xa0e   :  { %17567 = vmatprep.subr.bf16.mxu0 %v22055_v14 }
 0xa11   :  { %17568 = vmatpush1.bf16.msra.mxu0 %v22053_v17 }
 0xa12   :  { %17580 = vmatprep.subr.bf16.mxu0 %v22058_v54 }
 0xa14   :  { %17570 = vmatmul.mubr.bf16.vlgmr.msra.gmra.mrb[20].mxu0 %v23015_v2  ;;  %v22071_v2 = vld [vmem:[#allocation8 + $0x2200] ss:$24 sps:$4 sm:$0xff]  }
 0xa15   :  { %17581 = vmatpush1.bf16.msra.mxu0 %v22056_v60  ;;  %17612 = vmatprep.mubr.bf16.mxu0 %v23169_v10  ;;  %v22074_v10 = vld [vmem:[#allocation8 + $0x2230] ss:$24 sps:$4 sm:$0xff]  }
 0xa16   :  { %17582 = vmatprep.subr.bf16.mxu0 %v22061_v5 }
 0xa19   :  { %17583 = vmatpush1.bf16.msra.mxu0 %v22059_v51 }
 0xa1a   :  { %17584 = vmatprep.subr.bf16.mxu0 %v22064_v34 }
 0xa1d   :  { %17585 = vmatpush1.bf16.msra.mxu0 %v22062_v35 }
 0xa1e   :  { %17586 = vmatprep.subr.bf16.mxu0 %v22067_v48 }
 0xa21   :  { %17587 = vmatpush1.bf16.msra.mxu0 %v22065_v44 }
 0xa22   :  { %17588 = vmatprep.subr.bf16.mxu0 %v22070_v41 }
 0xa25   :  { %17589 = vmatpush1.bf16.msra.mxu0 %v22068_v45 }
 0xa26   :  { %17590 = vmatprep.subr.bf16.mxu0 %v22073_v55 }
 0xa29   :  { %17591 = vmatpush1.bf16.msra.mxu0 %v22071_v2 }
 0xa2a   :  { %17592 = vmatprep.subr.bf16.mxu0 %v22076_v43 }
 0xa2d   :  { %17593 = vmatpush1.bf16.msra.mxu0 %v22074_v10 }
 0xa2e   :  { %17594 = vmatprep.subr.bf16.mxu0 %v22079_v36 }
 0xa31   :  { %17595 = vmatpush1.bf16.msra.mxu0 %v22077_v3 }
 0xa32   :  { %v17098_v42 = vpop.f32.mrb[32].mxu1  ;;  %17596 = vmatprep.subr.bf16.mxu0 %v22082_v47 }
 0xa33   :  { %v17728_v62 = vadd.f32 %v17707_v50, %v17098_v42  ;;  %v17100_v18 = vpop.f32.mrb[33].mxu1 }
 0xa34   :  { %v17729_v25 = vadd.f32 %v17711_v8, %v17100_v18  ;;  %v17102_v6 = vpop.f32.mrb[34].mxu1 }
 0xa35   :  { %17740 = vst [vmem:[#allocation11 + $0x10] sm:$0xff] %v17728_v62  ;;  %v17734_v53 = vadd.f32 %v17707_v50, %v17102_v6  ;;  %17597 = vmatpush1.bf16.msra.mxu0 %v22080_v16  ;;  %v17104_v52 = vpop.f32.mrb[35].mxu1 }
 0xa36   :  { %17741 = vst [vmem:[#allocation11 + $0x18] sm:$0xff] %v17729_v25  ;;  %v17735_v0 = vadd.f32 %v17711_v8, %v17104_v52  ;;  %17598 = vmatprep.subr.bf16.mxu0 %v22085_v7 }
 0xa37   :  { %17746 = vst [vmem:[#allocation11 + $0x40] sm:$0xff] %v17734_v53 }
 0xa38   :  { %17747 = vst [vmem:[#allocation11 + $0x48] sm:$0xff] %v17735_v0 }
 0xa39   :  { %17599 = vmatpush1.bf16.msra.mxu0 %v22083_v63 }
 0xa3a   :  { %17600 = vmatprep.subr.bf16.mxu0 %v22088_v24 }
 0xa3d   :  { %17601 = vmatpush1.bf16.msra.mxu0 %v22086_v33 }
 0xa3e   :  { %17602 = vmatprep.subr.bf16.mxu0 %v22091_v49 }
 0xa41   :  { %17603 = vmatpush1.bf16.msra.mxu0 %v22089_v22 }
 0xa42   :  { %17604 = vmatprep.subr.bf16.mxu0 %v22094_v11 }
 0xa45   :  { %17605 = vmatpush1.bf16.msra.mxu0 %v22092_v57 }
 0xa46   :  { %17606 = vmatprep.subr.bf16.mxu0 %v22097_v1 }
 0xa49   :  { %17607 = vmatpush1.bf16.msra.mxu0 %v22095_v13 }
 0xa4a   :  { %17608 = vmatprep.subr.bf16.mxu0 %v22100_v39 }
 0xa4d   :  { %17609 = vmatpush1.bf16.msra.mxu0 %v22098_v12 }
 0xa4e   :  { %17610 = vmatprep.subr.bf16.mxu0 %v22103_v15 }
 0xa51   :  { %17611 = vmatpush1.bf16.msra.mxu0 %v22101_v26 }
 0xa54   :  { %17613 = vmatmul.mubr.bf16.vlgmr.msra.gmra.mrb[20].mxu0 %v23167_v19 }
 0xb27   :  { %v17614_v56 = vpop.f32.mrb[20].mxu0 }
 0xb28   :  { %v17730_v61 = vadd.f32 %v17715_v27, %v17614_v56  ;;  %v17616_v4 = vpop.f32.mrb[21].mxu0 }
 0xb29   :  { %v17731_v20 = vadd.f32 %v17719_v31, %v17616_v4  ;;  %v17618_v29 = vpop.f32.mrb[22].mxu0 }
 0xb2a   :  { %17742 = vst [vmem:[#allocation11 + $0x20] sm:$0xff] %v17730_v61  ;;  %v17736_v23 = vadd.f32 %v17715_v27, %v17618_v29  ;;  %v17620_v30 = vpop.f32.mrb[23].mxu0 }
 0xb2b   :  { %17743 = vst [vmem:[#allocation11 + $0x28] sm:$0xff] %v17731_v20  ;;  %v17737_v59 = vadd.f32 %v17719_v31, %v17620_v30 }
 0xb2c   :  { %17748 = vst [vmem:[#allocation11 + $0x50] sm:$0xff] %v17736_v23 }
 0xb2d   :  { %17749 = vst [vmem:[#allocation11 + $0x58] sm:$0xff] %v17737_v59 }
 0xb2e   :  { %22365 = shalt.err (!%p22362_p2)
}
 0xb2f   :  { %s22366_s30 = scalar_lea.hbm %s23237_s5, 1536 }
 0xb30   :  { %p22367_p3 = scmp.ne.s32.totalorder %s23237_s5, %s22366_s30  ;;  %p22370_p4 = scmp.lt.u32.totalorder %s22366_s30, %s23237_s5 }
 0xb32   :  { %p22372_p5 = pnand %p22370_p4, %p22367_p3 }
 0xb34   :  { %22375 = shalt.err (!%p22372_p5)
}
 0xb35   :  { %s22394_s11 = smov 768   ;;  %s22395_s12 = smov 48  }
 0xb36   :  { %17761 = dma.vmem_to_hbm [thread:$0]  %s17756_s27, 1536, %s23237_s5, [#allocation4], %s22394_s11, %s22394_s11, %s22395_s12  }
 0xb37   :  { %22382 = dma.done.wait [#allocation4], 1536  }
 0xb38   :  { %22383 = vsyncadd [#allocation4], 4294965760 }
 0xb39   :  { %17765 = vsyncpa [#allocation3], 1 }
 0xb3a   :  { %17766 = vsyncpa [#allocation6], 1 }
 0xb3b   :  { %17767 = vsyncpa [#allocation9], 1 }
 0xb3c   :  { %17768 = vsyncpa [#allocation4], 1 }

</bundles_post_ra>
